<compile_context>
chip_gen: v7x
topology: tpu7x:2x2x1
jax: 0.10.0
libtpu: 0.0.40
codegen_flags: <defaults>
</compile_context>

<pallas_src>
import math

import jax
import jax.numpy as jnp
from jax.experimental import pallas as pl
from jax.experimental.pallas import tpu as pltpu

D_MODEL = 32          # divisible by 8 heads (module hard-codes N=8)
N_HEADS = 8
HEAD_DIM = D_MODEL // N_HEADS
D_FF = 1024           # FeedForward default d_ff
EPS = 1e-5            # nn.LayerNorm default eps

_HI = jax.lax.Precision.HIGHEST


def _layernorm(x, gamma, beta):
    mu = jnp.mean(x, axis=-1, keepdims=True)
    var = jnp.mean((x - mu) ** 2, axis=-1, keepdims=True)
    return (x - mu) * jax.lax.rsqrt(var + EPS) * gamma + beta


def transformer_block_kernel(
    x_ref, bias_ref, seg_ref,
    g1_ref, be1_ref,
    wqkv_ref, bqkv_ref, wo_ref, bo_ref,
    g2_ref, be2_ref,
    w1_ref, bf1_ref, w2_ref, bf2_ref,
    out_ref, attnw_ref,
):
    BT, C = x_ref.shape          # (B*T, C)
    B = bias_ref.shape[0]
    T = BT // B
    H, D = N_HEADS, C // N_HEADS

    x = x_ref[...]                                                   # (B*T, C)

    # ---- norm_1 + fused QKV projection: one 2-D matmul over all B*T rows --------
    xn = _layernorm(x, g1_ref[...], be1_ref[...])
    qkv = jnp.dot(xn, wqkv_ref[...], preferred_element_type=jnp.float32,
                  precision=_HI) + bqkv_ref[...]                     # (B*T, 3C)
    # q already carries the 1/sqrt(D) scale (folded into Wq/bq in the wrapper).
    # leading-dim split only (lane dim unchanged) -> no relayout
    q3 = qkv[:, :C].reshape(B, T, C)
    k3 = qkv[:, C:2 * C].reshape(B, T, C)
    v3 = qkv[:, 2 * C:].reshape(B, T, C)

    # ---- per-head score matmuls, packed softmax ---------------------------------
    # Per-head matmuls stay as a static loop (MXU work, MXU is idle anyway); all
    # elementwise softmax work happens ONCE on the lane-packed (B, T, H*T) tensor.
    score_blocks = [
        jnp.einsum("bqd,bkd->bqk",
                   q3[:, :, h * D:(h + 1) * D], k3[:, :, h * D:(h + 1) * D],
                   preferred_element_type=jnp.float32, precision=_HI)
        for h in range(H)
    ]
    s = jnp.concatenate(score_blocks, axis=-1) + bias_ref[...]       # (B, T, H*T)

    # Row-global max is a constant per (b, q) row, so per-head softmax is exactly
    # preserved (shift-invariance) while exp stays overflow-safe; one XLU reduce.
    s = s - jnp.max(s, axis=-1, keepdims=True)
    e2d = jnp.exp(s).reshape(BT, H * T)                              # (B*T, H*T)

    # Per-head denominators, broadcast back across each 8-lane head block, via one
    # tiny MXU matmul with a block-diagonal ones matrix (exact with HIGHEST).
    denom = jnp.dot(e2d, seg_ref[...], preferred_element_type=jnp.float32,
                    precision=_HI)                                   # (B*T, H*T)
    p2d = e2d / denom                                                # exact divide
    p = p2d.reshape(B, T, H * T)

    # single (lane-packed) store of the attention weights: (B, T, H*T)
    attnw_ref[...] = p

    # ---- per-head PV matmuls + output projection --------------------------------
    head_outs = [
        jnp.einsum("bqk,bkd->bqd",
                   p[:, :, h * T:(h + 1) * T], v3[:, :, h * D:(h + 1) * D],
                   preferred_element_type=jnp.float32, precision=_HI)
        for h in range(H)
    ]
    attn = jnp.concatenate(head_outs, axis=-1).reshape(BT, C)        # (B*T, C)
    attn_out = jnp.dot(attn, wo_ref[...], preferred_element_type=jnp.float32,
                       precision=_HI) + bo_ref[...]
    x2 = x + attn_out                            # dropout_1 == identity (eval)

    # ---- norm_2 + feed-forward --------------------------------------------------
    xn2 = _layernorm(x2, g2_ref[...], be2_ref[...])
    h1 = jnp.dot(xn2, w1_ref[...], preferred_element_type=jnp.float32,
                 precision=_HI) + bf1_ref[...]
    h1 = jnp.maximum(h1, 0.0)                    # ReLU; FF dropout == identity (eval)
    ff = jnp.dot(h1, w2_ref[...], preferred_element_type=jnp.float32,
                 precision=_HI) + bf2_ref[...]
    out_ref[...] = x2 + ff                       # dropout_2 == identity (eval)


def transformer_block(x, mask, params):
    """x: (B, T, C) f32, mask: (B, T) int32. Returns (output, attention_weights)."""
    B, T, C = x.shape
    H, D = N_HEADS, C // N_HEADS
    (g1, be1, Wq, bq, Wk, bk, Wv, bv, Wo, bo, g2, be2, W1, bf1, W2, bf2) = params

    # Glue (all done once at trace time, free):
    #  * fold 1/sqrt(D) into the Q weight & bias,
    #  * fuse Q/K/V weights into one (C, 3C) matrix and biases into one (1, 3C) row,
    #  * precompute the additive mask bias already packed to the (B, 1, H*T) layout,
    #  * block-diagonal ones matrix for the per-head softmax denominator,
    #  * transpose remaining weights to [in, out], make biases / norm params 2-D rows,
    #  * fold the batch into rows so matmuls are batched over B*T.
    scale = 1.0 / math.sqrt(D)
    row = lambda v: v.reshape(1, -1)

    Wqkv = jnp.concatenate([Wq.T * scale, Wk.T, Wv.T], axis=1)            # (C, 3C)
    bqkv = jnp.concatenate([bq * scale, bk, bv]).reshape(1, -1)           # (1, 3C)

    neg = jnp.where(mask == 0, jnp.float32(-1e9), jnp.float32(0.0))       # (B, T)
    bias_packed = jnp.tile(neg, (1, H)).reshape(B, 1, H * T)              # (B,1,H*T)

    seg = jnp.kron(jnp.eye(H, dtype=jnp.float32),
                   jnp.ones((T, T), jnp.float32))                         # (H*T, H*T)

    kernel_args = (
        x.reshape(B * T, C).astype(jnp.float32),
        bias_packed, seg,
        row(g1), row(be1),
        Wqkv, bqkv, Wo.T, row(bo),
        row(g2), row(be2),
        W1.T, row(bf1), W2.T, row(bf2),
    )

    vmem = pl.BlockSpec(memory_space=pltpu.MemorySpace.VMEM)
    out_shape = (
        jax.ShapeDtypeStruct((B * T, C), jnp.float32),           # output, rows = (b, t)
        jax.ShapeDtypeStruct((B, T, N_HEADS * T), jnp.float32),  # attn weights, heads along lanes
    )

    out2d, attnw_flat = pl.pallas_call(
        transformer_block_kernel,
        out_shape=out_shape,
        in_specs=[vmem] * len(kernel_args),
        out_specs=(vmem, vmem),
    )(*kernel_args)

    out = out2d.reshape(B, T, C)
    attnw = attnw_flat.reshape(B, T, N_HEADS, T).transpose(0, 2, 1, 3)  # (B, H, T, T)
    return out, attnw


# ---------------------------- pure-JAX reference -------------------------------
def reference(x, mask, params):
    (g1, be1, Wq, bq, Wk, bk, Wv, bv, Wo, bo, g2, be2, W1, bf1, W2, bf2) = params
    B, T, C = x.shape

    def ln(v, g, b):
        mu = v.mean(-1, keepdims=True)
        var = ((v - mu) ** 2).mean(-1, keepdims=True)
        return (v - mu) / jnp.sqrt(var + EPS) * g + b

    xn = ln(x, g1, be1)
    q = (xn @ Wq.T + bq).reshape(B, T, N_HEADS, HEAD_DIM).transpose(0, 2, 1, 3)
    k = (xn @ Wk.T + bk).reshape(B, T, N_HEADS, HEAD_DIM).transpose(0, 2, 1, 3)
    v = (xn @ Wv.T + bv).reshape(B, T, N_HEADS, HEAD_DIM).transpose(0, 2, 1, 3)
    w = jnp.einsum("bhqd,bhkd->bhqk", q, k) / math.sqrt(HEAD_DIM)
    m = mask.reshape(B, 1, 1, T)
    w = jnp.where(m == 0, -1.0e9, w)
    p = jax.nn.softmax(w, axis=-1)
    a = jnp.einsum("bhqk,bhkd->bhqd", p, v).transpose(0, 2, 1, 3).reshape(B, T, C)
    attn_out = a @ Wo.T + bo
    x2 = x + attn_out
    xn2 = ln(x2, g2, be2)
    ff = jnp.maximum(xn2 @ W1.T + bf1, 0.0) @ W2.T + bf2
    return x2 + ff, p


def make_params(key, d_model, d_ff):
    def lin(k, out_f, in_f):
        kw, kb = jax.random.split(k)
        bound = 1.0 / math.sqrt(in_f)
        W = jax.random.uniform(kw, (out_f, in_f), jnp.float32, -bound, bound)
        b = jax.random.uniform(kb, (out_f,), jnp.float32, -bound, bound)
        return W, b

    ks = jax.random.split(key, 6)
    g1, be1 = jnp.ones((d_model,), jnp.float32), jnp.zeros((d_model,), jnp.float32)
    g2, be2 = jnp.ones((d_model,), jnp.float32), jnp.zeros((d_model,), jnp.float32)
    Wq, bq = lin(ks[0], d_model, d_model)
    Wk, bk = lin(ks[1], d_model, d_model)
    Wv, bv = lin(ks[2], d_model, d_model)
    Wo, bo = lin(ks[3], d_model, d_model)
    W1, bf1 = lin(ks[4], d_ff, d_model)
    W2, bf2 = lin(ks[5], d_model, d_ff)
    return (g1, be1, Wq, bq, Wk, bk, Wv, bv, Wo, bo, g2, be2, W1, bf1, W2, bf2)


if __name__ == "__main__":
    B, T, C = 2, 8, D_MODEL
    key = jax.random.PRNGKey(0)
    kx, kp = jax.random.split(key)

    x = jax.random.normal(kx, (B, T, C), jnp.float32)
    lengths = jnp.array([T, 5], dtype=jnp.int32)          # second sequence padded
    mask = (jnp.arange(T)[None, :] < lengths[:, None]).astype(jnp.int32)  # (B, T)

    params = make_params(kp, D_MODEL, D_FF)

    out, attn_w = transformer_block(x, mask, params)
    out, attn_w = jax.block_until_ready((out, attn_w))

    ref_out, ref_w = reference(x, mask, params)
    assert jnp.allclose(out, ref_out, atol=1e-4, rtol=1e-4), "output mismatch"
    assert jnp.allclose(attn_w, ref_w, atol=1e-5, rtol=1e-4), "attention-weight mismatch"

    print("KERNEL_OK")
</pallas_src>

<mosaic_0001>
module attributes {stable_mosaic.version = 11 : i64} {
  func.func @transformer_block_kernel(%arg0: memref<16x32xf32, #tpu.memory_space<vmem>>, %arg1: memref<2x1x64xf32, #tpu.memory_space<vmem>>, %arg2: memref<64x64xf32, #tpu.memory_space<vmem>>, %arg3: memref<1x32xf32, #tpu.memory_space<vmem>>, %arg4: memref<1x32xf32, #tpu.memory_space<vmem>>, %arg5: memref<32x96xf32, #tpu.memory_space<vmem>>, %arg6: memref<1x96xf32, #tpu.memory_space<vmem>>, %arg7: memref<32x32xf32, #tpu.memory_space<vmem>>, %arg8: memref<1x32xf32, #tpu.memory_space<vmem>>, %arg9: memref<1x32xf32, #tpu.memory_space<vmem>>, %arg10: memref<1x32xf32, #tpu.memory_space<vmem>>, %arg11: memref<32x1024xf32, #tpu.memory_space<vmem>>, %arg12: memref<1x1024xf32, #tpu.memory_space<vmem>>, %arg13: memref<1024x32xf32, #tpu.memory_space<vmem>>, %arg14: memref<1x32xf32, #tpu.memory_space<vmem>>, %arg15: memref<16x32xf32, #tpu.memory_space<vmem>>, %arg16: memref<2x8x64xf32, #tpu.memory_space<vmem>>) attributes {dimension_semantics = [], scalar_prefetch = 0 : i64, scratch_operands = 0 : i64, tpu.core_type = #tpu.core_type<tc>} {
    %c0 = arith.constant 0 : index
    %c0_0 = arith.constant 0 : index
    %0 = vector.load %arg0[%c0, %c0_0] : memref<16x32xf32, #tpu.memory_space<vmem>>, vector<16x32xf32>
    %c0_1 = arith.constant 0 : index
    %c0_2 = arith.constant 0 : index
    %1 = vector.load %arg3[%c0_1, %c0_2] : memref<1x32xf32, #tpu.memory_space<vmem>>, vector<1x32xf32>
    %c0_3 = arith.constant 0 : index
    %c0_4 = arith.constant 0 : index
    %2 = vector.load %arg4[%c0_3, %c0_4] : memref<1x32xf32, #tpu.memory_space<vmem>>, vector<1x32xf32>
    %cst = arith.constant dense<0.000000e+00> : vector<16xf32>
    %3 = vector.multi_reduction <add>, %0, %cst [1] : vector<16x32xf32> to vector<16xf32>
    %4 = vector.shape_cast %3 : vector<16xf32> to vector<16x1xf32>
    %cst_5 = arith.constant 3.200000e+01 : f32
    %5 = vector.broadcast %cst_5 : f32 to vector<16x1xf32>
    %6 = arith.divf %4, %5 : vector<16x1xf32>
    %7 = vector.broadcast %6 : vector<16x1xf32> to vector<16x32xf32>
    %8 = arith.subf %0, %7 : vector<16x32xf32>
    %9 = arith.mulf %8, %8 : vector<16x32xf32>
    %cst_6 = arith.constant dense<0.000000e+00> : vector<16xf32>
    %10 = vector.multi_reduction <add>, %9, %cst_6 [1] : vector<16x32xf32> to vector<16xf32>
    %11 = vector.shape_cast %10 : vector<16xf32> to vector<16x1xf32>
    %cst_7 = arith.constant 3.200000e+01 : f32
    %12 = vector.broadcast %cst_7 : f32 to vector<16x1xf32>
    %13 = arith.divf %11, %12 : vector<16x1xf32>
    %14 = vector.broadcast %6 : vector<16x1xf32> to vector<16x32xf32>
    %15 = arith.subf %0, %14 : vector<16x32xf32>
    %cst_8 = arith.constant 9.99999974E-6 : f32
    %16 = vector.broadcast %cst_8 : f32 to vector<16x1xf32>
    %17 = arith.addf %13, %16 : vector<16x1xf32>
    %18 = math.rsqrt %17 : vector<16x1xf32>
    %19 = vector.broadcast %18 : vector<16x1xf32> to vector<16x32xf32>
    %20 = arith.mulf %15, %19 : vector<16x32xf32>
    %21 = vector.broadcast %1 : vector<1x32xf32> to vector<16x32xf32>
    %22 = arith.mulf %20, %21 : vector<16x32xf32>
    %23 = vector.broadcast %2 : vector<1x32xf32> to vector<16x32xf32>
    %24 = arith.addf %22, %23 : vector<16x32xf32>
    %c0_9 = arith.constant 0 : index
    %c0_10 = arith.constant 0 : index
    %25 = vector.load %arg5[%c0_9, %c0_10] : memref<32x96xf32, #tpu.memory_space<vmem>>, vector<32x96xf32>
    %cst_11 = arith.constant dense<0.000000e+00> : vector<16x96xf32>
    %26 = tpu.matmul %24, %25, %cst_11 {dimension_numbers = #tpu.dot_dimension_numbers<[1], [0], [0], [1], [0, 0, 1, 1], [], []>, precision = #tpu.contract_precision<fp32>} : vector<16x32xf32>, vector<32x96xf32>, vector<16x96xf32> -> vector<16x96xf32>
    %c0_12 = arith.constant 0 : index
    %c0_13 = arith.constant 0 : index
    %27 = vector.load %arg6[%c0_12, %c0_13] : memref<1x96xf32, #tpu.memory_space<vmem>>, vector<1x96xf32>
    %28 = vector.broadcast %27 : vector<1x96xf32> to vector<16x96xf32>
    %29 = arith.addf %26, %28 : vector<16x96xf32>
    %30 = vector.extract_strided_slice %29 {offsets = [0, 0], sizes = [16, 32], strides = [1, 1]} : vector<16x96xf32> to vector<16x32xf32>
    %31 = vector.shape_cast %30 : vector<16x32xf32> to vector<2x8x32xf32>
    %32 = vector.extract_strided_slice %29 {offsets = [0, 32], sizes = [16, 32], strides = [1, 1]} : vector<16x96xf32> to vector<16x32xf32>
    %33 = vector.shape_cast %32 : vector<16x32xf32> to vector<2x8x32xf32>
    %34 = vector.extract_strided_slice %29 {offsets = [0, 64], sizes = [16, 32], strides = [1, 1]} : vector<16x96xf32> to vector<16x32xf32>
    %35 = vector.shape_cast %34 : vector<16x32xf32> to vector<2x8x32xf32>
    %36 = vector.extract_strided_slice %31 {offsets = [0, 0, 0], sizes = [2, 8, 4], strides = [1, 1, 1]} : vector<2x8x32xf32> to vector<2x8x4xf32>
    %37 = vector.extract_strided_slice %33 {offsets = [0, 0, 0], sizes = [2, 8, 4], strides = [1, 1, 1]} : vector<2x8x32xf32> to vector<2x8x4xf32>
    "tpu.trace_start"() <{level = 10 : i32, message = "bqd,bkd->bqk"}> : () -> ()
    %cst_14 = arith.constant dense<0.000000e+00> : vector<2x8x8xf32>
    %38 = tpu.matmul %36, %37, %cst_14 {dimension_numbers = #tpu.dot_dimension_numbers<[2], [2], [1], [1], [0, 0, 0, 1, 1, 1], [0], [0]>, precision = #tpu.contract_precision<fp32>} : vector<2x8x4xf32>, vector<2x8x4xf32>, vector<2x8x8xf32> -> vector<2x8x8xf32>
    "tpu.trace_stop"() : () -> ()
    %39 = vector.extract_strided_slice %31 {offsets = [0, 0, 4], sizes = [2, 8, 4], strides = [1, 1, 1]} : vector<2x8x32xf32> to vector<2x8x4xf32>
    %40 = vector.extract_strided_slice %33 {offsets = [0, 0, 4], sizes = [2, 8, 4], strides = [1, 1, 1]} : vector<2x8x32xf32> to vector<2x8x4xf32>
    "tpu.trace_start"() <{level = 10 : i32, message = "bqd,bkd->bqk"}> : () -> ()
    %cst_15 = arith.constant dense<0.000000e+00> : vector<2x8x8xf32>
    %41 = tpu.matmul %39, %40, %cst_15 {dimension_numbers = #tpu.dot_dimension_numbers<[2], [2], [1], [1], [0, 0, 0, 1, 1, 1], [0], [0]>, precision = #tpu.contract_precision<fp32>} : vector<2x8x4xf32>, vector<2x8x4xf32>, vector<2x8x8xf32> -> vector<2x8x8xf32>
    "tpu.trace_stop"() : () -> ()
    %42 = vector.extract_strided_slice %31 {offsets = [0, 0, 8], sizes = [2, 8, 4], strides = [1, 1, 1]} : vector<2x8x32xf32> to vector<2x8x4xf32>
    %43 = vector.extract_strided_slice %33 {offsets = [0, 0, 8], sizes = [2, 8, 4], strides = [1, 1, 1]} : vector<2x8x32xf32> to vector<2x8x4xf32>
    "tpu.trace_start"() <{level = 10 : i32, message = "bqd,bkd->bqk"}> : () -> ()
    %cst_16 = arith.constant dense<0.000000e+00> : vector<2x8x8xf32>
    %44 = tpu.matmul %42, %43, %cst_16 {dimension_numbers = #tpu.dot_dimension_numbers<[2], [2], [1], [1], [0, 0, 0, 1, 1, 1], [0], [0]>, precision = #tpu.contract_precision<fp32>} : vector<2x8x4xf32>, vector<2x8x4xf32>, vector<2x8x8xf32> -> vector<2x8x8xf32>
    "tpu.trace_stop"() : () -> ()
    %45 = vector.extract_strided_slice %31 {offsets = [0, 0, 12], sizes = [2, 8, 4], strides = [1, 1, 1]} : vector<2x8x32xf32> to vector<2x8x4xf32>
    %46 = vector.extract_strided_slice %33 {offsets = [0, 0, 12], sizes = [2, 8, 4], strides = [1, 1, 1]} : vector<2x8x32xf32> to vector<2x8x4xf32>
    "tpu.trace_start"() <{level = 10 : i32, message = "bqd,bkd->bqk"}> : () -> ()
    %cst_17 = arith.constant dense<0.000000e+00> : vector<2x8x8xf32>
    %47 = tpu.matmul %45, %46, %cst_17 {dimension_numbers = #tpu.dot_dimension_numbers<[2], [2], [1], [1], [0, 0, 0, 1, 1, 1], [0], [0]>, precision = #tpu.contract_precision<fp32>} : vector<2x8x4xf32>, vector<2x8x4xf32>, vector<2x8x8xf32> -> vector<2x8x8xf32>
    "tpu.trace_stop"() : () -> ()
    %48 = vector.extract_strided_slice %31 {offsets = [0, 0, 16], sizes = [2, 8, 4], strides = [1, 1, 1]} : vector<2x8x32xf32> to vector<2x8x4xf32>
    %49 = vector.extract_strided_slice %33 {offsets = [0, 0, 16], sizes = [2, 8, 4], strides = [1, 1, 1]} : vector<2x8x32xf32> to vector<2x8x4xf32>
    "tpu.trace_start"() <{level = 10 : i32, message = "bqd,bkd->bqk"}> : () -> ()
    %cst_18 = arith.constant dense<0.000000e+00> : vector<2x8x8xf32>
    %50 = tpu.matmul %48, %49, %cst_18 {dimension_numbers = #tpu.dot_dimension_numbers<[2], [2], [1], [1], [0, 0, 0, 1, 1, 1], [0], [0]>, precision = #tpu.contract_precision<fp32>} : vector<2x8x4xf32>, vector<2x8x4xf32>, vector<2x8x8xf32> -> vector<2x8x8xf32>
    "tpu.trace_stop"() : () -> ()
    %51 = vector.extract_strided_slice %31 {offsets = [0, 0, 20], sizes = [2, 8, 4], strides = [1, 1, 1]} : vector<2x8x32xf32> to vector<2x8x4xf32>
    %52 = vector.extract_strided_slice %33 {offsets = [0, 0, 20], sizes = [2, 8, 4], strides = [1, 1, 1]} : vector<2x8x32xf32> to vector<2x8x4xf32>
    "tpu.trace_start"() <{level = 10 : i32, message = "bqd,bkd->bqk"}> : () -> ()
    %cst_19 = arith.constant dense<0.000000e+00> : vector<2x8x8xf32>
    %53 = tpu.matmul %51, %52, %cst_19 {dimension_numbers = #tpu.dot_dimension_numbers<[2], [2], [1], [1], [0, 0, 0, 1, 1, 1], [0], [0]>, precision = #tpu.contract_precision<fp32>} : vector<2x8x4xf32>, vector<2x8x4xf32>, vector<2x8x8xf32> -> vector<2x8x8xf32>
    "tpu.trace_stop"() : () -> ()
    %54 = vector.extract_strided_slice %31 {offsets = [0, 0, 24], sizes = [2, 8, 4], strides = [1, 1, 1]} : vector<2x8x32xf32> to vector<2x8x4xf32>
    %55 = vector.extract_strided_slice %33 {offsets = [0, 0, 24], sizes = [2, 8, 4], strides = [1, 1, 1]} : vector<2x8x32xf32> to vector<2x8x4xf32>
    "tpu.trace_start"() <{level = 10 : i32, message = "bqd,bkd->bqk"}> : () -> ()
    %cst_20 = arith.constant dense<0.000000e+00> : vector<2x8x8xf32>
    %56 = tpu.matmul %54, %55, %cst_20 {dimension_numbers = #tpu.dot_dimension_numbers<[2], [2], [1], [1], [0, 0, 0, 1, 1, 1], [0], [0]>, precision = #tpu.contract_precision<fp32>} : vector<2x8x4xf32>, vector<2x8x4xf32>, vector<2x8x8xf32> -> vector<2x8x8xf32>
    "tpu.trace_stop"() : () -> ()
    %57 = vector.extract_strided_slice %31 {offsets = [0, 0, 28], sizes = [2, 8, 4], strides = [1, 1, 1]} : vector<2x8x32xf32> to vector<2x8x4xf32>
    %58 = vector.extract_strided_slice %33 {offsets = [0, 0, 28], sizes = [2, 8, 4], strides = [1, 1, 1]} : vector<2x8x32xf32> to vector<2x8x4xf32>
    "tpu.trace_start"() <{level = 10 : i32, message = "bqd,bkd->bqk"}> : () -> ()
    %cst_21 = arith.constant dense<0.000000e+00> : vector<2x8x8xf32>
    %59 = tpu.matmul %57, %58, %cst_21 {dimension_numbers = #tpu.dot_dimension_numbers<[2], [2], [1], [1], [0, 0, 0, 1, 1, 1], [0], [0]>, precision = #tpu.contract_precision<fp32>} : vector<2x8x4xf32>, vector<2x8x4xf32>, vector<2x8x8xf32> -> vector<2x8x8xf32>
    "tpu.trace_stop"() : () -> ()
    %60 = tpu.concatenate %38, %41, %44, %47, %50, %53, %56, %59 in 2 : vector<2x8x8xf32>, vector<2x8x8xf32>, vector<2x8x8xf32>, vector<2x8x8xf32>, vector<2x8x8xf32>, vector<2x8x8xf32>, vector<2x8x8xf32>, vector<2x8x8xf32> -> vector<2x8x64xf32>
    %c0_22 = arith.constant 0 : index
    %c0_23 = arith.constant 0 : index
    %c0_24 = arith.constant 0 : index
    %61 = vector.load %arg1[%c0_22, %c0_23, %c0_24] : memref<2x1x64xf32, #tpu.memory_space<vmem>>, vector<2x1x64xf32>
    %62 = vector.broadcast %61 : vector<2x1x64xf32> to vector<2x8x64xf32>
    %63 = arith.addf %60, %62 : vector<2x8x64xf32>
    %cst_25 = arith.constant dense<0xFF800000> : vector<2x8xf32>
    %64 = vector.multi_reduction <maximumf>, %63, %cst_25 [2] : vector<2x8x64xf32> to vector<2x8xf32>
    %65 = vector.shape_cast %64 : vector<2x8xf32> to vector<2x8x1xf32>
    %66 = vector.broadcast %65 : vector<2x8x1xf32> to vector<2x8x64xf32>
    %67 = arith.subf %63, %66 : vector<2x8x64xf32>
    %68 = math.exp %67 : vector<2x8x64xf32>
    %69 = vector.shape_cast %68 : vector<2x8x64xf32> to vector<16x64xf32>
    %c0_26 = arith.constant 0 : index
    %c0_27 = arith.constant 0 : index
    %70 = vector.load %arg2[%c0_26, %c0_27] : memref<64x64xf32, #tpu.memory_space<vmem>>, vector<64x64xf32>
    %cst_28 = arith.constant dense<0.000000e+00> : vector<16x64xf32>
    %71 = tpu.matmul %69, %70, %cst_28 {dimension_numbers = #tpu.dot_dimension_numbers<[1], [0], [0], [1], [0, 0, 1, 1], [], []>, precision = #tpu.contract_precision<fp32>} : vector<16x64xf32>, vector<64x64xf32>, vector<16x64xf32> -> vector<16x64xf32>
    %72 = arith.divf %69, %71 : vector<16x64xf32>
    %73 = vector.shape_cast %72 : vector<16x64xf32> to vector<2x8x64xf32>
    %c0_29 = arith.constant 0 : index
    %c0_30 = arith.constant 0 : index
    %c0_31 = arith.constant 0 : index
    %74 = vector.load %arg16[%c0_29, %c0_30, %c0_31] : memref<2x8x64xf32, #tpu.memory_space<vmem>>, vector<2x8x64xf32>
    tpu.vector_store %arg16[%c0_29, %c0_30, %c0_31], %73 {strides = array<i32>} : memref<2x8x64xf32, #tpu.memory_space<vmem>>, vector<2x8x64xf32>,
    %75 = vector.extract_strided_slice %73 {offsets = [0, 0, 0], sizes = [2, 8, 8], strides = [1, 1, 1]} : vector<2x8x64xf32> to vector<2x8x8xf32>
    %76 = vector.extract_strided_slice %35 {offsets = [0, 0, 0], sizes = [2, 8, 4], strides = [1, 1, 1]} : vector<2x8x32xf32> to vector<2x8x4xf32>
    "tpu.trace_start"() <{level = 10 : i32, message = "bqk,bkd->bqd"}> : () -> ()
    %cst_32 = arith.constant dense<0.000000e+00> : vector<2x8x4xf32>
    %77 = tpu.matmul %75, %76, %cst_32 {dimension_numbers = #tpu.dot_dimension_numbers<[2], [1], [1], [2], [0, 0, 0, 1, 1, 2], [0], [0]>, precision = #tpu.contract_precision<fp32>} : vector<2x8x8xf32>, vector<2x8x4xf32>, vector<2x8x4xf32> -> vector<2x8x4xf32>
    "tpu.trace_stop"() : () -> ()
    %78 = vector.extract_strided_slice %73 {offsets = [0, 0, 8], sizes = [2, 8, 8], strides = [1, 1, 1]} : vector<2x8x64xf32> to vector<2x8x8xf32>
    %79 = vector.extract_strided_slice %35 {offsets = [0, 0, 4], sizes = [2, 8, 4], strides = [1, 1, 1]} : vector<2x8x32xf32> to vector<2x8x4xf32>
    "tpu.trace_start"() <{level = 10 : i32, message = "bqk,bkd->bqd"}> : () -> ()
    %cst_33 = arith.constant dense<0.000000e+00> : vector<2x8x4xf32>
    %80 = tpu.matmul %78, %79, %cst_33 {dimension_numbers = #tpu.dot_dimension_numbers<[2], [1], [1], [2], [0, 0, 0, 1, 1, 2], [0], [0]>, precision = #tpu.contract_precision<fp32>} : vector<2x8x8xf32>, vector<2x8x4xf32>, vector<2x8x4xf32> -> vector<2x8x4xf32>
    "tpu.trace_stop"() : () -> ()
    %81 = vector.extract_strided_slice %73 {offsets = [0, 0, 16], sizes = [2, 8, 8], strides = [1, 1, 1]} : vector<2x8x64xf32> to vector<2x8x8xf32>
    %82 = vector.extract_strided_slice %35 {offsets = [0, 0, 8], sizes = [2, 8, 4], strides = [1, 1, 1]} : vector<2x8x32xf32> to vector<2x8x4xf32>
    "tpu.trace_start"() <{level = 10 : i32, message = "bqk,bkd->bqd"}> : () -> ()
    %cst_34 = arith.constant dense<0.000000e+00> : vector<2x8x4xf32>
    %83 = tpu.matmul %81, %82, %cst_34 {dimension_numbers = #tpu.dot_dimension_numbers<[2], [1], [1], [2], [0, 0, 0, 1, 1, 2], [0], [0]>, precision = #tpu.contract_precision<fp32>} : vector<2x8x8xf32>, vector<2x8x4xf32>, vector<2x8x4xf32> -> vector<2x8x4xf32>
    "tpu.trace_stop"() : () -> ()
    %84 = vector.extract_strided_slice %73 {offsets = [0, 0, 24], sizes = [2, 8, 8], strides = [1, 1, 1]} : vector<2x8x64xf32> to vector<2x8x8xf32>
    %85 = vector.extract_strided_slice %35 {offsets = [0, 0, 12], sizes = [2, 8, 4], strides = [1, 1, 1]} : vector<2x8x32xf32> to vector<2x8x4xf32>
    "tpu.trace_start"() <{level = 10 : i32, message = "bqk,bkd->bqd"}> : () -> ()
    %cst_35 = arith.constant dense<0.000000e+00> : vector<2x8x4xf32>
    %86 = tpu.matmul %84, %85, %cst_35 {dimension_numbers = #tpu.dot_dimension_numbers<[2], [1], [1], [2], [0, 0, 0, 1, 1, 2], [0], [0]>, precision = #tpu.contract_precision<fp32>} : vector<2x8x8xf32>, vector<2x8x4xf32>, vector<2x8x4xf32> -> vector<2x8x4xf32>
    "tpu.trace_stop"() : () -> ()
    %87 = vector.extract_strided_slice %73 {offsets = [0, 0, 32], sizes = [2, 8, 8], strides = [1, 1, 1]} : vector<2x8x64xf32> to vector<2x8x8xf32>
    %88 = vector.extract_strided_slice %35 {offsets = [0, 0, 16], sizes = [2, 8, 4], strides = [1, 1, 1]} : vector<2x8x32xf32> to vector<2x8x4xf32>
    "tpu.trace_start"() <{level = 10 : i32, message = "bqk,bkd->bqd"}> : () -> ()
    %cst_36 = arith.constant dense<0.000000e+00> : vector<2x8x4xf32>
    %89 = tpu.matmul %87, %88, %cst_36 {dimension_numbers = #tpu.dot_dimension_numbers<[2], [1], [1], [2], [0, 0, 0, 1, 1, 2], [0], [0]>, precision = #tpu.contract_precision<fp32>} : vector<2x8x8xf32>, vector<2x8x4xf32>, vector<2x8x4xf32> -> vector<2x8x4xf32>
    "tpu.trace_stop"() : () -> ()
    %90 = vector.extract_strided_slice %73 {offsets = [0, 0, 40], sizes = [2, 8, 8], strides = [1, 1, 1]} : vector<2x8x64xf32> to vector<2x8x8xf32>
    %91 = vector.extract_strided_slice %35 {offsets = [0, 0, 20], sizes = [2, 8, 4], strides = [1, 1, 1]} : vector<2x8x32xf32> to vector<2x8x4xf32>
    "tpu.trace_start"() <{level = 10 : i32, message = "bqk,bkd->bqd"}> : () -> ()
    %cst_37 = arith.constant dense<0.000000e+00> : vector<2x8x4xf32>
    %92 = tpu.matmul %90, %91, %cst_37 {dimension_numbers = #tpu.dot_dimension_numbers<[2], [1], [1], [2], [0, 0, 0, 1, 1, 2], [0], [0]>, precision = #tpu.contract_precision<fp32>} : vector<2x8x8xf32>, vector<2x8x4xf32>, vector<2x8x4xf32> -> vector<2x8x4xf32>
    "tpu.trace_stop"() : () -> ()
    %93 = vector.extract_strided_slice %73 {offsets = [0, 0, 48], sizes = [2, 8, 8], strides = [1, 1, 1]} : vector<2x8x64xf32> to vector<2x8x8xf32>
    %94 = vector.extract_strided_slice %35 {offsets = [0, 0, 24], sizes = [2, 8, 4], strides = [1, 1, 1]} : vector<2x8x32xf32> to vector<2x8x4xf32>
    "tpu.trace_start"() <{level = 10 : i32, message = "bqk,bkd->bqd"}> : () -> ()
    %cst_38 = arith.constant dense<0.000000e+00> : vector<2x8x4xf32>
    %95 = tpu.matmul %93, %94, %cst_38 {dimension_numbers = #tpu.dot_dimension_numbers<[2], [1], [1], [2], [0, 0, 0, 1, 1, 2], [0], [0]>, precision = #tpu.contract_precision<fp32>} : vector<2x8x8xf32>, vector<2x8x4xf32>, vector<2x8x4xf32> -> vector<2x8x4xf32>
    "tpu.trace_stop"() : () -> ()
    %96 = vector.extract_strided_slice %73 {offsets = [0, 0, 56], sizes = [2, 8, 8], strides = [1, 1, 1]} : vector<2x8x64xf32> to vector<2x8x8xf32>
    %97 = vector.extract_strided_slice %35 {offsets = [0, 0, 28], sizes = [2, 8, 4], strides = [1, 1, 1]} : vector<2x8x32xf32> to vector<2x8x4xf32>
    "tpu.trace_start"() <{level = 10 : i32, message = "bqk,bkd->bqd"}> : () -> ()
    %cst_39 = arith.constant dense<0.000000e+00> : vector<2x8x4xf32>
    %98 = tpu.matmul %96, %97, %cst_39 {dimension_numbers = #tpu.dot_dimension_numbers<[2], [1], [1], [2], [0, 0, 0, 1, 1, 2], [0], [0]>, precision = #tpu.contract_precision<fp32>} : vector<2x8x8xf32>, vector<2x8x4xf32>, vector<2x8x4xf32> -> vector<2x8x4xf32>
    "tpu.trace_stop"() : () -> ()
    %99 = tpu.concatenate %77, %80, %83, %86, %89, %92, %95, %98 in 2 : vector<2x8x4xf32>, vector<2x8x4xf32>, vector<2x8x4xf32>, vector<2x8x4xf32>, vector<2x8x4xf32>, vector<2x8x4xf32>, vector<2x8x4xf32>, vector<2x8x4xf32> -> vector<2x8x32xf32>
    %100 = vector.shape_cast %99 : vector<2x8x32xf32> to vector<16x32xf32>
    %c0_40 = arith.constant 0 : index
    %c0_41 = arith.constant 0 : index
    %101 = vector.load %arg7[%c0_40, %c0_41] : memref<32x32xf32, #tpu.memory_space<vmem>>, vector<32x32xf32>
    %cst_42 = arith.constant dense<0.000000e+00> : vector<16x32xf32>
    %102 = tpu.matmul %100, %101, %cst_42 {dimension_numbers = #tpu.dot_dimension_numbers<[1], [0], [0], [1], [0, 0, 1, 1], [], []>, precision = #tpu.contract_precision<fp32>} : vector<16x32xf32>, vector<32x32xf32>, vector<16x32xf32> -> vector<16x32xf32>
    %c0_43 = arith.constant 0 : index
    %c0_44 = arith.constant 0 : index
    %103 = vector.load %arg8[%c0_43, %c0_44] : memref<1x32xf32, #tpu.memory_space<vmem>>, vector<1x32xf32>
    %104 = vector.broadcast %103 : vector<1x32xf32> to vector<16x32xf32>
    %105 = arith.addf %102, %104 : vector<16x32xf32>
    %106 = arith.addf %0, %105 : vector<16x32xf32>
    %c0_45 = arith.constant 0 : index
    %c0_46 = arith.constant 0 : index
    %107 = vector.load %arg9[%c0_45, %c0_46] : memref<1x32xf32, #tpu.memory_space<vmem>>, vector<1x32xf32>
    %c0_47 = arith.constant 0 : index
    %c0_48 = arith.constant 0 : index
    %108 = vector.load %arg10[%c0_47, %c0_48] : memref<1x32xf32, #tpu.memory_space<vmem>>, vector<1x32xf32>
    %cst_49 = arith.constant dense<0.000000e+00> : vector<16xf32>
    %109 = vector.multi_reduction <add>, %106, %cst_49 [1] : vector<16x32xf32> to vector<16xf32>
    %110 = vector.shape_cast %109 : vector<16xf32> to vector<16x1xf32>
    %cst_50 = arith.constant 3.200000e+01 : f32
    %111 = vector.broadcast %cst_50 : f32 to vector<16x1xf32>
    %112 = arith.divf %110, %111 : vector<16x1xf32>
    %113 = vector.broadcast %112 : vector<16x1xf32> to vector<16x32xf32>
    %114 = arith.subf %106, %113 : vector<16x32xf32>
    %115 = arith.mulf %114, %114 : vector<16x32xf32>
    %cst_51 = arith.constant dense<0.000000e+00> : vector<16xf32>
    %116 = vector.multi_reduction <add>, %115, %cst_51 [1] : vector<16x32xf32> to vector<16xf32>
    %117 = vector.shape_cast %116 : vector<16xf32> to vector<16x1xf32>
    %cst_52 = arith.constant 3.200000e+01 : f32
    %118 = vector.broadcast %cst_52 : f32 to vector<16x1xf32>
    %119 = arith.divf %117, %118 : vector<16x1xf32>
    %120 = vector.broadcast %112 : vector<16x1xf32> to vector<16x32xf32>
    %121 = arith.subf %106, %120 : vector<16x32xf32>
    %cst_53 = arith.constant 9.99999974E-6 : f32
    %122 = vector.broadcast %cst_53 : f32 to vector<16x1xf32>
    %123 = arith.addf %119, %122 : vector<16x1xf32>
    %124 = math.rsqrt %123 : vector<16x1xf32>
    %125 = vector.broadcast %124 : vector<16x1xf32> to vector<16x32xf32>
    %126 = arith.mulf %121, %125 : vector<16x32xf32>
    %127 = vector.broadcast %107 : vector<1x32xf32> to vector<16x32xf32>
    %128 = arith.mulf %126, %127 : vector<16x32xf32>
    %129 = vector.broadcast %108 : vector<1x32xf32> to vector<16x32xf32>
    %130 = arith.addf %128, %129 : vector<16x32xf32>
    %c0_54 = arith.constant 0 : index
    %c0_55 = arith.constant 0 : index
    %131 = vector.load %arg11[%c0_54, %c0_55] : memref<32x1024xf32, #tpu.memory_space<vmem>>, vector<32x1024xf32>
    %cst_56 = arith.constant dense<0.000000e+00> : vector<16x1024xf32>
    %132 = tpu.matmul %130, %131, %cst_56 {dimension_numbers = #tpu.dot_dimension_numbers<[1], [0], [0], [1], [0, 0, 1, 1], [], []>, precision = #tpu.contract_precision<fp32>} : vector<16x32xf32>, vector<32x1024xf32>, vector<16x1024xf32> -> vector<16x1024xf32>
    %c0_57 = arith.constant 0 : index
    %c0_58 = arith.constant 0 : index
    %133 = vector.load %arg12[%c0_57, %c0_58] : memref<1x1024xf32, #tpu.memory_space<vmem>>, vector<1x1024xf32>
    %134 = vector.broadcast %133 : vector<1x1024xf32> to vector<16x1024xf32>
    %135 = arith.addf %132, %134 : vector<16x1024xf32>
    %cst_59 = arith.constant 0.000000e+00 : f32
    %136 = vector.broadcast %cst_59 : f32 to vector<16x1024xf32>
    %137 = arith.maximumf %135, %136 : vector<16x1024xf32>
    %c0_60 = arith.constant 0 : index
    %c0_61 = arith.constant 0 : index
    %138 = vector.load %arg13[%c0_60, %c0_61] : memref<1024x32xf32, #tpu.memory_space<vmem>>, vector<1024x32xf32>
    %cst_62 = arith.constant dense<0.000000e+00> : vector<16x32xf32>
    %139 = tpu.matmul %137, %138, %cst_62 {dimension_numbers = #tpu.dot_dimension_numbers<[1], [0], [0], [1], [0, 0, 1, 1], [], []>, precision = #tpu.contract_precision<fp32>} : vector<16x1024xf32>, vector<1024x32xf32>, vector<16x32xf32> -> vector<16x32xf32>
    %c0_63 = arith.constant 0 : index
    %c0_64 = arith.constant 0 : index
    %140 = vector.load %arg14[%c0_63, %c0_64] : memref<1x32xf32, #tpu.memory_space<vmem>>, vector<1x32xf32>
    %141 = vector.broadcast %140 : vector<1x32xf32> to vector<16x32xf32>
    %142 = arith.addf %139, %141 : vector<16x32xf32>
    %143 = arith.addf %106, %142 : vector<16x32xf32>
    %c0_65 = arith.constant 0 : index
    %c0_66 = arith.constant 0 : index
    %144 = vector.load %arg15[%c0_65, %c0_66] : memref<16x32xf32, #tpu.memory_space<vmem>>, vector<16x32xf32>
    tpu.vector_store %arg15[%c0_65, %c0_66], %143 {strides = array<i32>} : memref<16x32xf32, #tpu.memory_space<vmem>>, vector<16x32xf32>,
    return
  }
}

</mosaic_0001>

<bundles_post_ra>
// kernel: tpu_custom_call.1
= control target key start
LH: loop header
LB: loop body
LE: loop exit
PB: predicated region body
PF: predicated region fallthrough
CT: control target
= control target key end

     0   :  { %s32086_s0 = inlined_call_operand.vmem [shape: f32[16,32], index: 0, kind: input, shape index: {}]   ;;  %s32087_s1 = inlined_call_operand.vmem [shape: f32[2,1,64], index: 1, kind: input, shape index: {}]   ;;  %s32088_s2 = inlined_call_operand.vmem [shape: f32[64,64], index: 2, kind: input, shape index: {}]   ;;  %s32089_s3 = inlined_call_operand.vmem [shape: f32[1,32], index: 3, kind: input, shape index: {}]   ;;  %s32090_s4 = inlined_call_operand.vmem [shape: f32[1,32], index: 4, kind: input, shape index: {}]   ;;  %s32091_s5 = inlined_call_operand.vmem [shape: f32[32,96], index: 5, kind: input, shape index: {}]   ;;  %s32092_s6 = inlined_call_operand.vmem [shape: f32[1,96], index: 6, kind: input, shape index: {}]   ;;  %s32093_s7 = inlined_call_operand.vmem [shape: f32[32,32], index: 7, kind: input, shape index: {}]   ;;  %s32094_s8 = inlined_call_operand.vmem [shape: f32[1,32], index: 8, kind: input, shape index: {}]   ;;  %s32095_s9 = inlined_call_operand.vmem [shape: f32[1,32], index: 9, kind: input, shape index: {}]   ;;  %s32096_s10 = inlined_call_operand.vmem [shape: f32[1,32], index: 10, kind: input, shape index: {}]   ;;  %s32097_s11 = inlined_call_operand.vmem [shape: f32[32,1024], index: 11, kind: input, shape index: {}]   ;;  %s32098_s12 = inlined_call_operand.vmem [shape: f32[1,1024], index: 12, kind: input, shape index: {}]   ;;  %s32099_s13 = inlined_call_operand.vmem [shape: f32[1024,32], index: 13, kind: input, shape index: {}]   ;;  %s32100_s14 = inlined_call_operand.vmem [shape: f32[1,32], index: 14, kind: input, shape index: {}]   ;;  %s32101_s15 = inlined_call_operand.hbm [shape: f32[16,32], index: 15, kind: output, shape index: {0}]   ;;  %s32102_s16 = inlined_call_operand.hbm [shape: f32[2,8,64], index: 16, kind: output, shape index: {1}]  }
   0x1   :  { %32349 = sst [smem:[#allocation51_spill]] %s32086_s0 }
   0x2   :  { %22 = vsyncpa [#allocation3], 0  ;;  %s32350_s23 = sld [smem:[#allocation51_spill]]  ;;  %vm58_vm0 = vcmask 261120  }
   0x8   :  { %v54_v0 = vld [vmem:[%s32350_s23] sm:$0xff]  ;;  %v55_v1 = vld [vmem:[%s32350_s23 + $0x8] sm:$0xff] }
   0x9   :  { %23 = vsyncpa [#allocation5], 0  ;;  %v59_v2 = vsel %vm58_vm0, %v54_v0, 0.0  ;;  %v62_v3 = vsel %vm58_vm0, %v55_v1, 0.0  ;;  %v102_v14 = vld [vmem:[%s32091_s5] sm:$0xff]  ;;  %v103_v15 = vld [vmem:[%s32091_s5 + $0x8] sm:$0xff] }
   0xa   :  { %60 = vadd.xlane.f32.xlu0 %v59_v2  ;;  %v104_v16 = vld [vmem:[%s32091_s5 + $0x10] sm:$0xff]  ;;  %v120_v17 = vand.u32 4294901760, %v102_v14  ;;  %v123_v18 = vand.u32 4294901760, %v103_v15  ;;  %v105_v19 = vld [vmem:[%s32091_s5 + $0x18] sm:$0xff]  ;;  %v22832_v53 = vld [vmem:[%s32089_s3] ss:$0 sm:$0xff] }
   0xb   :  { %v126_v20 = vand.u32 4294901760, %v104_v16  ;;  %v129_v21 = vand.u32 4294901760, %v105_v19  ;;  %v22833_v55 = vld [vmem:[%s32090_s4] ss:$0 sm:$0xff]  ;;  %vm27181_vm1 = vmmov 0   ;;  %s27182_s22 = smov 96  }
   0xc   :  { %v27323_v22 = vpack.c.bf16 %v123_v18, %v120_v17  ;;  %v210_v24 = vsub.f32 %v102_v14, %v120_v17  ;;  %v217_v25 = vsub.f32 %v103_v15, %v123_v18  ;;  %s27183_s24 = smov 124   ;;  %s27184_s25 = smov 92   ;;  %vm650_vm2 = vcmask 31744  }
   0xd   :  { %v27325_v23 = vpack.c.bf16 %v129_v21, %v126_v20  ;;  %v224_v30 = vsub.f32 %v104_v16, %v126_v20  ;;  %v231_v31 = vsub.f32 %v105_v19, %v129_v21  ;;  %s27186_s26 = smov 88   ;;  %s27187_s27 = smov 116   ;;  %vm7966_vm3 = vcmask 64512  }
   0xe   :  { %63 = vadd.xlane.f32.xlu0 %v62_v3  ;;  %25476 = vmatprep.subr.bf16.mxu0 %v27323_v22  ;;  %v211_v26 = vand.u32 4294901760, %v210_v24  ;;  %v218_v27 = vand.u32 4294901760, %v217_v25  ;;  %v25491_v42 = vpack.c.bf16 %v217_v25, %v210_v24  ;;  %s27188_s28 = smov 84   ;;  %s27189_s29 = smov 112   ;;  %vm7969_vm4 = vcmask 130048  }
   0xf   :  { %25478 = vmatpush3.bf16.msra.mxu0 %v27323_v22  ;;  %v225_v34 = vand.u32 4294901760, %v224_v30  ;;  %v232_v35 = vand.u32 4294901760, %v231_v31  ;;  %v25495_v43 = vpack.c.bf16 %v231_v31, %v224_v30  ;;  %s27190_s30 = smov 80   ;;  %s27191_s0 = smov 108   ;;  %vm7972_vm5 = vcmask 195584  }
  0x10   :  { %25480 = vmatprep.subr.bf16.mxu0 %v27325_v23  ;;  %v212_v28 = vsub.f32 %v210_v24, %v211_v26  ;;  %v219_v29 = vsub.f32 %v217_v25, %v218_v27  ;;  %v25507_v44 = vpack.c.bf16 %v218_v27, %v211_v26  ;;  %s27192_s17 = smov 76   ;;  %s27193_s18 = smov 104   ;;  %vm7977_vm6 = vcmask 326656  }
  0x11   :  { %v226_v37 = vsub.f32 %v224_v30, %v225_v34  ;;  %v233_v38 = vsub.f32 %v231_v31, %v232_v35  ;;  %v25511_v45 = vpack.c.bf16 %v232_v35, %v225_v34  ;;  %s27194_s5 = smov 72   ;;  %s27195_s19 = smov 100   ;;  %vm7980_vm7 = vcmask 392192  }
  0x12   :  { %v213_v32 = vand.u32 4294901760, %v212_v28  ;;  %v220_v33 = vand.u32 4294901760, %v219_v29  ;;  %s27196_s20 = smov 68   ;;  %s32108_s21 = smov 8   ;;  %vm7983_vm8 = vcmask 457728   ;;  %vm8002_vm9 = vcmask 523264  }
  0x13   :  { %25482 = vmatpush3.bf16.msra.mxu0 %v27325_v23  ;;  %v227_v39 = vand.u32 4294901760, %v226_v37  ;;  %v234_v40 = vand.u32 4294901760, %v233_v38  ;;  %s32106_s3 = smov 16   ;;  %s32104_s4 = smov 24   ;;  %vm15921_vm10 = vcmask 97280   ;;  %vm15926_vm11 = vcmask 162816  }
  0x14   :  { %v25483_v36 = vpack.c.bf16 %v220_v33, %v213_v32  ;;  %vm15931_vm12 = vcmask 228352  }
  0x15   :  { %v25487_v41 = vpack.c.bf16 %v234_v40, %v227_v39 }
  0x16   :  { %25484 = vmatprep.subr.bf16.mxu0 %v25483_v36 }
  0x97   :  { %v61_v4 = vpop.xlane.xlu0 %60 }
  0x98   :  { %v66_v5 = vmul.f32 0.03125, %v61_v4 }
  0x9a   :  { %v68_v6 = vsub.f32 %v54_v0, %v66_v5 }
  0x9b   :  { %v64_v7 = vpop.xlane.xlu0 %63 }
  0x9c   :  { %v67_v8 = vmul.f32 0.03125, %v64_v7  ;;  %v70_v9 = vmul.f32 %v68_v6, %v68_v6 }
  0x9e   :  { %v69_v10 = vsub.f32 %v55_v1, %v67_v8  ;;  %v72_v11 = vsel %vm58_vm0, %v70_v9, 0.0 }
  0x9f   :  { %73 = vadd.xlane.f32.xlu1 %v72_v11  ;;  %v22834_v11 = vld [vmem:[%s32092_s6] ss:$0 sm:$0xff]  ;;  %s27185_s6 = smov 120  }
  0xa0   :  { %v71_v12 = vmul.f32 %v69_v10, %v69_v10 }
  0xa2   :  { %v75_v13 = vsel %vm58_vm0, %v71_v12, 0.0 }
  0xa3   :  { %76 = vadd.xlane.f32.xlu1 %v75_v13 }
 0x12c   :  { %v74_v46 = vpop.xlane.xlu1 %73 }
 0x12d   :  { %v78_v47 = vmul.f32 0.03125, %v74_v46 }
 0x12f   :  { %v80_v48 = vadd.f32 1e-05, %v78_v47 }
 0x130   :  { %v77_v49 = vpop.xlane.xlu1 %76 }
 0x131   :  { %27113 = vrsqrt.f32 %v80_v48  ;;  %v79_v50 = vmul.f32 0.03125, %v77_v49 }
 0x133   :  { %v81_v51 = vadd.f32 1e-05, %v79_v50 }
 0x135   :  { %27115 = vrsqrt.f32 %v81_v51 }
 0x13b   :  { %v27114_v52 = vpop.eup %27113 }
 0x13c   :  { %v84_v54 = vmul.f32 %v27114_v52, %v68_v6 }
 0x13e   :  { %v92_v56 = vmul.f32 %v22832_v53, %v84_v54 }
 0x13f   :  { %v27116_v57 = vpop.eup %27115 }
 0x140   :  { %v85_v58 = vmul.f32 %v27116_v57, %v69_v10  ;;  %v100_v59 = vadd.f32 %v22833_v55, %v92_v56  ;;  %v27180_v10 = vmov 0.0  }
 0x141   :  { %24335 = vmatprep.subr.mxu1 %v27180_v10  ;;  %24337 = vmatprep.mubr.msk.f32.mxu1 %vm27181_vm1, %v27180_v10 }
 0x142   :  { %v93_v60 = vmul.f32 %v22832_v53, %v85_v58  ;;  %v114_v61 = vsel %vm58_vm0, %v100_v59, 0 }
 0x143   :  { %v188_v62 = vand.u32 4294901760, %v114_v61 }
 0x144   :  { %v101_v63 = vadd.f32 %v22833_v55, %v93_v60 }
 0x145   :  { %v189_v0 = vsub.f32 %v114_v61, %v188_v62 }
 0x146   :  { %v117_v1 = vsel %vm58_vm0, %v101_v63, 0 }
 0x147   :  { %v190_v2 = vand.u32 4294901760, %v189_v0  ;;  %v198_v3 = vand.u32 4294901760, %v117_v1 }
 0x149   :  { %v191_v4 = vsub.f32 %v189_v0, %v190_v2  ;;  %v199_v5 = vsub.f32 %v117_v1, %v198_v3 }
 0x14b   :  { %v192_v6 = vand.u32 4294901760, %v191_v4  ;;  %v200_v7 = vand.u32 4294901760, %v199_v5 }
 0x14d   :  { %24277 = vmatprep.mubr.f32.mxu0 %v192_v6  ;;  %v201_v8 = vsub.f32 %v199_v5, %v200_v7 }
 0x14f   :  { %v202_v9 = vand.u32 4294901760, %v201_v8 }
 0x151   :  { %24278 = vmatmul.mubr.f32.vlgmr.msra.gmra.mrb[0].mxu0 %v202_v9 }
 0x152   :  { %25486 = vmatpush3.bf16.msra.mxu0 %v25483_v36  ;;  %24288 = vmatprep.mubr.f32.mxu0 %v188_v62 }
 0x153   :  { %25488 = vmatprep.subr.bf16.mxu0 %v25487_v41 }
 0x156   :  { %25490 = vmatpush3.bf16.msra.mxu0 %v25487_v41 }
 0x157   :  { %25492 = vmatprep.subr.bf16.mxu0 %v25491_v42 }
 0x159   :  { %24289 = vmatmul.mubr.f32.vlgmr.msra.gmra.mrb[0].mxu0 %v198_v3 }
 0x15a   :  { %25494 = vmatpush3.bf16.msra.mxu0 %v25491_v42  ;;  %24299 = vmatprep.mubr.f32.mxu0 %v189_v0 }
 0x15b   :  { %25496 = vmatprep.subr.bf16.mxu0 %v25495_v43 }
 0x15e   :  { %25498 = vmatpush3.bf16.msra.mxu0 %v25495_v43 }
 0x15f   :  { %25500 = vmatprep.subr.bf16.mxu0 %v27323_v22 }
 0x161   :  { %24300 = vmatmul.mubr.f32.vlgmr.msra.gmra.mrb[0].mxu0 %v199_v5 }
 0x162   :  { %25502 = vmatpush3.bf16.msra.mxu0 %v27323_v22  ;;  %24310 = vmatprep.mubr.f32.mxu0 %v190_v2 }
 0x163   :  { %25504 = vmatprep.subr.bf16.mxu0 %v27325_v23 }
 0x166   :  { %25506 = vmatpush3.bf16.msra.mxu0 %v27325_v23 }
 0x167   :  { %25508 = vmatprep.subr.bf16.mxu0 %v25507_v44 }
 0x169   :  { %24311 = vmatmul.mubr.f32.vlgmr.msra.gmra.mrb[0].mxu0 %v200_v7 }
 0x16a   :  { %25510 = vmatpush3.bf16.msra.mxu0 %v25507_v44  ;;  %24321 = vmatprep.mubr.f32.mxu0 %v188_v62 }
 0x16b   :  { %25512 = vmatprep.subr.bf16.mxu0 %v25511_v45 }
 0x16e   :  { %25514 = vmatpush3.bf16.msra.mxu0 %v25511_v45 }
 0x16f   :  { %25516 = vmatprep.subr.bf16.mxu0 %v27323_v22 }
 0x171   :  { %24322 = vmatmul.mubr.f32.vlgmr.msra.gmra.mrb[0].mxu0 %v198_v3 }
 0x172   :  { %25518 = vmatpush3.bf16.msra.mxu0 %v27323_v22  ;;  %24332 = vmatprep.mubr.f32.mxu0 %v188_v62 }
 0x173   :  { %25520 = vmatprep.subr.bf16.mxu0 %v27325_v23 }
 0x176   :  { %25522 = vmatpush3.bf16.msra.mxu0 %v27325_v23 }
 0x177   :  { %24395 = vmatprep.subr.mxu0 %v27180_v10 }
 0x179   :  { %24333 = vmatmul.mubr.f32.vlgmr.msra.gmra.mrb[0].mxu0 %v198_v3 }
 0x17a   :  { %24397 = vmatprep.mubr.msk.f32.mxu0 %vm27181_vm1, %v27180_v10 }
 0x24c   :  { %v24334_v12 = vpop.f32.mrb[0].mxu0 }
 0x24d   :  { %v27356_v13 = vadd.f32 %v24334_v12, %v22834_v11  ;;  %v637_v14 = vpop.f32.mrb[1].mxu0 }
 0x24e   :  { %v27358_v15 = vadd.f32 %v22834_v11, %v637_v14 }
 0x24f   :  { %1102 = vrot.lane.b32.xlu1 %v27356_v13, %s27182_s22  ;;  %v1104_v45 = vsel %vm650_vm2, %v27356_v13, 0 }
 0x250   :  { %648 = vrot.lane.b32.xlu0 %v27358_v15, %s27182_s22  ;;  %v651_v16 = vsel %vm650_vm2, %v27358_v15, 0  ;;  %v27450_v47 = vand.u32 4294901760, %v1104_v45 }
 0x251   :  { %v27406_v17 = vand.u32 4294901760, %v651_v16 }
 0x252   :  { %v27458_v50 = vsub.f32 %v1104_v45, %v27450_v47 }
 0x253   :  { %1554 = vrot.lane.b32.xlu1 %v27358_v15, %s27183_s24  ;;  %v722_v18 = vsub.f32 %v651_v16, %v27406_v17 }
 0x254   :  { %1556 = vrot.lane.b32.xlu0 %v27358_v15, %s27184_s25  ;;  %v1176_v55 = vand.u32 4294901760, %v27458_v50 }
 0x255   :  { %v723_v19 = vand.u32 4294901760, %v722_v18 }
 0x256   :  { %v1177_v59 = vsub.f32 %v27458_v50, %v1176_v55 }
 0x257   :  { %2008 = vrot.lane.b32.xlu1 %v27356_v13, %s27183_s24  ;;  %v724_v23 = vsub.f32 %v722_v18, %v723_v19  ;;  %s27200_s24 = smov 32  }
 0x258   :  { %2462 = vrot.lane.b32.xlu0 %v27358_v15, %s27185_s6  ;;  %v1178_v63 = vand.u32 4294901760, %v1177_v59 }
 0x259   :  { %v725_v31 = vand.u32 4294901760, %v724_v23 }
 0x25b   :  { %2010 = vrot.lane.b32.xlu1 %v27356_v13, %s27184_s25  ;;  %s27201_s25 = smov 40  }
 0x25c   :  { %2464 = vrot.lane.b32.xlu0 %v27358_v15, %s27186_s26 }
 0x25f   :  { %2916 = vrot.lane.b32.xlu1 %v27356_v13, %s27185_s6 }
 0x260   :  { %3370 = vrot.lane.b32.xlu0 %v27358_v15, %s27187_s27 }
 0x263   :  { %2918 = vrot.lane.b32.xlu1 %v27356_v13, %s27186_s26 }
 0x264   :  { %3372 = vrot.lane.b32.xlu0 %v27358_v15, %s27188_s28 }
 0x267   :  { %3824 = vrot.lane.b32.xlu1 %v27356_v13, %s27187_s27  ;;  %s27202_s27 = smov 48  }
 0x268   :  { %4278 = vrot.lane.b32.xlu0 %v27358_v15, %s27189_s29 }
 0x26b   :  { %3826 = vrot.lane.b32.xlu1 %v27356_v13, %s27188_s28  ;;  %s27203_s28 = smov 56  }
 0x26c   :  { %4280 = vrot.lane.b32.xlu0 %v27358_v15, %s27190_s30 }
 0x26f   :  { %4732 = vrot.lane.b32.xlu1 %v27356_v13, %s27189_s29 }
 0x270   :  { %5186 = vrot.lane.b32.xlu0 %v27358_v15, %s27191_s0 }
 0x273   :  { %4734 = vrot.lane.b32.xlu1 %v27356_v13, %s27190_s30 }
 0x274   :  { %5188 = vrot.lane.b32.xlu0 %v27358_v15, %s27192_s17 }
 0x277   :  { %5640 = vrot.lane.b32.xlu1 %v27356_v13, %s27191_s0 }
 0x278   :  { %6094 = vrot.lane.b32.xlu0 %v27358_v15, %s27193_s18 }
 0x27b   :  { %5642 = vrot.lane.b32.xlu1 %v27356_v13, %s27192_s17 }
 0x27c   :  { %6096 = vrot.lane.b32.xlu0 %v27358_v15, %s27194_s5 }
 0x27f   :  { %6548 = vrot.lane.b32.xlu1 %v27356_v13, %s27193_s18 }
 0x280   :  { %7002 = vrot.lane.b32.xlu0 %v27358_v15, %s27195_s19 }
 0x283   :  { %6550 = vrot.lane.b32.xlu1 %v27356_v13, %s27194_s5 }
 0x284   :  { %7004 = vrot.lane.b32.xlu0 %v27358_v15, %s27196_s20 }
 0x287   :  { %7456 = vrot.lane.b32.xlu1 %v27356_v13, %s27195_s19  ;;  %s27204_s19 = smov 64  }
 0x28b   :  { %7458 = vrot.lane.b32.xlu1 %v27356_v13, %s27196_s20 }
 0x2c1   :  { %v1103_v20 = vpop.permute.xlu1 %1102 }
 0x2c2   :  { %v649_v21 = vpop.permute.xlu0 %648  ;;  %v1106_v46 = vsel %vm650_vm2, %v1103_v20, 0 }
 0x2c3   :  { %v653_v22 = vsel %vm650_vm2, %v649_v21, 0  ;;  %v27452_v48 = vand.u32 4294901760, %v1106_v46 }
 0x2c4   :  { %v27410_v24 = vand.u32 4294901760, %v653_v22 }
 0x2c5   :  { %v1555_v25 = vpop.permute.xlu1 %1554  ;;  %v27461_v51 = vsub.f32 %v1106_v46, %v27452_v48 }
 0x2c6   :  { %v733_v26 = vsub.f32 %v653_v22, %v27410_v24  ;;  %v1558_v27 = vsel %vm650_vm2, %v1555_v25, 0  ;;  %24336 = vmatpush3.xpose.msra.mxu1 %v27410_v24  ;;  %v1557_v28 = vpop.permute.xlu0 %1556 }
 0x2c7   :  { %v27415_v29 = vand.u32 4294901760, %v1558_v27  ;;  %v1560_v30 = vsel %vm650_vm2, %v1557_v28, 0  ;;  %24340 = vmatprep.subr.mxu1 %v27180_v10  ;;  %v1187_v56 = vand.u32 4294901760, %v27461_v51 }
 0x2c8   :  { %v734_v32 = vand.u32 4294901760, %v733_v26  ;;  %v27419_v33 = vand.u32 4294901760, %v1560_v30 }
 0x2c9   :  { %v1629_v34 = vsub.f32 %v1558_v27, %v27415_v29  ;;  %24338 = vmatmul.mubr.f32.vlgmr.msra.gmra.mrb[0].mxu1 %v725_v31  ;;  %v1188_v60 = vsub.f32 %v27461_v51, %v1187_v56  ;;  %v2009_v6 = vpop.permute.xlu1 %2008 }
 0x2ca   :  { %v735_v35 = vsub.f32 %v733_v26, %v734_v32  ;;  %v1640_v36 = vsub.f32 %v1560_v30, %v27419_v33  ;;  %24396 = vmatpush3.xpose.msra.mxu0 %v27419_v33  ;;  %24342 = vmatprep.mubr.msk.f32.mxu1 %vm27181_vm1, %v27180_v10  ;;  %v2463_v44 = vpop.permute.xlu0 %2462  ;;  %v2012_v8 = vsel %vm650_vm2, %v2009_v6, 0 }
 0x2cb   :  { %v1630_v37 = vand.u32 4294901760, %v1629_v34  ;;  %24400 = vmatprep.subr.mxu0 %v27180_v10  ;;  %v2466_v52 = vsel %vm650_vm2, %v2463_v44, 0  ;;  %v1189_v0 = vand.u32 4294901760, %v1188_v60  ;;  %v27531_v12 = vand.u32 4294901760, %v2012_v8 }
 0x2cc   :  { %v736_v38 = vand.u32 4294901760, %v735_v35  ;;  %v1641_v39 = vand.u32 4294901760, %v1640_v36  ;;  %v27467_v54 = vand.u32 4294901760, %v2466_v52 }
 0x2cd   :  { %v1631_v40 = vsub.f32 %v1629_v34, %v1630_v37  ;;  %v2011_v7 = vpop.permute.xlu1 %2010 }
 0x2ce   :  { %v1642_v41 = vsub.f32 %v1640_v36, %v1641_v39  ;;  %24341 = vmatpush3.xpose.msra.mxu1 %v736_v38  ;;  %v2465_v49 = vpop.permute.xlu0 %2464  ;;  %v27480_v58 = vsub.f32 %v2466_v52, %v27467_v54  ;;  %v2014_v11 = vsel %vm650_vm2, %v2011_v7, 0 }
 0x2cf   :  { %v1632_v42 = vand.u32 4294901760, %v1631_v40  ;;  %24345 = vmatprep.subr.mxu1 %v27180_v10  ;;  %v2468_v53 = vsel %vm650_vm2, %v2465_v49, 0  ;;  %v27536_v14 = vand.u32 4294901760, %v2014_v11 }
 0x2d0   :  { %v1643_v43 = vand.u32 4294901760, %v1642_v41  ;;  %v27474_v57 = vand.u32 4294901760, %v2468_v53  ;;  %v2538_v62 = vand.u32 4294901760, %v27480_v58 }
 0x2d1   :  { %24343 = vmatmul.mubr.f32.vlgmr.msra.gmra.mrb[0].mxu1 %v27406_v17  ;;  %24398 = vmatmul.mubr.f32.vlgmr.msra.gmra.mrb[2].mxu0 %v1632_v42 }
 0x2d2   :  { %24401 = vmatpush3.xpose.msra.mxu0 %v1643_v43  ;;  %24346 = vmatpush3.xpose.msra.mxu1 %v733_v26  ;;  %v27485_v61 = vsub.f32 %v2468_v53, %v27474_v57  ;;  %v2539_v2 = vsub.f32 %v27480_v58, %v2538_v62  ;;  %v3371_v9 = vpop.permute.xlu0 %3370 }
 0x2d3   :  { %24347 = vmatprep.mubr.msk.f32.mxu1 %vm27181_vm1, %v27180_v10  ;;  %24350 = vmatprep.subr.mxu1 %v27180_v10 }
 0x2d4   :  { %24402 = vmatprep.mubr.msk.f32.mxu0 %vm27181_vm1, %v27180_v10  ;;  %24405 = vmatprep.subr.mxu0 %v27180_v10  ;;  %v2549_v1 = vand.u32 4294901760, %v27485_v61  ;;  %v2540_v4 = vand.u32 4294901760, %v2539_v2 }
 0x2d6   :  { %v2550_v3 = vsub.f32 %v27485_v61, %v2549_v1  ;;  %v3373_v16 = vpop.permute.xlu0 %3372 }
 0x2d7   :  { %v3376_v20 = vsel %vm650_vm2, %v3373_v16, 0 }
 0x2d8   :  { %v2551_v5 = vand.u32 4294901760, %v2550_v3 }
 0x2d9   :  { %24348 = vmatmul.mubr.f32.vlgmr.msra.gmra.mrb[0].mxu1 %v722_v18  ;;  %24403 = vmatmul.mubr.f32.vlgmr.msra.gmra.mrb[2].mxu0 %v27415_v29  ;;  %v27545_v18 = vsub.f32 %v2014_v11, %v27536_v14 }
 0x2da   :  { %24351 = vmatpush3.xpose.msra.mxu1 %v27410_v24  ;;  %24406 = vmatpush3.xpose.msra.mxu0 %v1640_v36  ;;  %v4279_v40 = vpop.permute.xlu0 %4278 }
 0x2db   :  { %24352 = vmatprep.mubr.msk.f32.mxu1 %vm27181_vm1, %v27180_v10  ;;  %24355 = vmatprep.subr.mxu1 %v27180_v10  ;;  %v2095_v23 = vand.u32 4294901760, %v27545_v18 }
 0x2dc   :  { %24407 = vmatprep.mubr.msk.f32.mxu0 %vm27181_vm1, %v27180_v10  ;;  %24410 = vmatprep.subr.mxu0 %v27180_v10 }
 0x2dd   :  { %v2096_v27 = vsub.f32 %v27545_v18, %v2095_v23 }
 0x2de   :  { %v4281_v44 = vpop.permute.xlu0 %4280 }
 0x2df   :  { %v2097_v31 = vand.u32 4294901760, %v2096_v27 }
 0x2e1   :  { %24353 = vmatmul.mubr.f32.vlgmr.msra.gmra.mrb[0].mxu1 %v723_v19  ;;  %24408 = vmatmul.mubr.f32.vlgmr.msra.gmra.mrb[2].mxu0 %v1629_v34  ;;  %v3374_v19 = vsel %vm650_vm2, %v3371_v9, 0 }
 0x2e2   :  { %24356 = vmatpush3.xpose.msra.mxu1 %v734_v32  ;;  %24411 = vmatpush3.xpose.msra.mxu0 %v27419_v33  ;;  %v27552_v22 = vand.u32 4294901760, %v3374_v19 }
 0x2e3   :  { %24357 = vmatprep.mubr.msk.f32.mxu1 %vm27181_vm1, %v27180_v10  ;;  %24360 = vmatprep.subr.mxu1 %v27180_v10 }
 0x2e4   :  { %24412 = vmatprep.mubr.msk.f32.mxu0 %vm27181_vm1, %v27180_v10  ;;  %24415 = vmatprep.subr.mxu0 %v27180_v10  ;;  %v27565_v26 = vsub.f32 %v3374_v19, %v27552_v22 }
 0x2e6   :  { %v3446_v30 = vand.u32 4294901760, %v27565_v26 }
 0x2e9   :  { %24358 = vmatmul.mubr.f32.vlgmr.msra.gmra.mrb[0].mxu1 %v27406_v17  ;;  %24413 = vmatmul.mubr.f32.vlgmr.msra.gmra.mrb[2].mxu0 %v1630_v37  ;;  %v2917_v37 = vpop.permute.xlu1 %2916 }
 0x2ea   :  { %24361 = vmatpush3.xpose.msra.mxu1 %v27410_v24  ;;  %24416 = vmatpush3.xpose.msra.mxu0 %v1641_v39  ;;  %v27558_v24 = vand.u32 4294901760, %v3376_v20  ;;  %v2920_v39 = vsel %vm650_vm2, %v2917_v37, 0 }
 0x2eb   :  { %24362 = vmatprep.mubr.msk.f32.mxu1 %vm27181_vm1, %v27180_v10  ;;  %24365 = vmatprep.subr.mxu1 %v27180_v10  ;;  %v27615_v42 = vand.u32 4294901760, %v2920_v39 }
 0x2ec   :  { %24417 = vmatprep.mubr.msk.f32.mxu0 %vm27181_vm1, %v27180_v10  ;;  %24420 = vmatprep.subr.mxu0 %v27180_v10  ;;  %v27569_v28 = vsub.f32 %v3376_v20, %v27558_v24 }
 0x2ed   :  { %v2919_v38 = vpop.permute.xlu1 %2918  ;;  %v27626_v45 = vsub.f32 %v2920_v39, %v27615_v42 }
 0x2ee   :  { %v3457_v32 = vand.u32 4294901760, %v27569_v28  ;;  %v2922_v41 = vsel %vm650_vm2, %v2919_v38, 0 }
 0x2ef   :  { %v27620_v43 = vand.u32 4294901760, %v2922_v41  ;;  %v2992_v49 = vand.u32 4294901760, %v27626_v45 }
 0x2f0   :  { %v3458_v34 = vsub.f32 %v27569_v28, %v3457_v32 }
 0x2f1   :  { %24363 = vmatmul.mubr.f32.vlgmr.msra.gmra.mrb[0].mxu1 %v27406_v17  ;;  %24418 = vmatmul.mubr.f32.vlgmr.msra.gmra.mrb[2].mxu0 %v27415_v29  ;;  %v27542_v17 = vsub.f32 %v2012_v8, %v27531_v12  ;;  %v27629_v46 = vsub.f32 %v2922_v41, %v27620_v43  ;;  %v2993_v53 = vsub.f32 %v27626_v45, %v2992_v49 }
 0x2f2   :  { %24366 = vmatpush3.xpose.msra.mxu1 %v27452_v48  ;;  %24421 = vmatpush3.xpose.msra.mxu0 %v27419_v33  ;;  %v3447_v33 = vsub.f32 %v27565_v26, %v3446_v30  ;;  %v3459_v36 = vand.u32 4294901760, %v3458_v34 }
 0x2f3   :  { %24367 = vmatprep.mubr.msk.f32.mxu1 %vm27181_vm1, %v27180_v10  ;;  %24370 = vmatprep.subr.mxu1 %v27180_v10  ;;  %v2084_v21 = vand.u32 4294901760, %v27542_v17 }
 0x2f4   :  { %24422 = vmatprep.mubr.msk.f32.mxu0 %vm27181_vm1, %v27180_v10  ;;  %24455 = vmatprep.subr.mxu0 %v27180_v10  ;;  %v3448_v35 = vand.u32 4294901760, %v3447_v33 }
 0x2f5   :  { %24368 = vmatmul.mubr.f32.vlgmr.msra.gmra.mrb[2].mxu1 %v1178_v63  ;;  %v2085_v25 = vsub.f32 %v27542_v17, %v2084_v21 }
 0x2f6   :  { %24371 = vmatpush3.xpose.msra.mxu1 %v1189_v0  ;;  %24372 = vmatprep.mubr.msk.f32.mxu1 %vm27181_vm1, %v27180_v10 }
 0x2f7   :  { %24375 = vmatprep.subr.mxu1 %v27180_v10 }
 0x2f9   :  { %24423 = vmatmul.mubr.f32.vlgmr.msra.gmra.mrb[2].mxu0 %v27415_v29  ;;  %v2086_v29 = vand.u32 4294901760, %v2085_v25 }
 0x2fa   :  { %24456 = vmatpush3.xpose.msra.mxu0 %v27474_v57  ;;  %24457 = vmatprep.mubr.msk.f32.mxu0 %vm27181_vm1, %v27180_v10 }
 0x2fb   :  { %24460 = vmatprep.subr.mxu0 %v27180_v10 }
 0x2fd   :  { %24373 = vmatmul.mubr.f32.vlgmr.msra.gmra.mrb[2].mxu1 %v27450_v47  ;;  %24458 = vmatmul.mubr.f32.vlgmr.msra.gmra.mrb[4].mxu0 %v2540_v4  ;;  %v5187_v4 = vpop.permute.xlu0 %5186 }
 0x2fe   :  { %24376 = vmatpush3.xpose.msra.mxu1 %v27461_v51  ;;  %24461 = vmatpush3.xpose.msra.mxu0 %v2551_v5  ;;  %v3003_v51 = vand.u32 4294901760, %v27629_v46 }
 0x2ff   :  { %24377 = vmatprep.mubr.msk.f32.mxu1 %vm27181_vm1, %v27180_v10  ;;  %24380 = vmatprep.subr.mxu1 %v27180_v10 }
 0x300   :  { %24462 = vmatprep.mubr.msk.f32.mxu0 %vm27181_vm1, %v27180_v10  ;;  %24465 = vmatprep.subr.mxu0 %v27180_v10 }
 0x301   :  { %v5189_v8 = vpop.permute.xlu0 %5188 }
 0x305   :  { %24378 = vmatmul.mubr.f32.vlgmr.msra.gmra.mrb[2].mxu1 %v27458_v50  ;;  %24463 = vmatmul.mubr.f32.vlgmr.msra.gmra.mrb[4].mxu0 %v27467_v54 }
 0x306   :  { %24381 = vmatpush3.xpose.msra.mxu1 %v27452_v48  ;;  %24466 = vmatpush3.xpose.msra.mxu0 %v27485_v61 }
 0x307   :  { %24382 = vmatprep.mubr.msk.f32.mxu1 %vm27181_vm1, %v27180_v10  ;;  %24385 = vmatprep.subr.mxu1 %v27180_v10 }
 0x308   :  { %24467 = vmatprep.mubr.msk.f32.mxu0 %vm27181_vm1, %v27180_v10  ;;  %24470 = vmatprep.subr.mxu0 %v27180_v10 }
 0x30d   :  { %24383 = vmatmul.mubr.f32.vlgmr.msra.gmra.mrb[2].mxu1 %v1176_v55  ;;  %24468 = vmatmul.mubr.f32.vlgmr.msra.gmra.mrb[4].mxu0 %v27480_v58  ;;  %v3004_v55 = vsub.f32 %v27629_v46, %v3003_v51 }
 0x30e   :  { %24386 = vmatpush3.xpose.msra.mxu1 %v1187_v56  ;;  %24471 = vmatpush3.xpose.msra.mxu0 %v27474_v57 }
 0x30f   :  { %24387 = vmatprep.mubr.msk.f32.mxu1 %vm27181_vm1, %v27180_v10  ;;  %24390 = vmatprep.subr.mxu1 %v27180_v10  ;;  %v3005_v59 = vand.u32 4294901760, %v3004_v55 }
 0x310   :  { %24472 = vmatprep.mubr.msk.f32.mxu0 %vm27181_vm1, %v27180_v10  ;;  %24475 = vmatprep.subr.mxu0 %v27180_v10 }
 0x315   :  { %24388 = vmatmul.mubr.f32.vlgmr.msra.gmra.mrb[2].mxu1 %v27450_v47  ;;  %24473 = vmatmul.mubr.f32.vlgmr.msra.gmra.mrb[4].mxu0 %v2538_v62 }
 0x316   :  { %24391 = vmatpush3.xpose.msra.mxu1 %v27452_v48  ;;  %24476 = vmatpush3.xpose.msra.mxu0 %v2549_v1  ;;  %v4284_v48 = vsel %vm650_vm2, %v4281_v44, 0  ;;  %v3825_v1 = vpop.permute.xlu1 %3824 }
 0x317   :  { %24392 = vmatprep.mubr.msk.f32.mxu1 %vm27181_vm1, %v27180_v10  ;;  %24425 = vmatprep.subr.mxu1 %v27180_v10  ;;  %v27642_v52 = vand.u32 4294901760, %v4284_v48  ;;  %v3828_v3 = vsel %vm650_vm2, %v3825_v1, 0 }
 0x318   :  { %24477 = vmatprep.mubr.msk.f32.mxu0 %vm27181_vm1, %v27180_v10  ;;  %24480 = vmatprep.subr.mxu0 %v27180_v10  ;;  %v27699_v6 = vand.u32 4294901760, %v3828_v3 }
 0x319   :  { %v27653_v56 = vsub.f32 %v4284_v48, %v27642_v52 }
 0x31a   :  { %v3827_v2 = vpop.permute.xlu1 %3826  ;;  %v27710_v9 = vsub.f32 %v3828_v3, %v27699_v6 }
 0x31b   :  { %v4365_v60 = vand.u32 4294901760, %v27653_v56  ;;  %v3830_v5 = vsel %vm650_vm2, %v3827_v2, 0 }
 0x31c   :  { %v27704_v7 = vand.u32 4294901760, %v3830_v5  ;;  %v3900_v16 = vand.u32 4294901760, %v27710_v9 }
 0x31d   :  { %24393 = vmatmul.mubr.f32.vlgmr.msra.gmra.mrb[2].mxu1 %v27450_v47  ;;  %24478 = vmatmul.mubr.f32.vlgmr.msra.gmra.mrb[4].mxu0 %v27467_v54  ;;  %v4282_v47 = vsel %vm650_vm2, %v4279_v40, 0  ;;  %v4366_v62 = vsub.f32 %v27653_v56, %v4365_v60 }
 0x31e   :  { %24426 = vmatpush3.xpose.msra.mxu1 %v27536_v14  ;;  %24481 = vmatpush3.xpose.msra.mxu0 %v27474_v57  ;;  %v27636_v50 = vand.u32 4294901760, %v4282_v47  ;;  %v2994_v57 = vand.u32 4294901760, %v2993_v53  ;;  %v27713_v11 = vsub.f32 %v3830_v5, %v27704_v7  ;;  %v3901_v20 = vsub.f32 %v27710_v9, %v3900_v16 }
 0x31f   :  { %24427 = vmatprep.mubr.msk.f32.mxu1 %vm27181_vm1, %v27180_v10  ;;  %24430 = vmatprep.subr.mxu1 %v27180_v10  ;;  %v4367_v0 = vand.u32 4294901760, %v4366_v62 }
 0x320   :  { %24482 = vmatprep.mubr.msk.f32.mxu0 %vm27181_vm1, %v27180_v10  ;;  %24515 = vmatprep.subr.mxu0 %v27180_v10 }
 0x321   :  { %24428 = vmatmul.mubr.f32.vlgmr.msra.gmra.mrb[4].mxu1 %v2086_v29 }
 0x322   :  { %24431 = vmatpush3.xpose.msra.mxu1 %v2097_v31  ;;  %24432 = vmatprep.mubr.msk.f32.mxu1 %vm27181_vm1, %v27180_v10 }
 0x323   :  { %24435 = vmatprep.subr.mxu1 %v27180_v10 }
 0x325   :  { %24483 = vmatmul.mubr.f32.vlgmr.msra.gmra.mrb[4].mxu0 %v27467_v54  ;;  %v27649_v54 = vsub.f32 %v4282_v47, %v27636_v50 }
 0x326   :  { %24516 = vmatpush3.xpose.msra.mxu0 %v27558_v24  ;;  %24517 = vmatprep.mubr.msk.f32.mxu0 %vm27181_vm1, %v27180_v10 }
 0x327   :  { %24520 = vmatprep.subr.mxu0 %v27180_v10  ;;  %v4354_v58 = vand.u32 4294901760, %v27649_v54 }
 0x329   :  { %24433 = vmatmul.mubr.f32.vlgmr.msra.gmra.mrb[4].mxu1 %v27531_v12  ;;  %24518 = vmatmul.mubr.f32.vlgmr.msra.gmra.mrb[6].mxu0 %v3448_v35  ;;  %v4355_v61 = vsub.f32 %v27649_v54, %v4354_v58  ;;  %v6095_v35 = vpop.permute.xlu0 %6094 }
 0x32a   :  { %24436 = vmatpush3.xpose.msra.mxu1 %v27545_v18  ;;  %24521 = vmatpush3.xpose.msra.mxu0 %v3459_v36  ;;  %v3911_v18 = vand.u32 4294901760, %v27713_v11 }
 0x32b   :  { %24437 = vmatprep.mubr.msk.f32.mxu1 %vm27181_vm1, %v27180_v10  ;;  %24440 = vmatprep.subr.mxu1 %v27180_v10  ;;  %v4356_v63 = vand.u32 4294901760, %v4355_v61 }
 0x32c   :  { %24522 = vmatprep.mubr.msk.f32.mxu0 %vm27181_vm1, %v27180_v10  ;;  %24525 = vmatprep.subr.mxu0 %v27180_v10 }
 0x32d   :  { %v6097_v39 = vpop.permute.xlu0 %6096 }
 0x331   :  { %24438 = vmatmul.mubr.f32.vlgmr.msra.gmra.mrb[4].mxu1 %v27542_v17  ;;  %24523 = vmatmul.mubr.f32.vlgmr.msra.gmra.mrb[6].mxu0 %v27552_v22 }
 0x332   :  { %24441 = vmatpush3.xpose.msra.mxu1 %v27536_v14  ;;  %24526 = vmatpush3.xpose.msra.mxu0 %v27569_v28 }
 0x333   :  { %24442 = vmatprep.mubr.msk.f32.mxu1 %vm27181_vm1, %v27180_v10  ;;  %24445 = vmatprep.subr.mxu1 %v27180_v10 }
 0x334   :  { %24527 = vmatprep.mubr.msk.f32.mxu0 %vm27181_vm1, %v27180_v10  ;;  %24530 = vmatprep.subr.mxu0 %v27180_v10 }
 0x339   :  { %24443 = vmatmul.mubr.f32.vlgmr.msra.gmra.mrb[4].mxu1 %v2084_v21  ;;  %24528 = vmatmul.mubr.f32.vlgmr.msra.gmra.mrb[6].mxu0 %v27565_v26 }
 0x33a   :  { %24446 = vmatpush3.xpose.msra.mxu1 %v2095_v23  ;;  %24531 = vmatpush3.xpose.msra.mxu0 %v27558_v24 }
 0x33b   :  { %24447 = vmatprep.mubr.msk.f32.mxu1 %vm27181_vm1, %v27180_v10  ;;  %24450 = vmatprep.subr.mxu1 %v27180_v10 }
 0x33c   :  { %24532 = vmatprep.mubr.msk.f32.mxu0 %vm27181_vm1, %v27180_v10  ;;  %24535 = vmatprep.subr.mxu0 %v27180_v10 }
 0x341   :  { %24448 = vmatmul.mubr.f32.vlgmr.msra.gmra.mrb[4].mxu1 %v27531_v12  ;;  %24533 = vmatmul.mubr.f32.vlgmr.msra.gmra.mrb[6].mxu0 %v3446_v30 }
 0x342   :  { %24451 = vmatpush3.xpose.msra.mxu1 %v27536_v14  ;;  %24536 = vmatpush3.xpose.msra.mxu0 %v3457_v32  ;;  %v5192_v14 = vsel %vm650_vm2, %v5189_v8, 0  ;;  %v4733_v32 = vpop.permute.xlu1 %4732 }
 0x343   :  { %24452 = vmatprep.mubr.msk.f32.mxu1 %vm27181_vm1, %v27180_v10  ;;  %24485 = vmatprep.subr.mxu1 %v27180_v10  ;;  %v27726_v19 = vand.u32 4294901760, %v5192_v14  ;;  %v4736_v34 = vsel %vm650_vm2, %v4733_v32, 0 }
 0x344   :  { %24537 = vmatprep.mubr.msk.f32.mxu0 %vm27181_vm1, %v27180_v10  ;;  %24540 = vmatprep.subr.mxu0 %v27180_v10  ;;  %v27783_v37 = vand.u32 4294901760, %v4736_v34 }
 0x345   :  { %v27737_v23 = vsub.f32 %v5192_v14, %v27726_v19 }
 0x346   :  { %v4735_v33 = vpop.permute.xlu1 %4734  ;;  %v27794_v40 = vsub.f32 %v4736_v34, %v27783_v37 }
 0x347   :  { %v5273_v27 = vand.u32 4294901760, %v27737_v23  ;;  %v4738_v36 = vsel %vm650_vm2, %v4735_v33, 0 }
 0x348   :  { %v27788_v38 = vand.u32 4294901760, %v4738_v36  ;;  %v4808_v44 = vand.u32 4294901760, %v27794_v40 }
 0x349   :  { %24453 = vmatmul.mubr.f32.vlgmr.msra.gmra.mrb[4].mxu1 %v27531_v12  ;;  %24538 = vmatmul.mubr.f32.vlgmr.msra.gmra.mrb[6].mxu0 %v27552_v22  ;;  %v5190_v12 = vsel %vm650_vm2, %v5187_v4, 0  ;;  %v5274_v29 = vsub.f32 %v27737_v23, %v5273_v27 }
 0x34a   :  { %24486 = vmatpush3.xpose.msra.mxu1 %v27620_v43  ;;  %24541 = vmatpush3.xpose.msra.mxu0 %v27558_v24  ;;  %v27720_v17 = vand.u32 4294901760, %v5190_v12  ;;  %v3902_v24 = vand.u32 4294901760, %v3901_v20  ;;  %v27797_v41 = vsub.f32 %v4738_v36, %v27788_v38  ;;  %v4809_v48 = vsub.f32 %v27794_v40, %v4808_v44 }
 0x34b   :  { %24487 = vmatprep.mubr.msk.f32.mxu1 %vm27181_vm1, %v27180_v10  ;;  %24490 = vmatprep.subr.mxu1 %v27180_v10  ;;  %v5275_v31 = vand.u32 4294901760, %v5274_v29 }
 0x34c   :  { %24542 = vmatprep.mubr.msk.f32.mxu0 %vm27181_vm1, %v27180_v10  ;;  %24575 = vmatprep.subr.mxu0 %v27180_v10  ;;  %v27733_v21 = vsub.f32 %v5190_v12, %v27720_v17 }
 0x34d   :  { %24488 = vmatmul.mubr.f32.vlgmr.msra.gmra.mrb[6].mxu1 %v2994_v57 }
 0x34e   :  { %24491 = vmatpush3.xpose.msra.mxu1 %v3005_v59  ;;  %24492 = vmatprep.mubr.msk.f32.mxu1 %vm27181_vm1, %v27180_v10  ;;  %v5262_v25 = vand.u32 4294901760, %v27733_v21 }
 0x34f   :  { %24495 = vmatprep.subr.mxu1 %v27180_v10 }
 0x350   :  { %v5263_v28 = vsub.f32 %v27733_v21, %v5262_v25 }
 0x351   :  { %24543 = vmatmul.mubr.f32.vlgmr.msra.gmra.mrb[6].mxu0 %v27552_v22  ;;  %v3912_v22 = vsub.f32 %v27713_v11, %v3911_v18 }
 0x352   :  { %24576 = vmatpush3.xpose.msra.mxu0 %v27642_v52  ;;  %24577 = vmatprep.mubr.msk.f32.mxu0 %vm27181_vm1, %v27180_v10  ;;  %v5264_v30 = vand.u32 4294901760, %v5263_v28 }
 0x353   :  { %24580 = vmatprep.subr.mxu0 %v27180_v10  ;;  %v3913_v26 = vand.u32 4294901760, %v3912_v22 }
 0x355   :  { %24493 = vmatmul.mubr.f32.vlgmr.msra.gmra.mrb[6].mxu1 %v27615_v42  ;;  %24578 = vmatmul.mubr.f32.vlgmr.msra.gmra.mrb[8].mxu0 %v4356_v63 }
 0x356   :  { %24496 = vmatpush3.xpose.msra.mxu1 %v27629_v46  ;;  %24581 = vmatpush3.xpose.msra.mxu0 %v4367_v0  ;;  %v4819_v46 = vand.u32 4294901760, %v27797_v41  ;;  %v7003_v0 = vpop.permute.xlu0 %7002 }
 0x357   :  { %24497 = vmatprep.mubr.msk.f32.mxu1 %vm27181_vm1, %v27180_v10  ;;  %24500 = vmatprep.subr.mxu1 %v27180_v10 }
 0x358   :  { %24582 = vmatprep.mubr.msk.f32.mxu0 %vm27181_vm1, %v27180_v10  ;;  %24585 = vmatprep.subr.mxu0 %v27180_v10 }
 0x35a   :  { %v7005_v4 = vpop.permute.xlu0 %7004 }
 0x35d   :  { %24498 = vmatmul.mubr.f32.vlgmr.msra.gmra.mrb[6].mxu1 %v27626_v45  ;;  %24583 = vmatmul.mubr.f32.vlgmr.msra.gmra.mrb[8].mxu0 %v27636_v50 }
 0x35e   :  { %24501 = vmatpush3.xpose.msra.mxu1 %v27620_v43  ;;  %24586 = vmatpush3.xpose.msra.mxu0 %v27653_v56 }
 0x35f   :  { %24502 = vmatprep.mubr.msk.f32.mxu1 %vm27181_vm1, %v27180_v10  ;;  %24505 = vmatprep.subr.mxu1 %v27180_v10 }
 0x360   :  { %24587 = vmatprep.mubr.msk.f32.mxu0 %vm27181_vm1, %v27180_v10  ;;  %24590 = vmatprep.subr.mxu0 %v27180_v10 }
 0x365   :  { %24503 = vmatmul.mubr.f32.vlgmr.msra.gmra.mrb[6].mxu1 %v2992_v49  ;;  %24588 = vmatmul.mubr.f32.vlgmr.msra.gmra.mrb[8].mxu0 %v27649_v54 }
 0x366   :  { %24506 = vmatpush3.xpose.msra.mxu1 %v3003_v51  ;;  %24591 = vmatpush3.xpose.msra.mxu0 %v27642_v52 }
 0x367   :  { %24507 = vmatprep.mubr.msk.f32.mxu1 %vm27181_vm1, %v27180_v10  ;;  %24510 = vmatprep.subr.mxu1 %v27180_v10 }
 0x368   :  { %24592 = vmatprep.mubr.msk.f32.mxu0 %vm27181_vm1, %v27180_v10  ;;  %24595 = vmatprep.subr.mxu0 %v27180_v10 }
 0x36d   :  { %24508 = vmatmul.mubr.f32.vlgmr.msra.gmra.mrb[6].mxu1 %v27615_v42  ;;  %24593 = vmatmul.mubr.f32.vlgmr.msra.gmra.mrb[8].mxu0 %v4354_v58 }
 0x36e   :  { %24511 = vmatpush3.xpose.msra.mxu1 %v27620_v43  ;;  %24596 = vmatpush3.xpose.msra.mxu0 %v4365_v60  ;;  %v6100_v43 = vsel %vm650_vm2, %v6097_v39, 0  ;;  %v5641_v60 = vpop.permute.xlu1 %5640 }
 0x36f   :  { %24512 = vmatprep.mubr.msk.f32.mxu1 %vm27181_vm1, %v27180_v10  ;;  %24545 = vmatprep.subr.mxu1 %v27180_v10  ;;  %v27810_v47 = vand.u32 4294901760, %v6100_v43  ;;  %v5644_v62 = vsel %vm650_vm2, %v5641_v60, 0 }
 0x370   :  { %24597 = vmatprep.mubr.msk.f32.mxu0 %vm27181_vm1, %v27180_v10  ;;  %24600 = vmatprep.subr.mxu0 %v27180_v10  ;;  %v27867_v1 = vand.u32 4294901760, %v5644_v62 }
 0x371   :  { %v27821_v51 = vsub.f32 %v6100_v43, %v27810_v47 }
 0x372   :  { %v5643_v61 = vpop.permute.xlu1 %5642  ;;  %v27878_v3 = vsub.f32 %v5644_v62, %v27867_v1 }
 0x373   :  { %v6181_v55 = vand.u32 4294901760, %v27821_v51  ;;  %v5646_v63 = vsel %vm650_vm2, %v5643_v61, 0 }
 0x374   :  { %v27872_v2 = vand.u32 4294901760, %v5646_v63 }
 0x375   :  { %24513 = vmatmul.mubr.f32.vlgmr.msra.gmra.mrb[6].mxu1 %v27615_v42  ;;  %24598 = vmatmul.mubr.f32.vlgmr.msra.gmra.mrb[8].mxu0 %v27636_v50  ;;  %v6098_v42 = vsel %vm650_vm2, %v6095_v35, 0  ;;  %v6182_v57 = vsub.f32 %v27821_v51, %v6181_v55 }
 0x376   :  { %24546 = vmatpush3.xpose.msra.mxu1 %v27704_v7  ;;  %24601 = vmatpush3.xpose.msra.mxu0 %v27642_v52  ;;  %v27804_v45 = vand.u32 4294901760, %v6098_v42  ;;  %v4810_v52 = vand.u32 4294901760, %v4809_v48  ;;  %v27881_v5 = vsub.f32 %v5646_v63, %v27872_v2 }
 0x377   :  { %24547 = vmatprep.mubr.msk.f32.mxu1 %vm27181_vm1, %v27180_v10  ;;  %24550 = vmatprep.subr.mxu1 %v27180_v10  ;;  %v6183_v59 = vand.u32 4294901760, %v6182_v57 }
 0x378   :  { %24602 = vmatprep.mubr.msk.f32.mxu0 %vm27181_vm1, %v27180_v10  ;;  %24635 = vmatprep.subr.mxu0 %v27180_v10  ;;  %v27817_v49 = vsub.f32 %v6098_v42, %v27804_v45  ;;  %v5727_v12 = vand.u32 4294901760, %v27881_v5 }
 0x379   :  { %24548 = vmatmul.mubr.f32.vlgmr.msra.gmra.mrb[8].mxu1 %v3902_v24 }
 0x37a   :  { %24551 = vmatpush3.xpose.msra.mxu1 %v3913_v26  ;;  %24552 = vmatprep.mubr.msk.f32.mxu1 %vm27181_vm1, %v27180_v10  ;;  %v6170_v53 = vand.u32 4294901760, %v27817_v49 }
 0x37b   :  { %24555 = vmatprep.subr.mxu1 %v27180_v10 }
 0x37c   :  { %v6171_v56 = vsub.f32 %v27817_v49, %v6170_v53 }
 0x37d   :  { %24603 = vmatmul.mubr.f32.vlgmr.msra.gmra.mrb[8].mxu0 %v27636_v50  ;;  %v4820_v50 = vsub.f32 %v27797_v41, %v4819_v46 }
 0x37e   :  { %24636 = vmatpush3.xpose.msra.mxu0 %v27726_v19  ;;  %24637 = vmatprep.mubr.msk.f32.mxu0 %vm27181_vm1, %v27180_v10  ;;  %v6172_v58 = vand.u32 4294901760, %v6171_v56 }
 0x37f   :  { %24640 = vmatprep.subr.mxu0 %v27180_v10  ;;  %v4821_v54 = vand.u32 4294901760, %v4820_v50 }
 0x381   :  { %24553 = vmatmul.mubr.f32.vlgmr.msra.gmra.mrb[8].mxu1 %v27699_v6  ;;  %24638 = vmatmul.mubr.f32.vlgmr.msra.gmra.mrb[10].mxu0 %v5264_v30 }
 0x382   :  { %24556 = vmatpush3.xpose.msra.mxu1 %v27713_v11  ;;  %24641 = vmatpush3.xpose.msra.mxu0 %v5275_v31  ;;  %v5716_v11 = vand.u32 4294901760, %v27878_v3  ;;  %v6549_v31 = vpop.permute.xlu1 %6548 }
 0x383   :  { %24557 = vmatprep.mubr.msk.f32.mxu1 %vm27181_vm1, %v27180_v10  ;;  %24560 = vmatprep.subr.mxu1 %v27180_v10  ;;  %v6552_v33 = vsel %vm650_vm2, %v6549_v31, 0 }
 0x384   :  { %24642 = vmatprep.mubr.msk.f32.mxu0 %vm27181_vm1, %v27180_v10  ;;  %24645 = vmatprep.subr.mxu0 %v27180_v10  ;;  %v27953_v35 = vand.u32 4294901760, %v6552_v33 }
 0x386   :  { %v6551_v32 = vpop.permute.xlu1 %6550 }
 0x387   :  { %v6554_v34 = vsel %vm650_vm2, %v6551_v32, 0 }
 0x388   :  { %v6557_v36 = vand.u32 4294901760, %v6554_v34 }
 0x389   :  { %24558 = vmatmul.mubr.f32.vlgmr.msra.gmra.mrb[8].mxu1 %v27710_v9  ;;  %24643 = vmatmul.mubr.f32.vlgmr.msra.gmra.mrb[10].mxu0 %v27720_v17  ;;  %v7008_v9 = vsel %vm650_vm2, %v7005_v4, 0 }
 0x38a   :  { %24561 = vmatpush3.xpose.msra.mxu1 %v27704_v7  ;;  %24646 = vmatpush3.xpose.msra.mxu0 %v27737_v23 }
 0x38b   :  { %24562 = vmatprep.mubr.msk.f32.mxu1 %vm27181_vm1, %v27180_v10  ;;  %24565 = vmatprep.subr.mxu1 %v27180_v10 }
 0x38c   :  { %24647 = vmatprep.mubr.msk.f32.mxu0 %vm27181_vm1, %v27180_v10  ;;  %24650 = vmatprep.subr.mxu0 %v27180_v10 }
 0x391   :  { %24563 = vmatmul.mubr.f32.vlgmr.msra.gmra.mrb[8].mxu1 %v3900_v16  ;;  %24648 = vmatmul.mubr.f32.vlgmr.msra.gmra.mrb[10].mxu0 %v27733_v21  ;;  %v27899_v16 = vand.u32 4294901760, %v7008_v9 }
 0x392   :  { %24566 = vmatpush3.xpose.msra.mxu1 %v3911_v18  ;;  %24651 = vmatpush3.xpose.msra.mxu0 %v27726_v19  ;;  %v5728_v18 = vsub.f32 %v27881_v5, %v5727_v12 }
 0x393   :  { %24567 = vmatprep.mubr.msk.f32.mxu1 %vm27181_vm1, %v27180_v10  ;;  %24570 = vmatprep.subr.mxu1 %v27180_v10  ;;  %v27907_v21 = vsub.f32 %v7008_v9, %v27899_v16 }
 0x394   :  { %24652 = vmatprep.mubr.msk.f32.mxu0 %vm27181_vm1, %v27180_v10  ;;  %24655 = vmatprep.subr.mxu0 %v27180_v10  ;;  %v5729_v24 = vand.u32 4294901760, %v5728_v18 }
 0x395   :  { %v7089_v26 = vand.u32 4294901760, %v27907_v21 }
 0x397   :  { %v7090_v28 = vsub.f32 %v27907_v21, %v7089_v26 }
 0x399   :  { %24568 = vmatmul.mubr.f32.vlgmr.msra.gmra.mrb[8].mxu1 %v27699_v6  ;;  %24653 = vmatmul.mubr.f32.vlgmr.msra.gmra.mrb[10].mxu0 %v5262_v25  ;;  %v7091_v30 = vand.u32 4294901760, %v7090_v28 }
 0x39a   :  { %24571 = vmatpush3.xpose.msra.mxu1 %v27704_v7  ;;  %24656 = vmatpush3.xpose.msra.mxu0 %v5273_v27  ;;  %v7006_v7 = vsel %vm650_vm2, %v7003_v0, 0 }
 0x39b   :  { %24572 = vmatprep.mubr.msk.f32.mxu1 %vm27181_vm1, %v27180_v10  ;;  %24605 = vmatprep.subr.mxu1 %v27180_v10  ;;  %v27894_v14 = vand.u32 4294901760, %v7006_v7 }
 0x39c   :  { %24657 = vmatprep.mubr.msk.f32.mxu0 %vm27181_vm1, %v27180_v10  ;;  %24660 = vmatprep.subr.mxu0 %v27180_v10 }
 0x3a1   :  { %24573 = vmatmul.mubr.f32.vlgmr.msra.gmra.mrb[8].mxu1 %v27699_v6  ;;  %24658 = vmatmul.mubr.f32.vlgmr.msra.gmra.mrb[10].mxu0 %v27720_v17 }
 0x3a2   :  { %24606 = vmatpush3.xpose.msra.mxu1 %v27788_v38  ;;  %24661 = vmatpush3.xpose.msra.mxu0 %v27726_v19  ;;  %v27904_v19 = vsub.f32 %v7006_v7, %v27894_v14 }
 0x3a3   :  { %24607 = vmatprep.mubr.msk.f32.mxu1 %vm27181_vm1, %v27180_v10  ;;  %24610 = vmatprep.subr.mxu1 %v27180_v10 }
 0x3a4   :  { %24662 = vmatprep.mubr.msk.f32.mxu0 %vm27181_vm1, %v27180_v10  ;;  %24695 = vmatprep.subr.mxu0 %v27180_v10  ;;  %v7078_v25 = vand.u32 4294901760, %v27904_v19 }
 0x3a5   :  { %24608 = vmatmul.mubr.f32.vlgmr.msra.gmra.mrb[10].mxu1 %v4810_v52 }
 0x3a6   :  { %24611 = vmatpush3.xpose.msra.mxu1 %v4821_v54  ;;  %24612 = vmatprep.mubr.msk.f32.mxu1 %vm27181_vm1, %v27180_v10  ;;  %v7079_v27 = vsub.f32 %v27904_v19, %v7078_v25 }
 0x3a7   :  { %24615 = vmatprep.subr.mxu1 %v27180_v10 }
 0x3a8   :  { %v7080_v29 = vand.u32 4294901760, %v7079_v27 }
 0x3a9   :  { %24663 = vmatmul.mubr.f32.vlgmr.msra.gmra.mrb[10].mxu0 %v27720_v17  ;;  %v5717_v17 = vsub.f32 %v27878_v3, %v5716_v11 }
 0x3aa   :  { %24696 = vmatpush3.xpose.msra.mxu0 %v27810_v47  ;;  %24697 = vmatprep.mubr.msk.f32.mxu0 %vm27181_vm1, %v27180_v10 }
 0x3ab   :  { %24700 = vmatprep.subr.mxu0 %v27180_v10  ;;  %v5718_v23 = vand.u32 4294901760, %v5717_v17 }
 0x3ad   :  { %24613 = vmatmul.mubr.f32.vlgmr.msra.gmra.mrb[10].mxu1 %v27783_v37  ;;  %24698 = vmatmul.mubr.f32.vlgmr.msra.gmra.mrb[12].mxu0 %v6172_v58 }
 0x3ae   :  { %24616 = vmatpush3.xpose.msra.mxu1 %v27797_v41  ;;  %24701 = vmatpush3.xpose.msra.mxu0 %v6183_v59 }
 0x3af   :  { %24617 = vmatprep.mubr.msk.f32.mxu1 %vm27181_vm1, %v27180_v10  ;;  %24620 = vmatprep.subr.mxu1 %v27180_v10 }
 0x3b0   :  { %24702 = vmatprep.mubr.msk.f32.mxu0 %vm27181_vm1, %v27180_v10  ;;  %24705 = vmatprep.subr.mxu0 %v27180_v10 }
 0x3b5   :  { %24618 = vmatmul.mubr.f32.vlgmr.msra.gmra.mrb[10].mxu1 %v27794_v40  ;;  %24703 = vmatmul.mubr.f32.vlgmr.msra.gmra.mrb[12].mxu0 %v27804_v45 }
 0x3b6   :  { %24621 = vmatpush3.xpose.msra.mxu1 %v27788_v38  ;;  %24706 = vmatpush3.xpose.msra.mxu0 %v27821_v51 }
 0x3b7   :  { %24622 = vmatprep.mubr.msk.f32.mxu1 %vm27181_vm1, %v27180_v10  ;;  %24625 = vmatprep.subr.mxu1 %v27180_v10 }
 0x3b8   :  { %24707 = vmatprep.mubr.msk.f32.mxu0 %vm27181_vm1, %v27180_v10  ;;  %24710 = vmatprep.subr.mxu0 %v27180_v10 }
 0x3bd   :  { %24623 = vmatmul.mubr.f32.vlgmr.msra.gmra.mrb[10].mxu1 %v4808_v44  ;;  %24708 = vmatmul.mubr.f32.vlgmr.msra.gmra.mrb[12].mxu0 %v27817_v49  ;;  %v7457_v49 = vpop.permute.xlu1 %7456 }
 0x3be   :  { %24626 = vmatpush3.xpose.msra.mxu1 %v4819_v46  ;;  %24711 = vmatpush3.xpose.msra.mxu0 %v27810_v47  ;;  %v7460_v51 = vsel %vm650_vm2, %v7457_v49, 0 }
 0x3bf   :  { %24627 = vmatprep.mubr.msk.f32.mxu1 %vm27181_vm1, %v27180_v10  ;;  %24630 = vmatprep.subr.mxu1 %v27180_v10 }
 0x3c0   :  { %24712 = vmatprep.mubr.msk.f32.mxu0 %vm27181_vm1, %v27180_v10  ;;  %24715 = vmatprep.subr.mxu0 %v27180_v10 }
 0x3c1   :  { %v7459_v50 = vpop.permute.xlu1 %7458 }
 0x3c2   :  { %v7462_v52 = vsel %vm650_vm2, %v7459_v50, 0 }
 0x3c3   :  { %v7465_v54 = vand.u32 4294901760, %v7462_v52 }
 0x3c4   :  { %v27883_v6 = vpop.f32.mrb[0].mxu1 }
 0x3c5   :  { %v24364_v8 = vpop.f32.mrb[1].mxu1  ;;  %24628 = vmatmul.mubr.f32.vlgmr.msra.gmra.mrb[10].mxu1 %v27783_v37  ;;  %24713 = vmatmul.mubr.f32.vlgmr.msra.gmra.mrb[12].mxu0 %v6170_v53  ;;  %v7530_v53 = vand.u32 4294901760, %v7460_v51  ;;  %v7542_v56 = vsub.f32 %v7462_v52, %v7465_v54 }
 0x3c6   :  { %24631 = vmatpush3.xpose.msra.mxu1 %v27788_v38  ;;  %24716 = vmatpush3.xpose.msra.mxu0 %v6181_v55  ;;  %v6634_v38 = vsub.f32 %v6554_v34, %v6557_v36 }
 0x3c7   :  { %24632 = vmatprep.mubr.msk.f32.mxu1 %vm27181_vm1, %v27180_v10  ;;  %24665 = vmatprep.subr.mxu1 %v27180_v10  ;;  %v7531_v55 = vsub.f32 %v7460_v51, %v7530_v53  ;;  %v7543_v60 = vand.u32 4294901760, %v7542_v56 }
 0x3c8   :  { %24717 = vmatprep.mubr.msk.f32.mxu0 %vm27181_vm1, %v27180_v10  ;;  %24720 = vmatprep.subr.mxu0 %v27180_v10  ;;  %v6635_v42 = vand.u32 4294901760, %v6634_v38 }
 0x3c9   :  { %v7532_v59 = vand.u32 4294901760, %v7531_v55  ;;  %v7544_v62 = vsub.f32 %v7542_v56, %v7543_v60 }
 0x3ca   :  { %v6636_v44 = vsub.f32 %v6634_v38, %v6635_v42 }
 0x3cb   :  { %v7533_v61 = vsub.f32 %v7531_v55, %v7532_v59 }
 0x3cc   :  { %v2004_v20 = vpop.f32.mrb[2].mxu0  ;;  %v6637_v48 = vand.u32 4294901760, %v6636_v44 }
 0x3cd   :  { %7912 = vrot.lane.b32.xlu0 %v2004_v20, %s32108_s21  ;;  %v24424_v22 = vpop.f32.mrb[3].mxu0  ;;  %24633 = vmatmul.mubr.f32.vlgmr.msra.gmra.mrb[10].mxu1 %v27783_v37  ;;  %v6623_v37 = vsub.f32 %v6552_v33, %v27953_v35 }
 0x3ce   :  { %24666 = vmatpush3.xpose.msra.mxu1 %v27872_v2  ;;  %24718 = vmatmul.mubr.f32.vlgmr.msra.gmra.mrb[12].mxu0 %v27804_v45 }
 0x3cf   :  { %24721 = vmatpush3.xpose.msra.mxu0 %v27810_v47  ;;  %24667 = vmatprep.mubr.msk.f32.mxu1 %vm27181_vm1, %v27180_v10  ;;  %v6624_v41 = vand.u32 4294901760, %v6623_v37 }
 0x3d0   :  { %24670 = vmatprep.subr.mxu1 %v27180_v10  ;;  %24722 = vmatprep.mubr.msk.f32.mxu0 %vm27181_vm1, %v27180_v10 }
 0x3d1   :  { %24668 = vmatmul.mubr.f32.vlgmr.msra.gmra.mrb[12].mxu1 %v5718_v23  ;;  %24755 = vmatprep.subr.mxu0 %v27180_v10  ;;  %v6625_v43 = vsub.f32 %v6623_v37, %v6624_v41 }
 0x3d2   :  { %24671 = vmatpush3.xpose.msra.mxu1 %v5729_v24  ;;  %24672 = vmatprep.mubr.msk.f32.mxu1 %vm27181_vm1, %v27180_v10 }
 0x3d3   :  { %24675 = vmatprep.subr.mxu1 %v27180_v10  ;;  %v6626_v47 = vand.u32 4294901760, %v6625_v43 }
 0x3d6   :  { %24723 = vmatmul.mubr.f32.vlgmr.msra.gmra.mrb[12].mxu0 %v27804_v45 }
 0x3d7   :  { %24756 = vmatpush3.xpose.msra.mxu0 %v27899_v16  ;;  %24757 = vmatprep.mubr.msk.f32.mxu0 %vm27181_vm1, %v27180_v10 }
 0x3d8   :  { %24760 = vmatprep.subr.mxu0 %v27180_v10 }
 0x3d9   :  { %24673 = vmatmul.mubr.f32.vlgmr.msra.gmra.mrb[12].mxu1 %v27867_v1 }
 0x3da   :  { %24676 = vmatpush3.xpose.msra.mxu1 %v27881_v5  ;;  %24758 = vmatmul.mubr.f32.vlgmr.msra.gmra.mrb[14].mxu0 %v7080_v29 }
 0x3db   :  { %24761 = vmatpush3.xpose.msra.mxu0 %v7091_v30  ;;  %24677 = vmatprep.mubr.msk.f32.mxu1 %vm27181_vm1, %v27180_v10 }
 0x3dc   :  { %24680 = vmatprep.subr.mxu1 %v27180_v10  ;;  %24762 = vmatprep.mubr.msk.f32.mxu0 %vm27181_vm1, %v27180_v10 }
 0x3dd   :  { %24765 = vmatprep.subr.mxu0 %v27180_v10 }
 0x3e1   :  { %24678 = vmatmul.mubr.f32.vlgmr.msra.gmra.mrb[12].mxu1 %v27878_v3 }
 0x3e2   :  { %24681 = vmatpush3.xpose.msra.mxu1 %v27872_v2  ;;  %24763 = vmatmul.mubr.f32.vlgmr.msra.gmra.mrb[14].mxu0 %v27894_v14 }
 0x3e3   :  { %24766 = vmatpush3.xpose.msra.mxu0 %v27907_v21  ;;  %24682 = vmatprep.mubr.msk.f32.mxu1 %vm27181_vm1, %v27180_v10 }
 0x3e4   :  { %24685 = vmatprep.subr.mxu1 %v27180_v10  ;;  %24767 = vmatprep.mubr.msk.f32.mxu0 %vm27181_vm1, %v27180_v10 }
 0x3e5   :  { %24770 = vmatprep.subr.mxu0 %v27180_v10 }
 0x3e9   :  { %24683 = vmatmul.mubr.f32.vlgmr.msra.gmra.mrb[12].mxu1 %v5716_v11 }
 0x3ea   :  { %24686 = vmatpush3.xpose.msra.mxu1 %v5727_v12  ;;  %24768 = vmatmul.mubr.f32.vlgmr.msra.gmra.mrb[14].mxu0 %v27904_v19 }
 0x3eb   :  { %24771 = vmatpush3.xpose.msra.mxu0 %v27899_v16  ;;  %24687 = vmatprep.mubr.msk.f32.mxu1 %vm27181_vm1, %v27180_v10 }
 0x3ec   :  { %24690 = vmatprep.subr.mxu1 %v27180_v10  ;;  %24772 = vmatprep.mubr.msk.f32.mxu0 %vm27181_vm1, %v27180_v10 }
 0x3ed   :  { %24775 = vmatprep.subr.mxu0 %v27180_v10 }
 0x3f0   :  { %v27963_v39 = vpop.f32.mrb[2].mxu1 }
 0x3f1   :  { %v24394_v40 = vpop.f32.mrb[3].mxu1  ;;  %24688 = vmatmul.mubr.f32.vlgmr.msra.gmra.mrb[12].mxu1 %v27867_v1 }
 0x3f2   :  { %24691 = vmatpush3.xpose.msra.mxu1 %v27872_v2  ;;  %24773 = vmatmul.mubr.f32.vlgmr.msra.gmra.mrb[14].mxu0 %v7078_v25  ;;  %v7545_v2 = vand.u32 4294901760, %v7544_v62 }
 0x3f3   :  { %24776 = vmatpush3.xpose.msra.mxu0 %v7089_v26  ;;  %24692 = vmatprep.mubr.msk.f32.mxu1 %vm27181_vm1, %v27180_v10 }
 0x3f4   :  { %24725 = vmatprep.subr.mxu1 %v27180_v10  ;;  %24777 = vmatprep.mubr.msk.f32.mxu0 %vm27181_vm1, %v27180_v10 }
 0x3f5   :  { %24780 = vmatprep.subr.mxu0 %v27180_v10 }
 0x3f8   :  { %v2912_v45 = vpop.f32.mrb[4].mxu0 }
 0x3f9   :  { %7920 = vrot.lane.b32.xlu0 %v2912_v45, %s32106_s3  ;;  %v24484_v46 = vpop.f32.mrb[5].mxu0  ;;  %24693 = vmatmul.mubr.f32.vlgmr.msra.gmra.mrb[12].mxu1 %v27867_v1  ;;  %v7534_v1 = vand.u32 4294901760, %v7533_v61  ;;  %v8016_v61 = vld [vmem:[%s32088_s2 + $0x8] sm:$0xff] }
 0x3fa   :  { %24726 = vmatpush3.xpose.msra.mxu1 %v6557_v36  ;;  %24778 = vmatmul.mubr.f32.vlgmr.msra.gmra.mrb[14].mxu0 %v27894_v14 }
 0x3fb   :  { %24781 = vmatpush3.xpose.msra.mxu0 %v27899_v16  ;;  %24727 = vmatprep.mubr.msk.f32.mxu1 %vm27181_vm1, %v27180_v10 }
 0x3fc   :  { %24730 = vmatprep.subr.mxu1 %v27180_v10  ;;  %24782 = vmatprep.mubr.msk.f32.mxu0 %vm27181_vm1, %v27180_v10 }
 0x3fd   :  { %24728 = vmatmul.mubr.f32.vlgmr.msra.gmra.mrb[14].mxu1 %v6626_v47 }
 0x3fe   :  { %24731 = vmatpush3.xpose.msra.mxu1 %v6637_v48  ;;  %24732 = vmatprep.mubr.msk.f32.mxu1 %vm27181_vm1, %v27180_v10 }
 0x3ff   :  { %24735 = vmatprep.subr.mxu1 %v27180_v10 }
 0x402   :  { %24783 = vmatmul.mubr.f32.vlgmr.msra.gmra.mrb[14].mxu0 %v27894_v14 }
 0x405   :  { %24733 = vmatmul.mubr.f32.vlgmr.msra.gmra.mrb[14].mxu1 %v27953_v35 }
 0x406   :  { %24736 = vmatpush3.xpose.msra.mxu1 %v6634_v38  ;;  %24737 = vmatprep.mubr.msk.f32.mxu1 %vm27181_vm1, %v27180_v10  ;;  %v22835_v38 = vld [vmem:[%s32087_s1] ss:$0 sm:$0xff] }
 0x407   :  { %24740 = vmatprep.subr.mxu1 %v27180_v10 }
 0x40d   :  { %24738 = vmatmul.mubr.f32.vlgmr.msra.gmra.mrb[14].mxu1 %v6623_v37 }
 0x40e   :  { %24741 = vmatpush3.xpose.msra.mxu1 %v6557_v36  ;;  %24742 = vmatprep.mubr.msk.f32.mxu1 %vm27181_vm1, %v27180_v10 }
 0x40f   :  { %24745 = vmatprep.subr.mxu1 %v27180_v10 }
 0x415   :  { %24743 = vmatmul.mubr.f32.vlgmr.msra.gmra.mrb[14].mxu1 %v6624_v41 }
 0x416   :  { %24746 = vmatpush3.xpose.msra.mxu1 %v6635_v42  ;;  %24747 = vmatprep.mubr.msk.f32.mxu1 %vm27181_vm1, %v27180_v10 }
 0x417   :  { %24750 = vmatprep.subr.mxu1 %v27180_v10 }
 0x41c   :  { %v2458_v57 = vpop.f32.mrb[4].mxu1 }
 0x41d   :  { %24748 = vmatmul.mubr.f32.vlgmr.msra.gmra.mrb[14].mxu1 %v27953_v35  ;;  %7914 = vrot.lane.b32.xlu1 %v2458_v57, %s32108_s21  ;;  %v24454_v58 = vpop.f32.mrb[5].mxu1 }
 0x41e   :  { %24751 = vmatpush3.xpose.msra.mxu1 %v6557_v36  ;;  %24752 = vmatprep.mubr.msk.f32.mxu1 %vm27181_vm1, %v27180_v10 }
 0x41f   :  { %24785 = vmatprep.subr.mxu1 %v27180_v10 }
 0x424   :  { %v3820_v63 = vpop.f32.mrb[6].mxu0 }
 0x425   :  { %7928 = vrot.lane.b32.xlu0 %v3820_v63, %s32104_s4  ;;  %v24544_v0 = vpop.f32.mrb[7].mxu0  ;;  %24753 = vmatmul.mubr.f32.vlgmr.msra.gmra.mrb[14].mxu1 %v27953_v35  ;;  %v8033_v63 = vand.u32 4294901760, %v8016_v61 }
 0x426   :  { %24786 = vmatpush3.xpose.msra.mxu1 %v7465_v54  ;;  %24787 = vmatprep.mubr.msk.f32.mxu1 %vm27181_vm1, %v27180_v10 }
 0x427   :  { %24790 = vmatprep.subr.mxu1 %v27180_v10 }
 0x429   :  { %24788 = vmatmul.mubr.f32.vlgmr.msra.gmra.mrb[16].mxu1 %v7534_v1  ;;  %v8017_v1 = vld [vmem:[%s32088_s2 + $0x10] sm:$0xff] }
 0x42a   :  { %24791 = vmatpush3.xpose.msra.mxu1 %v7545_v2  ;;  %24792 = vmatprep.mubr.msk.f32.mxu1 %vm27181_vm1, %v27180_v10  ;;  %v8018_v2 = vld [vmem:[%s32088_s2 + $0x18] sm:$0xff] }
 0x42b   :  { %24795 = vmatprep.subr.mxu1 %v27180_v10 }
 0x431   :  { %24793 = vmatmul.mubr.f32.vlgmr.msra.gmra.mrb[16].mxu1 %v7530_v53 }
 0x432   :  { %24796 = vmatpush3.xpose.msra.mxu1 %v7542_v56  ;;  %24797 = vmatprep.mubr.msk.f32.mxu1 %vm27181_vm1, %v27180_v10 }
 0x433   :  { %24800 = vmatprep.subr.mxu1 %v27180_v10 }
 0x439   :  { %24798 = vmatmul.mubr.f32.vlgmr.msra.gmra.mrb[16].mxu1 %v7531_v55  ;;  %v22836_v55 = vld [vmem:[%s32087_s1 + $0x1] ss:$0 sm:$0xff]  ;;  %s27205_s1 = smov 60  }
 0x43a   :  { %24801 = vmatpush3.xpose.msra.mxu1 %v7465_v54  ;;  %24802 = vmatprep.mubr.msk.f32.mxu1 %vm27181_vm1, %v27180_v10 }
 0x43b   :  { %24805 = vmatprep.subr.mxu1 %v27180_v10 }
 0x43f   :  { %v7913_v27 = vpop.permute.xlu0 %7912 }
 0x440   :  { %v7967_v32 = vsel %vm7966_vm3, %v27883_v6, %v7913_v27 }
 0x441   :  { %24803 = vmatmul.mubr.f32.vlgmr.msra.gmra.mrb[16].mxu1 %v7532_v59 }
 0x442   :  { %24806 = vmatpush3.xpose.msra.mxu1 %v7543_v60  ;;  %24807 = vmatprep.mubr.msk.f32.mxu1 %vm27181_vm1, %v27180_v10  ;;  %v8015_v60 = vld [vmem:[%s32088_s2] sm:$0xff] }
 0x443   :  { %24810 = vmatprep.subr.mxu1 %v27180_v10  ;;  %v8030_v62 = vand.u32 4294901760, %v8015_v60 }
 0x445   :  { %v28072_v0 = vpack.c.bf16 %v8033_v63, %v8030_v62 }
 0x447   :  { %25524 = vmatprep.subr.bf16.mxu0 %v28072_v0 }
 0x448   :  { %v3366_v3 = vpop.f32.mrb[6].mxu1  ;;  %25526 = vmatpush3.bf16.msra.mxu0 %v28072_v0 }
 0x449   :  { %24808 = vmatmul.mubr.f32.vlgmr.msra.gmra.mrb[16].mxu1 %v7530_v53  ;;  %7922 = vrot.lane.b32.xlu1 %v3366_v3, %s32106_s3  ;;  %v24514_v4 = vpop.f32.mrb[7].mxu1  ;;  %v8036_v3 = vand.u32 4294901760, %v8017_v1 }
 0x44a   :  { %24811 = vmatpush3.xpose.msra.mxu1 %v7465_v54  ;;  %24812 = vmatprep.mubr.msk.f32.mxu1 %vm27181_vm1, %v27180_v10  ;;  %v8039_v4 = vand.u32 4294901760, %v8018_v2 }
 0x44b   :  { %24929 = vmatprep.subr.mxu1 %v27180_v10 }
 0x44c   :  { %v8145_v27 = vsub.f32 %v8018_v2, %v8039_v4 }
 0x450   :  { %v4728_v5 = vpop.f32.mrb[8].mxu0 }
 0x451   :  { %7936 = vrot.lane.b32.xlu0 %v4728_v5, %s27200_s24  ;;  %v24604_v7 = vpop.f32.mrb[9].mxu0  ;;  %24813 = vmatmul.mubr.f32.vlgmr.msra.gmra.mrb[16].mxu1 %v7530_v53  ;;  %v28083_v5 = vpack.c.bf16 %v8039_v4, %v8036_v3 }
 0x452   :  { %24931 = vmatprep.mubr.msk.f32.mxu1 %vm27181_vm1, %v27180_v10  ;;  %v8019_v7 = vld [vmem:[%s32088_s2 + $0x20] sm:$0xff] }
 0x453   :  { %25528 = vmatprep.subr.bf16.mxu0 %v28083_v5 }
 0x454   :  { %25530 = vmatpush3.bf16.msra.mxu0 %v28083_v5 }
 0x46b   :  { %v7921_v28 = vpop.permute.xlu0 %7920 }
 0x46c   :  { %v7970_v33 = vsel %vm7969_vm4, %v7967_v32, %v7921_v28 }
 0x474   :  { %v4274_v8 = vpop.f32.mrb[8].mxu1 }
 0x475   :  { %7930 = vrot.lane.b32.xlu1 %v4274_v8, %s32104_s4  ;;  %v24574_v9 = vpop.f32.mrb[9].mxu1  ;;  %v8020_v8 = vld [vmem:[%s32088_s2 + $0x28] sm:$0xff] }
 0x476   :  { %v8042_v9 = vand.u32 4294901760, %v8019_v7 }
 0x47c   :  { %v5636_v11 = vpop.f32.mrb[10].mxu0 }
 0x47d   :  { %7944 = vrot.lane.b32.xlu0 %v5636_v11, %s27201_s25  ;;  %v24664_v12 = vpop.f32.mrb[11].mxu0  ;;  %v8045_v11 = vand.u32 4294901760, %v8020_v8 }
 0x47f   :  { %v28093_v12 = vpack.c.bf16 %v8045_v11, %v8042_v9 }
 0x481   :  { %25532 = vmatprep.subr.bf16.mxu0 %v28093_v12 }
 0x482   :  { %25534 = vmatpush3.bf16.msra.mxu0 %v28093_v12 }
 0x48f   :  { %v7915_v44 = vpop.permute.xlu1 %7914 }
 0x490   :  { %v7968_v49 = vsel %vm7966_vm3, %v27963_v39, %v7915_v44 }
 0x497   :  { %v7929_v29 = vpop.permute.xlu0 %7928 }
 0x498   :  { %v7973_v35 = vsel %vm7972_vm5, %v7970_v33, %v7929_v29 }
 0x4a0   :  { %v5182_v14 = vpop.f32.mrb[10].mxu1 }
 0x4a1   :  { %7938 = vrot.lane.b32.xlu1 %v5182_v14, %s27200_s24  ;;  %v24634_v16 = vpop.f32.mrb[11].mxu1  ;;  %v28095_v14 = vsub.f32 %v8015_v60, %v8030_v62 }
 0x4a2   :  { %v28097_v16 = vsub.f32 %v8016_v61, %v8033_v63 }
 0x4a9   :  { %v6544_v17 = vpop.f32.mrb[12].mxu0 }
 0x4aa   :  { %7952 = vrot.lane.b32.xlu0 %v6544_v17, %s27202_s27  ;;  %v24724_v18 = vpop.f32.mrb[13].mxu0  ;;  %v8021_v17 = vld [vmem:[%s32088_s2 + $0x30] sm:$0xff] }
 0x4ab   :  { %v8022_v18 = vld [vmem:[%s32088_s2 + $0x38] sm:$0xff]  ;;  %s27206_s2 = smov 52  }
 0x4bb   :  { %v7923_v45 = vpop.permute.xlu1 %7922 }
 0x4bc   :  { %v7971_v50 = vsel %vm7969_vm4, %v7968_v49, %v7923_v45 }
 0x4c3   :  { %v7937_v30 = vpop.permute.xlu0 %7936 }
 0x4c4   :  { %v7975_v36 = vsel %vm58_vm0, %v7973_v35, %v7937_v30  ;;  %v8159_v35 = vsub.f32 %v8020_v8, %v8045_v11 }
 0x4cc   :  { %v6090_v19 = vpop.f32.mrb[12].mxu1 }
 0x4cd   :  { %7946 = vrot.lane.b32.xlu1 %v6090_v19, %s27201_s25  ;;  %v24694_v20 = vpop.f32.mrb[13].mxu1  ;;  %v8048_v19 = vand.u32 4294901760, %v8021_v17 }
 0x4ce   :  { %v8051_v20 = vand.u32 4294901760, %v8022_v18 }
 0x4cf   :  { %v8166_v44 = vsub.f32 %v8021_v17, %v8048_v19 }
 0x4d0   :  { %v8173_v45 = vsub.f32 %v8022_v18, %v8051_v20 }
 0x4d1   :  { %v8167_v49 = vand.u32 4294901760, %v8166_v44 }
 0x4d2   :  { %v25567_v63 = vpack.c.bf16 %v8173_v45, %v8166_v44 }
 0x4d5   :  { %v7452_v21 = vpop.f32.mrb[14].mxu0 }
 0x4d6   :  { %7960 = vrot.lane.b32.xlu0 %v7452_v21, %s27203_s28  ;;  %v24784_v22 = vpop.f32.mrb[15].mxu0  ;;  %v8125_v21 = vand.u32 4294901760, %v28095_v14 }
 0x4d7   :  { %v8132_v22 = vand.u32 4294901760, %v28097_v16 }
 0x4e7   :  { %v7931_v46 = vpop.permute.xlu1 %7930 }
 0x4e8   :  { %v7974_v52 = vsel %vm7972_vm5, %v7971_v50, %v7931_v46  ;;  %v8174_v50 = vand.u32 4294901760, %v8173_v45 }
 0x4ea   :  { %v25599_v18 = vpack.c.bf16 %v8174_v50, %v8167_v49 }
 0x4ef   :  { %v7945_v31 = vpop.permute.xlu0 %7944 }
 0x4f0   :  { %v7978_v37 = vsel %vm7977_vm6, %v7975_v36, %v7945_v31  ;;  %v8146_v31 = vand.u32 4294901760, %v8145_v27 }
 0x4f2   :  { %v8147_v36 = vsub.f32 %v8145_v27, %v8146_v31 }
 0x4f8   :  { %v6998_v23 = vpop.f32.mrb[14].mxu1 }
 0x4f9   :  { %7954 = vrot.lane.b32.xlu1 %v6998_v23, %s27202_s27  ;;  %v24754_v24 = vpop.f32.mrb[15].mxu1  ;;  %v28109_v23 = vpack.c.bf16 %v8051_v20, %v8048_v19 }
 0x4fa   :  { %v8126_v24 = vsub.f32 %v28095_v14, %v8125_v21 }
 0x4fb   :  { %25536 = vmatprep.subr.bf16.mxu0 %v28109_v23 }
 0x4fc   :  { %v8127_v28 = vand.u32 4294901760, %v8126_v24  ;;  %25538 = vmatpush3.bf16.msra.mxu0 %v28109_v23 }
 0x513   :  { %v7939_v47 = vpop.permute.xlu1 %7938 }
 0x514   :  { %v7976_v53 = vsel %vm58_vm0, %v7974_v52, %v7939_v47  ;;  %v8168_v52 = vsub.f32 %v8166_v44, %v8167_v49 }
 0x51c   :  { %v7953_v34 = vpop.permute.xlu0 %7952 }
 0x51d   :  { %v7981_v40 = vsel %vm7980_vm7, %v7978_v37, %v7953_v34  ;;  %v8152_v34 = vsub.f32 %v8019_v7, %v8042_v9 }
 0x524   :  { %v7906_v25 = vpop.f32.mrb[16].mxu1 }
 0x525   :  { %7962 = vrot.lane.b32.xlu1 %v7906_v25, %s27203_s28  ;;  %v24814_v26 = vpop.f32.mrb[17].mxu1  ;;  %v8133_v25 = vsub.f32 %v28097_v16, %v8132_v22 }
 0x526   :  { %v8138_v26 = vsub.f32 %v8017_v1, %v8036_v3 }
 0x527   :  { %v8134_v29 = vand.u32 4294901760, %v8133_v25 }
 0x528   :  { %v8139_v30 = vand.u32 4294901760, %v8138_v26 }
 0x529   :  { %v25539_v32 = vpack.c.bf16 %v8134_v29, %v8127_v28 }
 0x52a   :  { %v8140_v33 = vsub.f32 %v8138_v26, %v8139_v30 }
 0x52b   :  { %25540 = vmatprep.subr.bf16.mxu0 %v25539_v32 }
 0x52c   :  { %v8141_v37 = vand.u32 4294901760, %v8140_v33 }
 0x53f   :  { %v7947_v48 = vpop.permute.xlu1 %7946 }
 0x540   :  { %v7979_v54 = vsel %vm7977_vm6, %v7976_v53, %v7947_v48  ;;  %v8175_v53 = vsub.f32 %v8173_v45, %v8174_v50 }
 0x548   :  { %v7961_v41 = vpop.permute.xlu0 %7960 }
 0x549   :  { %v7984_v6 = vsel %vm7983_vm8, %v7981_v40, %v7961_v41  ;;  %v8160_v40 = vand.u32 4294901760, %v8159_v35  ;;  %v8148_v41 = vand.u32 4294901760, %v8147_v36 }
 0x54a   :  { %v28044_v42 = vadd.f32 %v22835_v38, %v7984_v6  ;;  %v8153_v38 = vand.u32 4294901760, %v8152_v34 }
 0x54b   :  { %v25543_v46 = vpack.c.bf16 %v8148_v41, %v8141_v37 }
 0x54c   :  { %v8003_v43 = vsel %vm8002_vm9, %v28044_v42, -inf  ;;  %v8154_v6 = vsub.f32 %v8152_v34, %v8153_v38  ;;  %v25595_v17 = vpack.c.bf16 %v8160_v40, %v8153_v38 }
 0x54d   :  { %8004 = vmax.xlane.f32.xlu0 %v8003_v43  ;;  %v8161_v43 = vsub.f32 %v8159_v35, %v8160_v40 }
 0x54e   :  { %v8155_v47 = vand.u32 4294901760, %v8154_v6 }
 0x54f   :  { %v8162_v48 = vand.u32 4294901760, %v8161_v43 }
 0x563   :  { %8615 = vrot.lane.b32.xlu0 %v27358_v15, %s27204_s19 }
 0x56b   :  { %v7955_v51 = vpop.permute.xlu1 %7954 }
 0x56c   :  { %v7982_v56 = vsel %vm7980_vm7, %v7979_v54, %v7955_v51  ;;  %v25547_v51 = vpack.c.bf16 %v8162_v48, %v8155_v47  ;;  %v8169_v54 = vand.u32 4294901760, %v8168_v52 }
 0x597   :  { %v7963_v57 = vpop.permute.xlu1 %7962 }
 0x598   :  { %v7985_v58 = vsel %vm7983_vm8, %v7982_v56, %v7963_v57  ;;  %v25555_v57 = vpack.c.bf16 %v28097_v16, %v28095_v14  ;;  %v25587_v14 = vpack.c.bf16 %v8132_v22, %v8125_v21  ;;  %v25591_v16 = vpack.c.bf16 %v8146_v31, %v8139_v30 }
 0x599   :  { %v28060_v59 = vadd.f32 %v22836_v55, %v7985_v58  ;;  %v8176_v55 = vand.u32 4294901760, %v8175_v53  ;;  %v25559_v58 = vpack.c.bf16 %v8145_v27, %v8138_v26 }
 0x59b   :  { %v8006_v39 = vsel %vm8002_vm9, %v28060_v59, -inf  ;;  %v25551_v56 = vpack.c.bf16 %v8176_v55, %v8169_v54 }
 0x59c   :  { %8007 = vmax.xlane.f32.xlu1 %v8006_v39  ;;  %v25563_v39 = vpack.c.bf16 %v8159_v35, %v8152_v34 }
 0x5ad   :  { %9067 = vrot.lane.b32.xlu1 %v27356_v13, %s27204_s19 }
 0x5b1   :  { %9521 = vrot.lane.b32.xlu1 %v27358_v15, %s27205_s1 }
 0x5b5   :  { %9974 = vrot.lane.b32.xlu1 %v27356_v13, %s27205_s1 }
 0x5da   :  { %v8005_v60 = vpop.xlane.xlu0 %8004 }
 0x5db   :  { %v8009_v61 = vsub.f32 %v28044_v42, %v8005_v60 }
 0x5dd   :  { %v8011_v62 = vmul.f32 1.442695, %v8009_v61 }
 0x5de   :  { %v28118_v1 = vpop.permute.xlu0 %8615 }
 0x5df   :  { %27117 = vpow2.f32 %v8011_v62  ;;  %v28121_v2 = vand.u32 4294901760, %v28118_v1 }
 0x5e1   :  { %24930 = vmatpush3.msra.mxu1 %v28121_v2 }
 0x5e2   :  { %24934 = vmatprep.subr.mxu1 %v27180_v10 }
 0x5e9   :  { %v28125_v3 = vpop.eup %27117 }
 0x5ea   :  { %v8024_v4 = vsel %vm8002_vm9, %v28125_v3, 0 }
 0x5eb   :  { %v8102_v7 = vand.u32 4294901760, %v8024_v4 }
 0x5ed   :  { %v8103_v8 = vsub.f32 %v8024_v4, %v8102_v7 }
 0x5ef   :  { %v8104_v42 = vand.u32 4294901760, %v8103_v8 }
 0x5f1   :  { %v8105_v9 = vsub.f32 %v8103_v8, %v8104_v42 }
 0x5f3   :  { %v8106_v11 = vand.u32 4294901760, %v8105_v9 }
 0x5f5   :  { %24831 = vmatprep.mubr.f32.mxu0 %v8106_v11 }
 0x629   :  { %v8008_v19 = vpop.xlane.xlu1 %8007 }
 0x62a   :  { %v8010_v20 = vsub.f32 %v28060_v59, %v8008_v19 }
 0x62c   :  { %v8013_v24 = vmul.f32 1.442695, %v8010_v20 }
 0x62d   :  { %v9068_v43 = vpop.permute.xlu1 %9067 }
 0x62e   :  { %27119 = vpow2.f32 %v8013_v24  ;;  %v9074_v45 = vand.u32 4294901760, %v9068_v43 }
 0x630   :  { %v9151_v47 = vsub.f32 %v9068_v43, %v9074_v45 }
 0x632   :  { %v9152_v49 = vand.u32 4294901760, %v9151_v47 }
 0x638   :  { %v28130_v25 = vpop.eup %27119 }
 0x639   :  { %v8027_v26 = vsel %vm8002_vm9, %v28130_v25, 0 }
 0x63a   :  { %v8112_v27 = vand.u32 4294901760, %v8027_v26 }
 0x63c   :  { %v8113_v28 = vsub.f32 %v8027_v26, %v8112_v27 }
 0x63e   :  { %v8114_v29 = vand.u32 4294901760, %v8113_v28 }
 0x640   :  { %v8115_v33 = vsub.f32 %v8113_v28, %v8114_v29 }
 0x642   :  { %v8116_v34 = vand.u32 4294901760, %v8115_v33 }
 0x644   :  { %24832 = vmatmul.mubr.f32.vlgmr.msra.gmra.mrb[16].mxu0 %v8116_v34 }
 0x645   :  { %25542 = vmatpush3.bf16.msra.mxu0 %v25539_v32  ;;  %24850 = vmatprep.mubr.f32.mxu0 %v8102_v7 }
 0x646   :  { %25544 = vmatprep.subr.bf16.mxu0 %v25543_v46 }
 0x649   :  { %25546 = vmatpush3.bf16.msra.mxu0 %v25543_v46 }
 0x64a   :  { %25548 = vmatprep.subr.bf16.mxu0 %v25547_v51 }
 0x64d   :  { %25550 = vmatpush3.bf16.msra.mxu0 %v25547_v51  ;;  %v9153_v51 = vsub.f32 %v9151_v47, %v9152_v49 }
 0x64e   :  { %25552 = vmatprep.subr.bf16.mxu0 %v25551_v56 }
 0x64f   :  { %v9154_v52 = vand.u32 4294901760, %v9153_v51 }
 0x651   :  { %25554 = vmatpush3.bf16.msra.mxu0 %v25551_v56 }
 0x652   :  { %25556 = vmatprep.subr.bf16.mxu0 %v25555_v57 }
 0x654   :  { %24851 = vmatmul.mubr.f32.vlgmr.msra.gmra.mrb[16].mxu0 %v8112_v27 }
 0x655   :  { %25558 = vmatpush3.bf16.msra.mxu0 %v25555_v57  ;;  %24869 = vmatprep.mubr.f32.mxu0 %v8103_v8 }
 0x656   :  { %25560 = vmatprep.subr.bf16.mxu0 %v25559_v58 }
 0x659   :  { %25562 = vmatpush3.bf16.msra.mxu0 %v25559_v58 }
 0x65a   :  { %25564 = vmatprep.subr.bf16.mxu0 %v25563_v39 }
 0x65d   :  { %25566 = vmatpush3.bf16.msra.mxu0 %v25563_v39 }
 0x65e   :  { %25568 = vmatprep.subr.bf16.mxu0 %v25567_v63 }
 0x661   :  { %25570 = vmatpush3.bf16.msra.mxu0 %v25567_v63 }
 0x662   :  { %25572 = vmatprep.subr.bf16.mxu0 %v28072_v0 }
 0x664   :  { %24870 = vmatmul.mubr.f32.vlgmr.msra.gmra.mrb[16].mxu0 %v8113_v28 }
 0x665   :  { %25574 = vmatpush3.bf16.msra.mxu0 %v28072_v0  ;;  %24888 = vmatprep.mubr.f32.mxu0 %v8104_v42 }
 0x666   :  { %25576 = vmatprep.subr.bf16.mxu0 %v28083_v5 }
 0x669   :  { %25578 = vmatpush3.bf16.msra.mxu0 %v28083_v5 }
 0x66a   :  { %25580 = vmatprep.subr.bf16.mxu0 %v28093_v12 }
 0x66d   :  { %25582 = vmatpush3.bf16.msra.mxu0 %v28093_v12 }
 0x66e   :  { %25584 = vmatprep.subr.bf16.mxu0 %v28109_v23 }
 0x671   :  { %25586 = vmatpush3.bf16.msra.mxu0 %v28109_v23 }
 0x672   :  { %25588 = vmatprep.subr.bf16.mxu0 %v25587_v14 }
 0x674   :  { %24889 = vmatmul.mubr.f32.vlgmr.msra.gmra.mrb[16].mxu0 %v8114_v29 }
 0x675   :  { %25590 = vmatpush3.bf16.msra.mxu0 %v25587_v14  ;;  %24907 = vmatprep.mubr.f32.mxu0 %v8102_v7 }
 0x676   :  { %25592 = vmatprep.subr.bf16.mxu0 %v25591_v16 }
 0x679   :  { %25594 = vmatpush3.bf16.msra.mxu0 %v25591_v16 }
 0x67a   :  { %25596 = vmatprep.subr.bf16.mxu0 %v25595_v17 }
 0x67d   :  { %25598 = vmatpush3.bf16.msra.mxu0 %v25595_v17 }
 0x67e   :  { %25600 = vmatprep.subr.bf16.mxu0 %v25599_v18 }
 0x681   :  { %25602 = vmatpush3.bf16.msra.mxu0 %v25599_v18 }
 0x682   :  { %25604 = vmatprep.subr.bf16.mxu0 %v28072_v0 }
 0x684   :  { %24908 = vmatmul.mubr.f32.vlgmr.msra.gmra.mrb[16].mxu0 %v8112_v27 }
 0x685   :  { %25606 = vmatpush3.bf16.msra.mxu0 %v28072_v0  ;;  %24926 = vmatprep.mubr.f32.mxu0 %v8102_v7 }
 0x686   :  { %25608 = vmatprep.subr.bf16.mxu0 %v28083_v5 }
 0x689   :  { %25610 = vmatpush3.bf16.msra.mxu0 %v28083_v5 }
 0x68a   :  { %25612 = vmatprep.subr.bf16.mxu0 %v28093_v12 }
 0x68d   :  { %25614 = vmatpush3.bf16.msra.mxu0 %v28093_v12  ;;  %v8699_v12 = vsub.f32 %v28118_v1, %v28121_v2 }
 0x68e   :  { %25616 = vmatprep.subr.bf16.mxu0 %v28109_v23 }
 0x68f   :  { %v8700_v32 = vand.u32 4294901760, %v8699_v12 }
 0x691   :  { %25618 = vmatpush3.bf16.msra.mxu0 %v28109_v23  ;;  %v8701_v37 = vsub.f32 %v8699_v12, %v8700_v32 }
 0x692   :  { %25049 = vmatprep.subr.mxu0 %v27180_v10 }
 0x693   :  { %v8702_v41 = vand.u32 4294901760, %v8701_v37 }
 0x694   :  { %24927 = vmatmul.mubr.f32.vlgmr.msra.gmra.mrb[16].mxu0 %v8112_v27 }
 0x695   :  { %25051 = vmatprep.mubr.msk.f32.mxu0 %vm27181_vm1, %v27180_v10 }
 0x767   :  { %v24928_v59 = vpop.f32.mrb[16].mxu0 }
 0x768   :  { %27121 = vrcp.f32 %v24928_v59  ;;  %v8599_v0 = vpop.f32.mrb[17].mxu0 }
 0x769   :  { %27123 = vrcp.f32 %v8599_v0 }
 0x772   :  { %v27122_v21 = vpop.eup %27121 }
 0x773   :  { %v27124_v5 = vpop.eup %27123  ;;  %v8612_v22 = vmul.f32 %v27122_v21, %v28130_v25 }
 0x774   :  { %v28157_v30 = vmul.f32 %v27124_v5, %v28125_v3 }
 0x775   :  { %8614 = vst.msk [vmem:[#allocation4 + $0x8] sm:$0xff] %vm8002_vm9, %v8612_v22  ;;  %10878 = vrot.lane.b32.xlu1 %v8612_v22, %s27189_s29  ;;  %v9071_v6 = vsel %vm7966_vm3, %v8612_v22, 0 }
 0x776   :  { %8613 = vst.msk [vmem:[#allocation4] sm:$0xff] %vm8002_vm9, %v28157_v30  ;;  %9519 = vrot.lane.b32.xlu0 %v28157_v30, %s27185_s6  ;;  %v8619_v23 = vsel %vm7966_vm3, %v28157_v30, 0  ;;  %v9139_v44 = vand.u32 4294901760, %v9071_v6 }
 0x777   :  { %v28167_v31 = vand.u32 4294901760, %v8619_v23 }
 0x778   :  { %v9140_v46 = vsub.f32 %v9071_v6, %v9139_v44 }
 0x779   :  { %10880 = vrot.lane.b32.xlu1 %v27356_v13, %s27203_s28  ;;  %v8688_v35 = vsub.f32 %v8619_v23, %v28167_v31 }
 0x77a   :  { %9972 = vrot.lane.b32.xlu0 %v8612_v22, %s27185_s6  ;;  %s27207_s6 = smov 44   ;;  %v9141_v48 = vand.u32 4294901760, %v9140_v46 }
 0x77b   :  { %v8689_v36 = vand.u32 4294901760, %v8688_v35 }
 0x77c   :  { %v9142_v50 = vsub.f32 %v9140_v46, %v9141_v48 }
 0x77d   :  { %11784 = vrot.lane.b32.xlu1 %v8612_v22, %s27193_s18  ;;  %v8690_v38 = vsub.f32 %v8688_v35, %v8689_v36 }
 0x77e   :  { %10425 = vrot.lane.b32.xlu0 %v28157_v30, %s27189_s29  ;;  %s32351_s29 = smov 8  }
 0x77f   :  { %v8691_v40 = vand.u32 4294901760, %v8690_v38 }
 0x781   :  { %11786 = vrot.lane.b32.xlu1 %v27356_v13, %s27206_s2  ;;  %24932 = vmatmul.mubr.f32.vlgmr.msra.gmra.mrb[18].mxu1 %v8691_v40 }
 0x782   :  { %24935 = vmatpush3.msra.mxu1 %v8702_v41  ;;  %10427 = vrot.lane.b32.xlu0 %v27358_v15, %s27203_s28 }
 0x783   :  { %24936 = vmatprep.mubr.msk.f32.mxu1 %vm27181_vm1, %v27180_v10  ;;  %24939 = vmatprep.subr.mxu1 %v27180_v10 }
 0x785   :  { %12690 = vrot.lane.b32.xlu1 %v8612_v22, %s27182_s22 }
 0x786   :  { %11331 = vrot.lane.b32.xlu0 %v28157_v30, %s27193_s18  ;;  %s32352_s18 = smov 16  }
 0x789   :  { %12692 = vrot.lane.b32.xlu1 %v27356_v13, %s27202_s27  ;;  %24937 = vmatmul.mubr.f32.vlgmr.msra.gmra.mrb[18].mxu1 %v28167_v31 }
 0x78a   :  { %24940 = vmatpush3.msra.mxu1 %v8699_v12  ;;  %11333 = vrot.lane.b32.xlu0 %v27358_v15, %s27206_s2 }
 0x78b   :  { %24941 = vmatprep.mubr.msk.f32.mxu1 %vm27181_vm1, %v27180_v10  ;;  %24944 = vmatprep.subr.mxu1 %v27180_v10 }
 0x78d   :  { %13596 = vrot.lane.b32.xlu1 %v8612_v22, %s27186_s26 }
 0x78e   :  { %12237 = vrot.lane.b32.xlu0 %v28157_v30, %s27182_s22  ;;  %s27208_s22 = smov 36  }
 0x791   :  { %13598 = vrot.lane.b32.xlu1 %v27356_v13, %s27207_s6  ;;  %24942 = vmatmul.mubr.f32.vlgmr.msra.gmra.mrb[18].mxu1 %v8688_v35 }
 0x792   :  { %24945 = vmatpush3.msra.mxu1 %v28121_v2  ;;  %12239 = vrot.lane.b32.xlu0 %v27358_v15, %s27202_s27  ;;  %s27212_s27 = smov 28  }
 0x793   :  { %24946 = vmatprep.mubr.msk.f32.mxu1 %vm27181_vm1, %v27180_v10  ;;  %24949 = vmatprep.subr.mxu1 %v27180_v10 }
 0x795   :  { %14502 = vrot.lane.b32.xlu1 %v8612_v22, %s27190_s30 }
 0x796   :  { %13143 = vrot.lane.b32.xlu0 %v28157_v30, %s27186_s26  ;;  %s27209_s26 = smov 4  }
 0x799   :  { %14504 = vrot.lane.b32.xlu1 %v27356_v13, %s27201_s25  ;;  %24947 = vmatmul.mubr.f32.vlgmr.msra.gmra.mrb[18].mxu1 %v8689_v36 }
 0x79a   :  { %24950 = vmatpush3.msra.mxu1 %v8700_v32  ;;  %13145 = vrot.lane.b32.xlu0 %v27358_v15, %s27207_s6 }
 0x79b   :  { %24951 = vmatprep.mubr.msk.f32.mxu1 %vm27181_vm1, %v27180_v10  ;;  %24954 = vmatprep.subr.mxu1 %v27180_v10 }
 0x79d   :  { %15408 = vrot.lane.b32.xlu1 %v8612_v22, %s27194_s5 }
 0x79e   :  { %14049 = vrot.lane.b32.xlu0 %v28157_v30, %s27190_s30  ;;  %s27210_s30 = smov 12  }
 0x7a1   :  { %15410 = vrot.lane.b32.xlu1 %v27356_v13, %s27208_s22  ;;  %24952 = vmatmul.mubr.f32.vlgmr.msra.gmra.mrb[18].mxu1 %v28167_v31  ;;  %v9143_v13 = vand.u32 4294901760, %v9142_v50 }
 0x7a2   :  { %24955 = vmatpush3.msra.mxu1 %v28121_v2  ;;  %14051 = vrot.lane.b32.xlu0 %v27358_v15, %s27201_s25  ;;  %s32353_s25 = smov 24  }
 0x7a3   :  { %24956 = vmatprep.mubr.msk.f32.mxu1 %vm27181_vm1, %v27180_v10  ;;  %24959 = vmatprep.subr.mxu1 %v27180_v10 }
 0x7a6   :  { %14955 = vrot.lane.b32.xlu0 %v28157_v30, %s27194_s5  ;;  %s27211_s5 = smov 20  }
 0x7a9   :  { %24957 = vmatmul.mubr.f32.vlgmr.msra.gmra.mrb[18].mxu1 %v28167_v31 }
 0x7aa   :  { %24960 = vmatpush3.msra.mxu1 %v9074_v45  ;;  %14957 = vrot.lane.b32.xlu0 %v27358_v15, %s27208_s22  ;;  %v9522_v15 = vpop.permute.xlu1 %9521 }
 0x7ab   :  { %24961 = vmatprep.mubr.msk.f32.mxu1 %vm27181_vm1, %v27180_v10  ;;  %24964 = vmatprep.subr.mxu1 %v27180_v10  ;;  %v28245_v53 = vand.u32 4294901760, %v9522_v15 }
 0x7ad   :  { %24962 = vmatmul.mubr.f32.vlgmr.msra.gmra.mrb[20].mxu1 %v9143_v13  ;;  %v9604_v54 = vsub.f32 %v9522_v15, %v28245_v53 }
 0x7ae   :  { %24965 = vmatpush3.msra.mxu1 %v9154_v52  ;;  %24966 = vmatprep.mubr.msk.f32.mxu1 %vm27181_vm1, %v27180_v10  ;;  %v9975_v25 = vpop.permute.xlu1 %9974 }
 0x7af   :  { %24969 = vmatprep.subr.mxu1 %v27180_v10  ;;  %v9605_v58 = vand.u32 4294901760, %v9604_v54  ;;  %v28290_v28 = vand.u32 4294901760, %v9975_v25 }
 0x7b1   :  { %v9606_v62 = vsub.f32 %v9604_v54, %v9605_v58  ;;  %v28299_v33 = vsub.f32 %v9975_v25, %v28290_v28 }
 0x7b3   :  { %v9607_v7 = vand.u32 4294901760, %v9606_v62  ;;  %v10058_v5 = vand.u32 4294901760, %v28299_v33 }
 0x7b5   :  { %24967 = vmatmul.mubr.f32.vlgmr.msra.gmra.mrb[20].mxu1 %v9139_v44  ;;  %v10059_v23 = vsub.f32 %v28299_v33, %v10058_v5 }
 0x7b6   :  { %24970 = vmatpush3.msra.mxu1 %v9151_v47  ;;  %24971 = vmatprep.mubr.msk.f32.mxu1 %vm27181_vm1, %v27180_v10 }
 0x7b7   :  { %24974 = vmatprep.subr.mxu1 %v27180_v10  ;;  %v10060_v36 = vand.u32 4294901760, %v10059_v23 }
 0x7bd   :  { %24972 = vmatmul.mubr.f32.vlgmr.msra.gmra.mrb[20].mxu1 %v9140_v46 }
 0x7be   :  { %24975 = vmatpush3.msra.mxu1 %v9074_v45  ;;  %24976 = vmatprep.mubr.msk.f32.mxu1 %vm27181_vm1, %v27180_v10 }
 0x7bf   :  { %24979 = vmatprep.subr.mxu1 %v27180_v10 }
 0x7c5   :  { %24977 = vmatmul.mubr.f32.vlgmr.msra.gmra.mrb[20].mxu1 %v9141_v48 }
 0x7c6   :  { %24980 = vmatpush3.msra.mxu1 %v9152_v49  ;;  %24981 = vmatprep.mubr.msk.f32.mxu1 %vm27181_vm1, %v27180_v10 }
 0x7c7   :  { %24984 = vmatprep.subr.mxu1 %v27180_v10 }
 0x7cd   :  { %24982 = vmatmul.mubr.f32.vlgmr.msra.gmra.mrb[20].mxu1 %v9139_v44 }
 0x7ce   :  { %24985 = vmatpush3.msra.mxu1 %v9074_v45  ;;  %24986 = vmatprep.mubr.msk.f32.mxu1 %vm27181_vm1, %v27180_v10 }
 0x7cf   :  { %24989 = vmatprep.subr.mxu1 %v27180_v10 }
 0x7d5   :  { %24987 = vmatmul.mubr.f32.vlgmr.msra.gmra.mrb[20].mxu1 %v9139_v44 }
 0x7d6   :  { %24990 = vmatpush3.msra.mxu1 %v28245_v53  ;;  %24991 = vmatprep.mubr.msk.f32.mxu1 %vm27181_vm1, %v27180_v10 }
 0x7d7   :  { %24994 = vmatprep.subr.mxu1 %v27180_v10 }
 0x7e7   :  { %v10879_v43 = vpop.permute.xlu1 %10878 }
 0x7e8   :  { %v9520_v55 = vpop.permute.xlu0 %9519  ;;  %v10883_v44 = vsel %vm7966_vm3, %v10879_v43, 0 }
 0x7e9   :  { %v9524_v56 = vsel %vm7966_vm3, %v9520_v55, 0  ;;  %v28357_v46 = vand.u32 4294901760, %v10883_v44 }
 0x7ea   :  { %v28253_v57 = vand.u32 4294901760, %v9524_v56 }
 0x7eb   :  { %v10881_v45 = vpop.permute.xlu1 %10880  ;;  %v28368_v49 = vsub.f32 %v10883_v44, %v28357_v46 }
 0x7ec   :  { %v9593_v39 = vsub.f32 %v9524_v56, %v28253_v57  ;;  %v9973_v60 = vpop.permute.xlu0 %9972  ;;  %v28362_v48 = vand.u32 4294901760, %v10881_v45 }
 0x7ed   :  { %v9977_v24 = vsel %vm7966_vm3, %v9973_v60, 0  ;;  %v10953_v52 = vand.u32 4294901760, %v28368_v49 }
 0x7ee   :  { %v9594_v61 = vand.u32 4294901760, %v9593_v39  ;;  %v28285_v26 = vand.u32 4294901760, %v9977_v24  ;;  %v28371_v50 = vsub.f32 %v10881_v45, %v28362_v48 }
 0x7ef   :  { %v10954_v55 = vsub.f32 %v28368_v49, %v10953_v52 }
 0x7f0   :  { %v9595_v63 = vsub.f32 %v9593_v39, %v9594_v61  ;;  %v10426_v1 = vpop.permute.xlu0 %10425  ;;  %v28296_v29 = vsub.f32 %v9977_v24, %v28285_v26 }
 0x7f1   :  { %v10430_v2 = vsel %vm7966_vm3, %v10426_v1, 0 }
 0x7f2   :  { %v9596_v3 = vand.u32 4294901760, %v9595_v63  ;;  %v28257_v4 = vand.u32 4294901760, %v10430_v2  ;;  %v10047_v0 = vand.u32 4294901760, %v28296_v29 }
 0x7f4   :  { %v10499_v8 = vsub.f32 %v10430_v2, %v28257_v4  ;;  %v10428_v42 = vpop.permute.xlu0 %10427  ;;  %24992 = vmatmul.mubr.f32.vlgmr.msra.gmra.mrb[22].mxu1 %v9596_v3  ;;  %v10048_v12 = vsub.f32 %v28296_v29, %v10047_v0 }
 0x7f5   :  { %v28260_v9 = vand.u32 4294901760, %v10428_v42  ;;  %24995 = vmatpush3.msra.mxu1 %v9607_v7  ;;  %24996 = vmatprep.mubr.msk.f32.mxu1 %vm27181_vm1, %v27180_v10 }
 0x7f6   :  { %v10500_v11 = vand.u32 4294901760, %v10499_v8  ;;  %24999 = vmatprep.subr.mxu1 %v27180_v10  ;;  %v10049_v32 = vand.u32 4294901760, %v10048_v12 }
 0x7f7   :  { %v10510_v14 = vsub.f32 %v10428_v42, %v28260_v9  ;;  %25050 = vmatpush3.msra.mxu0 %v28260_v9 }
 0x7f8   :  { %v10501_v16 = vsub.f32 %v10499_v8, %v10500_v11  ;;  %25054 = vmatprep.subr.mxu0 %v27180_v10  ;;  %v11332_v27 = vpop.permute.xlu0 %11331 }
 0x7f9   :  { %v10511_v17 = vand.u32 4294901760, %v10510_v14  ;;  %v11336_v34 = vsel %vm7966_vm3, %v11332_v27, 0 }
 0x7fa   :  { %v10502_v18 = vand.u32 4294901760, %v10501_v16  ;;  %v28305_v21 = vand.u32 4294901760, %v11336_v34 }
 0x7fb   :  { %v10512_v19 = vsub.f32 %v10510_v14, %v10511_v17 }
 0x7fc   :  { %25052 = vmatmul.mubr.f32.vlgmr.msra.gmra.mrb[18].mxu0 %v10502_v18  ;;  %24997 = vmatmul.mubr.f32.vlgmr.msra.gmra.mrb[22].mxu1 %v28253_v57  ;;  %v11334_v59 = vpop.permute.xlu0 %11333  ;;  %v11405_v30 = vsub.f32 %v11336_v34, %v28305_v21 }
 0x7fd   :  { %v10513_v20 = vand.u32 4294901760, %v10512_v19  ;;  %25000 = vmatpush3.msra.mxu1 %v9604_v54  ;;  %25001 = vmatprep.mubr.msk.f32.mxu1 %vm27181_vm1, %v27180_v10  ;;  %v28311_v22 = vand.u32 4294901760, %v11334_v59 }
 0x7fe   :  { %25004 = vmatprep.subr.mxu1 %v27180_v10  ;;  %25056 = vmatprep.mubr.msk.f32.mxu0 %vm27181_vm1, %v27180_v10  ;;  %v11406_v35 = vand.u32 4294901760, %v11405_v30 }
 0x7ff   :  { %25055 = vmatpush3.msra.mxu0 %v10513_v20  ;;  %v11416_v31 = vsub.f32 %v11334_v59, %v28311_v22 }
 0x800   :  { %25059 = vmatprep.subr.mxu0 %v27180_v10  ;;  %v11407_v38 = vsub.f32 %v11405_v30, %v11406_v35  ;;  %v12238_v47 = vpop.permute.xlu0 %12237 }
 0x801   :  { %v11417_v37 = vand.u32 4294901760, %v11416_v31  ;;  %v12242_v51 = vsel %vm7966_vm3, %v12238_v47, 0 }
 0x802   :  { %v11408_v41 = vand.u32 4294901760, %v11407_v38  ;;  %v28377_v15 = vand.u32 4294901760, %v12242_v51 }
 0x803   :  { %v11418_v40 = vsub.f32 %v11416_v31, %v11417_v37 }
 0x804   :  { %25057 = vmatmul.mubr.f32.vlgmr.msra.gmra.mrb[18].mxu0 %v28257_v4  ;;  %25002 = vmatmul.mubr.f32.vlgmr.msra.gmra.mrb[22].mxu1 %v9593_v39  ;;  %v12240_v13 = vpop.permute.xlu0 %12239  ;;  %v12311_v56 = vsub.f32 %v12242_v51, %v28377_v15  ;;  %v10955_v39 = vand.u32 4294901760, %v10954_v55 }
 0x805   :  { %25060 = vmatpush3.msra.mxu0 %v10510_v14  ;;  %25005 = vmatpush3.msra.mxu1 %v28245_v53  ;;  %v11419_v6 = vand.u32 4294901760, %v11418_v40  ;;  %v28383_v54 = vand.u32 4294901760, %v12240_v13 }
 0x806   :  { %25006 = vmatprep.mubr.msk.f32.mxu1 %vm27181_vm1, %v27180_v10  ;;  %25009 = vmatprep.subr.mxu1 %v27180_v10  ;;  %v12312_v60 = vand.u32 4294901760, %v12311_v56 }
 0x807   :  { %25061 = vmatprep.mubr.msk.f32.mxu0 %vm27181_vm1, %v27180_v10  ;;  %25064 = vmatprep.subr.mxu0 %v27180_v10 }
 0x808   :  { %v12313_v63 = vsub.f32 %v12311_v56, %v12312_v60 }
 0x80a   :  { %v12314_v2 = vand.u32 4294901760, %v12313_v63 }
 0x80c   :  { %25062 = vmatmul.mubr.f32.vlgmr.msra.gmra.mrb[18].mxu0 %v10499_v8  ;;  %25007 = vmatmul.mubr.f32.vlgmr.msra.gmra.mrb[22].mxu1 %v9594_v61 }
 0x80d   :  { %25065 = vmatpush3.msra.mxu0 %v28260_v9  ;;  %25010 = vmatpush3.msra.mxu1 %v9605_v58  ;;  %v12322_v58 = vsub.f32 %v12240_v13, %v28383_v54 }
 0x80e   :  { %25011 = vmatprep.mubr.msk.f32.mxu1 %vm27181_vm1, %v27180_v10  ;;  %25014 = vmatprep.subr.mxu1 %v27180_v10 }
 0x80f   :  { %25066 = vmatprep.mubr.msk.f32.mxu0 %vm27181_vm1, %v27180_v10  ;;  %25069 = vmatprep.subr.mxu0 %v27180_v10  ;;  %v12323_v62 = vand.u32 4294901760, %v12322_v58 }
 0x811   :  { %v12324_v1 = vsub.f32 %v12322_v58, %v12323_v62 }
 0x813   :  { %v12325_v3 = vand.u32 4294901760, %v12324_v1 }
 0x814   :  { %25067 = vmatmul.mubr.f32.vlgmr.msra.gmra.mrb[18].mxu0 %v10500_v11  ;;  %25012 = vmatmul.mubr.f32.vlgmr.msra.gmra.mrb[22].mxu1 %v28253_v57 }
 0x815   :  { %25070 = vmatpush3.msra.mxu0 %v10511_v17  ;;  %25015 = vmatpush3.msra.mxu1 %v28245_v53  ;;  %v10964_v53 = vand.u32 4294901760, %v28371_v50 }
 0x816   :  { %25016 = vmatprep.mubr.msk.f32.mxu1 %vm27181_vm1, %v27180_v10  ;;  %25019 = vmatprep.subr.mxu1 %v27180_v10 }
 0x817   :  { %25071 = vmatprep.mubr.msk.f32.mxu0 %vm27181_vm1, %v27180_v10  ;;  %25074 = vmatprep.subr.mxu0 %v27180_v10 }
 0x81c   :  { %25072 = vmatmul.mubr.f32.vlgmr.msra.gmra.mrb[18].mxu0 %v28257_v4  ;;  %25017 = vmatmul.mubr.f32.vlgmr.msra.gmra.mrb[22].mxu1 %v28253_v57  ;;  %v10965_v57 = vsub.f32 %v28371_v50, %v10964_v53 }
 0x81d   :  { %25075 = vmatpush3.msra.mxu0 %v28260_v9  ;;  %25020 = vmatpush3.msra.mxu1 %v28290_v28  ;;  %v13144_v9 = vpop.permute.xlu0 %13143 }
 0x81e   :  { %25021 = vmatprep.mubr.msk.f32.mxu1 %vm27181_vm1, %v27180_v10  ;;  %25024 = vmatprep.subr.mxu1 %v27180_v10  ;;  %v10966_v61 = vand.u32 4294901760, %v10965_v57  ;;  %v13148_v17 = vsel %vm7966_vm3, %v13144_v9, 0 }
 0x81f   :  { %25076 = vmatprep.mubr.msk.f32.mxu0 %vm27181_vm1, %v27180_v10  ;;  %25109 = vmatprep.subr.mxu0 %v27180_v10  ;;  %v28449_v20 = vand.u32 4294901760, %v13148_v17 }
 0x820   :  { %25022 = vmatmul.mubr.f32.vlgmr.msra.gmra.mrb[24].mxu1 %v10049_v32 }
 0x821   :  { %25025 = vmatpush3.msra.mxu1 %v10060_v36  ;;  %25026 = vmatprep.mubr.msk.f32.mxu1 %vm27181_vm1, %v27180_v10  ;;  %v13146_v18 = vpop.permute.xlu0 %13145  ;;  %v28462_v27 = vsub.f32 %v13148_v17, %v28449_v20 }
 0x822   :  { %25029 = vmatprep.subr.mxu1 %v27180_v10  ;;  %v28455_v25 = vand.u32 4294901760, %v13146_v18 }
 0x823   :  { %v13218_v34 = vand.u32 4294901760, %v28462_v27 }
 0x824   :  { %25077 = vmatmul.mubr.f32.vlgmr.msra.gmra.mrb[18].mxu0 %v28257_v4  ;;  %v11785_v4 = vpop.permute.xlu1 %11784 }
 0x825   :  { %25110 = vmatpush3.msra.mxu0 %v28311_v22  ;;  %25111 = vmatprep.mubr.msk.f32.mxu0 %vm27181_vm1, %v27180_v10  ;;  %v11789_v7 = vsel %vm7966_vm3, %v11785_v4, 0 }
 0x826   :  { %25114 = vmatprep.subr.mxu0 %v27180_v10  ;;  %v28429_v42 = vand.u32 4294901760, %v11789_v7 }
 0x828   :  { %25027 = vmatmul.mubr.f32.vlgmr.msra.gmra.mrb[24].mxu1 %v28285_v26  ;;  %25112 = vmatmul.mubr.f32.vlgmr.msra.gmra.mrb[20].mxu0 %v11408_v41  ;;  %v11787_v8 = vpop.permute.xlu1 %11786  ;;  %v28440_v14 = vsub.f32 %v11789_v7, %v28429_v42 }
 0x829   :  { %25030 = vmatpush3.msra.mxu1 %v28299_v33  ;;  %25115 = vmatpush3.msra.mxu0 %v11419_v6  ;;  %v28434_v11 = vand.u32 4294901760, %v11787_v8 }
 0x82a   :  { %25031 = vmatprep.mubr.msk.f32.mxu1 %vm27181_vm1, %v27180_v10  ;;  %25034 = vmatprep.subr.mxu1 %v27180_v10  ;;  %v11859_v19 = vand.u32 4294901760, %v28440_v14 }
 0x82b   :  { %25116 = vmatprep.mubr.msk.f32.mxu0 %vm27181_vm1, %v27180_v10  ;;  %25119 = vmatprep.subr.mxu0 %v27180_v10  ;;  %v28443_v16 = vsub.f32 %v11787_v8, %v28434_v11 }
 0x82d   :  { %v11870_v24 = vand.u32 4294901760, %v28443_v16 }
 0x830   :  { %25032 = vmatmul.mubr.f32.vlgmr.msra.gmra.mrb[24].mxu1 %v28296_v29  ;;  %25117 = vmatmul.mubr.f32.vlgmr.msra.gmra.mrb[20].mxu0 %v28305_v21  ;;  %v28466_v29 = vsub.f32 %v13146_v18, %v28455_v25 }
 0x831   :  { %25035 = vmatpush3.msra.mxu1 %v28290_v28  ;;  %25120 = vmatpush3.msra.mxu0 %v11416_v31  ;;  %v12691_v31 = vpop.permute.xlu1 %12690 }
 0x832   :  { %25036 = vmatprep.mubr.msk.f32.mxu1 %vm27181_vm1, %v27180_v10  ;;  %25039 = vmatprep.subr.mxu1 %v27180_v10  ;;  %v12695_v32 = vsel %vm7966_vm3, %v12691_v31, 0 }
 0x833   :  { %25121 = vmatprep.mubr.msk.f32.mxu0 %vm27181_vm1, %v27180_v10  ;;  %25124 = vmatprep.subr.mxu0 %v27180_v10  ;;  %v28513_v36 = vand.u32 4294901760, %v12695_v32 }
 0x835   :  { %v28524_v40 = vsub.f32 %v12695_v32, %v28513_v36 }
 0x837   :  { %v12765_v44 = vand.u32 4294901760, %v28524_v40 }
 0x838   :  { %25037 = vmatmul.mubr.f32.vlgmr.msra.gmra.mrb[24].mxu1 %v10047_v0  ;;  %25122 = vmatmul.mubr.f32.vlgmr.msra.gmra.mrb[20].mxu0 %v11405_v30  ;;  %v13229_v0 = vand.u32 4294901760, %v28466_v29 }
 0x839   :  { %25040 = vmatpush3.msra.mxu1 %v10058_v5  ;;  %25125 = vmatpush3.msra.mxu0 %v28311_v22 }
 0x83a   :  { %25041 = vmatprep.mubr.msk.f32.mxu1 %vm27181_vm1, %v27180_v10  ;;  %25044 = vmatprep.subr.mxu1 %v27180_v10  ;;  %v13230_v5 = vsub.f32 %v28466_v29, %v13229_v0 }
 0x83b   :  { %25126 = vmatprep.mubr.msk.f32.mxu0 %vm27181_vm1, %v27180_v10  ;;  %25129 = vmatprep.subr.mxu0 %v27180_v10 }
 0x83c   :  { %v13231_v23 = vand.u32 4294901760, %v13230_v5 }
 0x840   :  { %25042 = vmatmul.mubr.f32.vlgmr.msra.gmra.mrb[24].mxu1 %v28285_v26  ;;  %25127 = vmatmul.mubr.f32.vlgmr.msra.gmra.mrb[20].mxu0 %v11406_v35  ;;  %v12693_v35 = vpop.permute.xlu1 %12692 }
 0x841   :  { %25045 = vmatpush3.msra.mxu1 %v28290_v28  ;;  %25130 = vmatpush3.msra.mxu0 %v11417_v37  ;;  %v11871_v28 = vsub.f32 %v28443_v16, %v11870_v24  ;;  %v14050_v37 = vpop.permute.xlu0 %14049  ;;  %v28518_v38 = vand.u32 4294901760, %v12693_v35 }
 0x842   :  { %25046 = vmatprep.mubr.msk.f32.mxu1 %vm27181_vm1, %v27180_v10  ;;  %25079 = vmatprep.subr.mxu1 %v27180_v10  ;;  %v14054_v6 = vsel %vm7966_vm3, %v14050_v37, 0 }
 0x843   :  { %25131 = vmatprep.mubr.msk.f32.mxu0 %vm27181_vm1, %v27180_v10  ;;  %25134 = vmatprep.subr.mxu0 %v27180_v10  ;;  %v11872_v59 = vand.u32 4294901760, %v11871_v28  ;;  %v28527_v41 = vsub.f32 %v12693_v35, %v28518_v38  ;;  %v28533_v45 = vand.u32 4294901760, %v14054_v6 }
 0x845   :  { %v14052_v43 = vpop.permute.xlu0 %14051 }
 0x846   :  { %v28539_v47 = vand.u32 4294901760, %v14052_v43 }
 0x848   :  { %25047 = vmatmul.mubr.f32.vlgmr.msra.gmra.mrb[24].mxu1 %v28285_v26  ;;  %25132 = vmatmul.mubr.f32.vlgmr.msra.gmra.mrb[20].mxu0 %v28305_v21  ;;  %v11860_v26 = vsub.f32 %v28440_v14, %v11859_v19  ;;  %v28550_v51 = vsub.f32 %v14052_v43, %v28539_v47 }
 0x849   :  { %25080 = vmatpush3.msra.mxu1 %v28362_v48  ;;  %25135 = vmatpush3.msra.mxu0 %v28311_v22  ;;  %v14956_v1 = vpop.permute.xlu0 %14955 }
 0x84a   :  { %25081 = vmatprep.mubr.msk.f32.mxu1 %vm27181_vm1, %v27180_v10  ;;  %25084 = vmatprep.subr.mxu1 %v27180_v10  ;;  %v11861_v33 = vand.u32 4294901760, %v11860_v26  ;;  %v14960_v7 = vsel %vm7966_vm3, %v14956_v1, 0 }
 0x84b   :  { %25136 = vmatprep.mubr.msk.f32.mxu0 %vm27181_vm1, %v27180_v10  ;;  %25169 = vmatprep.subr.mxu0 %v27180_v10  ;;  %v28617_v9 = vand.u32 4294901760, %v14960_v7 }
 0x84c   :  { %25082 = vmatmul.mubr.f32.vlgmr.msra.gmra.mrb[26].mxu1 %v10955_v39 }
 0x84d   :  { %25085 = vmatpush3.msra.mxu1 %v10966_v61  ;;  %25086 = vmatprep.mubr.msk.f32.mxu1 %vm27181_vm1, %v27180_v10  ;;  %v14958_v8 = vpop.permute.xlu0 %14957  ;;  %v15029_v17 = vsub.f32 %v14960_v7, %v28617_v9 }
 0x84e   :  { %25089 = vmatprep.subr.mxu1 %v27180_v10 }
 0x850   :  { %25137 = vmatmul.mubr.f32.vlgmr.msra.gmra.mrb[20].mxu0 %v28305_v21  ;;  %v13219_v21 = vsub.f32 %v28462_v27, %v13218_v34 }
 0x851   :  { %25170 = vmatpush3.msra.mxu0 %v28383_v54  ;;  %25171 = vmatprep.mubr.msk.f32.mxu0 %vm27181_vm1, %v27180_v10 }
 0x852   :  { %25174 = vmatprep.subr.mxu0 %v27180_v10  ;;  %v13220_v30 = vand.u32 4294901760, %v13219_v21 }
 0x854   :  { %25087 = vmatmul.mubr.f32.vlgmr.msra.gmra.mrb[26].mxu1 %v28357_v46  ;;  %25172 = vmatmul.mubr.f32.vlgmr.msra.gmra.mrb[22].mxu0 %v12314_v2 }
 0x855   :  { %25090 = vmatpush3.msra.mxu1 %v28371_v50  ;;  %25175 = vmatpush3.msra.mxu0 %v12325_v3 }
 0x856   :  { %25091 = vmatprep.mubr.msk.f32.mxu1 %vm27181_vm1, %v27180_v10  ;;  %25094 = vmatprep.subr.mxu1 %v27180_v10 }
 0x857   :  { %25176 = vmatprep.mubr.msk.f32.mxu0 %vm27181_vm1, %v27180_v10  ;;  %25179 = vmatprep.subr.mxu0 %v27180_v10 }
 0x85c   :  { %25092 = vmatmul.mubr.f32.vlgmr.msra.gmra.mrb[26].mxu1 %v28368_v49  ;;  %25177 = vmatmul.mubr.f32.vlgmr.msra.gmra.mrb[22].mxu0 %v28377_v15  ;;  %v28546_v49 = vsub.f32 %v14054_v6, %v28533_v45 }
 0x85d   :  { %25095 = vmatpush3.msra.mxu1 %v28362_v48  ;;  %25180 = vmatpush3.msra.mxu0 %v12322_v58 }
 0x85e   :  { %25096 = vmatprep.mubr.msk.f32.mxu1 %vm27181_vm1, %v27180_v10  ;;  %25099 = vmatprep.subr.mxu1 %v27180_v10 }
 0x85f   :  { %25181 = vmatprep.mubr.msk.f32.mxu0 %vm27181_vm1, %v27180_v10  ;;  %25184 = vmatprep.subr.mxu0 %v27180_v10 }
 0x864   :  { %25097 = vmatmul.mubr.f32.vlgmr.msra.gmra.mrb[26].mxu1 %v10953_v52  ;;  %25182 = vmatmul.mubr.f32.vlgmr.msra.gmra.mrb[22].mxu0 %v12311_v56  ;;  %v14124_v52 = vand.u32 4294901760, %v28546_v49 }
 0x865   :  { %25100 = vmatpush3.msra.mxu1 %v10964_v53  ;;  %25185 = vmatpush3.msra.mxu0 %v28383_v54  ;;  %v14135_v53 = vand.u32 4294901760, %v28550_v51 }
 0x866   :  { %25101 = vmatprep.mubr.msk.f32.mxu1 %vm27181_vm1, %v27180_v10  ;;  %25104 = vmatprep.subr.mxu1 %v27180_v10 }
 0x867   :  { %25186 = vmatprep.mubr.msk.f32.mxu0 %vm27181_vm1, %v27180_v10  ;;  %25189 = vmatprep.subr.mxu0 %v27180_v10  ;;  %v14136_v55 = vsub.f32 %v28550_v51, %v14135_v53 }
 0x869   :  { %v14137_v39 = vand.u32 4294901760, %v14136_v55 }
 0x86c   :  { %25102 = vmatmul.mubr.f32.vlgmr.msra.gmra.mrb[26].mxu1 %v28357_v46  ;;  %25187 = vmatmul.mubr.f32.vlgmr.msra.gmra.mrb[22].mxu0 %v12312_v60  ;;  %v13597_v60 = vpop.permute.xlu1 %13596 }
 0x86d   :  { %25105 = vmatpush3.msra.mxu1 %v28362_v48  ;;  %25190 = vmatpush3.msra.mxu0 %v12323_v62  ;;  %v12766_v48 = vsub.f32 %v28524_v40, %v12765_v44  ;;  %v13601_v61 = vsel %vm7966_vm3, %v13597_v60, 0 }
 0x86e   :  { %25106 = vmatprep.mubr.msk.f32.mxu1 %vm27181_vm1, %v27180_v10  ;;  %25139 = vmatprep.subr.mxu1 %v27180_v10  ;;  %v28597_v63 = vand.u32 4294901760, %v13601_v61 }
 0x86f   :  { %25191 = vmatprep.mubr.msk.f32.mxu0 %vm27181_vm1, %v27180_v10  ;;  %25194 = vmatprep.subr.mxu0 %v27180_v10  ;;  %v12767_v13 = vand.u32 4294901760, %v12766_v48 }
 0x870   :  { %v13599_v62 = vpop.permute.xlu1 %13598  ;;  %v28608_v3 = vsub.f32 %v13601_v61, %v28597_v63 }
 0x871   :  { %v28602_v2 = vand.u32 4294901760, %v13599_v62 }
 0x873   :  { %v28611_v4 = vsub.f32 %v13599_v62, %v28602_v2 }
 0x874   :  { %25107 = vmatmul.mubr.f32.vlgmr.msra.gmra.mrb[26].mxu1 %v28357_v46  ;;  %25192 = vmatmul.mubr.f32.vlgmr.msra.gmra.mrb[22].mxu0 %v28377_v15  ;;  %v12776_v46 = vand.u32 4294901760, %v28527_v41 }
 0x875   :  { %25140 = vmatpush3.msra.mxu1 %v28434_v11  ;;  %25195 = vmatpush3.msra.mxu0 %v28383_v54  ;;  %v14125_v54 = vsub.f32 %v28546_v49, %v14124_v52 }
 0x876   :  { %25141 = vmatprep.mubr.msk.f32.mxu1 %vm27181_vm1, %v27180_v10  ;;  %25144 = vmatprep.subr.mxu1 %v27180_v10  ;;  %v12777_v50 = vsub.f32 %v28527_v41, %v12776_v46 }
 0x877   :  { %25196 = vmatprep.mubr.msk.f32.mxu0 %vm27181_vm1, %v27180_v10  ;;  %25229 = vmatprep.subr.mxu0 %v27180_v10  ;;  %v14126_v58 = vand.u32 4294901760, %v14125_v54 }
 0x878   :  { %25142 = vmatmul.mubr.f32.vlgmr.msra.gmra.mrb[28].mxu1 %v11861_v33 }
 0x879   :  { %25145 = vmatpush3.msra.mxu1 %v11872_v59  ;;  %25146 = vmatprep.mubr.msk.f32.mxu1 %vm27181_vm1, %v27180_v10 }
 0x87a   :  { %25149 = vmatprep.subr.mxu1 %v27180_v10 }
 0x87c   :  { %v28485_v22 = vpop.f32.mrb[18].mxu1  ;;  %25197 = vmatmul.mubr.f32.vlgmr.msra.gmra.mrb[22].mxu0 %v28377_v15  ;;  %v12778_v15 = vand.u32 4294901760, %v12777_v50 }
 0x87d   :  { %25230 = vmatpush3.msra.mxu0 %v28455_v25  ;;  %v24958_v12 = vpop.f32.mrb[19].mxu1  ;;  %25231 = vmatprep.mubr.msk.f32.mxu0 %vm27181_vm1, %v27180_v10 }
 0x87e   :  { %25234 = vmatprep.subr.mxu0 %v27180_v10 }
 0x880   :  { %25147 = vmatmul.mubr.f32.vlgmr.msra.gmra.mrb[28].mxu1 %v28429_v42  ;;  %25232 = vmatmul.mubr.f32.vlgmr.msra.gmra.mrb[24].mxu0 %v13220_v30 }
 0x881   :  { %25150 = vmatpush3.msra.mxu1 %v28443_v16  ;;  %25235 = vmatpush3.msra.mxu0 %v13231_v23 }
 0x882   :  { %25151 = vmatprep.mubr.msk.f32.mxu1 %vm27181_vm1, %v27180_v10  ;;  %25154 = vmatprep.subr.mxu1 %v27180_v10 }
 0x883   :  { %25236 = vmatprep.mubr.msk.f32.mxu0 %vm27181_vm1, %v27180_v10  ;;  %25239 = vmatprep.subr.mxu0 %v27180_v10 }
 0x888   :  { %25152 = vmatmul.mubr.f32.vlgmr.msra.gmra.mrb[28].mxu1 %v28440_v14  ;;  %25237 = vmatmul.mubr.f32.vlgmr.msra.gmra.mrb[24].mxu0 %v28449_v20  ;;  %v28623_v14 = vand.u32 4294901760, %v14958_v8 }
 0x889   :  { %25155 = vmatpush3.msra.mxu1 %v28434_v11  ;;  %25240 = vmatpush3.msra.mxu0 %v28466_v29 }
 0x88a   :  { %25156 = vmatprep.mubr.msk.f32.mxu1 %vm27181_vm1, %v27180_v10  ;;  %25159 = vmatprep.subr.mxu1 %v27180_v10 }
 0x88b   :  { %25241 = vmatprep.mubr.msk.f32.mxu0 %vm27181_vm1, %v27180_v10  ;;  %25244 = vmatprep.subr.mxu0 %v27180_v10 }
 0x890   :  { %25157 = vmatmul.mubr.f32.vlgmr.msra.gmra.mrb[28].mxu1 %v11859_v19  ;;  %25242 = vmatmul.mubr.f32.vlgmr.msra.gmra.mrb[24].mxu0 %v28462_v27  ;;  %v15040_v19 = vsub.f32 %v14958_v8, %v28623_v14 }
 0x891   :  { %25160 = vmatpush3.msra.mxu1 %v11870_v24  ;;  %25245 = vmatpush3.msra.mxu0 %v28455_v25  ;;  %v15030_v24 = vand.u32 4294901760, %v15029_v17 }
 0x892   :  { %25161 = vmatprep.mubr.msk.f32.mxu1 %vm27181_vm1, %v27180_v10  ;;  %25164 = vmatprep.subr.mxu1 %v27180_v10  ;;  %v15041_v26 = vand.u32 4294901760, %v15040_v19 }
 0x893   :  { %25246 = vmatprep.mubr.msk.f32.mxu0 %vm27181_vm1, %v27180_v10  ;;  %25249 = vmatprep.subr.mxu0 %v27180_v10  ;;  %v15031_v27 = vsub.f32 %v15029_v17, %v15030_v24 }
 0x894   :  { %v15042_v28 = vsub.f32 %v15040_v19, %v15041_v26 }
 0x895   :  { %v15032_v29 = vand.u32 4294901760, %v15031_v27 }
 0x896   :  { %v15043_v33 = vand.u32 4294901760, %v15042_v28 }
 0x898   :  { %25162 = vmatmul.mubr.f32.vlgmr.msra.gmra.mrb[28].mxu1 %v28429_v42  ;;  %25247 = vmatmul.mubr.f32.vlgmr.msra.gmra.mrb[24].mxu0 %v13218_v34  ;;  %v14503_v34 = vpop.permute.xlu1 %14502 }
 0x899   :  { %25165 = vmatpush3.msra.mxu1 %v28434_v11  ;;  %25250 = vmatpush3.msra.mxu0 %v13229_v0  ;;  %v13682_v11 = vand.u32 4294901760, %v28611_v4  ;;  %v14507_v59 = vsel %vm7966_vm3, %v14503_v34, 0 }
 0x89a   :  { %25166 = vmatprep.mubr.msk.f32.mxu1 %vm27181_vm1, %v27180_v10  ;;  %25199 = vmatprep.subr.mxu1 %v27180_v10  ;;  %v28669_v21 = vand.u32 4294901760, %v14507_v59 }
 0x89b   :  { %25251 = vmatprep.mubr.msk.f32.mxu0 %vm27181_vm1, %v27180_v10  ;;  %25254 = vmatprep.subr.mxu0 %v27180_v10  ;;  %v13683_v18 = vsub.f32 %v28611_v4, %v13682_v11 }
 0x89c   :  { %v14505_v0 = vpop.permute.xlu1 %14504  ;;  %v14576_v12 = vsub.f32 %v14507_v59, %v28669_v21 }
 0x89d   :  { %v14510_v5 = vand.u32 4294901760, %v14505_v0 }
 0x89e   :  { %v14577_v32 = vand.u32 4294901760, %v14576_v12 }
 0x89f   :  { %v14587_v30 = vsub.f32 %v14505_v0, %v14510_v5 }
 0x8a0   :  { %25167 = vmatmul.mubr.f32.vlgmr.msra.gmra.mrb[28].mxu1 %v28429_v42  ;;  %25252 = vmatmul.mubr.f32.vlgmr.msra.gmra.mrb[24].mxu0 %v28449_v20  ;;  %v13671_v42 = vand.u32 4294901760, %v28608_v3  ;;  %v15409_v43 = vpop.permute.xlu1 %15408 }
 0x8a1   :  { %25200 = vmatpush3.msra.mxu1 %v28518_v38  ;;  %25255 = vmatpush3.msra.mxu0 %v28455_v25  ;;  %v13684_v25 = vand.u32 4294901760, %v13683_v18  ;;  %v14588_v35 = vand.u32 4294901760, %v14587_v30 }
 0x8a2   :  { %25201 = vmatprep.mubr.msk.f32.mxu1 %vm27181_vm1, %v27180_v10  ;;  %25204 = vmatprep.subr.mxu1 %v27180_v10  ;;  %v13672_v16 = vsub.f32 %v28608_v3, %v13671_v42 }
 0x8a3   :  { %25256 = vmatprep.mubr.msk.f32.mxu0 %vm27181_vm1, %v27180_v10  ;;  %25289 = vmatprep.subr.mxu0 %v27180_v10  ;;  %v14589_v37 = vsub.f32 %v14587_v30, %v14588_v35 }
 0x8a4   :  { %25202 = vmatmul.mubr.f32.vlgmr.msra.gmra.mrb[30].mxu1 %v12767_v13 }
 0x8a5   :  { %25205 = vmatpush3.msra.mxu1 %v12778_v15  ;;  %25206 = vmatprep.mubr.msk.f32.mxu1 %vm27181_vm1, %v27180_v10  ;;  %v14590_v6 = vand.u32 4294901760, %v14589_v37 }
 0x8a6   :  { %25209 = vmatprep.subr.mxu1 %v27180_v10 }
 0x8a8   :  { %v28569_v56 = vpop.f32.mrb[20].mxu1  ;;  %25257 = vmatmul.mubr.f32.vlgmr.msra.gmra.mrb[24].mxu0 %v28449_v20  ;;  %v13673_v20 = vand.u32 4294901760, %v13672_v16 }
 0x8a9   :  { %25290 = vmatpush3.msra.mxu0 %v28539_v47  ;;  %v24988_v57 = vpop.f32.mrb[21].mxu1  ;;  %25291 = vmatprep.mubr.msk.f32.mxu0 %vm27181_vm1, %v27180_v10 }
 0x8aa   :  { %25294 = vmatprep.subr.mxu0 %v27180_v10 }
 0x8ac   :  { %25207 = vmatmul.mubr.f32.vlgmr.msra.gmra.mrb[30].mxu1 %v28513_v36  ;;  %25292 = vmatmul.mubr.f32.vlgmr.msra.gmra.mrb[26].mxu0 %v14126_v58 }
 0x8ad   :  { %25210 = vmatpush3.msra.mxu1 %v28527_v41  ;;  %25295 = vmatpush3.msra.mxu0 %v14137_v39 }
 0x8ae   :  { %25211 = vmatprep.mubr.msk.f32.mxu1 %vm27181_vm1, %v27180_v10  ;;  %25214 = vmatprep.subr.mxu1 %v27180_v10 }
 0x8af   :  { %25296 = vmatprep.mubr.msk.f32.mxu0 %vm27181_vm1, %v27180_v10  ;;  %25299 = vmatprep.subr.mxu0 %v27180_v10 }
 0x8b4   :  { %25212 = vmatmul.mubr.f32.vlgmr.msra.gmra.mrb[30].mxu1 %v28524_v40  ;;  %25297 = vmatmul.mubr.f32.vlgmr.msra.gmra.mrb[26].mxu0 %v28533_v45 }
 0x8b5   :  { %25215 = vmatpush3.msra.mxu1 %v28518_v38  ;;  %25300 = vmatpush3.msra.mxu0 %v28550_v51 }
 0x8b6   :  { %25216 = vmatprep.mubr.msk.f32.mxu1 %vm27181_vm1, %v27180_v10  ;;  %25219 = vmatprep.subr.mxu1 %v27180_v10 }
 0x8b7   :  { %25301 = vmatprep.mubr.msk.f32.mxu0 %vm27181_vm1, %v27180_v10  ;;  %25304 = vmatprep.subr.mxu0 %v27180_v10 }
 0x8bc   :  { %25217 = vmatmul.mubr.f32.vlgmr.msra.gmra.mrb[30].mxu1 %v12765_v44  ;;  %25302 = vmatmul.mubr.f32.vlgmr.msra.gmra.mrb[26].mxu0 %v28546_v49  ;;  %v15413_v44 = vsel %vm7966_vm3, %v15409_v43, 0 }
 0x8bd   :  { %25220 = vmatpush3.msra.mxu1 %v12776_v46  ;;  %25305 = vmatpush3.msra.mxu0 %v28539_v47  ;;  %v15481_v46 = vand.u32 4294901760, %v15413_v44 }
 0x8be   :  { %25221 = vmatprep.mubr.msk.f32.mxu1 %vm27181_vm1, %v27180_v10  ;;  %25224 = vmatprep.subr.mxu1 %v27180_v10 }
 0x8bf   :  { %25306 = vmatprep.mubr.msk.f32.mxu0 %vm27181_vm1, %v27180_v10  ;;  %25309 = vmatprep.subr.mxu0 %v27180_v10  ;;  %v15482_v48 = vsub.f32 %v15413_v44, %v15481_v46 }
 0x8c1   :  { %v15483_v13 = vand.u32 4294901760, %v15482_v48 }
 0x8c3   :  { %v15484_v15 = vsub.f32 %v15482_v48, %v15483_v13 }
 0x8c4   :  { %25222 = vmatmul.mubr.f32.vlgmr.msra.gmra.mrb[30].mxu1 %v28513_v36  ;;  %25307 = vmatmul.mubr.f32.vlgmr.msra.gmra.mrb[26].mxu0 %v14124_v52 }
 0x8c5   :  { %25225 = vmatpush3.msra.mxu1 %v28518_v38  ;;  %25310 = vmatpush3.msra.mxu0 %v14135_v53  ;;  %v15485_v57 = vand.u32 4294901760, %v15484_v15 }
 0x8c6   :  { %25226 = vmatprep.mubr.msk.f32.mxu1 %vm27181_vm1, %v27180_v10  ;;  %25259 = vmatprep.subr.mxu1 %v27180_v10 }
 0x8c7   :  { %25311 = vmatprep.mubr.msk.f32.mxu0 %vm27181_vm1, %v27180_v10  ;;  %25314 = vmatprep.subr.mxu0 %v27180_v10 }
 0x8cc   :  { %25227 = vmatmul.mubr.f32.vlgmr.msra.gmra.mrb[30].mxu1 %v28513_v36  ;;  %25312 = vmatmul.mubr.f32.vlgmr.msra.gmra.mrb[26].mxu0 %v28533_v45  ;;  %v14578_v36 = vsub.f32 %v14576_v12, %v14577_v32 }
 0x8cd   :  { %25260 = vmatpush3.msra.mxu1 %v28602_v2  ;;  %25315 = vmatpush3.msra.mxu0 %v28539_v47 }
 0x8ce   :  { %25261 = vmatprep.mubr.msk.f32.mxu1 %vm27181_vm1, %v27180_v10  ;;  %25264 = vmatprep.subr.mxu1 %v27180_v10  ;;  %v14579_v41 = vand.u32 4294901760, %v14578_v36 }
 0x8cf   :  { %25316 = vmatprep.mubr.msk.f32.mxu0 %vm27181_vm1, %v27180_v10  ;;  %25349 = vmatprep.subr.mxu0 %v27180_v10 }
 0x8d0   :  { %25262 = vmatmul.mubr.f32.vlgmr.msra.gmra.mrb[32].mxu1 %v13673_v20  ;;  %v15935_v20 = vld [vmem:[%s32093_s7 + $0x8] sm:$0xff] }
 0x8d1   :  { %25265 = vmatpush3.msra.mxu1 %v13684_v25  ;;  %25266 = vmatprep.mubr.msk.f32.mxu1 %vm27181_vm1, %v27180_v10  ;;  %v15955_v25 = vand.u32 4294901760, %v15935_v20 }
 0x8d2   :  { %25269 = vmatprep.subr.mxu1 %v27180_v10 }
 0x8d3   :  { %v16049_v28 = vsub.f32 %v15935_v20, %v15955_v25 }
 0x8d4   :  { %25317 = vmatmul.mubr.f32.vlgmr.msra.gmra.mrb[26].mxu0 %v28533_v45  ;;  %v15411_v45 = vpop.permute.xlu1 %15410 }
 0x8d5   :  { %25350 = vmatpush3.msra.mxu0 %v28623_v14  ;;  %25351 = vmatprep.mubr.msk.f32.mxu0 %vm27181_vm1, %v27180_v10  ;;  %v15416_v47 = vand.u32 4294901760, %v15411_v45 }
 0x8d6   :  { %25354 = vmatprep.subr.mxu0 %v27180_v10 }
 0x8d7   :  { %v15493_v49 = vsub.f32 %v15411_v45, %v15416_v47 }
 0x8d8   :  { %25267 = vmatmul.mubr.f32.vlgmr.msra.gmra.mrb[32].mxu1 %v28597_v63  ;;  %25352 = vmatmul.mubr.f32.vlgmr.msra.gmra.mrb[28].mxu0 %v15032_v29  ;;  %v15936_v29 = vld [vmem:[%s32093_s7 + $0x10] sm:$0xff] }
 0x8d9   :  { %25270 = vmatpush3.msra.mxu1 %v28611_v4  ;;  %25355 = vmatpush3.msra.mxu0 %v15043_v33  ;;  %v15494_v52 = vand.u32 4294901760, %v15493_v49  ;;  %v15937_v33 = vld [vmem:[%s32093_s7 + $0x18] sm:$0xff]  ;;  %v15958_v34 = vand.u32 4294901760, %v15936_v29 }
 0x8da   :  { %25271 = vmatprep.mubr.msk.f32.mxu1 %vm27181_vm1, %v27180_v10  ;;  %25274 = vmatprep.subr.mxu1 %v27180_v10  ;;  %v15961_v59 = vand.u32 4294901760, %v15937_v33 }
 0x8db   :  { %25356 = vmatprep.mubr.msk.f32.mxu0 %vm27181_vm1, %v27180_v10  ;;  %25359 = vmatprep.subr.mxu0 %v27180_v10  ;;  %v15495_v53 = vsub.f32 %v15493_v49, %v15494_v52 }
 0x8dd   :  { %v15496_v58 = vand.u32 4294901760, %v15495_v53 }
 0x8e0   :  { %25272 = vmatmul.mubr.f32.vlgmr.msra.gmra.mrb[32].mxu1 %v28608_v3  ;;  %25357 = vmatmul.mubr.f32.vlgmr.msra.gmra.mrb[28].mxu0 %v28617_v9 }
 0x8e1   :  { %25275 = vmatpush3.msra.mxu1 %v28602_v2  ;;  %25360 = vmatpush3.msra.mxu0 %v15040_v19  ;;  %v15934_v19 = vld [vmem:[%s32093_s7] sm:$0xff] }
 0x8e2   :  { %25276 = vmatprep.mubr.msk.f32.mxu1 %vm27181_vm1, %v27180_v10  ;;  %25279 = vmatprep.subr.mxu1 %v27180_v10 }
 0x8e3   :  { %25361 = vmatprep.mubr.msk.f32.mxu0 %vm27181_vm1, %v27180_v10  ;;  %25364 = vmatprep.subr.mxu0 %v27180_v10 }
 0x8e8   :  { %25277 = vmatmul.mubr.f32.vlgmr.msra.gmra.mrb[32].mxu1 %v13671_v42  ;;  %25362 = vmatmul.mubr.f32.vlgmr.msra.gmra.mrb[28].mxu0 %v15029_v17 }
 0x8e9   :  { %25280 = vmatpush3.msra.mxu1 %v13682_v11  ;;  %25365 = vmatpush3.msra.mxu0 %v28623_v14 }
 0x8ea   :  { %25281 = vmatprep.mubr.msk.f32.mxu1 %vm27181_vm1, %v27180_v10  ;;  %25284 = vmatprep.subr.mxu1 %v27180_v10 }
 0x8eb   :  { %25366 = vmatprep.mubr.msk.f32.mxu0 %vm27181_vm1, %v27180_v10  ;;  %25369 = vmatprep.subr.mxu0 %v27180_v10 }
 0x8ef   :  { %v9968_v23 = vpop.f32.mrb[22].mxu1 }
 0x8f0   :  { %25282 = vmatmul.mubr.f32.vlgmr.msra.gmra.mrb[32].mxu1 %v28597_v63  ;;  %25367 = vmatmul.mubr.f32.vlgmr.msra.gmra.mrb[28].mxu0 %v15030_v24  ;;  %v25018_v31 = vpop.f32.mrb[23].mxu1  ;;  %v15952_v24 = vand.u32 4294901760, %v15934_v19 }
 0x8f1   :  { %25285 = vmatpush3.msra.mxu1 %v28602_v2  ;;  %25370 = vmatpush3.msra.mxu0 %v15041_v26  ;;  %v16063_v31 = vsub.f32 %v15937_v33, %v15961_v59 }
 0x8f2   :  { %15863 = vrot.lane.b32.xlu0 %v9968_v23, %s27209_s26  ;;  %25286 = vmatprep.mubr.msk.f32.mxu1 %vm27181_vm1, %v27180_v10  ;;  %v28749_v26 = vpack.c.bf16 %v15955_v25, %v15952_v24  ;;  %v16042_v27 = vsub.f32 %v15934_v19, %v15952_v24  ;;  %v16056_v23 = vsub.f32 %v15936_v29, %v15958_v34 }
 0x8f3   :  { %25319 = vmatprep.subr.mxu1 %v27180_v10  ;;  %25371 = vmatprep.mubr.msk.f32.mxu0 %vm27181_vm1, %v27180_v10  ;;  %v16064_v37 = vand.u32 4294901760, %v16063_v31 }
 0x8f4   :  { %25374 = vmatprep.subr.mxu0 %v27180_v10  ;;  %v16043_v0 = vand.u32 4294901760, %v16042_v27  ;;  %v16057_v36 = vand.u32 4294901760, %v16056_v23 }
 0x8f5   :  { %v16065_v43 = vsub.f32 %v16063_v31, %v16064_v37 }
 0x8f6   :  { %v25655_v15 = vpack.c.bf16 %v16064_v37, %v16057_v36 }
 0x8f7   :  { %v10874_v38 = vpop.f32.mrb[18].mxu0  ;;  %v16066_v45 = vand.u32 4294901760, %v16065_v43 }
 0x8f8   :  { %v25078_v40 = vpop.f32.mrb[19].mxu0  ;;  %25287 = vmatmul.mubr.f32.vlgmr.msra.gmra.mrb[32].mxu1 %v28597_v63  ;;  %25372 = vmatmul.mubr.f32.vlgmr.msra.gmra.mrb[28].mxu0 %v28617_v9 }
 0x8f9   :  { %25320 = vmatpush3.msra.mxu1 %v14510_v5  ;;  %25375 = vmatpush3.msra.mxu0 %v28623_v14 }
 0x8fa   :  { %15871 = vrot.lane.b32.xlu0 %v10874_v38, %s32351_s29  ;;  %25321 = vmatprep.mubr.msk.f32.mxu1 %vm27181_vm1, %v27180_v10 }
 0x8fb   :  { %25324 = vmatprep.subr.mxu1 %v27180_v10  ;;  %25376 = vmatprep.mubr.msk.f32.mxu0 %vm27181_vm1, %v27180_v10 }
 0x8fc   :  { %25322 = vmatmul.mubr.f32.vlgmr.msra.gmra.mrb[34].mxu1 %v14579_v41  ;;  %25620 = vmatprep.subr.bf16.mxu0 %v28749_v26  ;;  %v16058_v41 = vsub.f32 %v16056_v23, %v16057_v36 }
 0x8fd   :  { %25325 = vmatpush3.msra.mxu1 %v14590_v6  ;;  %25326 = vmatprep.mubr.msk.f32.mxu1 %vm27181_vm1, %v27180_v10 }
 0x8fe   :  { %25329 = vmatprep.subr.mxu1 %v27180_v10  ;;  %v16059_v44 = vand.u32 4294901760, %v16058_v41 }
 0x900   :  { %25377 = vmatmul.mubr.f32.vlgmr.msra.gmra.mrb[28].mxu0 %v28617_v9 }
 0x901   :  { %25622 = vmatpush3.bf16.msra.mxu0 %v28749_v26 }
 0x904   :  { %25327 = vmatmul.mubr.f32.vlgmr.msra.gmra.mrb[34].mxu1 %v28669_v21 }
 0x905   :  { %25330 = vmatpush3.msra.mxu1 %v14587_v30  ;;  %25331 = vmatprep.mubr.msk.f32.mxu1 %vm27181_vm1, %v27180_v10 }
 0x906   :  { %25334 = vmatprep.subr.mxu1 %v27180_v10 }
 0x90c   :  { %25332 = vmatmul.mubr.f32.vlgmr.msra.gmra.mrb[34].mxu1 %v14576_v12  ;;  %v16044_v12 = vsub.f32 %v16042_v27, %v16043_v0 }
 0x90d   :  { %25335 = vmatpush3.msra.mxu1 %v14510_v5  ;;  %25336 = vmatprep.mubr.msk.f32.mxu1 %vm27181_vm1, %v27180_v10 }
 0x90e   :  { %25339 = vmatprep.subr.mxu1 %v27180_v10 }
 0x914   :  { %25337 = vmatmul.mubr.f32.vlgmr.msra.gmra.mrb[34].mxu1 %v14577_v32  ;;  %v16045_v32 = vand.u32 4294901760, %v16044_v12 }
 0x915   :  { %25340 = vmatpush3.msra.mxu1 %v14588_v35  ;;  %25341 = vmatprep.mubr.msk.f32.mxu1 %vm27181_vm1, %v27180_v10 }
 0x916   :  { %25344 = vmatprep.subr.mxu1 %v27180_v10 }
 0x91b   :  { %v10421_v50 = vpop.f32.mrb[24].mxu1 }
 0x91c   :  { %25342 = vmatmul.mubr.f32.vlgmr.msra.gmra.mrb[34].mxu1 %v28669_v21  ;;  %15865 = vrot.lane.b32.xlu1 %v10421_v50, %s27209_s26  ;;  %v25048_v51 = vpop.f32.mrb[25].mxu1 }
 0x91d   :  { %25345 = vmatpush3.msra.mxu1 %v14510_v5  ;;  %25346 = vmatprep.mubr.msk.f32.mxu1 %vm27181_vm1, %v27180_v10  ;;  %v28759_v5 = vpack.c.bf16 %v15961_v59, %v15958_v34 }
 0x91e   :  { %25379 = vmatprep.subr.mxu1 %v27180_v10 }
 0x91f   :  { %25624 = vmatprep.subr.bf16.mxu0 %v28759_v5 }
 0x920   :  { %25626 = vmatpush3.bf16.msra.mxu0 %v28759_v5 }
 0x923   :  { %v11780_v54 = vpop.f32.mrb[20].mxu0 }
 0x924   :  { %v25138_v55 = vpop.f32.mrb[21].mxu0  ;;  %25347 = vmatmul.mubr.f32.vlgmr.msra.gmra.mrb[34].mxu1 %v28669_v21  ;;  %15879 = vrot.lane.b32.xlu0 %v11780_v54, %s27210_s30  ;;  %v16050_v21 = vand.u32 4294901760, %v16049_v28 }
 0x925   :  { %25380 = vmatpush3.msra.mxu1 %v15416_v47  ;;  %25381 = vmatprep.mubr.msk.f32.mxu1 %vm27181_vm1, %v27180_v10 }
 0x926   :  { %25384 = vmatprep.subr.mxu1 %v27180_v10  ;;  %v16051_v30 = vsub.f32 %v16049_v28, %v16050_v21 }
 0x928   :  { %25382 = vmatmul.mubr.f32.vlgmr.msra.gmra.mrb[36].mxu1 %v15485_v57  ;;  %v16052_v35 = vand.u32 4294901760, %v16051_v30 }
 0x929   :  { %25385 = vmatpush3.msra.mxu1 %v15496_v58  ;;  %25386 = vmatprep.mubr.msk.f32.mxu1 %vm27181_vm1, %v27180_v10 }
 0x92a   :  { %25389 = vmatprep.subr.mxu1 %v27180_v10  ;;  %v25627_v40 = vpack.c.bf16 %v16052_v35, %v16045_v32 }
 0x92c   :  { %25628 = vmatprep.subr.bf16.mxu0 %v25627_v40 }
 0x930   :  { %25387 = vmatmul.mubr.f32.vlgmr.msra.gmra.mrb[36].mxu1 %v15481_v46 }
 0x931   :  { %25390 = vmatpush3.msra.mxu1 %v15493_v49  ;;  %25391 = vmatprep.mubr.msk.f32.mxu1 %vm27181_vm1, %v27180_v10 }
 0x932   :  { %25394 = vmatprep.subr.mxu1 %v27180_v10 }
 0x938   :  { %25392 = vmatmul.mubr.f32.vlgmr.msra.gmra.mrb[36].mxu1 %v15482_v48  ;;  %v25639_v48 = vpack.c.bf16 %v16063_v31, %v16056_v23 }
 0x939   :  { %25395 = vmatpush3.msra.mxu1 %v15416_v47  ;;  %25396 = vmatprep.mubr.msk.f32.mxu1 %vm27181_vm1, %v27180_v10 }
 0x93a   :  { %25399 = vmatprep.subr.mxu1 %v27180_v10 }
 0x940   :  { %25397 = vmatmul.mubr.f32.vlgmr.msra.gmra.mrb[36].mxu1 %v15483_v13 }
 0x941   :  { %25400 = vmatpush3.msra.mxu1 %v15494_v52  ;;  %25401 = vmatprep.mubr.msk.f32.mxu1 %vm27181_vm1, %v27180_v10  ;;  %v25651_v52 = vpack.c.bf16 %v16050_v21, %v16043_v0  ;;  %v22837_v21 = vld [vmem:[%s32094_s8] ss:$0 sm:$0xff] }
 0x942   :  { %25404 = vmatprep.subr.mxu1 %v27180_v10 }
 0x947   :  { %v11327_v39 = vpop.f32.mrb[26].mxu1 }
 0x948   :  { %25402 = vmatmul.mubr.f32.vlgmr.msra.gmra.mrb[36].mxu1 %v15481_v46  ;;  %15873 = vrot.lane.b32.xlu1 %v11327_v39, %s32351_s29  ;;  %v25108_v60 = vpop.f32.mrb[27].mxu1 }
 0x949   :  { %25405 = vmatpush3.msra.mxu1 %v15416_v47  ;;  %25406 = vmatprep.mubr.msk.f32.mxu1 %vm27181_vm1, %v27180_v10  ;;  %v25635_v47 = vpack.c.bf16 %v16049_v28, %v16042_v27 }
 0x94f   :  { %v12686_v61 = vpop.f32.mrb[22].mxu0 }
 0x950   :  { %v25198_v62 = vpop.f32.mrb[23].mxu0  ;;  %25407 = vmatmul.mubr.f32.vlgmr.msra.gmra.mrb[36].mxu1 %v15481_v46  ;;  %15887 = vrot.lane.b32.xlu0 %v12686_v61, %s32352_s18  ;;  %v25631_v46 = vpack.c.bf16 %v16066_v45, %v16059_v44 }
 0x951   :  { %16804 = vmatprep.mubr.f32.mxu1 %v27180_v10 }
 0x964   :  { %v15864_v49 = vpop.permute.xlu0 %15863 }
 0x965   :  { %v15917_v54 = vsel %vm650_vm2, %v28485_v22, %v15864_v49  ;;  %v16526_v49 = vld [vmem:[%s32097_s11 + $0x8] sm:$0xff] }
 0x96c   :  { %v15872_v50 = vpop.permute.xlu0 %15871 }
 0x96d   :  { %v15919_v55 = vsel %vm7966_vm3, %v15917_v54, %v15872_v50  ;;  %v16534_v50 = vld [vmem:[%s32097_s11 + $0x48] sm:$0xff] }
 0x973   :  { %v12233_v63 = vpop.f32.mrb[28].mxu1 }
 0x974   :  { %15881 = vrot.lane.b32.xlu1 %v12233_v63, %s27210_s30  ;;  %v25168_v1 = vpop.f32.mrb[29].mxu1 }
 0x97b   :  { %v13592_v2 = vpop.f32.mrb[24].mxu0 }
 0x97c   :  { %v25258_v3 = vpop.f32.mrb[25].mxu0  ;;  %15895 = vrot.lane.b32.xlu0 %v13592_v2, %s27211_s5 }
 0x996   :  { %v15880_v51 = vpop.permute.xlu0 %15879 }
 0x997   :  { %v15922_v58 = vsel %vm15921_vm10, %v15919_v55, %v15880_v51  ;;  %v16605_v51 = vand.u32 4294901760, %v16526_v49 }
 0x999   :  { %v28832_v55 = vsub.f32 %v16526_v49, %v16605_v51 }
 0x99f   :  { %v13139_v4 = vpop.f32.mrb[30].mxu1 }
 0x9a0   :  { %15889 = vrot.lane.b32.xlu1 %v13139_v4, %s32352_s18  ;;  %v25228_v7 = vpop.f32.mrb[31].mxu1 }
 0x9a7   :  { %v14498_v8 = vpop.f32.mrb[26].mxu0 }
 0x9a8   :  { %v25318_v42 = vpop.f32.mrb[27].mxu0  ;;  %15903 = vrot.lane.b32.xlu0 %v14498_v8, %s32353_s25  ;;  %v15866_v8 = vpop.permute.xlu1 %15865 }
 0x9ba   :  { %v15874_v42 = vpop.permute.xlu1 %15873 }
 0x9c2   :  { %v15888_v13 = vpop.permute.xlu0 %15887 }
 0x9c3   :  { %v15924_v39 = vsel %vm7969_vm4, %v15922_v58, %v15888_v13  ;;  %v16609_v13 = vand.u32 4294901760, %v16534_v50 }
 0x9cb   :  { %v14045_v9 = vpop.f32.mrb[32].mxu1 }
 0x9cc   :  { %15897 = vrot.lane.b32.xlu1 %v14045_v9, %s27211_s5  ;;  %v25288_v11 = vpop.f32.mrb[33].mxu1 }
 0x9d3   :  { %v15404_v14 = vpop.f32.mrb[28].mxu0 }
 0x9d4   :  { %v25378_v16 = vpop.f32.mrb[29].mxu0  ;;  %15911 = vrot.lane.b32.xlu0 %v15404_v14, %s27212_s27 }
 0x9d5   :  { %v15918_v16 = vsel %vm650_vm2, %v28569_v56, %v15866_v8 }
 0x9e6   :  { %v15882_v9 = vpop.permute.xlu1 %15881 }
 0x9ee   :  { %v15896_v53 = vpop.permute.xlu0 %15895 }
 0x9ef   :  { %v15927_v60 = vsel %vm15926_vm11, %v15924_v39, %v15896_v53 }
 0x9f7   :  { %v14951_v17 = vpop.f32.mrb[34].mxu1 }
 0x9f8   :  { %15905 = vrot.lane.b32.xlu1 %v14951_v17, %s32353_s25  ;;  %v25348_v18 = vpop.f32.mrb[35].mxu1  ;;  %v15920_v17 = vsel %vm7966_vm3, %v15918_v16, %v15874_v42 }
 0x9f9   :  { %v15923_v19 = vsel %vm15921_vm10, %v15920_v17, %v15882_v9 }
 0xa12   :  { %v15890_v11 = vpop.permute.xlu1 %15889 }
 0xa13   :  { %v15925_v20 = vsel %vm7969_vm4, %v15923_v19, %v15890_v11 }
 0xa1a   :  { %v15904_v57 = vpop.permute.xlu0 %15903 }
 0xa1b   :  { %v15929_v61 = vsel %vm7972_vm5, %v15927_v60, %v15904_v57  ;;  %v28834_v57 = vsub.f32 %v16534_v50, %v16609_v13  ;;  %v16542_v60 = vld [vmem:[%s32097_s11 + $0x88] sm:$0xff]  ;;  %v16528_v50 = vld [vmem:[%s32097_s11 + $0x18] sm:$0xff] }
 0xa23   :  { %v15857_v38 = vpop.f32.mrb[36].mxu1 }
 0xa24   :  { %15913 = vrot.lane.b32.xlu1 %v15857_v38, %s27212_s27  ;;  %v25408_v6 = vpop.f32.mrb[37].mxu1 }
 0xa3e   :  { %v15898_v14 = vpop.permute.xlu1 %15897 }
 0xa3f   :  { %v15928_v24 = vsel %vm15926_vm11, %v15925_v20, %v15898_v14 }
 0xa46   :  { %v15912_v62 = vpop.permute.xlu0 %15911 }
 0xa47   :  { %v15932_v63 = vsel %vm15931_vm12, %v15929_v61, %v15912_v62  ;;  %v16550_v61 = vld [vmem:[%s32097_s11 + $0xc8] sm:$0xff]  ;;  %v16702_v62 = vand.u32 4294901760, %v28832_v55 }
 0xa48   :  { %v15946_v1 = vsel %vm58_vm0, %v15932_v63, 0  ;;  %v16714_v63 = vand.u32 4294901760, %v28834_v57 }
 0xa49   :  { %v16020_v2 = vand.u32 4294901760, %v15946_v1  ;;  %v16703_v9 = vsub.f32 %v28832_v55, %v16702_v62 }
 0xa4a   :  { %v16715_v11 = vsub.f32 %v28834_v57, %v16714_v63 }
 0xa4b   :  { %v16021_v22 = vsub.f32 %v15946_v1, %v16020_v2  ;;  %v16613_v1 = vand.u32 4294901760, %v16542_v60 }
 0xa4d   :  { %v16022_v3 = vand.u32 4294901760, %v16021_v22  ;;  %v28862_v14 = vsub.f32 %v16542_v60, %v16613_v1 }
 0xa4f   :  { %v16023_v4 = vsub.f32 %v16021_v22, %v16022_v3 }
 0xa51   :  { %v16024_v7 = vand.u32 4294901760, %v16023_v4 }
 0xa53   :  { %25417 = vmatprep.mubr.f32.mxu0 %v16024_v7 }
 0xa6a   :  { %v15906_v18 = vpop.permute.xlu1 %15905 }
 0xa6b   :  { %v15930_v25 = vsel %vm7972_vm5, %v15928_v24, %v15906_v18  ;;  %v16704_v24 = vand.u32 4294901760, %v16703_v9 }
 0xa96   :  { %v15914_v27 = vpop.permute.xlu1 %15913 }
 0xa97   :  { %v15933_v28 = vsel %vm15931_vm12, %v15930_v25, %v15914_v27  ;;  %v16716_v25 = vand.u32 4294901760, %v16715_v11  ;;  %v16726_v27 = vand.u32 4294901760, %v28862_v14 }
 0xa98   :  { %v15949_v29 = vsel %vm58_vm0, %v15933_v28, 0 }
 0xa99   :  { %v16030_v33 = vand.u32 4294901760, %v15949_v29 }
 0xa9b   :  { %v16031_v34 = vsub.f32 %v15949_v29, %v16030_v33 }
 0xa9d   :  { %v16032_v59 = vand.u32 4294901760, %v16031_v34 }
 0xa9f   :  { %v16033_v56 = vsub.f32 %v16031_v34, %v16032_v59 }
 0xaa1   :  { %v16034_v0 = vand.u32 4294901760, %v16033_v56  ;;  %v25675_v56 = vpack.c.bf16 %v16716_v25, %v16704_v24 }
 0xaa3   :  { %25418 = vmatmul.mubr.f32.vlgmr.msra.gmra.mrb[30].mxu0 %v16034_v0  ;;  %v16727_v0 = vsub.f32 %v28862_v14, %v16726_v27  ;;  %25676 = vmatprep.subr.bf16.mxu1 %v25675_v56 }
 0xaa4   :  { %25630 = vmatpush3.bf16.msra.mxu0 %v25627_v40  ;;  %25428 = vmatprep.mubr.f32.mxu0 %v16020_v2 }
 0xaa5   :  { %25632 = vmatprep.subr.bf16.mxu0 %v25631_v46 }
 0xaa8   :  { %25634 = vmatpush3.bf16.msra.mxu0 %v25631_v46 }
 0xaa9   :  { %25636 = vmatprep.subr.bf16.mxu0 %v25635_v47 }
 0xaab   :  { %25429 = vmatmul.mubr.f32.vlgmr.msra.gmra.mrb[30].mxu0 %v16030_v33 }
 0xaac   :  { %25638 = vmatpush3.bf16.msra.mxu0 %v25635_v47  ;;  %25439 = vmatprep.mubr.f32.mxu0 %v16021_v22  ;;  %v16541_v22 = vld [vmem:[%s32097_s11 + $0x80] sm:$0xff] }
 0xaad   :  { %25640 = vmatprep.subr.bf16.mxu0 %v25639_v48  ;;  %v16615_v8 = vand.u32 4294901760, %v16541_v22 }
 0xaaf   :  { %v28872_v19 = vsub.f32 %v16541_v22, %v16615_v8 }
 0xab0   :  { %25642 = vmatpush3.bf16.msra.mxu0 %v25639_v48 }
 0xab1   :  { %25644 = vmatprep.subr.bf16.mxu0 %v28749_v26 }
 0xab3   :  { %25440 = vmatmul.mubr.f32.vlgmr.msra.gmra.mrb[30].mxu0 %v16031_v34  ;;  %v16732_v34 = vand.u32 4294901760, %v28872_v19 }
 0xab4   :  { %25646 = vmatpush3.bf16.msra.mxu0 %v28749_v26  ;;  %25450 = vmatprep.mubr.f32.mxu0 %v16022_v3  ;;  %v16549_v3 = vld [vmem:[%s32097_s11 + $0xc0] sm:$0xff] }
 0xab5   :  { %25648 = vmatprep.subr.bf16.mxu0 %v28759_v5  ;;  %v16619_v42 = vand.u32 4294901760, %v16549_v3 }
 0xab7   :  { %v28874_v20 = vsub.f32 %v16549_v3, %v16619_v42 }
 0xab8   :  { %25650 = vmatpush3.bf16.msra.mxu0 %v28759_v5 }
 0xab9   :  { %25652 = vmatprep.subr.bf16.mxu0 %v25651_v52  ;;  %v25689_v49 = vpack.c.bf16 %v28874_v20, %v28872_v19 }
 0xabb   :  { %25451 = vmatmul.mubr.f32.vlgmr.msra.gmra.mrb[30].mxu0 %v16032_v59  ;;  %v16744_v59 = vand.u32 4294901760, %v28874_v20 }
 0xabc   :  { %25654 = vmatpush3.bf16.msra.mxu0 %v25651_v52  ;;  %25461 = vmatprep.mubr.f32.mxu0 %v16020_v2  ;;  %v16525_v52 = vld [vmem:[%s32097_s11] sm:$0xff] }
 0xabd   :  { %25656 = vmatprep.subr.bf16.mxu0 %v25655_v15  ;;  %v16607_v53 = vand.u32 4294901760, %v16525_v52 }
 0xabf   :  { %v28836_v58 = vsub.f32 %v16525_v52, %v16607_v53 }
 0xac0   :  { %25658 = vmatpush3.bf16.msra.mxu0 %v25655_v15  ;;  %v16533_v15 = vld [vmem:[%s32097_s11 + $0x40] sm:$0xff] }
 0xac1   :  { %25660 = vmatprep.subr.bf16.mxu0 %v28749_v26  ;;  %v16611_v54 = vand.u32 4294901760, %v16533_v15  ;;  %v16708_v4 = vand.u32 4294901760, %v28836_v58 }
 0xac3   :  { %25462 = vmatmul.mubr.f32.vlgmr.msra.gmra.mrb[30].mxu0 %v16030_v33  ;;  %v28838_v39 = vsub.f32 %v16533_v15, %v16611_v54  ;;  %v16709_v17 = vsub.f32 %v28836_v58, %v16708_v4 }
 0xac4   :  { %25662 = vmatpush3.bf16.msra.mxu0 %v28749_v26  ;;  %25472 = vmatprep.mubr.f32.mxu0 %v16020_v2  ;;  %v27129_v26 = vld [vmem:[%s32350_s23 + $0x8] sm:$0xff]  ;;  %v16617_v2 = vand.u32 4294901760, %v16550_v61 }
 0xac5   :  { %25664 = vmatprep.subr.bf16.mxu0 %v28759_v5  ;;  %v16720_v7 = vand.u32 4294901760, %v28838_v39  ;;  %v16710_v29 = vand.u32 4294901760, %v16709_v17  ;;  %v28937_v17 = vpack.c.bf16 %v16744_v59, %v16732_v34 }
 0xac6   :  { %v28864_v16 = vsub.f32 %v16550_v61, %v16617_v2 }
 0xac7   :  { %v16721_v18 = vsub.f32 %v28838_v39, %v16720_v7 }
 0xac8   :  { %25666 = vmatpush3.bf16.msra.mxu0 %v28759_v5  ;;  %v27130_v5 = vld [vmem:[%s32350_s23] sm:$0xff]  ;;  %v16738_v28 = vand.u32 4294901760, %v28864_v16 }
 0xaca   :  { %v28935_v11 = vpack.c.bf16 %v16738_v28, %v16726_v27 }
 0xacb   :  { %25473 = vmatmul.mubr.f32.vlgmr.msra.gmra.mrb[30].mxu0 %v16030_v33  ;;  %v16722_v33 = vand.u32 4294901760, %v16721_v18 }
 0xacc   :  { %16677 = vmatprep.mubr.f32.mxu0 %v27180_v10 }
 0xb9e   :  { %v25474_v12 = vpop.f32.mrb[30].mxu0 }
 0xb9f   :  { %v26629_v30 = vadd.f32 %v25474_v12, %v22837_v21  ;;  %v16469_v23 = vpop.f32.mrb[31].mxu0  ;;  %v25677_v12 = vpack.c.bf16 %v16722_v33, %v16710_v29 }
 0xba0   :  { %v26630_v31 = vadd.f32 %v22837_v21, %v16469_v23  ;;  %v16739_v21 = vsub.f32 %v28864_v16, %v16738_v28  ;;  %v16745_v23 = vsub.f32 %v28874_v20, %v16744_v59  ;;  %v22838_v28 = vld [vmem:[%s32095_s9] ss:$0 sm:$0xff] }
 0xba1   :  { %v28797_v32 = vadd.f32 %v27129_v26, %v26629_v30  ;;  %v16733_v30 = vsub.f32 %v28872_v19, %v16732_v34  ;;  %25678 = vmatpush1.bf16.msra.mxu1 %v25677_v12  ;;  %v22839_v34 = vld [vmem:[%s32096_s10] ss:$0 sm:$0xff] }
 0xba2   :  { %v28802_v35 = vadd.f32 %v27130_v5, %v26630_v31  ;;  %v16728_v31 = vand.u32 4294901760, %v16727_v0  ;;  %v16740_v26 = vand.u32 4294901760, %v16739_v21  ;;  %v16544_v0 = vld [vmem:[%s32097_s11 + $0x98] sm:$0xff] }
 0xba3   :  { %32354 = vst [vmem:[#allocation8_spill] sm:$0xff] %v28797_v32  ;;  %v16486_v36 = vsel %vm58_vm0, %v28797_v32, 0.0  ;;  %v16734_v5 = vand.u32 4294901760, %v16733_v30  ;;  %v16552_v21 = vld [vmem:[%s32097_s11 + $0xd8] sm:$0xff] }
 0xba4   :  { %32355 = vst [vmem:[#allocation9_spill] sm:$0xff] %v28802_v35  ;;  %16487 = vadd.xlane.f32.xlu1 %v16486_v36  ;;  %v16483_v37 = vsel %vm58_vm0, %v28802_v35, 0.0  ;;  %v16746_v36 = vand.u32 4294901760, %v16745_v23  ;;  %v16551_v23 = vld [vmem:[%s32097_s11 + $0xd0] sm:$0xff] }
 0xba5   :  { %16484 = vadd.xlane.f32.xlu0 %v16483_v37  ;;  %v25679_v37 = vpack.c.bf16 %v16740_v26, %v16728_v31 }
 0xba7   :  { %25680 = vmatprep.subr.bf16.mxu1 %v25679_v37 }
 0xc31   :  { %v16488_v38 = vpop.xlane.xlu1 %16487 }
 0xc32   :  { %v16490_v40 = vmul.f32 0.03125, %v16488_v38  ;;  %v16485_v41 = vpop.xlane.xlu0 %16484  ;;  %v25681_v38 = vpack.c.bf16 %v16746_v36, %v16734_v5  ;;  %v17205_v5 = vand.u32 4294901760, %v16544_v0  ;;  %v17209_v36 = vand.u32 4294901760, %v16552_v21 }
 0xc33   :  { %v16489_v6 = vmul.f32 0.03125, %v16485_v41  ;;  %v25683_v41 = vpack.c.bf16 %v28834_v57, %v28832_v55 }
 0xc34   :  { %v28809_v43 = vsub.f32 %v28797_v32, %v16490_v40  ;;  %25682 = vmatpush1.bf16.msra.mxu1 %v25681_v38  ;;  %v28884_v40 = vpack.c.bf16 %v16609_v13, %v16605_v51  ;;  %v16536_v51 = vld [vmem:[%s32097_s11 + $0x58] sm:$0xff]  ;;  %v17197_v13 = vand.u32 4294901760, %v16528_v50  ;;  %v29031_v20 = vpack.c.bf16 %v17209_v36, %v17205_v5 }
 0xc35   :  { %v28812_v44 = vsub.f32 %v28802_v35, %v16489_v6  ;;  %v28888_v6 = vpack.c.bf16 %v16611_v54, %v16607_v53  ;;  %25684 = vmatprep.subr.bf16.mxu1 %v25683_v41  ;;  %v17201_v52 = vand.u32 4294901760, %v16536_v51 }
 0xc36   :  { %v16494_v47 = vmul.f32 %v28809_v43, %v28809_v43  ;;  %25668 = vmatprep.subr.bf16.mxu0 %v28884_v40  ;;  %v28912_v53 = vsub.f32 %v16528_v50, %v17197_v13 }
 0xc37   :  { %v16493_v45 = vmul.f32 %v28812_v44, %v28812_v44  ;;  %25670 = vmatpush1.bf16.msra.mxu0 %v28888_v6  ;;  %v28910_v15 = vpack.c.bf16 %v17201_v52, %v17197_v13  ;;  %v28914_v54 = vsub.f32 %v16536_v51, %v17201_v52  ;;  %v17211_v13 = vand.u32 4294901760, %v16551_v23 }
 0xc38   :  { %v16498_v48 = vsel %vm58_vm0, %v16494_v47, 0.0  ;;  %v25687_v47 = vpack.c.bf16 %v28864_v16, %v28862_v14  ;;  %v17294_v60 = vand.u32 4294901760, %v28912_v53 }
 0xc39   :  { %v16495_v46 = vsel %vm58_vm0, %v16493_v45, 0.0  ;;  %v25685_v45 = vpack.c.bf16 %v28838_v39, %v28836_v58  ;;  %v17306_v61 = vand.u32 4294901760, %v28914_v54  ;;  %v25731_v18 = vpack.c.bf16 %v28914_v54, %v28912_v53 }
 0xc3a   :  { %16496 = vadd.xlane.f32.xlu0 %v16495_v46  ;;  %v28894_v46 = vpack.c.bf16 %v16617_v2, %v16613_v1  ;;  %v17295_v1 = vsub.f32 %v28912_v53, %v17294_v60 }
 0xc3b   :  { %v17307_v2 = vsub.f32 %v28914_v54, %v17306_v61  ;;  %v28941_v55 = vpack.c.bf16 %v17306_v61, %v17294_v60  ;;  %v28976_v61 = vsub.f32 %v16544_v0, %v17205_v5 }
 0xc3c   :  { %25672 = vmatprep.subr.bf16.mxu0 %v28894_v46  ;;  %v17296_v22 = vand.u32 4294901760, %v17295_v1  ;;  %v28978_v1 = vsub.f32 %v16552_v21, %v17209_v36  ;;  %v29078_v36 = vld [vmem:[%s32097_s11 + $0x20] sm:$0xff] }
 0xc3d   :  { %v17308_v3 = vand.u32 4294901760, %v17307_v2  ;;  %v17318_v58 = vand.u32 4294901760, %v28976_v61 }
 0xc3e   :  { %16499 = vadd.xlane.f32.xlu0 %v16498_v48  ;;  %v28898_v48 = vpack.c.bf16 %v16619_v42, %v16615_v8  ;;  %v28925_v8 = vpack.c.bf16 %v16714_v63, %v16702_v62  ;;  %v28931_v42 = vpack.c.bf16 %v16720_v7, %v16708_v4  ;;  %v16527_v4 = vld [vmem:[%s32097_s11 + $0x10] sm:$0xff]  ;;  %v17330_v39 = vand.u32 4294901760, %v28978_v1 }
 0xc3f   :  { %v28933_v9 = vpack.c.bf16 %v17308_v3, %v17296_v22  ;;  %v16535_v7 = vld [vmem:[%s32097_s11 + $0x50] sm:$0xff]  ;;  %v17199_v59 = vand.u32 4294901760, %v16527_v4 }
 0xc40   :  { %25674 = vmatpush1.bf16.msra.mxu0 %v28898_v48  ;;  %v17203_v56 = vand.u32 4294901760, %v16535_v7 }
 0xc41   :  { %25716 = vmatprep.subr.bf16.mxu0 %v28910_v15  ;;  %v28969_v37 = vsub.f32 %v16527_v4, %v17199_v59 }
 0xc42   :  { %v28971_v38 = vsub.f32 %v16535_v7, %v17203_v56 }
 0xc43   :  { %v17300_v2 = vand.u32 4294901760, %v28969_v37 }
 0xc45   :  { %v17301_v14 = vsub.f32 %v28969_v37, %v17300_v2 }
 0xcc7   :  { %v16497_v57 = vpop.xlane.xlu0 %16496 }
 0xcc8   :  { %v16501_v62 = vmul.f32 0.03125, %v16497_v57  ;;  %v28992_v57 = vsub.f32 %v16551_v23, %v17211_v13  ;;  %v29069_v23 = vld [vmem:[%s32097_s11 + $0x68] sm:$0xff] }
 0xcca   :  { %v16503_v63 = vadd.f32 1e-05, %v16501_v62  ;;  %v17312_v62 = vand.u32 4294901760, %v28971_v38  ;;  %v17336_v4 = vand.u32 4294901760, %v28992_v57 }
 0xccb   :  { %v16500_v24 = vpop.xlane.xlu0 %16499 }
 0xccc   :  { %27125 = vrsqrt.f32 %v16503_v63  ;;  %v16502_v25 = vmul.f32 0.03125, %v16500_v24  ;;  %v17313_v16 = vsub.f32 %v28971_v38, %v17312_v62  ;;  %v17337_v0 = vsub.f32 %v28992_v57, %v17336_v4 }
 0xcce   :  { %v16504_v29 = vadd.f32 1e-05, %v16502_v25  ;;  %v17338_v5 = vand.u32 4294901760, %v17337_v0 }
 0xcd0   :  { %27127 = vrsqrt.f32 %v16504_v29  ;;  %v29011_v29 = vpack.c.bf16 %v17203_v56, %v17199_v59  ;;  %v17314_v59 = vand.u32 4294901760, %v17313_v16  ;;  %v29114_v16 = vld [vmem:[%s32097_s11 + $0xe0] sm:$0xff] }
 0xcd1   :  { %v17803_v0 = vand.u32 4294901760, %v29114_v16 }
 0xcd3   :  { %v29163_v54 = vsub.f32 %v29114_v16, %v17803_v0 }
 0xcd6   :  { %v27126_v27 = vpop.eup %27125 }
 0xcd7   :  { %v16507_v33 = vmul.f32 %v27126_v27, %v28812_v44  ;;  %v16543_v44 = vld [vmem:[%s32097_s11 + $0x90] sm:$0xff]  ;;  %v17331_v27 = vsub.f32 %v28978_v1, %v17330_v39 }
 0xcd8   :  { %v17207_v51 = vand.u32 4294901760, %v16543_v44 }
 0xcd9   :  { %v16515_v12 = vmul.f32 %v22838_v28, %v16507_v33 }
 0xcda   :  { %v27128_v30 = vpop.eup %27127  ;;  %v28990_v3 = vsub.f32 %v16543_v44, %v17207_v51  ;;  %v29043_v33 = vpack.c.bf16 %v17211_v13, %v17207_v51  ;;  %v29064_v44 = vld [vmem:[%s32097_s11 + $0x28] sm:$0xff]  ;;  %v17793_v13 = vand.u32 4294901760, %v29069_v23 }
 0xcdb   :  { %v16523_v31 = vadd.f32 %v22839_v34, %v16515_v12  ;;  %v16508_v26 = vmul.f32 %v27128_v30, %v28809_v43  ;;  %v17332_v30 = vand.u32 4294901760, %v17331_v27  ;;  %v17789_v51 = vand.u32 4294901760, %v29064_v44 }
 0xcdd   :  { %v16600_v41 = vsel %vm58_vm0, %v16523_v31, 0  ;;  %v16516_v50 = vmul.f32 %v22838_v28, %v16508_v26 }
 0xcde   :  { %v28974_v52 = vand.u32 4294901760, %v16600_v41 }
 0xcdf   :  { %v16524_v60 = vadd.f32 %v22839_v34, %v16516_v50  ;;  %v17302_v34 = vand.u32 4294901760, %v17301_v14  ;;  %v29109_v14 = vld [vmem:[%s32097_s11 + $0xa0] sm:$0xff] }
 0xce0   :  { %v28981_v43 = vsub.f32 %v16600_v41, %v28974_v52  ;;  %16806 = vmatmul.mubr.f32.vlgmr.msra.gmra.mrb[38].mxu1 %v28974_v52  ;;  %v29083_v41 = vld [vmem:[%s32097_s11 + $0x60] sm:$0xff] }
 0xce1   :  { %v16603_v22 = vsel %vm58_vm0, %v16524_v60, 0  ;;  %25686 = vmatpush1.bf16.msra.mxu1 %v25685_v45  ;;  %16811 = vmatprep.mubr.f32.mxu1 %v27180_v10  ;;  %v25725_v31 = vpack.c.bf16 %v17314_v59, %v17302_v34  ;;  %v29094_v60 = vld [vmem:[%s32097_s11 + $0xa8] sm:$0xff]  ;;  %v25733_v34 = vpack.c.bf16 %v28971_v38, %v28969_v37  ;;  %v25751_v37 = vpack.c.bf16 %v17330_v39, %v17318_v58 }
 0xce2   :  { %v28995_v63 = vand.u32 4294901760, %v16603_v22  ;;  %25688 = vmatprep.subr.bf16.mxu1 %v25687_v47  ;;  %v29001_v24 = vand.u32 4294901760, %v28981_v43  ;;  %v17324_v47 = vand.u32 4294901760, %v28990_v3  ;;  %v17797_v27 = vand.u32 4294901760, %v29094_v60 }
 0xce4   :  { %v29006_v45 = vsub.f32 %v16603_v22, %v28995_v63  ;;  %16813 = vmatmul.mubr.f32.gmra.mrb[40].mxu1 %v28995_v63  ;;  %v16681_v25 = vsub.f32 %v28981_v43, %v29001_v24  ;;  %v17325_v56 = vsub.f32 %v28990_v3, %v17324_v47  ;;  %v17791_v22 = vand.u32 4294901760, %v29078_v36 }
 0xce5   :  { %25690 = vmatpush1.bf16.msra.mxu1 %v25689_v49  ;;  %16899 = vmatprep.mubr.f32.mxu1 %v27180_v10  ;;  %v17319_v49 = vsub.f32 %v28976_v61, %v17318_v58 }
 0xce6   :  { %v29025_v7 = vand.u32 4294901760, %v16681_v25  ;;  %25692 = vmatprep.subr.bf16.mxu1 %v28884_v40  ;;  %v29029_v19 = vand.u32 4294901760, %v29006_v45  ;;  %v17326_v26 = vand.u32 4294901760, %v17325_v56  ;;  %v17795_v25 = vand.u32 4294901760, %v29083_v41 }
 0xce7   :  { %v17320_v12 = vand.u32 4294901760, %v17319_v49  ;;  %v29121_v49 = vsub.f32 %v29069_v23, %v17793_v13  ;;  %v17799_v56 = vand.u32 4294901760, %v29109_v14 }
 0xce8   :  { %16683 = vmatmul.mubr.f32.vlgmr.msra.gmra.mrb[32].mxu0 %v29025_v7  ;;  %16902 = vmatmul.mubr.f32.vlgmr.msra.gmra.mrb[38].mxu1 %v28981_v43  ;;  %v16692_v28 = vsub.f32 %v29006_v45, %v29029_v19  ;;  %v29134_v59 = vsub.f32 %v29083_v41, %v17795_v25 }
 0xce9   :  { %25694 = vmatpush1.bf16.msra.mxu1 %v28888_v6  ;;  %25718 = vmatpush1.bf16.msra.mxu0 %v29011_v29  ;;  %v25727_v50 = vpack.c.bf16 %v17332_v30, %v17320_v12  ;;  %v25735_v12 = vpack.c.bf16 %v28978_v1, %v28976_v61  ;;  %v17898_v23 = vand.u32 4294901760, %v29121_v49  ;;  %v29160_v53 = vsub.f32 %v29109_v14, %v17799_v56 }
 0xcea   :  { %16688 = vmatprep.mubr.f32.mxu0 %v27180_v10  ;;  %16907 = vmatprep.mubr.f32.mxu1 %v27180_v10  ;;  %v29055_v21 = vand.u32 4294901760, %v16692_v28  ;;  %v29207_v14 = vpack.c.bf16 %v17803_v0, %v17799_v56  ;;  %v25753_v61 = vpack.c.bf16 %v17336_v4, %v17324_v47 }
 0xceb   :  { %25696 = vmatprep.subr.bf16.mxu1 %v28894_v46  ;;  %25720 = vmatprep.subr.bf16.mxu0 %v29031_v20 }
 0xcec   :  { %16694 = vmatmul.mubr.f32.gmra.mrb[34].mxu0 %v29055_v21  ;;  %16910 = vmatmul.mubr.f32.gmra.mrb[40].mxu1 %v29006_v45 }
 0xced   :  { %25698 = vmatpush1.bf16.msra.mxu1 %v28898_v48  ;;  %25722 = vmatpush1.bf16.msra.mxu0 %v29043_v33 }
 0xcee   :  { %16988 = vmatprep.mubr.f32.mxu1 %v27180_v10  ;;  %17269 = vmatprep.mubr.f32.mxu0 %v27180_v10 }
 0xcef   :  { %25700 = vmatprep.subr.bf16.mxu1 %v28925_v8  ;;  %25724 = vmatprep.subr.bf16.mxu0 %v28933_v9  ;;  %v29099_v8 = vld [vmem:[%s32097_s11 + $0xe8] sm:$0xff]  ;;  %v25729_v9 = vpack.c.bf16 %v17338_v5, %v17326_v26  ;;  %v29169_v26 = vpack.c.bf16 %v17793_v13, %v17789_v51  ;;  %v17899_v5 = vsub.f32 %v29121_v49, %v17898_v23  ;;  %v17916_v13 = vand.u32 4294901760, %v29160_v53 }
 0xcf0   :  { %16992 = vmatmul.mubr.f32.vlgmr.msra.gmra.mrb[38].mxu1 %v29001_v24  ;;  %17275 = vmatmul.mubr.f32.vlgmr.msra.gmra.mrb[36].mxu0 %v29025_v7  ;;  %v17801_v28 = vand.u32 4294901760, %v29099_v8 }
 0xcf1   :  { %25702 = vmatpush1.bf16.msra.mxu1 %v28931_v42  ;;  %25726 = vmatpush1.bf16.msra.mxu0 %v25725_v31  ;;  %v29118_v42 = vsub.f32 %v29064_v44, %v17789_v51  ;;  %v17904_v31 = vand.u32 4294901760, %v29134_v59 }
 0xcf2   :  { %16997 = vmatprep.mubr.f32.mxu1 %v27180_v10  ;;  %17280 = vmatprep.mubr.f32.mxu0 %v27180_v10  ;;  %v29150_v30 = vsub.f32 %v29099_v8, %v17801_v28  ;;  %v29195_v8 = vpack.c.bf16 %v17801_v28, %v17797_v27  ;;  %v17917_v28 = vsub.f32 %v29160_v53, %v17916_v13 }
 0xcf3   :  { %25704 = vmatprep.subr.bf16.mxu1 %v28935_v11  ;;  %25728 = vmatprep.subr.bf16.mxu0 %v25727_v50  ;;  %v29131_v11 = vsub.f32 %v29078_v36, %v17791_v22  ;;  %v17886_v44 = vand.u32 4294901760, %v29118_v42  ;;  %v29182_v50 = vpack.c.bf16 %v17795_v25, %v17791_v22  ;;  %v17905_v51 = vsub.f32 %v29134_v59, %v17904_v31 }
 0xcf4   :  { %17001 = vmatmul.mubr.f32.gmra.mrb[40].mxu1 %v29029_v19  ;;  %17286 = vmatmul.mubr.f32.gmra.mrb[38].mxu0 %v29055_v21  ;;  %v17922_v41 = vand.u32 4294901760, %v29150_v30 }
 0xcf5   :  { %25706 = vmatpush1.bf16.msra.mxu1 %v28937_v17  ;;  %25730 = vmatpush1.bf16.msra.mxu0 %v25729_v9  ;;  %v29147_v17 = vsub.f32 %v29094_v60, %v17797_v27  ;;  %v17928_v60 = vand.u32 4294901760, %v29163_v54  ;;  %v17900_v9 = vand.u32 4294901760, %v17899_v5  ;;  %v17906_v27 = vand.u32 4294901760, %v17905_v51 }
 0xcf6   :  { %17095 = vmatprep.mubr.f32.mxu1 %v27180_v10  ;;  %17396 = vmatprep.mubr.f32.mxu0 %v27180_v10  ;;  %v17923_v25 = vsub.f32 %v29150_v30, %v17922_v41  ;;  %v25749_v5 = vpack.c.bf16 %v17312_v62, %v17300_v2  ;;  %v17918_v51 = vand.u32 4294901760, %v17917_v28 }
 0xcf7   :  { %25708 = vmatprep.subr.bf16.mxu1 %v28884_v40  ;;  %25732 = vmatprep.subr.bf16.mxu0 %v25731_v18  ;;  %v25737_v40 = vpack.c.bf16 %v28992_v57, %v28990_v3  ;;  %v17892_v18 = vand.u32 4294901760, %v29131_v11  ;;  %v17910_v36 = vand.u32 4294901760, %v29147_v17  ;;  %v29288_v3 = vld [vmem:[%s32097_s11 + $0xf0] sm:$0xff] }
 0xcf8   :  { %17097 = vmatmul.mubr.f32.vlgmr.msra.gmra.mrb[38].mxu1 %v28974_v52  ;;  %17398 = vmatmul.mubr.f32.vlgmr.msra.gmra.mrb[36].mxu0 %v28974_v52 }
 0xcf9   :  { %25710 = vmatpush1.bf16.msra.mxu1 %v28888_v6  ;;  %25734 = vmatpush1.bf16.msra.mxu0 %v25733_v34  ;;  %v17887_v6 = vsub.f32 %v29118_v42, %v17886_v44  ;;  %v17911_v22 = vsub.f32 %v29147_v17, %v17910_v36  ;;  %v17929_v34 = vsub.f32 %v29163_v54, %v17928_v60 }
 0xcfa   :  { %17102 = vmatprep.mubr.f32.mxu1 %v27180_v10  ;;  %17403 = vmatprep.mubr.f32.mxu0 %v27180_v10 }
 0xcfb   :  { %25712 = vmatprep.subr.bf16.mxu1 %v28894_v46  ;;  %25736 = vmatprep.subr.bf16.mxu0 %v25735_v12  ;;  %v17893_v46 = vsub.f32 %v29131_v11, %v17892_v18  ;;  %v17912_v0 = vand.u32 4294901760, %v17911_v22  ;;  %v17924_v12 = vand.u32 4294901760, %v17923_v25  ;;  %v29249_v22 = vld [vmem:[%s32097_s11 + $0x70] sm:$0xff]  ;;  %v29263_v25 = vld [vmem:[%s32097_s11 + $0xb8] sm:$0xff] }
 0xcfc   :  { %17104 = vmatmul.mubr.f32.gmra.mrb[40].mxu1 %v28995_v63  ;;  %17405 = vmatmul.mubr.f32.gmra.mrb[38].mxu0 %v28995_v63  ;;  %v18387_v39 = vand.u32 4294901760, %v29249_v22  ;;  %v18389_v4 = vand.u32 4294901760, %v29263_v25 }
 0xcfd   :  { %25714 = vmatpush1.bf16.msra.mxu1 %v28898_v48  ;;  %25738 = vmatpush1.bf16.msra.mxu0 %v25737_v40  ;;  %v17888_v48 = vand.u32 4294901760, %v17887_v6  ;;  %v17894_v16 = vand.u32 4294901760, %v17893_v46  ;;  %v29226_v40 = vld [vmem:[%s32097_s11 + $0x38] sm:$0xff]  ;;  %v25775_v38 = vpack.c.bf16 %v17924_v12, %v17912_v0 }
 0xcfe   :  { %17182 = vmatprep.mubr.f32.mxu1 %v27180_v10  ;;  %17491 = vmatprep.mubr.f32.mxu0 %v27180_v10  ;;  %v29231_v6 = vld [vmem:[%s32097_s11 + $0x78] sm:$0xff]  ;;  %v18381_v2 = vand.u32 4294901760, %v29226_v40  ;;  %v29306_v0 = vsub.f32 %v29249_v22, %v18387_v39 }
 0xcff   :  { %25740 = vmatprep.subr.bf16.mxu0 %v28910_v15  ;;  %25764 = vmatprep.subr.bf16.mxu1 %v29169_v26  ;;  %v25771_v56 = vpack.c.bf16 %v17900_v9, %v17888_v48  ;;  %v25773_v46 = vpack.c.bf16 %v17906_v27, %v17894_v16  ;;  %v17930_v48 = vand.u32 4294901760, %v17929_v34  ;;  %v29244_v9 = vld [vmem:[%s32097_s11 + $0x30] sm:$0xff]  ;;  %v18385_v62 = vand.u32 4294901760, %v29231_v6 }
 0xd00   :  { %17184 = vmatmul.mubr.f32.vlgmr.msra.gmra.mrb[38].mxu1 %v28974_v52  ;;  %17494 = vmatmul.mubr.f32.vlgmr.msra.gmra.mrb[36].mxu0 %v28981_v43  ;;  %v18383_v58 = vand.u32 4294901760, %v29244_v9  ;;  %v25779_v16 = vpack.c.bf16 %v29121_v49, %v29118_v42  ;;  %v29283_v27 = vld [vmem:[%s32097_s11 + $0xb0] sm:$0xff]  ;;  %v29291_v57 = vsub.f32 %v29226_v40, %v18381_v2  ;;  %v25781_v34 = vpack.c.bf16 %v29134_v59, %v29131_v11 }
 0xd01   :  { %25742 = vmatpush1.bf16.msra.mxu0 %v29011_v29  ;;  %25766 = vmatpush1.bf16.msra.mxu1 %v29182_v50  ;;  %v25777_v1 = vpack.c.bf16 %v17930_v48, %v17918_v51  ;;  %v29294_v47 = vsub.f32 %v29231_v6, %v18385_v62  ;;  %v18391_v12 = vand.u32 4294901760, %v29283_v27  ;;  %v18395_v40 = vand.u32 4294901760, %v29288_v3 }
 0xd02   :  { %17189 = vmatprep.mubr.f32.mxu1 %v27180_v10  ;;  %17499 = vmatprep.mubr.f32.mxu0 %v27180_v10  ;;  %v25783_v6 = vpack.c.bf16 %v29150_v30, %v29147_v17  ;;  %v18478_v51 = vand.u32 4294901760, %v29291_v57  ;;  %v25801_v11 = vpack.c.bf16 %v17928_v60, %v17916_v13 }
 0xd03   :  { %25744 = vmatprep.subr.bf16.mxu0 %v29031_v20  ;;  %25768 = vmatprep.subr.bf16.mxu1 %v29195_v8  ;;  %v18490_v48 = vand.u32 4294901760, %v29294_v47  ;;  %v29332_v22 = vsub.f32 %v29288_v3, %v18395_v40  ;;  %v25827_v17 = vpack.c.bf16 %v29294_v47, %v29291_v57 }
 0xd04   :  { %17191 = vmatmul.mubr.f32.gmra.mrb[40].mxu1 %v28995_v63  ;;  %17502 = vmatmul.mubr.f32.gmra.mrb[38].mxu0 %v29006_v45 }
 0xd05   :  { %25746 = vmatpush1.bf16.msra.mxu0 %v29043_v33  ;;  %25770 = vmatpush1.bf16.msra.mxu1 %v29207_v14 }
 0xd06   :  { %17580 = vmatprep.mubr.f32.mxu0 %v27180_v10  ;;  %17861 = vmatprep.mubr.f32.mxu1 %v27180_v10 }
 0xd07   :  { %25748 = vmatprep.subr.bf16.mxu0 %v28941_v55  ;;  %25772 = vmatprep.subr.bf16.mxu1 %v25771_v56  ;;  %v29268_v55 = vld [vmem:[%s32097_s11 + $0xf8] sm:$0xff]  ;;  %v29303_v56 = vsub.f32 %v29244_v9, %v18383_v58  ;;  %v25785_v9 = vpack.c.bf16 %v29163_v54, %v29160_v53  ;;  %v25843_v53 = vpack.c.bf16 %v18490_v48, %v18478_v51 }
 0xd08   :  { %17584 = vmatmul.mubr.f32.vlgmr.msra.gmra.mrb[36].mxu0 %v29001_v24  ;;  %17867 = vmatmul.mubr.f32.vlgmr.msra.gmra.mrb[42].mxu1 %v29025_v7  ;;  %v18393_v28 = vand.u32 4294901760, %v29268_v55 }
 0xd09   :  { %25750 = vmatpush1.bf16.msra.mxu0 %v25749_v5  ;;  %25774 = vmatpush1.bf16.msra.mxu1 %v25773_v46  ;;  %v29316_v5 = vsub.f32 %v29263_v25, %v18389_v4  ;;  %v29338_v25 = vpack.c.bf16 %v18385_v62, %v18381_v2  ;;  %v29351_v2 = vpack.c.bf16 %v18387_v39, %v18383_v58 }
 0xd0a   :  { %17589 = vmatprep.mubr.f32.mxu0 %v27180_v10  ;;  %17872 = vmatprep.mubr.f32.mxu1 %v27180_v10  ;;  %v29319_v46 = vsub.f32 %v29268_v55, %v18393_v28  ;;  %v18491_v55 = vsub.f32 %v29294_v47, %v18490_v48  ;;  %v29364_v58 = vpack.c.bf16 %v18393_v28, %v18389_v4 }
 0xd0b   :  { %25752 = vmatprep.subr.bf16.mxu0 %v25751_v37  ;;  %25776 = vmatprep.subr.bf16.mxu1 %v25775_v38  ;;  %v18484_v37 = vand.u32 4294901760, %v29303_v56  ;;  %v18496_v38 = vand.u32 4294901760, %v29306_v0  ;;  %v29376_v4 = vpack.c.bf16 %v18395_v40, %v18391_v12 }
 0xd0c   :  { %17593 = vmatmul.mubr.f32.gmra.mrb[38].mxu0 %v29029_v19  ;;  %17878 = vmatmul.mubr.f32.gmra.mrb[44].mxu1 %v29055_v21  ;;  %v18492_v39 = vand.u32 4294901760, %v18491_v55  ;;  %v25831_v30 = vpack.c.bf16 %v29319_v46, %v29316_v5 }
 0xd0d   :  { %25754 = vmatpush1.bf16.msra.mxu0 %v25753_v61  ;;  %25778 = vmatpush1.bf16.msra.mxu1 %v25777_v1  ;;  %v18502_v61 = vand.u32 4294901760, %v29316_v5  ;;  %v18514_v1 = vand.u32 4294901760, %v29319_v46  ;;  %v18497_v62 = vsub.f32 %v29306_v0, %v18496_v38 }
 0xd0e   :  { %17687 = vmatprep.mubr.f32.mxu0 %v27180_v10  ;;  %17988 = vmatprep.mubr.f32.mxu1 %v27180_v10 }
 0xd0f   :  { %25756 = vmatprep.subr.bf16.mxu0 %v28910_v15  ;;  %25780 = vmatprep.subr.bf16.mxu1 %v25779_v16  ;;  %v29329_v15 = vsub.f32 %v29283_v27, %v18391_v12  ;;  %v32110_v27 = vand.u32 4294901760, %v29332_v22  ;;  %v18503_v3 = vsub.f32 %v29316_v5, %v18502_v61  ;;  %v25795_v12 = vpack.c.bf16 %v17898_v23, %v17886_v44 }
 0xd10   :  { %17689 = vmatmul.mubr.f32.vlgmr.msra.gmra.mrb[36].mxu0 %v28974_v52  ;;  %17990 = vmatmul.mubr.f32.vlgmr.msra.gmra.mrb[42].mxu1 %v28974_v52  ;;  %v25799_v44 = vpack.c.bf16 %v17922_v41, %v17910_v36  ;;  %v25847_v54 = vpack.c.bf16 %v18514_v1, %v18502_v61  ;;  %v18990_v36 = vld [vmem:[%s32099_s13 + $0x8] sm:$0xff] }
 0xd11   :  { %25758 = vmatpush1.bf16.msra.mxu0 %v29011_v29  ;;  %25782 = vmatpush1.bf16.msra.mxu1 %v25781_v34  ;;  %v18479_v29 = vsub.f32 %v29291_v57, %v18478_v51  ;;  %v18508_v16 = vand.u32 4294901760, %v29329_v15  ;;  %v18515_v34 = vsub.f32 %v29319_v46, %v18514_v1  ;;  %v18504_v55 = vand.u32 4294901760, %v18503_v3 }
 0xd12   :  { %17694 = vmatprep.mubr.f32.mxu0 %v27180_v10  ;;  %17995 = vmatprep.mubr.f32.mxu1 %v27180_v10  ;;  %v19128_v60 = vand.u32 4294901760, %v18990_v36 }
 0xd13   :  { %25760 = vmatprep.subr.bf16.mxu0 %v29031_v20  ;;  %25784 = vmatprep.subr.bf16.mxu1 %v25783_v6  ;;  %v18485_v20 = vsub.f32 %v29303_v56, %v18484_v37  ;;  %v18498_v6 = vand.u32 4294901760, %v18497_v62  ;;  %v25797_v62 = vpack.c.bf16 %v17904_v31, %v17892_v18  ;;  %v19006_v18 = vld [vmem:[%s32099_s13 + $0x88] sm:$0xff]  ;;  %v32356_v31 = vand.u32 4294901760, %v29332_v22 }
 0xd14   :  { %17696 = vmatmul.mubr.f32.gmra.mrb[38].mxu0 %v28995_v63  ;;  %17997 = vmatmul.mubr.f32.gmra.mrb[44].mxu1 %v28995_v63 }
 0xd15   :  { %25762 = vmatpush1.bf16.msra.mxu0 %v29043_v33  ;;  %25786 = vmatpush1.bf16.msra.mxu1 %v25785_v9  ;;  %v18480_v33 = vand.u32 4294901760, %v18479_v29  ;;  %v18486_v28 = vand.u32 4294901760, %v18485_v20  ;;  %v18509_v9 = vsub.f32 %v29329_v15, %v18508_v16  ;;  %v18521_v29 = vsub.f32 %v29332_v22, %v32110_v27 }
 0xd16   :  { %17774 = vmatprep.mubr.f32.mxu0 %v27180_v10  ;;  %18083 = vmatprep.mubr.f32.mxu1 %v27180_v10  ;;  %v18516_v20 = vand.u32 4294901760, %v18515_v34  ;;  %v19012_v34 = vld [vmem:[%s32099_s13 + $0xb8] sm:$0xff] }
 0xd17   :  { %25788 = vmatprep.subr.bf16.mxu1 %v29169_v26  ;;  %25812 = vmatprep.subr.bf16.mxu0 %v29338_v25  ;;  %v25819_v40 = vpack.c.bf16 %v18492_v39, %v18480_v33  ;;  %v25821_v42 = vpack.c.bf16 %v18498_v6, %v18486_v28  ;;  %v18510_v27 = vand.u32 4294901760, %v18509_v9  ;;  %v18522_v49 = vand.u32 4294901760, %v18521_v29 }
 0xd18   :  { %17776 = vmatmul.mubr.f32.vlgmr.msra.gmra.mrb[36].mxu0 %v28974_v52  ;;  %18086 = vmatmul.mubr.f32.vlgmr.msra.gmra.mrb[42].mxu1 %v28981_v43  ;;  %v25823_v23 = vpack.c.bf16 %v18516_v20, %v18504_v55 }
 0xd19   :  { %25790 = vmatpush1.bf16.msra.mxu1 %v29182_v50  ;;  %25814 = vmatpush1.bf16.msra.mxu0 %v29351_v2  ;;  %v25825_v59 = vpack.c.bf16 %v18522_v49, %v18510_v27  ;;  %v18994_v27 = vld [vmem:[%s32099_s13 + $0x28] sm:$0xff] }
 0xd1a   :  { %17781 = vmatprep.mubr.f32.mxu0 %v27180_v10  ;;  %18091 = vmatprep.mubr.f32.mxu1 %v27180_v10 }
 0xd1b   :  { %25792 = vmatprep.subr.bf16.mxu1 %v29195_v8  ;;  %25816 = vmatprep.subr.bf16.mxu0 %v29364_v58 }
 0xd1c   :  { %17783 = vmatmul.mubr.f32.gmra.mrb[38].mxu0 %v28995_v63  ;;  %18094 = vmatmul.mubr.f32.gmra.mrb[44].mxu1 %v29006_v45 }
 0xd1d   :  { %25794 = vmatpush1.bf16.msra.mxu1 %v29207_v14  ;;  %25818 = vmatpush1.bf16.msra.mxu0 %v29376_v4 }
 0xd1e   :  { %18172 = vmatprep.mubr.f32.mxu1 %v27180_v10  ;;  %18453 = vmatprep.mubr.f32.mxu0 %v27180_v10 }
 0xd1f   :  { %25796 = vmatprep.subr.bf16.mxu1 %v25795_v12  ;;  %25820 = vmatprep.subr.bf16.mxu0 %v25819_v40 }
 0xd20   :  { %18176 = vmatmul.mubr.f32.vlgmr.msra.gmra.mrb[42].mxu1 %v29001_v24  ;;  %18459 = vmatmul.mubr.f32.vlgmr.msra.gmra.mrb[40].mxu0 %v29025_v7  ;;  %v25829_v7 = vpack.c.bf16 %v29306_v0, %v29303_v56  ;;  %v18991_v56 = vld [vmem:[%s32099_s13 + $0x10] sm:$0xff] }
 0xd21   :  { %25798 = vmatpush1.bf16.msra.mxu1 %v25797_v62  ;;  %25822 = vmatpush1.bf16.msra.mxu0 %v25821_v42  ;;  %v19131_v46 = vand.u32 4294901760, %v18991_v56  ;;  %v19194_v62 = vand.u32 4294901760, %v19012_v34 }
 0xd22   :  { %18181 = vmatprep.mubr.f32.mxu1 %v27180_v10  ;;  %18464 = vmatprep.mubr.f32.mxu0 %v27180_v10 }
 0xd23   :  { %25800 = vmatprep.subr.bf16.mxu1 %v25799_v44  ;;  %25824 = vmatprep.subr.bf16.mxu0 %v25823_v23  ;;  %v29536_v28 = vsub.f32 %v18991_v56, %v19131_v46  ;;  %v18996_v44 = vld [vmem:[%s32099_s13 + $0x38] sm:$0xff] }
 0xd24   :  { %18185 = vmatmul.mubr.f32.gmra.mrb[44].mxu1 %v29029_v19  ;;  %18470 = vmatmul.mubr.f32.gmra.mrb[42].mxu0 %v29055_v21  ;;  %v25833_v21 = vpack.c.bf16 %v29332_v22, %v29329_v15  ;;  %v29503_v15 = vsub.f32 %v18990_v36, %v19128_v60  ;;  %v19000_v56 = vld [vmem:[%s32099_s13 + $0x58] sm:$0xff] }
 0xd25   :  { %25802 = vmatpush1.bf16.msra.mxu1 %v25801_v11  ;;  %25826 = vmatpush1.bf16.msra.mxu0 %v25825_v59  ;;  %v19268_v35 = vand.u32 4294901760, %v29536_v28 }
 0xd26   :  { %18279 = vmatprep.mubr.f32.mxu1 %v27180_v10  ;;  %18580 = vmatprep.mubr.f32.mxu0 %v27180_v10 }
 0xd27   :  { %25804 = vmatprep.subr.bf16.mxu1 %v29169_v26  ;;  %25828 = vmatprep.subr.bf16.mxu0 %v25827_v17  ;;  %v25849_v26 = vpack.c.bf16 %v32356_v31, %v18508_v16  ;;  %v18993_v16 = vld [vmem:[%s32099_s13 + $0x20] sm:$0xff] }
 0xd28   :  { %18281 = vmatmul.mubr.f32.vlgmr.msra.gmra.mrb[42].mxu1 %v28974_v52  ;;  %18582 = vmatmul.mubr.f32.vlgmr.msra.gmra.mrb[40].mxu0 %v28974_v52  ;;  %v19137_v9 = vand.u32 4294901760, %v18993_v16  ;;  %v19013_v17 = vld [vmem:[%s32099_s13 + $0xc0] sm:$0xff] }
 0xd29   :  { %25806 = vmatpush1.bf16.msra.mxu1 %v29182_v50  ;;  %25830 = vmatpush1.bf16.msra.mxu0 %v25829_v7  ;;  %v19176_v50 = vand.u32 4294901760, %v19006_v18  ;;  %v19014_v7 = vld [vmem:[%s32099_s13 + $0xc8] sm:$0xff] }
 0xd2a   :  { %18286 = vmatprep.mubr.f32.mxu1 %v27180_v10  ;;  %18587 = vmatprep.mubr.f32.mxu0 %v27180_v10  ;;  %v29568_v59 = vsub.f32 %v18993_v16, %v19137_v9  ;;  %v19200_v36 = vand.u32 4294901760, %v19014_v7 }
 0xd2b   :  { %25808 = vmatprep.subr.bf16.mxu1 %v29195_v8  ;;  %25832 = vmatprep.subr.bf16.mxu0 %v25831_v30  ;;  %v19007_v8 = vld [vmem:[%s32099_s13 + $0x90] sm:$0xff]  ;;  %v29498_v5 = vsub.f32 %v19006_v18, %v19176_v50  ;;  %v19146_v18 = vand.u32 4294901760, %v18996_v44 }
 0xd2c   :  { %18288 = vmatmul.mubr.f32.gmra.mrb[44].mxu1 %v28995_v63  ;;  %18589 = vmatmul.mubr.f32.gmra.mrb[42].mxu0 %v28995_v63  ;;  %v19179_v57 = vand.u32 4294901760, %v19007_v8 }
 0xd2d   :  { %25810 = vmatpush1.bf16.msra.mxu1 %v29207_v14  ;;  %25834 = vmatpush1.bf16.msra.mxu0 %v25833_v21  ;;  %v19008_v14 = vld [vmem:[%s32099_s13 + $0x98] sm:$0xff] }
 0xd2e   :  { %18366 = vmatprep.mubr.f32.mxu1 %v27180_v10  ;;  %18675 = vmatprep.mubr.f32.mxu0 %v27180_v10  ;;  %v19182_v47 = vand.u32 4294901760, %v19008_v14  ;;  %v29505_v22 = vsub.f32 %v19007_v8, %v19179_v57 }
 0xd2f   :  { %25836 = vmatprep.subr.bf16.mxu0 %v29338_v25 }
 0xd30   :  { %18368 = vmatmul.mubr.f32.vlgmr.msra.gmra.mrb[42].mxu1 %v28974_v52  ;;  %18678 = vmatmul.mubr.f32.vlgmr.msra.gmra.mrb[40].mxu0 %v28981_v43  ;;  %v25845_v43 = vpack.c.bf16 %v18496_v38, %v18484_v37  ;;  %v19009_v37 = vld [vmem:[%s32099_s13 + $0xa0] sm:$0xff]  ;;  %v19010_v38 = vld [vmem:[%s32099_s13 + $0xa8] sm:$0xff]  ;;  %v29541_v29 = vpack.c.bf16 %v19182_v47, %v19179_v57 }
 0xd31   :  { %25838 = vmatpush1.bf16.msra.mxu0 %v29351_v2  ;;  %18373 = vmatprep.mubr.f32.mxu1 %v27180_v10  ;;  %v19185_v39 = vand.u32 4294901760, %v19009_v37  ;;  %v19188_v3 = vand.u32 4294901760, %v19010_v38 }
 0xd32   :  { %18683 = vmatprep.mubr.f32.mxu0 %v27180_v10  ;;  %25840 = vmatprep.subr.bf16.mxu0 %v29364_v58 }
 0xd33   :  { %v29553_v42 = vsub.f32 %v19009_v37, %v19185_v39  ;;  %v29555_v49 = vsub.f32 %v19010_v38, %v19188_v3  ;;  %v29564_v23 = vpack.c.bf16 %v19188_v3, %v19185_v39  ;;  %v19018_v39 = vld [vmem:[%s32099_s13 + $0xe8] sm:$0xff] }
 0xd34   :  { %18375 = vmatmul.mubr.f32.gmra.mrb[44].mxu1 %v28995_v63  ;;  %18686 = vmatmul.mubr.f32.gmra.mrb[42].mxu0 %v29006_v45  ;;  %v19005_v45 = vld [vmem:[%s32099_s13 + $0x80] sm:$0xff] }
 0xd35   :  { %25842 = vmatpush1.bf16.msra.mxu0 %v29376_v4  ;;  %18764 = vmatprep.mubr.f32.mxu0 %v27180_v10  ;;  %v19173_v41 = vand.u32 4294901760, %v19005_v45 }
 0xd36   :  { %25844 = vmatprep.subr.bf16.mxu0 %v25843_v53 }
 0xd37   :  { %v29496_v0 = vsub.f32 %v19005_v45, %v19173_v41  ;;  %v29517_v61 = vpack.c.bf16 %v19176_v50, %v19173_v41 }
 0xd38   :  { %18768 = vmatmul.mubr.f32.vlgmr.msra.gmra.mrb[40].mxu0 %v29001_v24  ;;  %v18989_v24 = vld [vmem:[%s32099_s13] sm:$0xff] }
 0xd39   :  { %25846 = vmatpush1.bf16.msra.mxu0 %v25845_v43  ;;  %18773 = vmatprep.mubr.f32.mxu0 %v27180_v10  ;;  %v19125_v13 = vand.u32 4294901760, %v18989_v24  ;;  %v25923_v33 = vpack.c.bf16 %v29498_v5, %v29496_v0  ;;  %v18997_v43 = vld [vmem:[%s32099_s13 + $0x40] sm:$0xff] }
 0xd3a   :  { %25848 = vmatprep.subr.bf16.mxu0 %v25847_v54  ;;  %25860 = vmatprep.subr.bf16.mxu1 %v29517_v61  ;;  %v18998_v54 = vld [vmem:[%s32099_s13 + $0x48] sm:$0xff]  ;;  %v19149_v41 = vand.u32 4294901760, %v18997_v43 }
 0xd3b   :  { %v29501_v48 = vsub.f32 %v18989_v24, %v19125_v13  ;;  %v29519_v1 = vpack.c.bf16 %v19128_v60, %v19125_v13  ;;  %v19197_v24 = vand.u32 4294901760, %v19013_v17  ;;  %v19152_v50 = vand.u32 4294901760, %v18998_v54  ;;  %v19016_v13 = vld [vmem:[%s32099_s13 + $0xd8] sm:$0xff] }
 0xd3c   :  { %18777 = vmatmul.mubr.f32.gmra.mrb[42].mxu0 %v29029_v19  ;;  %v18992_v19 = vld [vmem:[%s32099_s13 + $0x18] sm:$0xff]  ;;  %v19206_v37 = vand.u32 4294901760, %v19016_v13  ;;  %v29627_v38 = vsub.f32 %v18997_v43, %v19149_v41 }
 0xd3d   :  { %25850 = vmatpush1.bf16.msra.mxu0 %v25849_v26  ;;  %18871 = vmatprep.mubr.f32.mxu0 %v27180_v10  ;;  %v19134_v51 = vand.u32 4294901760, %v18992_v19  ;;  %v25925_v55 = vpack.c.bf16 %v29503_v15, %v29501_v48  ;;  %v25931_v26 = vpack.c.bf16 %v29555_v49, %v29553_v42  ;;  %v29629_v16 = vsub.f32 %v18998_v54, %v19152_v50  ;;  %v19019_v54 = vld [vmem:[%s32099_s13 + $0xf0] sm:$0xff] }
 0xd3e   :  { %25852 = vmatprep.subr.bf16.mxu0 %v29338_v25  ;;  %v29515_v25 = vsub.f32 %v19008_v14, %v19182_v47  ;;  %25862 = vmatpush3.bf16.msra.mxu1 %v29519_v1  ;;  %v29614_v47 = vsub.f32 %v18996_v44, %v19146_v18  ;;  %v29654_v44 = vpack.c.bf16 %v19200_v36, %v19197_v24 }
 0xd3f   :  { %v29538_v6 = vsub.f32 %v18992_v19, %v19134_v51  ;;  %v29545_v12 = vpack.c.bf16 %v19134_v51, %v19131_v46  ;;  %25864 = vmatprep.subr.bf16.mxu1 %v29541_v29  ;;  %v29623_v19 = vsub.f32 %v19013_v17, %v19197_v24  ;;  %v29625_v46 = vsub.f32 %v19014_v7, %v19200_v36 }
 0xd40   :  { %18873 = vmatmul.mubr.f32.vlgmr.msra.gmra.mrb[40].mxu0 %v28974_v52  ;;  %v25927_v20 = vpack.c.bf16 %v29515_v25, %v29505_v22  ;;  %32357 = vst [vmem:[#allocation10_spill] sm:$0xff] %v29654_v44  ;;  %v29660_v7 = vpack.c.bf16 %v19152_v50, %v19149_v41  ;;  %v19215_v36 = vand.u32 4294901760, %v19019_v54  ;;  %v19003_v41 = vld [vmem:[%s32099_s13 + $0x70] sm:$0xff]  ;;  %v19004_v50 = vld [vmem:[%s32099_s13 + $0x78] sm:$0xff] }
 0xd41   :  { %25854 = vmatpush1.bf16.msra.mxu0 %v29351_v2  ;;  %18878 = vmatprep.mubr.f32.mxu0 %v27180_v10  ;;  %v19011_v2 = vld [vmem:[%s32099_s13 + $0xb0] sm:$0xff]  ;;  %v25929_v11 = vpack.c.bf16 %v29538_v6, %v29536_v28 }
 0xd42   :  { %25856 = vmatprep.subr.bf16.mxu0 %v29364_v58  ;;  %v19140_v58 = vand.u32 4294901760, %v18994_v27  ;;  %v19191_v40 = vand.u32 4294901760, %v19011_v2  ;;  %25866 = vmatpush3.bf16.msra.mxu1 %v29545_v12  ;;  %32358 = vst [vmem:[#allocation11_spill] sm:$0xff] %v29660_v7  ;;  %v29695_v32 = vsub.f32 %v19019_v54, %v19215_v36 }
 0xd43   :  { %25868 = vmatprep.subr.bf16.mxu1 %v29564_v23 }
 0xd44   :  { %18880 = vmatmul.mubr.f32.gmra.mrb[42].mxu0 %v28995_v63  ;;  %v29577_v30 = vsub.f32 %v18994_v27, %v19140_v58  ;;  %v29580_v21 = vsub.f32 %v19011_v2, %v19191_v40  ;;  %v29582_v53 = vpack.c.bf16 %v19140_v58, %v19137_v9  ;;  %v29593_v31 = vpack.c.bf16 %v19194_v62, %v19191_v40  ;;  %v19001_v58 = vld [vmem:[%s32099_s13 + $0x60] sm:$0xff] }
 0xd45   :  { %25858 = vmatpush1.bf16.msra.mxu0 %v29376_v4  ;;  %18958 = vmatprep.mubr.f32.mxu0 %v27180_v10  ;;  %v18995_v4 = vld [vmem:[%s32099_s13 + $0x30] sm:$0xff]  ;;  %v19158_v2 = vand.u32 4294901760, %v19000_v56  ;;  %v19212_v9 = vand.u32 4294901760, %v19018_v39  ;;  %v25939_v40 = vpack.c.bf16 %v29625_v46, %v29623_v19  ;;  %v19161_v43 = vand.u32 4294901760, %v19001_v58 }
 0xd46   :  { %25924 = vmatprep.subr.bf16.mxu0 %v25923_v33  ;;  %v19143_v45 = vand.u32 4294901760, %v18995_v4  ;;  %v25933_v60 = vpack.c.bf16 %v29577_v30, %v29568_v59  ;;  %25870 = vmatpush3.bf16.msra.mxu1 %v29582_v53  ;;  %v19017_v33 = vld [vmem:[%s32099_s13 + $0xe0] sm:$0xff] }
 0xd47   :  { %25872 = vmatprep.subr.bf16.mxu1 %v29593_v31  ;;  %v29658_v17 = vsub.f32 %v19000_v56, %v19158_v2 }
 0xd48   :  { %18960 = vmatmul.mubr.f32.vlgmr.msra.gmra.mrb[40].mxu0 %v28974_v52  ;;  %v29591_v52 = vsub.f32 %v19012_v34, %v19194_v62  ;;  %v29608_v8 = vpack.c.bf16 %v19146_v18, %v19143_v45  ;;  %v29612_v57 = vsub.f32 %v18995_v4, %v19143_v45  ;;  %v19209_v34 = vand.u32 4294901760, %v19017_v33  ;;  %v19002_v62 = vld [vmem:[%s32099_s13 + $0x68] sm:$0xff]  ;;  %v19020_v45 = vld [vmem:[%s32099_s13 + $0xf8] sm:$0xff] }
 0xd49   :  { %18965 = vmatprep.mubr.f32.mxu0 %v27180_v10  ;;  %25926 = vmatpush3.bf16.msra.mxu0 %v25925_v55  ;;  %v19015_v10 = vld [vmem:[%s32099_s13 + $0xd0] sm:$0xff]  ;;  %v25941_v4 = vpack.c.bf16 %v29629_v16, %v29627_v38  ;;  %v19164_v24 = vand.u32 4294901760, %v19002_v62 }
 0xd4a   :  { %25928 = vmatprep.subr.bf16.mxu0 %v25927_v20  ;;  %v25935_v14 = vpack.c.bf16 %v29591_v52, %v29580_v21  ;;  %v19203_v51 = vand.u32 4294901760, %v19015_v10  ;;  %25874 = vmatpush3.bf16.msra.mxu1 %v29608_v8  ;;  %v25937_v3 = vpack.c.bf16 %v29614_v47, %v29612_v57  ;;  %v29647_v20 = vsub.f32 %v19016_v13, %v19206_v37 }
 0xd4b   :  { %25876 = vmatprep.subr.bf16.mxu1 %v29654_v44  ;;  %v29669_v18 = vsub.f32 %v19017_v33, %v19209_v34  ;;  %v19218_v13 = vand.u32 4294901760, %v19020_v45  ;;  %v29686_v33 = vsub.f32 %v19001_v58, %v19161_v43 }
 0xd4c   :  { %18967 = vmatmul.mubr.f32.gmra.mrb[42].mxu0 %v28995_v63  ;;  %v18999_v63 = vld [vmem:[%s32099_s13 + $0x50] sm:$0xff]  ;;  %v29645_v55 = vsub.f32 %v19015_v10, %v19203_v51 }
 0xd4d   :  { %25930 = vmatpush3.bf16.msra.mxu0 %v25929_v11  ;;  %v19155_v27 = vand.u32 4294901760, %v18999_v63 }
 0xd4e   :  { %25932 = vmatprep.subr.bf16.mxu0 %v25931_v26  ;;  %v29671_v26 = vsub.f32 %v19018_v39, %v19212_v9  ;;  %v25943_v10 = vpack.c.bf16 %v29647_v20, %v29645_v55  ;;  %25878 = vmatpush3.bf16.msra.mxu1 %v29660_v7 }
 0xd4f   :  { %v29656_v11 = vsub.f32 %v18999_v63, %v19155_v27  ;;  %v29682_v63 = vpack.c.bf16 %v19206_v37, %v19203_v51  ;;  %v29688_v39 = vpack.c.bf16 %v19158_v2, %v19155_v27  ;;  %v29698_v51 = vsub.f32 %v19020_v45, %v19218_v13 }
 0xd50   :  { %v29704_v27 = vpack.c.bf16 %v19212_v9, %v19209_v34  ;;  %v29706_v2 = vpack.c.bf16 %v19164_v24, %v19161_v43  ;;  %v19366_v45 = vand.u32 4294901760, %v29496_v0  ;;  %v19373_v9 = vand.u32 4294901760, %v29498_v5 }
 0xd51   :  { %25934 = vmatpush3.bf16.msra.mxu0 %v25933_v60  ;;  %v19167_v60 = vand.u32 4294901760, %v19003_v41  ;;  %32359 = vst [vmem:[#allocation12_spill] sm:$0xff] %v29682_v63  ;;  %v25945_v56 = vpack.c.bf16 %v29658_v17, %v29656_v11  ;;  %32360 = vst [vmem:[#allocation13_spill] sm:$0xff] %v29688_v39  ;;  %25880 = vmatprep.subr.bf16.mxu1 %v29682_v63 }
 0xd52   :  { %25936 = vmatprep.subr.bf16.mxu0 %v25935_v14  ;;  %v19170_v14 = vand.u32 4294901760, %v19004_v50  ;;  %25882 = vmatpush3.bf16.msra.mxu1 %v29688_v39  ;;  %32361 = vst [vmem:[#allocation14_spill] sm:$0xff] %v29704_v27  ;;  %32362 = vst [vmem:[#allocation15_spill] sm:$0xff] %v29706_v2 }
 0xd53   :  { %v29700_v37 = vsub.f32 %v19003_v41, %v19167_v60  ;;  %25884 = vmatprep.subr.bf16.mxu1 %v29704_v27  ;;  %v25951_v41 = vpack.c.bf16 %v29698_v51, %v29695_v32  ;;  %v19275_v27 = vand.u32 4294901760, %v29538_v6 }
 0xd54   :  { %v29702_v58 = vsub.f32 %v19004_v50, %v19170_v14  ;;  %v19380_v50 = vand.u32 4294901760, %v29505_v22 }
 0xd55   :  { %25938 = vmatpush3.bf16.msra.mxu0 %v25937_v3  ;;  %v25947_v3 = vpack.c.bf16 %v29671_v26, %v29669_v18 }
 0xd56   :  { %25940 = vmatprep.subr.bf16.mxu0 %v25939_v40  ;;  %v29692_v40 = vsub.f32 %v19002_v62, %v19164_v24  ;;  %v19254_v62 = vand.u32 4294901760, %v29501_v48  ;;  %v25953_v34 = vpack.c.bf16 %v29702_v58, %v29700_v37  ;;  %25886 = vmatpush3.bf16.msra.mxu1 %v29706_v2  ;;  %v29722_v24 = vpack.c.bf16 %v19218_v13, %v19215_v36 }
 0xd57   :  { %v19374_v2 = vsub.f32 %v29498_v5, %v19373_v9  ;;  %v19394_v5 = vand.u32 4294901760, %v29553_v42 }
 0xd58   :  { %v25949_v54 = vpack.c.bf16 %v29692_v40, %v29686_v33  ;;  %32363 = vst [vmem:[#allocation16_spill] sm:$0xff] %v29722_v24  ;;  %25888 = vmatprep.subr.bf16.mxu1 %v29722_v24  ;;  %v19255_v13 = vsub.f32 %v29501_v48, %v19254_v62  ;;  %v19289_v48 = vand.u32 4294901760, %v29577_v30 }
 0xd59   :  { %25942 = vmatpush3.bf16.msra.mxu0 %v25941_v4  ;;  %v19261_v4 = vand.u32 4294901760, %v29503_v15 }
 0xd5a   :  { %25944 = vmatprep.subr.bf16.mxu0 %v25943_v10  ;;  %v19387_v10 = vand.u32 4294901760, %v29515_v25  ;;  %v19256_v7 = vand.u32 4294901760, %v19255_v13 }
 0xd5b   :  { %v29720_v43 = vpack.c.bf16 %v19261_v4, %v19254_v62  ;;  %v19262_v63 = vsub.f32 %v29503_v15, %v19261_v4  ;;  %v19381_v15 = vsub.f32 %v29505_v22, %v19380_v50  ;;  %v19408_v22 = vand.u32 4294901760, %v29580_v21 }
 0xd5c   :  { %v29733_v39 = vpack.c.bf16 %v19387_v10, %v19380_v50 }
 0xd5d   :  { %25946 = vmatpush3.bf16.msra.mxu0 %v25945_v56  ;;  %v19367_v56 = vsub.f32 %v29496_v0, %v19366_v45  ;;  %v25987_v0 = vpack.c.bf16 %v19373_v9, %v19366_v45  ;;  %v19263_v44 = vand.u32 4294901760, %v19262_v63  ;;  %v19269_v63 = vsub.f32 %v29536_v28, %v19268_v35 }
 0xd5e   :  { %25948 = vmatprep.subr.bf16.mxu0 %v25947_v3  ;;  %v29727_v3 = vpack.c.bf16 %v19170_v14, %v19167_v60  ;;  %v29738_v60 = vpack.c.bf16 %v19275_v27, %v19268_v35  ;;  %v19375_v14 = vand.u32 4294901760, %v19374_v2  ;;  %v19388_v2 = vsub.f32 %v29515_v25, %v19387_v10 }
 0xd5f   :  { %v19368_v36 = vand.u32 4294901760, %v19367_v56  ;;  %v19282_v56 = vand.u32 4294901760, %v29568_v59  ;;  %v29745_v62 = vpack.c.bf16 %v19263_v44, %v19256_v7  ;;  %v19276_v9 = vsub.f32 %v29538_v6, %v19275_v27 }
 0xd60   :  { %25890 = vmatpush3.bf16.msra.mxu1 %v29727_v3  ;;  %v19270_v13 = vand.u32 4294901760, %v19269_v63  ;;  %v19415_v44 = vand.u32 4294901760, %v29591_v52  ;;  %v19303_v25 = vand.u32 4294901760, %v29614_v47  ;;  %v19395_v35 = vsub.f32 %v29553_v42, %v19394_v5 }
 0xd61   :  { %25950 = vmatpush3.bf16.msra.mxu0 %v25949_v54  ;;  %v19401_v54 = vand.u32 4294901760, %v29555_v49  ;;  %v25891_v24 = vpack.c.bf16 %v19375_v14, %v19368_v36  ;;  %v29751_v45 = vpack.c.bf16 %v19289_v48, %v19282_v56  ;;  %v19389_v36 = vand.u32 4294901760, %v19388_v2 }
 0xd62   :  { %25952 = vmatprep.subr.bf16.mxu0 %v25951_v41  ;;  %v19382_v41 = vand.u32 4294901760, %v19381_v15  ;;  %v19277_v7 = vand.u32 4294901760, %v19276_v9  ;;  %v19283_v6 = vsub.f32 %v29568_v59, %v19282_v56  ;;  %v19290_v2 = vsub.f32 %v29577_v30, %v19289_v48 }
 0xd63   :  { %v29747_v4 = vpack.c.bf16 %v19401_v54, %v19394_v5  ;;  %25892 = vmatprep.subr.bf16.mxu1 %v25891_v24  ;;  %v29761_v24 = vpack.c.bf16 %v19415_v44, %v19408_v22  ;;  %v19402_v50 = vsub.f32 %v29555_v49, %v19401_v54  ;;  %v19422_v63 = vand.u32 4294901760, %v29623_v19 }
 0xd64   :  { %v29759_v28 = vpack.c.bf16 %v19389_v36, %v19382_v41  ;;  %v29765_v27 = vpack.c.bf16 %v19277_v7, %v19270_v13  ;;  %v19284_v15 = vand.u32 4294901760, %v19283_v6  ;;  %v19429_v42 = vand.u32 4294901760, %v29625_v46 }
 0xd65   :  { %25954 = vmatpush3.bf16.msra.mxu0 %v25953_v34  ;;  %v19296_v34 = vand.u32 4294901760, %v29612_v57  ;;  %v19403_v14 = vand.u32 4294901760, %v19402_v50  ;;  %v19310_v5 = vand.u32 4294901760, %v29627_v38  ;;  %v19291_v49 = vand.u32 4294901760, %v19290_v2 }
 0xd66   :  { %25988 = vmatprep.subr.bf16.mxu0 %v25987_v0  ;;  %v19396_v0 = vand.u32 4294901760, %v19395_v35  ;;  %v19317_v59 = vand.u32 4294901760, %v29629_v16  ;;  %v29776_v54 = vpack.c.bf16 %v19429_v42, %v19422_v63  ;;  %v19409_v56 = vsub.f32 %v29580_v21, %v19408_v22 }
 0xd67   :  { %v29767_v10 = vpack.c.bf16 %v19303_v25, %v19296_v34  ;;  %v19416_v9 = vsub.f32 %v29591_v52, %v19415_v44  ;;  %v19297_v36 = vsub.f32 %v29612_v57, %v19296_v34  ;;  %v29781_v30 = vpack.c.bf16 %v19291_v49, %v19284_v15 }
 0xd68   :  { %v29773_v41 = vpack.c.bf16 %v19403_v14, %v19396_v0  ;;  %v29783_v48 = vpack.c.bf16 %v19317_v59, %v19310_v5  ;;  %v19304_v13 = vsub.f32 %v29614_v47, %v19303_v25  ;;  %v19436_v7 = vand.u32 4294901760, %v29645_v55 }
 0xd69   :  { %v19410_v35 = vand.u32 4294901760, %v19409_v56  ;;  %v19417_v50 = vand.u32 4294901760, %v19416_v9  ;;  %v19298_v6 = vand.u32 4294901760, %v19297_v36  ;;  %v19443_v0 = vand.u32 4294901760, %v29647_v20 }
 0xd6a   :  { %v19305_v14 = vand.u32 4294901760, %v19304_v13  ;;  %v19324_v21 = vand.u32 4294901760, %v29656_v11  ;;  %v19331_v52 = vand.u32 4294901760, %v29658_v17  ;;  %v19423_v57 = vsub.f32 %v29623_v19, %v19422_v63 }
 0xd6b   :  { %v29791_v22 = vpack.c.bf16 %v19417_v50, %v19410_v35  ;;  %v29793_v44 = vpack.c.bf16 %v19443_v0, %v19436_v7  ;;  %v19430_v47 = vsub.f32 %v29625_v46, %v19429_v42  ;;  %v19311_v34 = vsub.f32 %v29627_v38, %v19310_v5 }
 0xd6c   :  { %v29797_v25 = vpack.c.bf16 %v19305_v14, %v19298_v6  ;;  %v29799_v15 = vpack.c.bf16 %v19331_v52, %v19324_v21  ;;  %v19424_v2 = vand.u32 4294901760, %v19423_v57  ;;  %v19318_v49 = vsub.f32 %v29629_v16, %v19317_v59 }
 0xd6d   :  { %v19431_v56 = vand.u32 4294901760, %v19430_v47  ;;  %v19312_v9 = vand.u32 4294901760, %v19311_v34  ;;  %v19450_v36 = vand.u32 4294901760, %v29669_v18  ;;  %v19457_v19 = vand.u32 4294901760, %v29671_v26 }
 0xd6e   :  { %v19319_v63 = vand.u32 4294901760, %v19318_v49  ;;  %v19338_v13 = vand.u32 4294901760, %v29686_v33  ;;  %v19345_v46 = vand.u32 4294901760, %v29692_v40  ;;  %v19437_v38 = vsub.f32 %v29645_v55, %v19436_v7 }
 0xd6f   :  { %v29807_v42 = vpack.c.bf16 %v19431_v56, %v19424_v2  ;;  %v29809_v5 = vpack.c.bf16 %v19457_v19, %v19450_v36  ;;  %v19444_v35 = vsub.f32 %v29647_v20, %v19443_v0  ;;  %v19325_v16 = vsub.f32 %v29656_v11, %v19324_v21 }
 0xd70   :  { %v29813_v59 = vpack.c.bf16 %v19319_v63, %v19312_v9  ;;  %v29815_v50 = vpack.c.bf16 %v19345_v46, %v19338_v13  ;;  %v19438_v6 = vand.u32 4294901760, %v19437_v38  ;;  %v19332_v14 = vsub.f32 %v29658_v17, %v19331_v52 }
 0xd71   :  { %v19445_v57 = vand.u32 4294901760, %v19444_v35  ;;  %v19326_v47 = vand.u32 4294901760, %v19325_v16  ;;  %v19464_v34 = vand.u32 4294901760, %v29695_v32  ;;  %v19471_v55 = vand.u32 4294901760, %v29698_v51 }
 0xd72   :  { %v19333_v7 = vand.u32 4294901760, %v19332_v14  ;;  %v19352_v2 = vand.u32 4294901760, %v29700_v37  ;;  %v19359_v20 = vand.u32 4294901760, %v29702_v58  ;;  %v19451_v11 = vsub.f32 %v29669_v18, %v19450_v36 }
 0xd73   :  { %v29823_v0 = vpack.c.bf16 %v19445_v57, %v19438_v6  ;;  %v29825_v21 = vpack.c.bf16 %v19471_v55, %v19464_v34  ;;  %v19458_v49 = vsub.f32 %v29671_v26, %v19457_v19  ;;  %v19339_v17 = vsub.f32 %v29686_v33, %v19338_v13 }
 0xd74   :  { %v29829_v52 = vpack.c.bf16 %v19333_v7, %v19326_v47  ;;  %v29831_v56 = vpack.c.bf16 %v19359_v20, %v19352_v2  ;;  %v19452_v9 = vand.u32 4294901760, %v19451_v11  ;;  %v19346_v63 = vsub.f32 %v29692_v40, %v19345_v46 }
 0xd75   :  { %v19459_v38 = vand.u32 4294901760, %v19458_v49  ;;  %v19340_v35 = vand.u32 4294901760, %v19339_v17  ;;  %v19465_v18 = vsub.f32 %v29695_v32, %v19464_v34  ;;  %v19472_v26 = vsub.f32 %v29698_v51, %v19471_v55 }
 0xd76   :  { %v19347_v16 = vand.u32 4294901760, %v19346_v63  ;;  %v19353_v33 = vsub.f32 %v29700_v37, %v19352_v2  ;;  %v19360_v19 = vsub.f32 %v29702_v58, %v19359_v20  ;;  %v16559_v49 = vlaneseq  ;;  %v29852_v37 = vld [vmem:[%s32098_s12] sm:$0xff] }
 0xd77   :  { %v29835_v36 = vpack.c.bf16 %v19459_v38, %v19452_v9  ;;  %v19466_v14 = vand.u32 4294901760, %v19465_v18  ;;  %v19473_v13 = vand.u32 4294901760, %v19472_v26  ;;  %32364 = vst [vmem:[#allocation17_spill] sm:$0xff] %v29852_v37 }
 0xd78   :  { %v29837_v6 = vpack.c.bf16 %v19347_v16, %v19340_v35  ;;  %v19354_v57 = vand.u32 4294901760, %v19353_v33  ;;  %v19361_v47 = vand.u32 4294901760, %v19360_v19  ;;  %v29846_v17 = vshrl.u32 %v16559_v49, 7 }
 0xd79   :  { %v29842_v40 = vpack.c.bf16 %v19473_v13, %v19466_v14 }
 0xd7a   :  { %v29844_v46 = vpack.c.bf16 %v19361_v47, %v19354_v57  ;;  %v16561_v51 = vsub.s32 0, %v29846_v17  ;;  %v16565_v58 = vsub.s32 1, %v29846_v17 }
 0xd7c   :  { %v16562_v55 = vrot.slane %v29852_v37, %v16561_v51  ;;  %v16566_v2 = vrot.slane %v29852_v37, %v16565_v58 }
 0xdbb   :  { %v16684_v7 = vpop.f32.mrb[32].mxu0 }
 0xdbc   :  { %v16686_v32 = vpop.f32.mrb[33].mxu0  ;;  %v16685_v20 = vadd.f32 %v16684_v7, %v16562_v55 }
 0xdbd   :  { %v16687_v9 = vadd.f32 %v16686_v32, %v16566_v2 }
 0xdbf   :  { %v16695_v34 = vpop.f32.mrb[34].mxu0 }
 0xdc0   :  { %v16697_v11 = vpop.f32.mrb[35].mxu0  ;;  %v16696_v18 = vadd.f32 %v16695_v34, %v16562_v55 }
 0xdc1   :  { %v16698_v26 = vadd.f32 %v16697_v11, %v16566_v2 }
 0xdd3   :  { %v17185_v63 = vpop.f32.mrb[38].mxu1 }
 0xdd4   :  { %v26632_v38 = vadd.f32 %v17185_v63, %v16685_v20  ;;  %v17187_v35 = vpop.f32.mrb[39].mxu1 }
 0xdd5   :  { %v26634_v16 = vadd.f32 %v17187_v35, %v16687_v9 }
 0xdd6   :  { %v18973_v14 = vmax.f32 %v26632_v38, 0.0 }
 0xdd7   :  { %v18974_v33 = vmax.f32 %v26634_v16, 0.0  ;;  %v17192_v19 = vpop.f32.mrb[40].mxu1 }
 0xdd8   :  { %v29857_v13 = vand.u32 4294901760, %v18973_v14  ;;  %v26636_v57 = vadd.f32 %v17192_v19, %v16696_v18  ;;  %v17194_v47 = vpop.f32.mrb[41].mxu1  ;;  %v16573_v19 = vsub.s32 3, %v29846_v17 }
 0xdd9   :  { %v29859_v49 = vand.u32 4294901760, %v18974_v33  ;;  %v26638_v51 = vadd.f32 %v17194_v47, %v16698_v26 }
 0xdda   :  { %32365 = vst [vmem:[#allocation18_spill] sm:$0xff] %v29857_v13  ;;  %v29862_v58 = vsub.f32 %v18973_v14, %v29857_v13  ;;  %v18981_v7 = vmax.f32 %v26636_v57, 0.0 }
 0xddb   :  { %v29865_v32 = vsub.f32 %v18974_v33, %v29859_v49  ;;  %v18982_v20 = vmax.f32 %v26638_v51, 0.0 }
 0xddc   :  { %v32130_v34 = vand.u32 4294901760, %v29862_v58  ;;  %v29868_v11 = vand.u32 4294901760, %v18981_v7 }
 0xddd   :  { %v29870_v55 = vand.u32 4294901760, %v18982_v20  ;;  %19620 = vmatprep.mubr.f32.mxu0 %v29865_v32  ;;  %v32145_v2 = vand.u32 4294901760, %v29865_v32 }
 0xdde   :  { %32366 = vst [vmem:[#allocation19_spill] sm:$0xff] %v29868_v11  ;;  %v19229_v9 = vsub.f32 %v29862_v58, %v32130_v34  ;;  %v29878_v63 = vsub.f32 %v18981_v7, %v29868_v11  ;;  %19623 = vmatmul.mubr.f32.vlgmr.msra.gmra.mrb[44].mxu0 %v29862_v58  ;;  %v30072_v34 = vld [vmem:[%s32099_s13 + $0x130] sm:$0xff] }
 0xddf   :  { %32367 = vst [vmem:[#allocation20_spill] sm:$0xff] %v29870_v55  ;;  %v29882_v38 = vsub.f32 %v18982_v20, %v29870_v55  ;;  %25990 = vmatpush3.bf16.msra.mxu0 %v29720_v43  ;;  %v19223_v35 = vsub.f32 %v29865_v32, %v32145_v2  ;;  %v29996_v20 = vld [vmem:[%s32099_s13 + $0x1a0] sm:$0xff] }
 0xde0   :  { %25992 = vmatprep.subr.bf16.mxu0 %v29733_v39  ;;  %v32128_v16 = vand.u32 4294901760, %v29878_v63  ;;  %v19230_v26 = vand.u32 4294901760, %v19229_v9  ;;  %v30001_v9 = vld [vmem:[%s32099_s13 + $0x1a8] sm:$0xff] }
 0xde1   :  { %19629 = vmatprep.mubr.f32.mxu0 %v29882_v38  ;;  %v19224_v18 = vand.u32 4294901760, %v19223_v35  ;;  %v32129_v14 = vand.u32 4294901760, %v29882_v38 }
 0xde2   :  { %19632 = vmatmul.mubr.f32.gmra.mrb[46].mxu0 %v29878_v63  ;;  %v19244_v43 = vsub.f32 %v29878_v63, %v32128_v16 }
 0xde3   :  { %25994 = vmatpush3.bf16.msra.mxu0 %v29738_v60  ;;  %19225 = vmatprep.mubr.f32.mxu1 %v19224_v18  ;;  %v19238_v39 = vsub.f32 %v29882_v38, %v32129_v14  ;;  %v29910_v60 = vrot.slane %v29852_v37, %v16573_v19 }
 0xde4   :  { %19917 = vmatprep.mubr.f32.mxu0 %v29859_v49  ;;  %19231 = vmatmul.mubr.f32.vlgmr.msra.gmra.mrb[46].mxu1 %v19230_v26  ;;  %v19245_v57 = vand.u32 4294901760, %v19244_v43  ;;  %v16569_v26 = vsub.s32 2, %v29846_v17  ;;  %v32132_v43 = vand.u32 4294901760, %v30001_v9 }
 0xde5   :  { %25894 = vmatpush3.bf16.msra.mxu1 %v29745_v62  ;;  %25996 = vmatprep.subr.bf16.mxu0 %v29747_v4  ;;  %v19239_v33 = vand.u32 4294901760, %v19238_v39  ;;  %v30026_v39 = vld [vmem:[%s32099_s13 + $0x120] sm:$0xff] }
 0xde6   :  { %25896 = vmatprep.subr.bf16.mxu1 %v29759_v28 }
 0xde7   :  { %25998 = vmatpush3.bf16.msra.mxu0 %v29751_v45  ;;  %19240 = vmatprep.mubr.f32.mxu1 %v19239_v33  ;;  %v30031_v33 = vld [vmem:[%s32099_s13 + $0x128] sm:$0xff] }
 0xde8   :  { %19246 = vmatmul.mubr.f32.gmra.mrb[48].mxu1 %v19245_v57  ;;  %26000 = vmatprep.subr.bf16.mxu0 %v29761_v24  ;;  %v30040_v57 = vld [vmem:[%s32099_s13 + $0x1b0] sm:$0xff] }
 0xde9   :  { %25898 = vmatpush3.bf16.msra.mxu1 %v29765_v27  ;;  %19476 = vmatprep.mubr.f32.mxu1 %v29859_v49  ;;  %v32144_v16 = vand.u32 4294901760, %v30040_v57 }
 0xdea   :  { %25900 = vmatprep.subr.bf16.mxu1 %v29773_v41  ;;  %v29932_v41 = vld [vmem:[%s32099_s13 + $0x180] sm:$0xff] }
 0xdeb   :  { %26002 = vmatpush3.bf16.msra.mxu0 %v29767_v10  ;;  %v29914_v62 = vpop.f32.mrb[36].mxu0 }
 0xdec   :  { %v17779_v4 = vpop.f32.mrb[37].mxu0  ;;  %26004 = vmatprep.subr.bf16.mxu0 %v29776_v54  ;;  %v29937_v54 = vld [vmem:[%s32099_s13 + $0x188] sm:$0xff] }
 0xded   :  { %v26640_v45 = vadd.f32 %v17779_v4, %v29910_v60  ;;  %25902 = vmatpush3.bf16.msra.mxu1 %v29781_v30  ;;  %v32142_v30 = vand.u32 4294901760, %v29932_v41  ;;  %v30045_v4 = vld [vmem:[%s32099_s13 + $0x1b8] sm:$0xff] }
 0xdee   :  { %25904 = vmatprep.subr.bf16.mxu1 %v29791_v22  ;;  %v29947_v22 = vld [vmem:[%s32099_s13 + $0x100] sm:$0xff]  ;;  %v32143_v14 = vand.u32 4294901760, %v30045_v4 }
 0xdef   :  { %v18976_v28 = vmax.f32 %v26640_v45, 0.0  ;;  %26006 = vmatpush3.bf16.msra.mxu0 %v29783_v48  ;;  %v29921_v24 = vpop.f32.mrb[38].mxu0  ;;  %v32141_v48 = vand.u32 4294901760, %v29937_v54  ;;  %v32139_v45 = vand.u32 4294901760, %v30026_v39 }
 0xdf0   :  { %v29923_v27 = vpop.f32.mrb[39].mxu0  ;;  %26008 = vmatprep.subr.bf16.mxu0 %v29793_v44  ;;  %v29952_v44 = vld [vmem:[%s32099_s13 + $0x108] sm:$0xff] }
 0xdf1   :  { %v29926_v10 = vand.u32 4294901760, %v18976_v28  ;;  %25906 = vmatpush3.bf16.msra.mxu1 %v29797_v25  ;;  %v32137_v47 = vand.u32 4294901760, %v29952_v44 }
 0xdf2   :  { %25908 = vmatprep.subr.bf16.mxu1 %v29807_v42  ;;  %v29966_v42 = vld [vmem:[%s32099_s13 + $0x198] sm:$0xff] }
 0xdf3   :  { %32368 = vst [vmem:[#allocation21_spill] sm:$0xff] %v29926_v10  ;;  %26010 = vmatpush3.bf16.msra.mxu0 %v29799_v15  ;;  %v29955_v25 = vsub.f32 %v18976_v28, %v29926_v10  ;;  %v29961_v15 = vld [vmem:[%s32099_s13 + $0x190] sm:$0xff]  ;;  %v32135_v7 = vand.u32 4294901760, %v29966_v42  ;;  %v32138_v28 = vand.u32 4294901760, %v30031_v33 }
 0xdf4   :  { %26012 = vmatprep.subr.bf16.mxu0 %v29809_v5  ;;  %v32140_v5 = vand.u32 4294901760, %v29947_v22  ;;  %v32136_v51 = vand.u32 4294901760, %v29961_v15 }
 0xdf5   :  { %25910 = vmatpush3.bf16.msra.mxu1 %v29813_v59  ;;  %v29977_v59 = vpack.c.bf16 %v32141_v48, %v32142_v30  ;;  %v26642_v30 = vadd.f32 %v29923_v27, %v29910_v60 }
 0xdf6   :  { %25912 = vmatprep.subr.bf16.mxu1 %v29823_v0  ;;  %v29989_v0 = vld [vmem:[%s32099_s13 + $0x118] sm:$0xff] }
 0xdf7   :  { %26014 = vmatpush3.bf16.msra.mxu0 %v29815_v50  ;;  %32369 = vst [vmem:[#allocation22_spill] sm:$0xff] %v29977_v59  ;;  %v29984_v50 = vld [vmem:[%s32099_s13 + $0x110] sm:$0xff]  ;;  %v32131_v18 = vand.u32 4294901760, %v29989_v0 }
 0xdf8   :  { %26016 = vmatprep.subr.bf16.mxu0 %v29825_v21  ;;  %v32127_v21 = vand.u32 4294901760, %v29955_v25  ;;  %v32134_v35 = vand.u32 4294901760, %v29984_v50 }
 0xdf9   :  { %25914 = vmatpush3.bf16.msra.mxu1 %v29829_v52  ;;  %v30009_v52 = vpack.c.bf16 %v32137_v47, %v32140_v5  ;;  %v30156_v5 = vld [vmem:[%s32099_s13 + $0x150] sm:$0xff] }
 0xdfa   :  { %25916 = vmatprep.subr.bf16.mxu1 %v29835_v36  ;;  %v30019_v36 = vpack.c.bf16 %v32135_v7, %v32136_v51  ;;  %v20141_v19 = vsub.f32 %v29955_v25, %v32127_v21  ;;  %v16570_v21 = vrot.slane %v29852_v37, %v16569_v26  ;;  %v30077_v26 = vld [vmem:[%s32099_s13 + $0x138] sm:$0xff]  ;;  %v30106_v51 = vld [vmem:[%s32099_s13 + $0x140] sm:$0xff] }
 0xdfb   :  { %26018 = vmatpush3.bf16.msra.mxu0 %v29831_v56  ;;  %32370 = vst [vmem:[#allocation23_spill] sm:$0xff] %v30009_v52  ;;  %v32133_v56 = vand.u32 4294901760, %v29996_v20  ;;  %v32150_v7 = vand.u32 4294901760, %v30077_v26 }
 0xdfc   :  { %26052 = vmatprep.subr.bf16.mxu0 %v29977_v59  ;;  %32371 = vst [vmem:[#allocation24_spill] sm:$0xff] %v30019_v36  ;;  %v26639_v47 = vadd.f32 %v29914_v62, %v16570_v21  ;;  %v30129_v62 = vld [vmem:[%s32099_s13 + $0x1d0] sm:$0xff]  ;;  %v26641_v2 = vadd.f32 %v29921_v24, %v16570_v21  ;;  %v30178_v24 = vld [vmem:[%s32099_s13 + $0x1e0] sm:$0xff]  ;;  %v30183_v21 = vld [vmem:[%s32099_s13 + $0x1e8] sm:$0xff] }
 0xdfd   :  { %25918 = vmatpush3.bf16.msra.mxu1 %v29837_v6  ;;  %v30055_v6 = vpack.c.bf16 %v32131_v18, %v32134_v35  ;;  %v20142_v18 = vand.u32 4294901760, %v20141_v19  ;;  %v32151_v19 = vand.u32 4294901760, %v30072_v34 }
 0xdfe   :  { %19919 = vmatmul.mubr.f32.vlgmr.msra.gmra.mrb[48].mxu0 %v29857_v13  ;;  %25920 = vmatprep.subr.bf16.mxu1 %v29842_v40  ;;  %v30065_v40 = vpack.c.bf16 %v32132_v43, %v32133_v56  ;;  %v30083_v43 = vld [vmem:[%s32099_s13 + $0x1c0] sm:$0xff]  ;;  %v30088_v56 = vld [vmem:[%s32099_s13 + $0x1c8] sm:$0xff] }
 0xdff   :  { %19924 = vmatprep.mubr.f32.mxu0 %v29870_v55  ;;  %26054 = vmatpush3.bf16.msra.mxu0 %v30009_v52  ;;  %32372 = vst [vmem:[#allocation25_spill] sm:$0xff] %v30055_v6  ;;  %v30150_v60 = vpack.c.bf16 %v32150_v7, %v32151_v19  ;;  %v32382_v7 = vand.u32 4294901760, %v30088_v56  ;;  %v30217_v52 = vld [vmem:[%s32099_s13 + $0x168] sm:$0xff] }
 0xe00   :  { %26056 = vmatprep.subr.bf16.mxu0 %v30019_v36  ;;  %32373 = vst [vmem:[#allocation26_spill] sm:$0xff] %v30065_v40 }
 0xe01   :  { %25922 = vmatpush3.bf16.msra.mxu1 %v29844_v46  ;;  %v30099_v46 = vpack.c.bf16 %v32138_v28, %v32139_v45  ;;  %v30122_v45 = vpack.c.bf16 %v32143_v14, %v32144_v16  ;;  %v30138_v14 = vld [vmem:[%s32099_s13 + $0x1d8] sm:$0xff]  ;;  %32379 = vst [vmem:[#allocation32_spill] sm:$0xff] %v30150_v60  ;;  %v18975_v16 = vmax.f32 %v26639_v47, 0.0 }
 0xe02   :  { %19926 = vmatmul.mubr.f32.gmra.mrb[50].mxu0 %v29868_v11  ;;  %25956 = vmatprep.subr.bf16.mxu1 %v29517_v61  ;;  %v30173_v47 = vld [vmem:[%s32099_s13 + $0x158] sm:$0xff] }
 0xe03   :  { %26058 = vmatpush3.bf16.msra.mxu0 %v30055_v6  ;;  %20143 = vmatprep.mubr.f32.mxu0 %v20142_v18  ;;  %v30093_v35 = vpop.f32.mrb[42].mxu1  ;;  %32375 = vst [vmem:[#allocation28_spill] sm:$0xff] %v30099_v46  ;;  %v30111_v18 = vld [vmem:[%s32099_s13 + $0x148] sm:$0xff]  ;;  %32377 = vst [vmem:[#allocation30_spill] sm:$0xff] %v30122_v45  ;;  %v32170_v36 = vand.u32 4294901760, %v30173_v47 }
 0xe04   :  { %32374 = vst [vmem:[#allocation27_spill] sm:$0xff] %v30093_v35  ;;  %19478 = vmatmul.mubr.f32.vlgmr.msra.gmra.mrb[50].mxu1 %v29857_v13  ;;  %v30115_v28 = vpop.f32.mrb[43].mxu1  ;;  %26060 = vmatprep.subr.bf16.mxu0 %v30065_v40  ;;  %v32381_v40 = vand.u32 4294901760, %v30083_v43  ;;  %v32386_v27 = vand.u32 4294901760, %v30111_v18  ;;  %v32396_v35 = vand.u32 4294901760, %v30183_v21 }
 0xe05   :  { %32376 = vst [vmem:[#allocation29_spill] sm:$0xff] %v30115_v28  ;;  %19483 = vmatprep.mubr.f32.mxu1 %v29870_v55  ;;  %25958 = vmatpush3.bf16.msra.mxu1 %v29519_v1 }
 0xe06   :  { %25960 = vmatprep.subr.bf16.mxu1 %v29541_v29  ;;  %v30167_v19 = vpack.c.bf16 %v32382_v7, %v32381_v40  ;;  %v32384_v7 = vand.u32 4294901760, %v29865_v32  ;;  %v32385_v40 = vand.u32 4294901760, %v30106_v51  ;;  %v30200_v32 = vand.u32 4294901760, %v18975_v16 }
 0xe07   :  { %26062 = vmatpush3.bf16.msra.mxu0 %v30099_v46  ;;  %v30144_v48 = vpop.f32.mrb[44].mxu1 }
 0xe08   :  { %32378 = vst [vmem:[#allocation31_spill] sm:$0xff] %v30144_v48  ;;  %19485 = vmatmul.mubr.f32.gmra.mrb[52].mxu1 %v29868_v11  ;;  %v30160_v46 = vpop.f32.mrb[45].mxu1  ;;  %26064 = vmatprep.subr.bf16.mxu0 %v30122_v45  ;;  %32383 = vst [vmem:[#allocation34_spill] sm:$0xff] %v30167_v19  ;;  %v18984_v45 = vmax.f32 %v26642_v30, 0.0  ;;  %v30193_v6 = vpack.c.bf16 %v32386_v27, %v32385_v40  ;;  %v32390_v27 = vand.u32 4294901760, %v30138_v14  ;;  %v30212_v48 = vld [vmem:[%s32099_s13 + $0x160] sm:$0xff] }
 0xe09   :  { %32380 = vst [vmem:[#allocation33_spill] sm:$0xff] %v30160_v46  ;;  %25962 = vmatpush3.bf16.msra.mxu1 %v29545_v12  ;;  %19736 = vmatprep.mubr.f32.mxu1 %v32384_v7  ;;  %32388 = vst [vmem:[#allocation36_spill] sm:$0xff] %v30200_v32  ;;  %v18983_v7 = vmax.f32 %v26641_v2, 0.0  ;;  %v32389_v46 = vand.u32 4294901760, %v30129_v62  ;;  %v30225_v2 = vld [vmem:[%s32099_s13 + $0x1f0] sm:$0xff]  ;;  %v32182_v28 = vand.u32 4294901760, %v30212_v48  ;;  %v30249_v55 = vsub.f32 %v18975_v16, %v30200_v32 }
 0xe0a   :  { %25964 = vmatprep.subr.bf16.mxu1 %v29564_v23  ;;  %32387 = vst [vmem:[#allocation35_spill] sm:$0xff] %v30193_v6  ;;  %v30219_v30 = vand.u32 4294901760, %v18984_v45  ;;  %v32401_v11 = vld [vmem:[#allocation10_spill] sm:$0xff] }
 0xe0b   :  { %26066 = vmatpush3.bf16.msra.mxu0 %v30150_v60  ;;  %v30207_v40 = vpack.c.bf16 %v32390_v27, %v32389_v46  ;;  %v30230_v46 = vld [vmem:[%s32099_s13 + $0x1f8] sm:$0xff]  ;;  %v32393_v27 = vand.u32 4294901760, %v30156_v5  ;;  %v32395_v60 = vand.u32 4294901760, %v30178_v24  ;;  %32398 = vst [vmem:[#allocation41_spill] sm:$0xff] %v30249_v55 }
 0xe0c   :  { %26068 = vmatprep.subr.bf16.mxu0 %v30167_v19  ;;  %32392 = vst [vmem:[#allocation38_spill] sm:$0xff] %v30219_v30  ;;  %v30267_v16 = vsub.f32 %v18984_v45, %v30219_v30  ;;  %v32410_v45 = vld [vmem:[#allocation11_spill] sm:$0xff]  ;;  %v32411_v30 = vld [vmem:[#allocation12_spill] sm:$0xff] }
 0xe0d   :  { %32391 = vst [vmem:[#allocation37_spill] sm:$0xff] %v30207_v40  ;;  %25966 = vmatpush3.bf16.msra.mxu1 %v29582_v53  ;;  %v30238_v19 = vpack.c.bf16 %v32170_v36, %v32393_v27  ;;  %v30244_v59 = vpack.c.bf16 %v32396_v35, %v32395_v60  ;;  %v30259_v35 = vld [vmem:[%s32099_s13 + $0x170] sm:$0xff]  ;;  %v30264_v60 = vld [vmem:[%s32099_s13 + $0x178] sm:$0xff]  ;;  %v32402_v27 = vand.u32 4294901760, %v29932_v41 }
 0xe0e   :  { %25968 = vmatprep.subr.bf16.mxu1 %v29593_v31  ;;  %32400 = vst [vmem:[#allocation43_spill] sm:$0xff] %v30267_v16  ;;  %v32416_v13 = vand.u32 4294901760, %v30264_v60 }
 0xe0f   :  { %26070 = vmatpush3.bf16.msra.mxu0 %v30193_v6  ;;  %32394 = vst [vmem:[#allocation39_spill] sm:$0xff] %v30238_v19  ;;  %32397 = vst [vmem:[#allocation40_spill] sm:$0xff] %v30244_v59  ;;  %v30251_v6 = vand.u32 4294901760, %v18983_v7  ;;  %v30274_v36 = vsub.f32 %v29932_v41, %v32402_v27  ;;  %v32406_v41 = vand.u32 4294901760, %v29937_v54 }
 0xe10   :  { %26072 = vmatprep.subr.bf16.mxu0 %v30207_v40  ;;  %v32403_v40 = vand.u32 4294901760, %v30217_v52 }
 0xe11   :  { %32399 = vst [vmem:[#allocation42_spill] sm:$0xff] %v30251_v6  ;;  %25970 = vmatpush3.bf16.msra.mxu1 %v29608_v8  ;;  %v30287_v10 = vsub.f32 %v18983_v7, %v30251_v6  ;;  %v30292_v27 = vsub.f32 %v29937_v54, %v32406_v41  ;;  %v32412_v7 = vand.u32 4294901760, %v29947_v22  ;;  %v32413_v54 = vand.u32 4294901760, %v29952_v44 }
 0xe12   :  { %25972 = vmatprep.subr.bf16.mxu1 %v32401_v11  ;;  %v30281_v32 = vpack.c.bf16 %v32403_v40, %v32182_v28  ;;  %v32408_v40 = vand.u32 4294901760, %v30230_v46 }
 0xe13   :  { %26074 = vmatpush3.bf16.msra.mxu0 %v30238_v19  ;;  %32405 = vst [vmem:[#allocation44_spill] sm:$0xff] %v30287_v10  ;;  %v32407_v19 = vand.u32 4294901760, %v30225_v2  ;;  %v30307_v6 = vsub.f32 %v29947_v22, %v32412_v7  ;;  %v30312_v41 = vsub.f32 %v29952_v44, %v32413_v54  ;;  %v32418_v22 = vand.u32 4294901760, %v30249_v55 }
 0xe14   :  { %32404 = vst [vmem:[#allocation10_spill] sm:$0xff] %v30281_v32  ;;  %26076 = vmatprep.subr.bf16.mxu0 %v30244_v59  ;;  %v32414_v59 = vand.u32 4294901760, %v29961_v15  ;;  %v32419_v44 = vand.u32 4294901760, %v29966_v42 }
 0xe15   :  { %v30299_v28 = vpack.c.bf16 %v32408_v40, %v32407_v19  ;;  %25974 = vmatpush3.bf16.msra.mxu1 %v32410_v45  ;;  %v32415_v40 = vand.u32 4294901760, %v30259_v35  ;;  %v20147_v7 = vsub.f32 %v30249_v55, %v32418_v22  ;;  %v32423_v22 = vand.u32 4294901760, %v29984_v50 }
 0xe16   :  { %25976 = vmatprep.subr.bf16.mxu1 %v32411_v30  ;;  %v30317_v19 = vsub.f32 %v29961_v15, %v32414_v59  ;;  %v30332_v54 = vsub.f32 %v29966_v42, %v32419_v44  ;;  %v26115_v15 = vpack.c.bf16 %v30292_v27, %v30274_v36  ;;  %v32422_v30 = vld [vmem:[#allocation14_spill] sm:$0xff]  ;;  %v32424_v44 = vand.u32 4294901760, %v29989_v0 }
 0xe17   :  { %32409 = vst [vmem:[#allocation45_spill] sm:$0xff] %v30299_v28  ;;  %26078 = vmatpush3.bf16.msra.mxu0 %v30281_v32  ;;  %v30324_v37 = vpack.c.bf16 %v32416_v13, %v32415_v40  ;;  %v32420_v32 = vld [vmem:[#allocation13_spill] sm:$0xff]  ;;  %v32421_v13 = vand.u32 4294901760, %v30267_v16  ;;  %v30346_v42 = vsub.f32 %v29984_v50, %v32423_v22  ;;  %v32425_v59 = vand.u32 4294901760, %v29996_v20 }
 0xe18   :  { %26080 = vmatprep.subr.bf16.mxu0 %v30299_v28  ;;  %v30351_v28 = vsub.f32 %v29989_v0, %v32424_v44  ;;  %v32427_v50 = vand.u32 4294901760, %v30001_v9  ;;  %v32429_v44 = vand.u32 4294901760, %v30287_v10 }
 0xe19   :  { %32417 = vst [vmem:[#allocation11_spill] sm:$0xff] %v30324_v37  ;;  %25978 = vmatpush3.bf16.msra.mxu1 %v32420_v32  ;;  %v20156_v40 = vsub.f32 %v30267_v16, %v32421_v13  ;;  %v30356_v55 = vsub.f32 %v29996_v20, %v32425_v59  ;;  %v26117_v16 = vpack.c.bf16 %v30312_v41, %v30307_v6  ;;  %v32432_v32 = vand.u32 4294901760, %v30026_v39 }
 0xe1a   :  { %25980 = vmatprep.subr.bf16.mxu1 %v32422_v30  ;;  %v20148_v30 = vand.u32 4294901760, %v20147_v7  ;;  %v30366_v22 = vsub.f32 %v30001_v9, %v32427_v50  ;;  %v20162_v20 = vsub.f32 %v30287_v10, %v32429_v44  ;;  %v26119_v59 = vpack.c.bf16 %v30332_v54, %v30317_v19  ;;  %v32431_v7 = vld [vmem:[#allocation16_spill] sm:$0xff] }
 0xe1b   :  { %26082 = vmatpush3.bf16.msra.mxu0 %v30324_v37  ;;  %v30359_v13 = vpop.f32.mrb[40].mxu0  ;;  %v20157_v37 = vand.u32 4294901760, %v20156_v40  ;;  %v30380_v9 = vsub.f32 %v30026_v39, %v32432_v32  ;;  %v26121_v40 = vpack.c.bf16 %v30351_v28, %v30346_v42  ;;  %v32436_v39 = vand.u32 4294901760, %v30045_v4 }
 0xe1c   :  { %32426 = vst [vmem:[#allocation46_spill] sm:$0xff] %v30359_v13  ;;  %v30368_v0 = vpop.f32.mrb[41].mxu0  ;;  %26116 = vmatprep.subr.bf16.mxu0 %v26115_v15  ;;  %v32430_v13 = vld [vmem:[#allocation15_spill] sm:$0xff]  ;;  %v32433_v15 = vand.u32 4294901760, %v30031_v33 }
 0xe1d   :  { %32428 = vst [vmem:[#allocation47_spill] sm:$0xff] %v30368_v0  ;;  %25982 = vmatpush3.bf16.msra.mxu1 %v32430_v13  ;;  %v30399_v32 = vsub.f32 %v30045_v4, %v32436_v39  ;;  %v32439_v4 = vand.u32 4294901760, %v30077_v26  ;;  %v32442_v39 = vand.u32 4294901760, %v29862_v58 }
 0xe1e   :  { %20149 = vmatmul.mubr.f32.vlgmr.msra.gmra.mrb[52].mxu0 %v20148_v30  ;;  %25984 = vmatprep.subr.bf16.mxu1 %v32431_v7  ;;  %v30385_v50 = vsub.f32 %v30031_v33, %v32433_v15  ;;  %v32435_v30 = vand.u32 4294901760, %v30040_v57  ;;  %v20163_v33 = vand.u32 4294901760, %v20162_v20 }
 0xe1f   :  { %20158 = vmatprep.mubr.f32.mxu0 %v20157_v37  ;;  %26118 = vmatpush3.bf16.msra.mxu0 %v26117_v16  ;;  %v30387_v44 = vpop.f32.mrb[42].mxu0  ;;  %v26123_v37 = vpack.c.bf16 %v30366_v22, %v30356_v55  ;;  %v30415_v15 = vsub.f32 %v30077_v26, %v32439_v4 }
 0xe20   :  { %32434 = vst [vmem:[#allocation15_spill] sm:$0xff] %v30387_v44  ;;  %v30394_v0 = vsub.f32 %v30040_v57, %v32435_v30  ;;  %v30401_v10 = vpop.f32.mrb[43].mxu0  ;;  %26120 = vmatprep.subr.bf16.mxu0 %v26119_v59  ;;  %v32438_v57 = vand.u32 4294901760, %v30072_v34  ;;  %v26125_v20 = vpack.c.bf16 %v30385_v50, %v30380_v9  ;;  %v32440_v59 = vand.u32 4294901760, %v30083_v43  ;;  %v32508_v44 = vld [vmem:[#allocation32_spill] sm:$0xff] }
 0xe21   :  { %32437 = vst [vmem:[#allocation16_spill] sm:$0xff] %v30401_v10  ;;  %25986 = vmatpush3.bf16.msra.mxu1 %v29727_v3  ;;  %v32441_v30 = vand.u32 4294901760, %v30088_v56 }
 0xe22   :  { %20164 = vmatmul.mubr.f32.gmra.mrb[54].mxu0 %v20163_v33  ;;  %26020 = vmatprep.subr.bf16.mxu1 %v29517_v61  ;;  %v30410_v16 = vsub.f32 %v30072_v34, %v32438_v57  ;;  %v30423_v61 = vsub.f32 %v30083_v43, %v32440_v59  ;;  %v26127_v26 = vpack.c.bf16 %v30399_v32, %v30394_v0  ;;  %v32444_v43 = vand.u32 4294901760, %v30106_v51 }
 0xe23   :  { %26122 = vmatpush3.bf16.msra.mxu0 %v26121_v40  ;;  %20538 = vmatprep.mubr.f32.mxu0 %v29955_v25  ;;  %v30428_v34 = vsub.f32 %v30088_v56, %v32441_v30  ;;  %v32443_v40 = vand.u32 4294901760, %v29882_v38  ;;  %v32445_v56 = vand.u32 4294901760, %v30111_v18  ;;  %v32446_v38 = vand.u32 4294901760, %v30129_v62 }
 0xe24   :  { %19740 = vmatmul.mubr.f32.vlgmr.msra.gmra.mrb[54].mxu1 %v32442_v39  ;;  %26124 = vmatprep.subr.bf16.mxu0 %v26123_v37  ;;  %v30441_v33 = vsub.f32 %v30106_v51, %v32444_v43  ;;  %v26129_v37 = vpack.c.bf16 %v30415_v15, %v30410_v16  ;;  %v32448_v51 = vand.u32 4294901760, %v29878_v63  ;;  %v20291_v43 = vand.u32 4294901760, %v30292_v27 }
 0xe25   :  { %19747 = vmatprep.mubr.f32.mxu1 %v32443_v40  ;;  %26022 = vmatpush3.bf16.msra.mxu1 %v29519_v1  ;;  %v30446_v58 = vsub.f32 %v30111_v18, %v32445_v56  ;;  %v30453_v1 = vsub.f32 %v30129_v62, %v32446_v38  ;;  %v26131_v18 = vpack.c.bf16 %v30428_v34, %v30423_v61  ;;  %v32449_v62 = vand.u32 4294901760, %v30156_v5 }
 0xe26   :  { %26024 = vmatprep.subr.bf16.mxu1 %v29541_v29  ;;  %v32447_v29 = vand.u32 4294901760, %v30138_v14 }
 0xe27   :  { %26126 = vmatpush3.bf16.msra.mxu0 %v26125_v20  ;;  %v30470_v4 = vsub.f32 %v30156_v5, %v32449_v62  ;;  %v26133_v20 = vpack.c.bf16 %v30446_v58, %v30441_v33  ;;  %v32459_v62 = vld [vmem:[#allocation12_spill] sm:$0xff] }
 0xe28   :  { %v30458_v57 = vsub.f32 %v30138_v14, %v32447_v29  ;;  %19751 = vmatmul.mubr.f32.gmra.mrb[56].mxu1 %v32448_v51  ;;  %26128 = vmatprep.subr.bf16.mxu0 %v26127_v26  ;;  %v32450_v14 = vand.u32 4294901760, %v30173_v47  ;;  %v32455_v26 = vand.u32 4294901760, %v30225_v2  ;;  %v20179_v29 = vand.u32 4294901760, %v30312_v41 }
 0xe29   :  { %26026 = vmatpush3.bf16.msra.mxu1 %v29545_v12  ;;  %20028 = vmatprep.mubr.f32.mxu1 %v29859_v49  ;;  %v32451_v12 = vand.u32 4294901760, %v30178_v24  ;;  %v20292_v51 = vsub.f32 %v30292_v27, %v20291_v43 }
 0xe2a   :  { %26028 = vmatprep.subr.bf16.mxu1 %v29564_v23  ;;  %v30475_v63 = vsub.f32 %v30173_v47, %v32450_v14  ;;  %v32452_v23 = vand.u32 4294901760, %v30183_v21  ;;  %v26135_v5 = vpack.c.bf16 %v30458_v57, %v30453_v1  ;;  %v32453_v47 = vand.u32 4294901760, %v30212_v48 }
 0xe2b   :  { %26130 = vmatpush3.bf16.msra.mxu0 %v26129_v37  ;;  %v30482_v49 = vsub.f32 %v30178_v24, %v32451_v12  ;;  %v32454_v24 = vand.u32 4294901760, %v30217_v52  ;;  %v20180_v14 = vsub.f32 %v30312_v41, %v20179_v29  ;;  %v20312_v41 = vand.u32 4294901760, %v30356_v55 }
 0xe2c   :  { %v30487_v59 = vsub.f32 %v30183_v21, %v32452_v23  ;;  %26132 = vmatprep.subr.bf16.mxu0 %v26131_v18  ;;  %v30496_v30 = vsub.f32 %v30212_v48, %v32453_v47  ;;  %v26137_v21 = vpack.c.bf16 %v30475_v63, %v30470_v4  ;;  %v16581_v18 = vsub.s32 5, %v29846_v17  ;;  %v32460_v47 = vld [vmem:[#allocation13_spill] sm:$0xff] }
 0xe2d   :  { %26030 = vmatpush3.bf16.msra.mxu1 %v29582_v53  ;;  %v30501_v39 = vsub.f32 %v30217_v52, %v32454_v24  ;;  %v30508_v53 = vsub.f32 %v30225_v2, %v32455_v26  ;;  %v20284_v52 = vand.u32 4294901760, %v30274_v36  ;;  %v32457_v2 = vand.u32 4294901760, %v30259_v35 }
 0xe2e   :  { %26032 = vmatprep.subr.bf16.mxu1 %v29593_v31  ;;  %v32456_v31 = vand.u32 4294901760, %v30230_v46  ;;  %v26139_v48 = vpack.c.bf16 %v30487_v59, %v30482_v49  ;;  %v20298_v23 = vand.u32 4294901760, %v30317_v19 }
 0xe2f   :  { %26134 = vmatpush3.bf16.msra.mxu0 %v26133_v20  ;;  %v30524_v56 = vsub.f32 %v30259_v35, %v32457_v2  ;;  %v20285_v35 = vsub.f32 %v30274_v36, %v20284_v52  ;;  %v26179_v12 = vpack.c.bf16 %v20291_v43, %v20284_v52  ;;  %v20305_v36 = vand.u32 4294901760, %v30332_v54 }
 0xe30   :  { %v30513_v40 = vsub.f32 %v30230_v46, %v32456_v31  ;;  %26136 = vmatprep.subr.bf16.mxu0 %v26135_v5  ;;  %v32458_v46 = vand.u32 4294901760, %v30264_v60  ;;  %v20293_v5 = vand.u32 4294901760, %v20292_v51  ;;  %v20299_v26 = vsub.f32 %v30317_v19, %v20298_v23  ;;  %v32461_v31 = vld [vmem:[#allocation14_spill] sm:$0xff] }
 0xe31   :  { %26034 = vmatpush3.bf16.msra.mxu1 %v29608_v8  ;;  %v26141_v8 = vpack.c.bf16 %v30501_v39, %v30496_v30  ;;  %v20286_v27 = vand.u32 4294901760, %v20285_v35  ;;  %v20200_v52 = vand.u32 4294901760, %v30380_v9  ;;  %v20207_v43 = vand.u32 4294901760, %v30385_v50  ;;  %v32462_v35 = vld [vmem:[#allocation17_spill] sm:$0xff] }
 0xe32   :  { %26036 = vmatprep.subr.bf16.mxu1 %v32401_v11  ;;  %v30529_v37 = vsub.f32 %v30264_v60, %v32458_v46  ;;  %v20172_v11 = vand.u32 4294901760, %v30307_v6  ;;  %v26143_v38 = vpack.c.bf16 %v30513_v40, %v30508_v53  ;;  %v20306_v2 = vsub.f32 %v30332_v54, %v20305_v36 }
 0xe33   :  { %26138 = vmatpush3.bf16.msra.mxu0 %v26137_v21  ;;  %v20319_v21 = vand.u32 4294901760, %v30366_v22  ;;  %v30561_v51 = vrot.slane %v32462_v35, %v16581_v18  ;;  %v26183_v19 = vpack.c.bf16 %v20305_v36, %v20298_v23  ;;  %v32464_v18 = vld [vmem:[#allocation43_spill] sm:$0xff]  ;;  %v20208_v36 = vsub.f32 %v30385_v50, %v20207_v43 }
 0xe34   :  { %26140 = vmatprep.subr.bf16.mxu0 %v26139_v48  ;;  %v20173_v60 = vsub.f32 %v30307_v6, %v20172_v11  ;;  %v26145_v20 = vpack.c.bf16 %v30529_v37, %v30524_v56  ;;  %v20193_v6 = vand.u32 4294901760, %v30351_v28  ;;  %v20181_v48 = vand.u32 4294901760, %v20180_v14 }
 0xe35   :  { %26038 = vmatpush3.bf16.msra.mxu1 %v32410_v45  ;;  %v20186_v45 = vand.u32 4294901760, %v30346_v42  ;;  %v26181_v46 = vpack.c.bf16 %v20179_v29, %v20172_v11  ;;  %v26187_v14 = vpack.c.bf16 %v20319_v21, %v20312_v41  ;;  %v20320_v54 = vsub.f32 %v30366_v22, %v20319_v21 }
 0xe36   :  { %26040 = vmatprep.subr.bf16.mxu1 %v32459_v62  ;;  %v20174_v24 = vand.u32 4294901760, %v20173_v60  ;;  %v26083_v62 = vpack.c.bf16 %v20293_v5, %v20286_v27  ;;  %v20300_v11 = vand.u32 4294901760, %v20299_v26  ;;  %v20307_v29 = vand.u32 4294901760, %v20306_v2  ;;  %v32466_v26 = vld [vmem:[#allocation21_spill] sm:$0xff] }
 0xe37   :  { %26142 = vmatpush3.bf16.msra.mxu0 %v26141_v8  ;;  %v20187_v8 = vsub.f32 %v30346_v42, %v20186_v45  ;;  %v26185_v60 = vpack.c.bf16 %v20193_v6, %v20186_v45  ;;  %v20333_v22 = vand.u32 4294901760, %v30399_v32  ;;  %v20221_v45 = vand.u32 4294901760, %v30415_v15 }
 0xe38   :  { %26144 = vmatprep.subr.bf16.mxu0 %v26143_v38  ;;  %v20194_v38 = vsub.f32 %v30351_v28, %v20193_v6  ;;  %v26085_v42 = vpack.c.bf16 %v20181_v48, %v20174_v24  ;;  %v26189_v28 = vpack.c.bf16 %v20207_v43, %v20200_v52  ;;  %v20321_v27 = vand.u32 4294901760, %v20320_v54  ;;  %v32467_v43 = vld [vmem:[#allocation18_spill] sm:$0xff] }
 0xe39   :  { %26042 = vmatpush3.bf16.msra.mxu1 %v32460_v47  ;;  %v20313_v47 = vsub.f32 %v30356_v55, %v20312_v41  ;;  %v20326_v55 = vand.u32 4294901760, %v30394_v0  ;;  %v20340_v5 = vand.u32 4294901760, %v30423_v61  ;;  %v20347_v24 = vand.u32 4294901760, %v30428_v34 }
 0xe3a   :  { %26044 = vmatprep.subr.bf16.mxu1 %v32461_v31  ;;  %v20195_v23 = vand.u32 4294901760, %v20194_v38  ;;  %v26087_v50 = vpack.c.bf16 %v20307_v29, %v20300_v11  ;;  %v20334_v21 = vsub.f32 %v30399_v32, %v20333_v22  ;;  %v32468_v38 = vld [vmem:[#allocation20_spill] sm:$0xff]  ;;  %v20228_v35 = vand.u32 4294901760, %v30441_v33  ;;  %v32469_v11 = vld [vmem:[#allocation19_spill] sm:$0xff] }
 0xe3b   :  { %26146 = vmatpush3.bf16.msra.mxu0 %v26145_v20  ;;  %v32463_v20 = vld [vmem:[#allocation41_spill] sm:$0xff]  ;;  %v20314_v6 = vand.u32 4294901760, %v20313_v47  ;;  %v20327_v41 = vsub.f32 %v30394_v0, %v20326_v55  ;;  %v26191_v2 = vpack.c.bf16 %v20333_v22, %v20326_v55  ;;  %v26195_v32 = vpack.c.bf16 %v20347_v24, %v20340_v5 }
 0xe3c   :  { %26180 = vmatprep.subr.bf16.mxu0 %v26179_v12  ;;  %v20188_v12 = vand.u32 4294901760, %v20187_v8  ;;  %v20222_v8 = vsub.f32 %v30415_v15, %v20221_v45  ;;  %v20354_v15 = vand.u32 4294901760, %v30453_v1 }
 0xe3d   :  { %26046 = vmatpush3.bf16.msra.mxu1 %v32430_v13  ;;  %v20201_v13 = vsub.f32 %v30380_v9, %v20200_v52  ;;  %v32465_v9 = vld [vmem:[#allocation44_spill] sm:$0xff]  ;;  %v26091_v0 = vpack.c.bf16 %v20321_v27, %v20314_v6 }
 0xe3e   :  { %20541 = vmatmul.mubr.f32.vlgmr.msra.gmra.mrb[56].mxu0 %v32463_v20  ;;  %26048 = vmatprep.subr.bf16.mxu1 %v32431_v7  ;;  %v20214_v7 = vand.u32 4294901760, %v30410_v16  ;;  %v26089_v31 = vpack.c.bf16 %v20195_v23, %v20188_v12  ;;  %v20223_v29 = vand.u32 4294901760, %v20222_v8  ;;  %v20242_v12 = vand.u32 4294901760, %v30470_v4 }
 0xe3f   :  { %20547 = vmatprep.mubr.f32.mxu0 %v32464_v18  ;;  %26182 = vmatpush3.bf16.msra.mxu0 %v26181_v46  ;;  %v20202_v48 = vand.u32 4294901760, %v20201_v13  ;;  %v20229_v23 = vsub.f32 %v30441_v33, %v20228_v35 }
 0xe40   :  { %26184 = vmatprep.subr.bf16.mxu0 %v26183_v19  ;;  %v20215_v52 = vsub.f32 %v30410_v16, %v20214_v7  ;;  %v26193_v46 = vpack.c.bf16 %v20221_v45, %v20214_v7  ;;  %v20235_v19 = vand.u32 4294901760, %v30446_v58  ;;  %v20341_v16 = vsub.f32 %v30423_v61, %v20340_v5  ;;  %v32470_v61 = vld [vmem:[#allocation29_spill] sm:$0xff] }
 0xe41   :  { %26050 = vmatpush3.bf16.msra.mxu1 %v29727_v3  ;;  %v20209_v3 = vand.u32 4294901760, %v20208_v36  ;;  %v20355_v36 = vsub.f32 %v30453_v1, %v20354_v15  ;;  %v20243_v6 = vsub.f32 %v30470_v4, %v20242_v12  ;;  %v20375_v1 = vand.u32 4294901760, %v30487_v59 }
 0xe42   :  { %20550 = vmatmul.mubr.f32.gmra.mrb[58].mxu0 %v32465_v9  ;;  %26084 = vmatprep.subr.bf16.mxu1 %v26083_v62  ;;  %v20335_v62 = vand.u32 4294901760, %v20334_v21  ;;  %v20216_v54 = vand.u32 4294901760, %v20215_v52  ;;  %v20236_v13 = vsub.f32 %v30446_v58, %v20235_v19  ;;  %v20342_v7 = vand.u32 4294901760, %v20341_v16 }
 0xe43   :  { %26186 = vmatpush3.bf16.msra.mxu0 %v26185_v60  ;;  %20835 = vmatprep.mubr.f32.mxu0 %v32466_v26  ;;  %v20328_v60 = vand.u32 4294901760, %v20327_v41  ;;  %v26093_v47 = vpack.c.bf16 %v20209_v3, %v20202_v48  ;;  %v26197_v33 = vpack.c.bf16 %v20235_v19, %v20228_v35  ;;  %v20356_v21 = vand.u32 4294901760, %v20355_v36  ;;  %v30653_v36 = vld [vmem:[%s32099_s13 + $0x290] sm:$0xff] }
 0xe44   :  { %20030 = vmatmul.mubr.f32.vlgmr.msra.gmra.mrb[58].mxu1 %v32467_v43  ;;  %26188 = vmatprep.subr.bf16.mxu0 %v26187_v14  ;;  %v20348_v14 = vsub.f32 %v30428_v34, %v20347_v24  ;;  %v30598_v34 = vadd.f32 %v32470_v61, %v30561_v51  ;;  %v26097_v5 = vpack.c.bf16 %v20223_v29, %v20216_v54  ;;  %v20230_v24 = vand.u32 4294901760, %v20229_v23 }
 0xe45   :  { %20035 = vmatprep.mubr.f32.mxu1 %v32468_v38  ;;  %26086 = vmatpush3.bf16.msra.mxu1 %v26085_v42  ;;  %v20361_v42 = vand.u32 4294901760, %v30458_v57  ;;  %v26095_v22 = vpack.c.bf16 %v20335_v62, %v20328_v60  ;;  %v20237_v41 = vand.u32 4294901760, %v20236_v13  ;;  %v20256_v3 = vand.u32 4294901760, %v30496_v30  ;;  %v30622_v60 = vld [vmem:[%s32099_s13 + $0x280] sm:$0xff]  ;;  %v30627_v62 = vld [vmem:[%s32099_s13 + $0x288] sm:$0xff] }
 0xe46   :  { %26088 = vmatprep.subr.bf16.mxu1 %v26087_v50  ;;  %v20349_v45 = vand.u32 4294901760, %v20348_v14  ;;  %v20368_v50 = vand.u32 4294901760, %v30482_v49  ;;  %v20263_v43 = vand.u32 4294901760, %v30501_v39  ;;  %v20382_v38 = vand.u32 4294901760, %v30508_v53 }
 0xe47   :  { %26190 = vmatpush3.bf16.msra.mxu0 %v26189_v28  ;;  %v20249_v28 = vand.u32 4294901760, %v30475_v63  ;;  %v20362_v55 = vsub.f32 %v30458_v57, %v20361_v42  ;;  %v26199_v58 = vpack.c.bf16 %v20361_v42, %v20354_v15  ;;  %v18978_v57 = vmax.f32 %v30598_v34, 0.0 }
 0xe48   :  { %20037 = vmatmul.mubr.f32.gmra.mrb[60].mxu1 %v32469_v11  ;;  %26192 = vmatprep.subr.bf16.mxu0 %v26191_v2  ;;  %v26099_v48 = vpack.c.bf16 %v20349_v45, %v20342_v7  ;;  %v20369_v4 = vsub.f32 %v30482_v49, %v20368_v50  ;;  %v20244_v2 = vand.u32 4294901760, %v20243_v6  ;;  %v26203_v8 = vpack.c.bf16 %v20375_v1, %v20368_v50 }
 0xe49   :  { %26090 = vmatpush3.bf16.msra.mxu1 %v26089_v31  ;;  %20394 = vmatprep.mubr.f32.mxu1 %v32466_v26  ;;  %v20250_v27 = vsub.f32 %v30475_v63, %v20249_v28  ;;  %v20363_v31 = vand.u32 4294901760, %v20362_v55  ;;  %v20376_v63 = vsub.f32 %v30487_v59, %v20375_v1  ;;  %v26201_v52 = vpack.c.bf16 %v20249_v28, %v20242_v12  ;;  %v30658_v55 = vld [vmem:[%s32099_s13 + $0x298] sm:$0xff] }
 0xe4a   :  { %26092 = vmatprep.subr.bf16.mxu1 %v26091_v0  ;;  %v20389_v0 = vand.u32 4294901760, %v30513_v40  ;;  %v30616_v35 = vand.u32 4294901760, %v18978_v57  ;;  %v26101_v49 = vpack.c.bf16 %v20237_v41, %v20230_v24  ;;  %v20264_v59 = vsub.f32 %v30501_v39, %v20263_v43  ;;  %v30678_v24 = vld [vmem:[%s32099_s13 + $0x218] sm:$0xff] }
 0xe4b   :  { %26194 = vmatpush3.bf16.msra.mxu0 %v26193_v46  ;;  %v20251_v46 = vand.u32 4294901760, %v20250_v27  ;;  %v26103_v19 = vpack.c.bf16 %v20363_v31, %v20356_v21  ;;  %v20370_v16 = vand.u32 4294901760, %v20369_v4  ;;  %v20383_v14 = vsub.f32 %v30508_v53, %v20382_v38  ;;  %v30638_v53 = vld [vmem:[%s32099_s13 + $0x200] sm:$0xff]  ;;  %v30689_v31 = vld [vmem:[%s32099_s13 + $0x2a8] sm:$0xff] }
 0xe4c   :  { %26196 = vmatprep.subr.bf16.mxu0 %v26195_v32  ;;  %v20257_v32 = vsub.f32 %v30496_v30, %v20256_v3  ;;  %32471 = vst [vmem:[#allocation12_spill] sm:$0xff] %v30616_v35  ;;  %v20377_v30 = vand.u32 4294901760, %v20376_v63  ;;  %v26205_v54 = vpack.c.bf16 %v20263_v43, %v20256_v3  ;;  %v20270_v15 = vand.u32 4294901760, %v30524_v56  ;;  %v30684_v21 = vld [vmem:[%s32099_s13 + $0x2a0] sm:$0xff] }
 0xe4d   :  { %26094 = vmatpush3.bf16.msra.mxu1 %v26093_v47  ;;  %v20390_v47 = vsub.f32 %v30513_v40, %v20389_v0  ;;  %v26105_v39 = vpack.c.bf16 %v20251_v46, %v20244_v2  ;;  %v20277_v42 = vand.u32 4294901760, %v30529_v37  ;;  %v26207_v11 = vpack.c.bf16 %v20389_v0, %v20382_v38  ;;  %v30643_v40 = vld [vmem:[%s32099_s13 + $0x208] sm:$0xff] }
 0xe4e   :  { %26096 = vmatprep.subr.bf16.mxu1 %v26095_v22  ;;  %v20258_v29 = vand.u32 4294901760, %v20257_v32  ;;  %v32218_v12 = vand.u32 4294901760, %v30622_v60  ;;  %v32217_v23 = vand.u32 4294901760, %v30627_v62  ;;  %v30646_v13 = vsub.f32 %v18978_v57, %v30616_v35  ;;  %v30717_v38 = vld [vmem:[%s32099_s13 + $0x228] sm:$0xff] }
 0xe4f   :  { %26198 = vmatpush3.bf16.msra.mxu0 %v26197_v33  ;;  %v20265_v61 = vand.u32 4294901760, %v20264_v59  ;;  %v20271_v34 = vsub.f32 %v30524_v56, %v20270_v15  ;;  %v20278_v28 = vsub.f32 %v30529_v37, %v20277_v42  ;;  %v26107_v22 = vpack.c.bf16 %v20377_v30, %v20370_v16  ;;  %v32475_v59 = vld [vmem:[#allocation36_spill] sm:$0xff]  ;;  %v32476_v16 = vld [vmem:[#allocation38_spill] sm:$0xff] }
 0xe50   :  { %26200 = vmatprep.subr.bf16.mxu0 %v26199_v58  ;;  %v20384_v7 = vand.u32 4294901760, %v20383_v14  ;;  %v20391_v45 = vand.u32 4294901760, %v20390_v47  ;;  %v26209_v33 = vpack.c.bf16 %v20277_v42, %v20270_v15  ;;  %v32214_v56 = vand.u32 4294901760, %v30638_v53  ;;  %v30756_v15 = vld [vmem:[%s32098_s12] sm:$0xff] }
 0xe51   :  { %26098 = vmatpush3.bf16.msra.mxu1 %v26097_v5  ;;  %v32211_v37 = vand.u32 4294901760, %v30643_v40  ;;  %v30666_v58 = vpack.c.bf16 %v32217_v23, %v32218_v12  ;;  %v32210_v6 = vand.u32 4294901760, %v30653_v36  ;;  %v32209_v27 = vand.u32 4294901760, %v30658_v55  ;;  %v30673_v5 = vld [vmem:[%s32099_s13 + $0x210] sm:$0xff] }
 0xe52   :  { %26100 = vmatprep.subr.bf16.mxu1 %v26099_v48  ;;  %v26109_v50 = vpack.c.bf16 %v20265_v61, %v20258_v29  ;;  %v20272_v1 = vand.u32 4294901760, %v20271_v34  ;;  %v20279_v57 = vand.u32 4294901760, %v20278_v28  ;;  %v32200_v41 = vand.u32 4294901760, %v30646_v13  ;;  %v30771_v28 = vld [vmem:[%s32099_s13 + $0x2c0] sm:$0xff]  ;;  %v32492_v23 = vld [vmem:[#allocation26_spill] sm:$0xff] }
 0xe53   :  { %26202 = vmatpush3.bf16.msra.mxu0 %v26201_v52  ;;  %32472 = vst [vmem:[#allocation13_spill] sm:$0xff] %v30666_v58  ;;  %v26111_v48 = vpack.c.bf16 %v20391_v45, %v20384_v7  ;;  %v30695_v3 = vpack.c.bf16 %v32211_v37, %v32214_v56  ;;  %v32208_v4 = vand.u32 4294901760, %v30673_v5  ;;  %v32207_v63 = vand.u32 4294901760, %v30678_v24  ;;  %v32479_v7 = vld [vmem:[#allocation42_spill] sm:$0xff] }
 0xe54   :  { %26204 = vmatprep.subr.bf16.mxu0 %v26203_v8  ;;  %v16577_v52 = vsub.s32 4, %v29846_v17  ;;  %v30705_v43 = vpack.c.bf16 %v32209_v27, %v32210_v6  ;;  %v32206_v2 = vand.u32 4294901760, %v30684_v21  ;;  %v32205_v46 = vand.u32 4294901760, %v30689_v31  ;;  %v30712_v8 = vld [vmem:[%s32099_s13 + $0x220] sm:$0xff]  ;;  %v32480_v45 = vld [vmem:[#allocation22_spill] sm:$0xff]  ;;  %v32488_v6 = vld [vmem:[#allocation31_spill] sm:$0xff] }
 0xe55   :  { %26102 = vmatpush3.bf16.msra.mxu1 %v26101_v49  ;;  %32473 = vst [vmem:[#allocation14_spill] sm:$0xff] %v30695_v3  ;;  %v26113_v0 = vpack.c.bf16 %v20279_v57, %v20272_v1  ;;  %v21059_v32 = vsub.f32 %v30646_v13, %v32200_v41  ;;  %v30725_v49 = vld [vmem:[%s32099_s13 + $0x2b0] sm:$0xff]  ;;  %v30739_v30 = vpack.c.bf16 %v32207_v63, %v32208_v4  ;;  %v32204_v14 = vand.u32 4294901760, %v30712_v8  ;;  %v30792_v57 = vld [vmem:[%s32099_s13 + $0x240] sm:$0xff]  ;;  %v30808_v41 = vld [vmem:[%s32099_s13 + $0x248] sm:$0xff] }
 0xe56   :  { %26104 = vmatprep.subr.bf16.mxu1 %v26103_v19  ;;  %32474 = vst [vmem:[#allocation17_spill] sm:$0xff] %v30705_v43  ;;  %v30730_v19 = vld [vmem:[%s32099_s13 + $0x2b8] sm:$0xff]  ;;  %v32201_v47 = vand.u32 4294901760, %v30717_v38  ;;  %v16578_v42 = vrot.slane %v30756_v15, %v16577_v52  ;;  %v32203_v29 = vand.u32 4294901760, %v30725_v49  ;;  %v32226_v63 = vand.u32 4294901760, %v30792_v57 }
 0xe57   :  { %26206 = vmatpush3.bf16.msra.mxu0 %v26205_v54  ;;  %32477 = vst [vmem:[#allocation41_spill] sm:$0xff] %v30739_v30  ;;  %v30746_v54 = vld [vmem:[%s32099_s13 + $0x230] sm:$0xff]  ;;  %v32202_v61 = vand.u32 4294901760, %v30730_v19  ;;  %v21060_v34 = vand.u32 4294901760, %v21059_v32  ;;  %v32216_v32 = vand.u32 4294901760, %v30771_v28  ;;  %v32225_v4 = vand.u32 4294901760, %v30808_v41 }
 0xe58   :  { %26208 = vmatprep.subr.bf16.mxu0 %v26207_v11  ;;  %v30764_v11 = vpack.c.bf16 %v32205_v46, %v32206_v2  ;;  %v30787_v1 = vpack.c.bf16 %v32201_v47, %v32204_v14  ;;  %v30818_v47 = vld [vmem:[%s32099_s13 + $0x2d8] sm:$0xff]  ;;  %v32486_v46 = vld [vmem:[#allocation24_spill] sm:$0xff]  ;;  %v26645_v37 = vadd.f32 %v32488_v6, %v16578_v42  ;;  %v32491_v56 = vand.u32 4294901760, %v29955_v25 }
 0xe59   :  { %26106 = vmatpush3.bf16.msra.mxu1 %v26105_v39  ;;  %v30751_v39 = vld [vmem:[%s32099_s13 + $0x238] sm:$0xff]  ;;  %v30874_v25 = vpack.c.bf16 %v32225_v4, %v32226_v63  ;;  %v32498_v63 = vld [vmem:[#allocation30_spill] sm:$0xff] }
 0xe5a   :  { %26108 = vmatprep.subr.bf16.mxu1 %v26107_v22  ;;  %32478 = vst [vmem:[#allocation43_spill] sm:$0xff] %v30764_v11  ;;  %v30776_v22 = vld [vmem:[%s32099_s13 + $0x2c8] sm:$0xff]  ;;  %32481 = vst [vmem:[#allocation44_spill] sm:$0xff] %v30787_v1  ;;  %v32485_v14 = vld [vmem:[#allocation23_spill] sm:$0xff] }
 0xe5b   :  { %26210 = vmatpush3.bf16.msra.mxu0 %v26209_v33  ;;  %v32213_v33 = vand.u32 4294901760, %v30746_v54  ;;  %32493 = vst [vmem:[#allocation19_spill] sm:$0xff] %v30874_v25 }
 0xe5c   :  { %26244 = vmatprep.subr.bf16.mxu0 %v30666_v58 }
 0xe5d   :  { %26110 = vmatpush3.bf16.msra.mxu1 %v26109_v50  ;;  %v32212_v50 = vand.u32 4294901760, %v30751_v39 }
 0xe5e   :  { %20837 = vmatmul.mubr.f32.vlgmr.msra.gmra.mrb[60].mxu0 %v32475_v59  ;;  %26112 = vmatprep.subr.bf16.mxu1 %v26111_v48  ;;  %v32482_v48 = vld [vmem:[#allocation27_spill] sm:$0xff] }
 0xe5f   :  { %20842 = vmatprep.mubr.f32.mxu0 %v32476_v16  ;;  %26246 = vmatpush3.bf16.msra.mxu0 %v30695_v3  ;;  %v26643_v52 = vadd.f32 %v32482_v48, %v16578_v42  ;;  %v30813_v48 = vld [vmem:[%s32099_s13 + $0x2d0] sm:$0xff]  ;;  %v30829_v2 = vpack.c.bf16 %v32212_v50, %v32213_v33  ;;  %v32490_v42 = vld [vmem:[#allocation25_spill] sm:$0xff] }
 0xe60   :  { %26248 = vmatprep.subr.bf16.mxu0 %v30705_v43  ;;  %v30848_v33 = vld [vmem:[%s32099_s13 + $0x250] sm:$0xff] }
 0xe61   :  { %26114 = vmatpush3.bf16.msra.mxu1 %v26113_v0  ;;  %v30801_v0 = vpack.c.bf16 %v32202_v61, %v32203_v29  ;;  %v32484_v61 = vld [vmem:[#allocation33_spill] sm:$0xff]  ;;  %32487 = vst [vmem:[#allocation18_spill] sm:$0xff] %v30829_v2  ;;  %v18977_v27 = vmax.f32 %v26643_v52, 0.0  ;;  %v30853_v52 = vld [vmem:[%s32099_s13 + $0x258] sm:$0xff]  ;;  %v32499_v4 = vand.u32 4294901760, %v30848_v33 }
 0xe62   :  { %20844 = vmatmul.mubr.f32.gmra.mrb[62].mxu0 %v32479_v7  ;;  %26148 = vmatprep.subr.bf16.mxu1 %v32480_v45  ;;  %v26646_v29 = vadd.f32 %v32484_v61, %v30561_v51  ;;  %v32228_v51 = vand.u32 4294901760, %v30813_v48  ;;  %v32227_v61 = vand.u32 4294901760, %v30818_v47 }
 0xe63   :  { %26250 = vmatpush3.bf16.msra.mxu0 %v30739_v30  ;;  %21061 = vmatprep.mubr.f32.mxu0 %v21060_v34  ;;  %32483 = vst [vmem:[#allocation21_spill] sm:$0xff] %v30801_v0  ;;  %v32215_v34 = vand.u32 4294901760, %v30776_v22  ;;  %v32509_v30 = vld [vmem:[#allocation34_spill] sm:$0xff] }
 0xe64   :  { %20396 = vmatmul.mubr.f32.vlgmr.msra.gmra.mrb[62].mxu1 %v32475_v59  ;;  %26252 = vmatprep.subr.bf16.mxu0 %v30764_v11  ;;  %v18986_v6 = vmax.f32 %v26646_v29, 0.0  ;;  %v32497_v29 = vld [vmem:[#allocation28_spill] sm:$0xff] }
 0xe65   :  { %20401 = vmatprep.mubr.f32.mxu1 %v32476_v16  ;;  %26150 = vmatpush3.bf16.msra.mxu1 %v32485_v14  ;;  %v30843_v50 = vpack.c.bf16 %v32215_v34, %v32216_v32  ;;  %v30861_v34 = vld [vmem:[%s32099_s13 + $0x2e0] sm:$0xff]  ;;  %v30866_v32 = vld [vmem:[%s32099_s13 + $0x2e8] sm:$0xff] }
 0xe66   :  { %26152 = vmatprep.subr.bf16.mxu1 %v32486_v46  ;;  %v30904_v12 = vand.u32 4294901760, %v18986_v6  ;;  %v32505_v58 = vand.u32 4294901760, %v30866_v32 }
 0xe67   :  { %26254 = vmatpush3.bf16.msra.mxu0 %v30787_v1  ;;  %32489 = vst [vmem:[#allocation20_spill] sm:$0xff] %v30843_v50  ;;  %v18985_v1 = vmax.f32 %v26645_v37, 0.0  ;;  %v30910_v37 = vld [vmem:[%s32099_s13 + $0x2f8] sm:$0xff] }
 0xe68   :  { %20403 = vmatmul.mubr.f32.gmra.mrb[64].mxu1 %v32479_v7  ;;  %26256 = vmatprep.subr.bf16.mxu0 %v30801_v0  ;;  %v30889_v0 = vand.u32 4294901760, %v18977_v27  ;;  %32496 = vst [vmem:[#allocation27_spill] sm:$0xff] %v30904_v12  ;;  %v30947_v43 = vsub.f32 %v18986_v6, %v30904_v12  ;;  %v32518_v6 = vld [vmem:[#allocation35_spill] sm:$0xff]  ;;  %v32519_v12 = vld [vmem:[#allocation37_spill] sm:$0xff] }
 0xe69   :  { %26154 = vmatpush3.bf16.msra.mxu1 %v32490_v42  ;;  %20654 = vmatprep.mubr.f32.mxu1 %v32491_v56  ;;  %v30880_v56 = vpack.c.bf16 %v32227_v61, %v32228_v51  ;;  %v30897_v61 = vld [vmem:[%s32099_s13 + $0x268] sm:$0xff]  ;;  %v30902_v51 = vld [vmem:[%s32099_s13 + $0x2f0] sm:$0xff]  ;;  %v30926_v10 = vand.u32 4294901760, %v18985_v1 }
 0xe6a   :  { %26156 = vmatprep.subr.bf16.mxu1 %v32492_v23  ;;  %32495 = vst [vmem:[#allocation22_spill] sm:$0xff] %v30889_v0  ;;  %v30924_v3 = vsub.f32 %v18977_v27, %v30889_v0  ;;  %v30944_v27 = vld [vmem:[%s32099_s13 + $0x278] sm:$0xff]  ;;  %32507 = vst [vmem:[#allocation25_spill] sm:$0xff] %v30947_v43 }
 0xe6b   :  { %26258 = vmatpush3.bf16.msra.mxu0 %v30829_v2  ;;  %32494 = vst [vmem:[#allocation29_spill] sm:$0xff] %v30880_v56  ;;  %v30887_v2 = vld [vmem:[%s32099_s13 + $0x260] sm:$0xff]  ;;  %32503 = vst [vmem:[#allocation24_spill] sm:$0xff] %v30926_v10  ;;  %v30967_v59 = vsub.f32 %v18985_v1, %v30926_v10  ;;  %v32520_v1 = vand.u32 4294901760, %v30638_v53  ;;  %v32524_v16 = vand.u32 4294901760, %v30944_v27 }
 0xe6c   :  { %26260 = vmatprep.subr.bf16.mxu0 %v30843_v50  ;;  %v32500_v50 = vand.u32 4294901760, %v30853_v52  ;;  %32502 = vst [vmem:[#allocation23_spill] sm:$0xff] %v30924_v3 }
 0xe6d   :  { %26158 = vmatpush3.bf16.msra.mxu1 %v32497_v29  ;;  %v30987_v10 = vsub.f32 %v30638_v53, %v32520_v1  ;;  %v32526_v53 = vand.u32 4294901760, %v30924_v3 }
 0xe6e   :  { %26160 = vmatprep.subr.bf16.mxu1 %v32498_v63  ;;  %v30918_v11 = vpack.c.bf16 %v32500_v50, %v32499_v4  ;;  %v30939_v50 = vld [vmem:[%s32099_s13 + $0x270] sm:$0xff]  ;;  %v32511_v4 = vand.u32 4294901760, %v30887_v2 }
 0xe6f   :  { %26262 = vmatpush3.bf16.msra.mxu0 %v30874_v25  ;;  %v32504_v25 = vand.u32 4294901760, %v30861_v34  ;;  %v21065_v1 = vsub.f32 %v30924_v3, %v32526_v53  ;;  %v32531_v53 = vand.u32 4294901760, %v30673_v5 }
 0xe70   :  { %32501 = vst [vmem:[#allocation33_spill] sm:$0xff] %v30918_v11  ;;  %26264 = vmatprep.subr.bf16.mxu0 %v30880_v56  ;;  %v32512_v56 = vand.u32 4294901760, %v30897_v61 }
 0xe71   :  { %v30933_v7 = vpack.c.bf16 %v32505_v58, %v32504_v25  ;;  %26162 = vmatpush3.bf16.msra.mxu1 %v32508_v44  ;;  %v32510_v58 = vand.u32 4294901760, %v30622_v60 }
 0xe72   :  { %26164 = vmatprep.subr.bf16.mxu1 %v32509_v30  ;;  %v30961_v0 = vpack.c.bf16 %v32512_v56, %v32511_v4  ;;  %v32516_v56 = vand.u32 4294901760, %v30910_v37 }
 0xe73   :  { %32506 = vst [vmem:[#allocation31_spill] sm:$0xff] %v30933_v7  ;;  %v30954_v25 = vsub.f32 %v30622_v60, %v32510_v58  ;;  %26266 = vmatpush3.bf16.msra.mxu0 %v30918_v11  ;;  %v32514_v60 = vand.u32 4294901760, %v30627_v62  ;;  %v32515_v11 = vand.u32 4294901760, %v30902_v51 }
 0xe74   :  { %32513 = vst [vmem:[#allocation26_spill] sm:$0xff] %v30961_v0  ;;  %26268 = vmatprep.subr.bf16.mxu0 %v30933_v7  ;;  %v32522_v7 = vand.u32 4294901760, %v30653_v36 }
 0xe75   :  { %v30972_v58 = vsub.f32 %v30627_v62, %v32514_v60  ;;  %v30979_v4 = vpack.c.bf16 %v32516_v56, %v32515_v11  ;;  %26166 = vmatpush3.bf16.msra.mxu1 %v32518_v6  ;;  %v32521_v62 = vand.u32 4294901760, %v30643_v40  ;;  %v32523_v56 = vand.u32 4294901760, %v30939_v50 }
 0xe76   :  { %26168 = vmatprep.subr.bf16.mxu1 %v32519_v12  ;;  %v30997_v11 = vsub.f32 %v30653_v36, %v32522_v7  ;;  %v32530_v12 = vld [vmem:[#allocation40_spill] sm:$0xff]  ;;  %v32533_v7 = vand.u32 4294901760, %v30684_v21 }
 0xe77   :  { %32517 = vst [vmem:[#allocation28_spill] sm:$0xff] %v30979_v4  ;;  %v30992_v60 = vsub.f32 %v30643_v40, %v32521_v62  ;;  %26270 = vmatpush3.bf16.msra.mxu0 %v30961_v0  ;;  %v31004_v35 = vpack.c.bf16 %v32524_v16, %v32523_v56  ;;  %v32527_v40 = vand.u32 4294901760, %v30658_v55  ;;  %v26307_v36 = vpack.c.bf16 %v30972_v58, %v30954_v25  ;;  %v32528_v0 = vld [vmem:[#allocation39_spill] sm:$0xff] }
 0xe78   :  { %26272 = vmatprep.subr.bf16.mxu0 %v30979_v4  ;;  %v32529_v16 = vand.u32 4294901760, %v30947_v43  ;;  %v31036_v3 = vsub.f32 %v30684_v21, %v32533_v7  ;;  %v32536_v7 = vld [vmem:[#allocation10_spill] sm:$0xff] }
 0xe79   :  { %32525 = vst [vmem:[#allocation30_spill] sm:$0xff] %v31004_v35  ;;  %v31012_v62 = vsub.f32 %v30658_v55, %v32527_v40  ;;  %26170 = vmatpush3.bf16.msra.mxu1 %v32528_v0  ;;  %v31026_v55 = vsub.f32 %v30673_v5, %v32531_v53  ;;  %v32532_v40 = vand.u32 4294901760, %v30678_v24 }
 0xe7a   :  { %v21074_v56 = vsub.f32 %v30947_v43, %v32529_v16  ;;  %26172 = vmatprep.subr.bf16.mxu1 %v32530_v12  ;;  %v26309_v16 = vpack.c.bf16 %v30992_v60, %v30987_v10  ;;  %v21066_v43 = vand.u32 4294901760, %v21065_v1  ;;  %v32534_v12 = vand.u32 4294901760, %v30689_v31 }
 0xe7b   :  { %v31031_v4 = vsub.f32 %v30678_v24, %v32532_v40  ;;  %26274 = vmatpush3.bf16.msra.mxu0 %v31004_v35  ;;  %v32535_v24 = vand.u32 4294901760, %v30967_v59  ;;  %v26311_v21 = vpack.c.bf16 %v31012_v62, %v30997_v11  ;;  %v32537_v35 = vld [vmem:[#allocation45_spill] sm:$0xff]  ;;  %v32538_v1 = vand.u32 4294901760, %v30712_v8 }
 0xe7c   :  { %v31044_v5 = vsub.f32 %v30689_v31, %v32534_v12  ;;  %26308 = vmatprep.subr.bf16.mxu0 %v26307_v36  ;;  %v21075_v40 = vand.u32 4294901760, %v21074_v56  ;;  %v32539_v12 = vand.u32 4294901760, %v30717_v38  ;;  %v32540_v56 = vand.u32 4294901760, %v30725_v49 }
 0xe7d   :  { %v21080_v53 = vsub.f32 %v30967_v59, %v32535_v24  ;;  %26174 = vmatpush3.bf16.msra.mxu1 %v32536_v7  ;;  %v31056_v0 = vsub.f32 %v30712_v8, %v32538_v1  ;;  %v26313_v36 = vpack.c.bf16 %v31031_v4, %v31026_v55  ;;  %v32541_v24 = vand.u32 4294901760, %v30730_v19 }
 0xe7e   :  { %21067 = vmatmul.mubr.f32.vlgmr.msra.gmra.mrb[64].mxu0 %v21066_v43  ;;  %26176 = vmatprep.subr.bf16.mxu1 %v32537_v35  ;;  %v31061_v31 = vsub.f32 %v30717_v38, %v32539_v12  ;;  %v31068_v43 = vsub.f32 %v30725_v49, %v32540_v56  ;;  %v26315_v38 = vpack.c.bf16 %v31044_v5, %v31036_v3  ;;  %v32544_v12 = vand.u32 4294901760, %v30751_v39 }
 0xe7f   :  { %21076 = vmatprep.mubr.f32.mxu0 %v21075_v40  ;;  %26310 = vmatpush3.bf16.msra.mxu0 %v26309_v16  ;;  %v31073_v8 = vsub.f32 %v30730_v19, %v32541_v24  ;;  %v21081_v1 = vand.u32 4294901760, %v21080_v53  ;;  %v32542_v40 = vld [vmem:[#allocation11_spill] sm:$0xff]  ;;  %v32543_v16 = vand.u32 4294901760, %v30746_v54  ;;  %v32546_v56 = vand.u32 4294901760, %v30776_v22 }
 0xe80   :  { %26312 = vmatprep.subr.bf16.mxu0 %v26311_v21  ;;  %v31087_v19 = vsub.f32 %v30751_v39, %v32544_v12  ;;  %v26317_v53 = vpack.c.bf16 %v31061_v31, %v31056_v0  ;;  %v32545_v21 = vand.u32 4294901760, %v30771_v28  ;;  %v32547_v24 = vand.u32 4294901760, %v32463_v20 }
 0xe81   :  { %26178 = vmatpush3.bf16.msra.mxu1 %v32542_v40  ;;  %v31082_v49 = vsub.f32 %v30746_v54, %v32543_v16  ;;  %v31100_v54 = vsub.f32 %v30776_v22, %v32546_v56  ;;  %v26319_v39 = vpack.c.bf16 %v31073_v8, %v31068_v43  ;;  %v32550_v22 = vand.u32 4294901760, %v30808_v41 }
 0xe82   :  { %21082 = vmatmul.mubr.f32.gmra.mrb[66].mxu0 %v21081_v1  ;;  %26212 = vmatprep.subr.bf16.mxu1 %v32480_v45  ;;  %v31095_v45 = vsub.f32 %v30771_v28, %v32545_v21  ;;  %v32549_v28 = vand.u32 4294901760, %v30792_v57 }
 0xe83   :  { %26314 = vmatpush3.bf16.msra.mxu0 %v26313_v36  ;;  %21456 = vmatprep.mubr.f32.mxu0 %v30646_v13  ;;  %v32548_v36 = vand.u32 4294901760, %v32464_v18  ;;  %v31118_v20 = vsub.f32 %v30808_v41, %v32550_v22  ;;  %v32551_v18 = vand.u32 4294901760, %v30813_v48 }
 0xe84   :  { %20658 = vmatmul.mubr.f32.vlgmr.msra.gmra.mrb[66].mxu1 %v32547_v24  ;;  %26316 = vmatprep.subr.bf16.mxu0 %v26315_v38  ;;  %v31113_v1 = vsub.f32 %v30792_v57, %v32549_v28  ;;  %v26321_v38 = vpack.c.bf16 %v31087_v19, %v31082_v49  ;;  %v32553_v57 = vand.u32 4294901760, %v32465_v9  ;;  %v26323_v41 = vpack.c.bf16 %v31100_v54, %v31095_v45 }
 0xe85   :  { %20665 = vmatprep.mubr.f32.mxu1 %v32548_v36  ;;  %26214 = vmatpush3.bf16.msra.mxu1 %v32485_v14  ;;  %v31125_v14 = vsub.f32 %v30813_v48, %v32551_v18  ;;  %v32554_v48 = vand.u32 4294901760, %v30848_v33  ;;  %v32562_v28 = vand.u32 4294901760, %v30939_v50  ;;  %v21202_v18 = vand.u32 4294901760, %v30954_v25 }
 0xe86   :  { %26216 = vmatprep.subr.bf16.mxu1 %v32486_v46  ;;  %v32552_v46 = vand.u32 4294901760, %v30818_v47 }
 0xe87   :  { %26318 = vmatpush3.bf16.msra.mxu0 %v26317_v53  ;;  %v31142_v12 = vsub.f32 %v30848_v33, %v32554_v48  ;;  %v26325_v53 = vpack.c.bf16 %v31118_v20, %v31113_v1  ;;  %v31194_v22 = vsub.f32 %v30939_v50, %v32562_v28  ;;  %v32564_v48 = vld [vmem:[#allocation37_spill] sm:$0xff] }
 0xe88   :  { %v31130_v16 = vsub.f32 %v30818_v47, %v32552_v46  ;;  %20669 = vmatmul.mubr.f32.gmra.mrb[68].mxu1 %v32553_v57  ;;  %26320 = vmatprep.subr.bf16.mxu0 %v26319_v39  ;;  %v32555_v47 = vand.u32 4294901760, %v30853_v52  ;;  %v32560_v39 = vand.u32 4294901760, %v30902_v51  ;;  %v21090_v46 = vand.u32 4294901760, %v30987_v10 }
 0xe89   :  { %26218 = vmatpush3.bf16.msra.mxu1 %v32490_v42  ;;  %20946 = vmatprep.mubr.f32.mxu1 %v32466_v26  ;;  %v32556_v42 = vand.u32 4294901760, %v30861_v34 }
 0xe8a   :  { %26220 = vmatprep.subr.bf16.mxu1 %v32492_v23  ;;  %v31147_v9 = vsub.f32 %v30853_v52, %v32555_v47  ;;  %v32557_v23 = vand.u32 4294901760, %v30866_v32  ;;  %v26327_v33 = vpack.c.bf16 %v31130_v16, %v31125_v14  ;;  %v32558_v52 = vand.u32 4294901760, %v30887_v2 }
 0xe8b   :  { %26322 = vmatpush3.bf16.msra.mxu0 %v26321_v38  ;;  %v31154_v26 = vsub.f32 %v30861_v34, %v32556_v42  ;;  %v32559_v34 = vand.u32 4294901760, %v30897_v61  ;;  %v21091_v47 = vsub.f32 %v30987_v10, %v21090_v46  ;;  %v32566_v10 = vld [vmem:[#allocation39_spill] sm:$0xff] }
 0xe8c   :  { %v31159_v21 = vsub.f32 %v30866_v32, %v32557_v23  ;;  %26324 = vmatprep.subr.bf16.mxu0 %v26323_v41  ;;  %v31168_v56 = vsub.f32 %v30887_v2, %v32558_v52  ;;  %v26329_v32 = vpack.c.bf16 %v31147_v9, %v31142_v12  ;;  %v32565_v52 = vld [vmem:[#allocation47_spill] sm:$0xff] }
 0xe8d   :  { %26222 = vmatpush3.bf16.msra.mxu1 %v32497_v29  ;;  %v31173_v24 = vsub.f32 %v30897_v61, %v32559_v34  ;;  %v31180_v29 = vsub.f32 %v30902_v51, %v32560_v39  ;;  %v16589_v61 = vsub.s32 7, %v29846_v17  ;;  %v32563_v51 = vand.u32 4294901760, %v30944_v27 }
 0xe8e   :  { %26224 = vmatprep.subr.bf16.mxu1 %v32498_v63  ;;  %v32561_v63 = vand.u32 4294901760, %v30910_v37  ;;  %v26331_v2 = vpack.c.bf16 %v31159_v21, %v31154_v26 }
 0xe8f   :  { %26326 = vmatpush3.bf16.msra.mxu0 %v26325_v53  ;;  %v26333_v38 = vpack.c.bf16 %v31173_v24, %v31168_v56  ;;  %v31211_v57 = vrot.slane %v30756_v15, %v16589_v61 }
 0xe90   :  { %v31185_v36 = vsub.f32 %v30910_v37, %v32561_v63  ;;  %26328 = vmatprep.subr.bf16.mxu0 %v26327_v33  ;;  %v31200_v37 = vsub.f32 %v30944_v27, %v32563_v51  ;;  %v21203_v27 = vsub.f32 %v30954_v25, %v21202_v18  ;;  %v21216_v33 = vand.u32 4294901760, %v30997_v11  ;;  %v32567_v63 = vld [vmem:[#allocation40_spill] sm:$0xff] }
 0xe91   :  { %26226 = vmatpush3.bf16.msra.mxu1 %v32508_v44  ;;  %v21209_v44 = vand.u32 4294901760, %v30972_v58  ;;  %v21104_v25 = vand.u32 4294901760, %v31026_v55  ;;  %v31227_v34 = vadd.f32 %v32565_v52, %v31211_v57 }
 0xe92   :  { %26228 = vmatprep.subr.bf16.mxu1 %v32509_v30  ;;  %v26335_v50 = vpack.c.bf16 %v31185_v36, %v31180_v29  ;;  %v21097_v30 = vand.u32 4294901760, %v30992_v60  ;;  %v26337_v42 = vpack.c.bf16 %v31200_v37, %v31194_v22  ;;  %v21217_v28 = vsub.f32 %v30997_v11, %v21216_v33 }
 0xe93   :  { %26330 = vmatpush3.bf16.msra.mxu0 %v26329_v32  ;;  %v21210_v41 = vsub.f32 %v30972_v58, %v21209_v44  ;;  %v26371_v23 = vpack.c.bf16 %v21209_v44, %v21202_v18  ;;  %v21111_v58 = vand.u32 4294901760, %v31031_v4  ;;  %v21204_v32 = vand.u32 4294901760, %v21203_v27 }
 0xe94   :  { %26332 = vmatprep.subr.bf16.mxu0 %v26331_v2  ;;  %v21098_v53 = vsub.f32 %v30992_v60, %v21097_v30  ;;  %v26373_v60 = vpack.c.bf16 %v21097_v30, %v21090_v46  ;;  %v21092_v2 = vand.u32 4294901760, %v21091_v47  ;;  %v21237_v18 = vand.u32 4294901760, %v31044_v5 }
 0xe95   :  { %26230 = vmatpush3.bf16.msra.mxu1 %v32518_v6  ;;  %v21223_v6 = vand.u32 4294901760, %v31012_v62  ;;  %v21211_v39 = vand.u32 4294901760, %v21210_v41  ;;  %v21105_v44 = vsub.f32 %v31026_v55, %v21104_v25  ;;  %v26377_v30 = vpack.c.bf16 %v21111_v58, %v21104_v25  ;;  %v32568_v55 = vld [vmem:[#allocation23_spill] sm:$0xff] }
 0xe96   :  { %26232 = vmatprep.subr.bf16.mxu1 %v32564_v48  ;;  %v21099_v61 = vand.u32 4294901760, %v21098_v53  ;;  %v21118_v27 = vand.u32 4294901760, %v31056_v0  ;;  %v21125_v41 = vand.u32 4294901760, %v31061_v31  ;;  %v21244_v11 = vand.u32 4294901760, %v31068_v43 }
 0xe97   :  { %26334 = vmatpush3.bf16.msra.mxu0 %v26333_v38  ;;  %v21224_v51 = vsub.f32 %v31012_v62, %v21223_v6  ;;  %v21230_v38 = vand.u32 4294901760, %v31036_v3  ;;  %v26375_v46 = vpack.c.bf16 %v21223_v6, %v21216_v33  ;;  %v21251_v62 = vand.u32 4294901760, %v31073_v8  ;;  %v32569_v33 = vld [vmem:[#allocation25_spill] sm:$0xff] }
 0xe98   :  { %26336 = vmatprep.subr.bf16.mxu0 %v26335_v50  ;;  %v21112_v50 = vsub.f32 %v31031_v4, %v21111_v58  ;;  %v21238_v47 = vsub.f32 %v31044_v5, %v21237_v18  ;;  %v26275_v4 = vpack.c.bf16 %v21211_v39, %v21204_v32  ;;  %v26277_v53 = vpack.c.bf16 %v21099_v61, %v21092_v2 }
 0xe99   :  { %26234 = vmatpush3.bf16.msra.mxu1 %v32566_v10  ;;  %v21231_v48 = vsub.f32 %v31036_v3, %v21230_v38  ;;  %v21132_v25 = vand.u32 4294901760, %v31082_v49  ;;  %v21139_v58 = vand.u32 4294901760, %v31087_v19  ;;  %v26379_v3 = vpack.c.bf16 %v21237_v18, %v21230_v38 }
 0xe9a   :  { %26236 = vmatprep.subr.bf16.mxu1 %v32567_v63  ;;  %v21113_v6 = vand.u32 4294901760, %v21112_v50  ;;  %v26381_v5 = vpack.c.bf16 %v21125_v41, %v21118_v27  ;;  %v21119_v52 = vsub.f32 %v31056_v0, %v21118_v27  ;;  %v26383_v10 = vpack.c.bf16 %v21251_v62, %v21244_v11  ;;  %v32572_v50 = vld [vmem:[#allocation38_spill] sm:$0xff] }
 0xe9b   :  { %26338 = vmatpush3.bf16.msra.mxu0 %v26337_v42  ;;  %v21218_v42 = vand.u32 4294901760, %v21217_v28  ;;  %v21232_v32 = vand.u32 4294901760, %v21231_v48  ;;  %v21239_v39 = vand.u32 4294901760, %v21238_v47  ;;  %v21252_v2 = vsub.f32 %v31073_v8, %v21251_v62  ;;  %v32570_v28 = vld [vmem:[#allocation12_spill] sm:$0xff] }
 0xe9c   :  { %26372 = vmatprep.subr.bf16.mxu0 %v26371_v23  ;;  %v21225_v23 = vand.u32 4294901760, %v21224_v51  ;;  %v21133_v61 = vsub.f32 %v31082_v49, %v21132_v25  ;;  %v32571_v51 = vld [vmem:[#allocation36_spill] sm:$0xff]  ;;  %v21120_v38 = vand.u32 4294901760, %v21119_v52  ;;  %v21258_v18 = vand.u32 4294901760, %v31095_v45 }
 0xe9d   :  { %26238 = vmatpush3.bf16.msra.mxu1 %v32536_v7  ;;  %v21106_v7 = vand.u32 4294901760, %v21105_v44  ;;  %v21265_v44 = vand.u32 4294901760, %v31100_v54  ;;  %v26283_v8 = vpack.c.bf16 %v21239_v39, %v21232_v32  ;;  %v21146_v49 = vand.u32 4294901760, %v31113_v1 }
 0xe9e   :  { %21459 = vmatmul.mubr.f32.vlgmr.msra.gmra.mrb[68].mxu0 %v32568_v55  ;;  %26240 = vmatprep.subr.bf16.mxu1 %v32537_v35  ;;  %v21126_v35 = vsub.f32 %v31061_v31, %v21125_v41  ;;  %v26279_v63 = vpack.c.bf16 %v21225_v23, %v21218_v42  ;;  %v26385_v31 = vpack.c.bf16 %v21139_v58, %v21132_v25  ;;  %v21134_v27 = vand.u32 4294901760, %v21133_v61  ;;  %v32573_v42 = vld [vmem:[#allocation42_spill] sm:$0xff] }
 0xe9f   :  { %21465 = vmatprep.mubr.f32.mxu0 %v32569_v33  ;;  %26374 = vmatpush3.bf16.msra.mxu0 %v26373_v60  ;;  %v21245_v60 = vsub.f32 %v31068_v43, %v21244_v11  ;;  %v26281_v0 = vpack.c.bf16 %v21113_v6, %v21106_v7  ;;  %v21259_v41 = vsub.f32 %v31095_v45, %v21258_v18  ;;  %v21272_v48 = vand.u32 4294901760, %v31125_v14 }
 0xea0   :  { %26376 = vmatprep.subr.bf16.mxu0 %v26375_v46  ;;  %v21127_v43 = vand.u32 4294901760, %v21126_v35  ;;  %v21153_v46 = vand.u32 4294901760, %v31118_v20  ;;  %v21266_v11 = vsub.f32 %v31100_v54, %v21265_v44  ;;  %v21279_v47 = vand.u32 4294901760, %v31130_v16 }
 0xea1   :  { %26242 = vmatpush3.bf16.msra.mxu1 %v32542_v40  ;;  %v21140_v40 = vsub.f32 %v31087_v19, %v21139_v58  ;;  %v21253_v19 = vand.u32 4294901760, %v21252_v2  ;;  %v26387_v7 = vpack.c.bf16 %v21265_v44, %v21258_v18  ;;  %v21160_v54 = vand.u32 4294901760, %v31142_v12 }
 0xea2   :  { %21468 = vmatmul.mubr.f32.gmra.mrb[70].mxu0 %v30967_v59  ;;  %26276 = vmatprep.subr.bf16.mxu1 %v26275_v4  ;;  %v21147_v4 = vsub.f32 %v31113_v1, %v21146_v49  ;;  %v26285_v23 = vpack.c.bf16 %v21127_v43, %v21120_v38  ;;  %v21154_v6 = vsub.f32 %v31118_v20, %v21153_v46  ;;  %v21267_v52 = vand.u32 4294901760, %v21266_v11 }
 0xea3   :  { %26378 = vmatpush3.bf16.msra.mxu0 %v26377_v30  ;;  %21753 = vmatprep.mubr.f32.mxu0 %v32570_v28  ;;  %v21246_v30 = vand.u32 4294901760, %v21245_v60  ;;  %v21141_v62 = vand.u32 4294901760, %v21140_v40  ;;  %v26389_v45 = vpack.c.bf16 %v21153_v46, %v21146_v49  ;;  %v21273_v25 = vsub.f32 %v31125_v14, %v21272_v48 }
 0xea4   :  { %20948 = vmatmul.mubr.f32.vlgmr.msra.gmra.mrb[70].mxu1 %v32571_v51  ;;  %26380 = vmatprep.subr.bf16.mxu0 %v26379_v3  ;;  %v21280_v58 = vsub.f32 %v31130_v16, %v21279_v47  ;;  %v21167_v3 = vand.u32 4294901760, %v31147_v9  ;;  %v21148_v20 = vand.u32 4294901760, %v21147_v4  ;;  %v21286_v32 = vand.u32 4294901760, %v31154_v26 }
 0xea5   :  { %20953 = vmatprep.mubr.f32.mxu1 %v32572_v50  ;;  %26278 = vmatpush3.bf16.msra.mxu1 %v26277_v53  ;;  %v18980_v53 = vmax.f32 %v31227_v34, 0.0  ;;  %v26287_v1 = vpack.c.bf16 %v21253_v19, %v21246_v30  ;;  %v26289_v35 = vpack.c.bf16 %v21141_v62, %v21134_v27  ;;  %v21155_v39 = vand.u32 4294901760, %v21154_v6  ;;  %v31296_v19 = vld [vmem:[%s32099_s13 + $0x380] sm:$0xff]  ;;  %v31301_v27 = vld [vmem:[%s32099_s13 + $0x388] sm:$0xff] }
 0xea6   :  { %26280 = vmatprep.subr.bf16.mxu1 %v26279_v63  ;;  %v21293_v60 = vand.u32 4294901760, %v31159_v21  ;;  %v21174_v14 = vand.u32 4294901760, %v31168_v56  ;;  %v21181_v16 = vand.u32 4294901760, %v31173_v24  ;;  %v21274_v63 = vand.u32 4294901760, %v21273_v25 }
 0xea7   :  { %26382 = vmatpush3.bf16.msra.mxu0 %v26381_v5  ;;  %v21260_v5 = vand.u32 4294901760, %v21259_v41  ;;  %v21281_v2 = vand.u32 4294901760, %v21280_v58  ;;  %v21161_v61 = vsub.f32 %v31142_v12, %v21160_v54  ;;  %v21287_v40 = vsub.f32 %v31154_v26, %v21286_v32 }
 0xea8   :  { %20955 = vmatmul.mubr.f32.gmra.mrb[72].mxu1 %v32573_v42  ;;  %26384 = vmatprep.subr.bf16.mxu0 %v26383_v10  ;;  %v26391_v10 = vpack.c.bf16 %v21279_v47, %v21272_v48  ;;  %v21294_v51 = vsub.f32 %v31159_v21, %v21293_v60  ;;  %v31287_v38 = vand.u32 4294901760, %v18980_v53  ;;  %v26393_v43 = vpack.c.bf16 %v21167_v3, %v21160_v54 }
 0xea9   :  { %26282 = vmatpush3.bf16.msra.mxu1 %v26281_v0  ;;  %21312 = vmatprep.mubr.f32.mxu1 %v32570_v28  ;;  %v21168_v0 = vsub.f32 %v31147_v9, %v21167_v3  ;;  %v21300_v18 = vand.u32 4294901760, %v31180_v29  ;;  %v21307_v44 = vand.u32 4294901760, %v31185_v36  ;;  %v26293_v12 = vpack.c.bf16 %v21155_v39, %v21148_v20 }
 0xeaa   :  { %26284 = vmatprep.subr.bf16.mxu1 %v26283_v8  ;;  %32574 = vst [vmem:[#allocation32_spill] sm:$0xff] %v31287_v38  ;;  %v26395_v50 = vpack.c.bf16 %v21293_v60, %v21286_v32  ;;  %v21175_v9 = vsub.f32 %v31168_v56, %v21174_v14  ;;  %v21182_v8 = vsub.f32 %v31173_v24, %v21181_v16  ;;  %v21162_v46 = vand.u32 4294901760, %v21161_v61  ;;  %v31353_v61 = vld [vmem:[%s32099_s13 + $0x310] sm:$0xff] }
 0xeab   :  { %26386 = vmatpush3.bf16.msra.mxu0 %v26385_v31  ;;  %v26291_v31 = vpack.c.bf16 %v21267_v52, %v21260_v5  ;;  %v26397_v21 = vpack.c.bf16 %v21181_v16, %v21174_v14  ;;  %v26295_v49 = vpack.c.bf16 %v21281_v2, %v21274_v63  ;;  %v21169_v30 = vand.u32 4294901760, %v21168_v0  ;;  %v31331_v5 = vld [vmem:[%s32099_s13 + $0x390] sm:$0xff]  ;;  %v31336_v52 = vld [vmem:[%s32099_s13 + $0x398] sm:$0xff] }
 0xeac   :  { %26388 = vmatprep.subr.bf16.mxu0 %v26387_v7  ;;  %v21288_v56 = vand.u32 4294901760, %v21287_v40  ;;  %v21295_v24 = vand.u32 4294901760, %v21294_v51  ;;  %v21301_v11 = vsub.f32 %v31180_v29, %v21300_v18  ;;  %v21308_v62 = vsub.f32 %v31185_v36, %v21307_v44  ;;  %v31314_v29 = vld [vmem:[%s32099_s13 + $0x300] sm:$0xff]  ;;  %v31319_v36 = vld [vmem:[%s32099_s13 + $0x308] sm:$0xff]  ;;  %v31358_v0 = vld [vmem:[%s32099_s13 + $0x318] sm:$0xff] }
 0xead   :  { %26286 = vmatpush3.bf16.msra.mxu1 %v26285_v23  ;;  %v26399_v47 = vpack.c.bf16 %v21307_v44, %v21300_v18  ;;  %v21188_v4 = vand.u32 4294901760, %v31194_v22  ;;  %v21195_v42 = vand.u32 4294901760, %v31200_v37  ;;  %v21176_v23 = vand.u32 4294901760, %v21175_v9  ;;  %v31366_v18 = vld [vmem:[%s32099_s13 + $0x3a0] sm:$0xff]  ;;  %v31371_v44 = vld [vmem:[%s32099_s13 + $0x3a8] sm:$0xff] }
 0xeae   :  { %26288 = vmatprep.subr.bf16.mxu1 %v26287_v1  ;;  %v21183_v7 = vand.u32 4294901760, %v21182_v8  ;;  %v32288_v6 = vand.u32 4294901760, %v31296_v19  ;;  %v31324_v54 = vsub.f32 %v18980_v53, %v31287_v38  ;;  %v26297_v58 = vpack.c.bf16 %v21169_v30, %v21162_v46 }
 0xeaf   :  { %26390 = vmatpush3.bf16.msra.mxu0 %v26389_v45  ;;  %v32287_v45 = vand.u32 4294901760, %v31301_v27  ;;  %v21189_v1 = vsub.f32 %v31194_v22, %v21188_v4  ;;  %v21196_v3 = vsub.f32 %v31200_v37, %v21195_v42  ;;  %v26299_v53 = vpack.c.bf16 %v21295_v24, %v21288_v56  ;;  %v31399_v56 = vld [vmem:[%s32099_s13 + $0x328] sm:$0xff] }
 0xeb0   :  { %26392 = vmatprep.subr.bf16.mxu0 %v26391_v10  ;;  %32575 = vst [vmem:[#allocation34_spill] sm:$0xff] %v31324_v54  ;;  %v21309_v10 = vand.u32 4294901760, %v21308_v62  ;;  %v26401_v37 = vpack.c.bf16 %v21195_v42, %v21188_v4  ;;  %v32286_v32 = vand.u32 4294901760, %v31314_v29  ;;  %v32283_v39 = vand.u32 4294901760, %v31319_v36  ;;  %v31414_v4 = vld [vmem:[%s32099_s13 + $0x3b8] sm:$0xff] }
 0xeb1   :  { %26290 = vmatpush3.bf16.msra.mxu1 %v26289_v35  ;;  %v23465_v26 = vpop.f32.mrb[44].mxu0  ;;  %v21302_v35 = vand.u32 4294901760, %v21301_v11  ;;  %v26301_v14 = vpack.c.bf16 %v21183_v7, %v21176_v23  ;;  %v31346_v16 = vpack.c.bf16 %v32287_v45, %v32288_v6  ;;  %v32280_v63 = vand.u32 4294901760, %v31331_v5  ;;  %v32579_v23 = vld [vmem:[#allocation22_spill] sm:$0xff]  ;;  %v32580_v7 = vld [vmem:[#allocation27_spill] sm:$0xff] }
 0xeb2   :  { %v23466_v41 = vpop.f32.mrb[45].mxu0  ;;  %26292 = vmatprep.subr.bf16.mxu1 %v26291_v31  ;;  %v32279_v2 = vand.u32 4294901760, %v31336_v52  ;;  %v21190_v40 = vand.u32 4294901760, %v21189_v1  ;;  %v21197_v51 = vand.u32 4294901760, %v21196_v3  ;;  %v31378_v8 = vpack.c.bf16 %v32283_v39, %v32286_v32  ;;  %v32594_v39 = vld [vmem:[#allocation41_spill] sm:$0xff]  ;;  %v32597_v6 = vld [vmem:[#allocation43_spill] sm:$0xff] }
 0xeb3   :  { %v31305_v48 = vadd.f32 %v23466_v41, %v23465_v26  ;;  %26394 = vmatpush3.bf16.msra.mxu0 %v26393_v43  ;;  %32576 = vst [vmem:[#allocation35_spill] sm:$0xff] %v31346_v16  ;;  %v32270_v43 = vand.u32 4294901760, %v31324_v54  ;;  %v32278_v26 = vand.u32 4294901760, %v31353_v61  ;;  %v32276_v46 = vand.u32 4294901760, %v31366_v18  ;;  %v31394_v41 = vld [vmem:[%s32099_s13 + $0x320] sm:$0xff]  ;;  %v31545_v32 = vld [vmem:[%s32099_s13 + $0x3e8] sm:$0xff] }
 0xeb4   :  { %26396 = vmatprep.subr.bf16.mxu0 %v26395_v50  ;;  %v26303_v50 = vpack.c.bf16 %v21309_v10, %v21302_v35  ;;  %32577 = vst [vmem:[#allocation10_spill] sm:$0xff] %v31378_v8  ;;  %v32275_v30 = vand.u32 4294901760, %v31371_v44  ;;  %v26305_v11 = vpack.c.bf16 %v21197_v51, %v21190_v40  ;;  %v32271_v1 = vand.u32 4294901760, %v31399_v56  ;;  %v31445_v35 = vld [vmem:[%s32099_s13 + $0x338] sm:$0xff]  ;;  %v32584_v40 = vld [vmem:[#allocation24_spill] sm:$0xff]  ;;  %v32585_v51 = vld [vmem:[#allocation13_spill] sm:$0xff] }
 0xeb5   :  { %26294 = vmatpush3.bf16.msra.mxu1 %v26293_v12  ;;  %v23468_v25 = vpop.f32.mrb[46].mxu0  ;;  %v16585_v12 = vsub.s32 6, %v29846_v17  ;;  %v31387_v17 = vpack.c.bf16 %v32279_v2, %v32280_v63  ;;  %v21977_v62 = vsub.f32 %v31324_v54, %v32270_v43  ;;  %v32588_v43 = vld [vmem:[#allocation16_spill] sm:$0xff] }
 0xeb6   :  { %v23469_v34 = vpop.f32.mrb[47].mxu0  ;;  %26296 = vmatprep.subr.bf16.mxu1 %v26295_v49 }
 0xeb7   :  { %v31338_v20 = vadd.f32 %v23469_v34, %v23468_v25  ;;  %26398 = vmatpush3.bf16.msra.mxu0 %v26397_v21  ;;  %v23389_v22 = vpop.f32.mrb[46].mxu1  ;;  %v32277_v21 = vand.u32 4294901760, %v31358_v0  ;;  %32578 = vst [vmem:[#allocation45_spill] sm:$0xff] %v31387_v17  ;;  %v16586_v42 = vrot.slane %v30756_v15, %v16585_v12  ;;  %v31433_v15 = vpack.c.bf16 %v32275_v30, %v32276_v46  ;;  %v32590_v46 = vld [vmem:[#allocation17_spill] sm:$0xff] }
 0xeb8   :  { %v23390_v60 = vpop.f32.mrb[47].mxu1  ;;  %26400 = vmatprep.subr.bf16.mxu0 %v26399_v47  ;;  %v31409_v47 = vld [vmem:[%s32099_s13 + $0x3b0] sm:$0xff]  ;;  %v32272_v34 = vand.u32 4294901760, %v31414_v4  ;;  %v21978_v10 = vand.u32 4294901760, %v21977_v62 }
 0xeb9   :  { %v31360_v31 = vadd.f32 %v23390_v60, %v23389_v22  ;;  %26298 = vmatpush3.bf16.msra.mxu1 %v26297_v58  ;;  %v31424_v25 = vpack.c.bf16 %v32277_v21, %v32278_v26  ;;  %v32274_v58 = vand.u32 4294901760, %v31394_v41  ;;  %32582 = vst [vmem:[#allocation37_spill] sm:$0xff] %v31433_v15  ;;  %v32273_v3 = vand.u32 4294901760, %v31409_v47  ;;  %v31450_v22 = vld [vmem:[%s32099_s13 + $0x3c0] sm:$0xff]  ;;  %v32583_v60 = vld [vmem:[#allocation46_spill] sm:$0xff]  ;;  %v32592_v26 = vld [vmem:[#allocation15_spill] sm:$0xff] }
 0xeba   :  { %26300 = vmatprep.subr.bf16.mxu1 %v26299_v53  ;;  %v31440_v53 = vld [vmem:[%s32099_s13 + $0x330] sm:$0xff]  ;;  %v26649_v2 = vadd.f32 %v32592_v26, %v16586_v42  ;;  %v31532_v26 = vld [vmem:[%s32099_s13 + $0x358] sm:$0xff] }
 0xebb   :  { %26402 = vmatpush3.bf16.msra.mxu0 %v26401_v37  ;;  %v23392_v9 = vpop.f32.mrb[48].mxu1  ;;  %32581 = vst [vmem:[#allocation11_spill] sm:$0xff] %v31424_v25  ;;  %v31455_v37 = vld [vmem:[%s32099_s13 + $0x3c8] sm:$0xff]  ;;  %v31465_v12 = vpack.c.bf16 %v32271_v1, %v32274_v58  ;;  %v26650_v1 = vadd.f32 %v32588_v43, %v31211_v57  ;;  %v31501_v58 = vld [vmem:[%s32099_s13 + $0x3d8] sm:$0xff] }
 0xebc   :  { %v23393_v49 = vpop.f32.mrb[49].mxu1  ;;  %26436 = vmatprep.subr.bf16.mxu0 %v31346_v16  ;;  %v32284_v62 = vand.u32 4294901760, %v31455_v37 }
 0xebd   :  { %v31401_v24 = vadd.f32 %v23393_v49, %v23392_v9  ;;  %26302 = vmatpush3.bf16.msra.mxu1 %v26301_v14  ;;  %v26647_v14 = vadd.f32 %v32583_v60, %v16586_v42  ;;  %32586 = vst [vmem:[#allocation47_spill] sm:$0xff] %v31465_v12  ;;  %v32281_v9 = vand.u32 4294901760, %v31445_v35  ;;  %v31475_v49 = vpack.c.bf16 %v32272_v34, %v32273_v3  ;;  %v31487_v60 = vld [vmem:[%s32099_s13 + $0x348] sm:$0xff]  ;;  %v32589_v34 = vld [vmem:[#allocation14_spill] sm:$0xff] }
 0xebe   :  { %21755 = vmatmul.mubr.f32.vlgmr.msra.gmra.mrb[72].mxu0 %v32579_v23  ;;  %26304 = vmatprep.subr.bf16.mxu1 %v26303_v50  ;;  %v32282_v50 = vand.u32 4294901760, %v31440_v53  ;;  %v31496_v3 = vld [vmem:[%s32099_s13 + $0x3d0] sm:$0xff]  ;;  %v32297_v21 = vand.u32 4294901760, %v31487_v60  ;;  %v18988_v42 = vmax.f32 %v26650_v1, 0.0 }
 0xebf   :  { %21760 = vmatprep.mubr.f32.mxu0 %v32580_v7  ;;  %26438 = vmatpush3.bf16.msra.mxu0 %v31378_v8  ;;  %32587 = vst [vmem:[#allocation39_spill] sm:$0xff] %v31475_v49  ;;  %v18979_v30 = vmax.f32 %v26647_v14, 0.0  ;;  %v32299_v63 = vand.u32 4294901760, %v31496_v3 }
 0xec0   :  { %26440 = vmatprep.subr.bf16.mxu0 %v31387_v17  ;;  %v31509_v57 = vpack.c.bf16 %v32281_v9, %v32282_v50  ;;  %v31527_v50 = vld [vmem:[%s32099_s13 + $0x350] sm:$0xff]  ;;  %v18987_v9 = vmax.f32 %v26649_v2, 0.0  ;;  %v31576_v2 = vld [vmem:[%s32099_s13 + $0x368] sm:$0xff] }
 0xec1   :  { %26306 = vmatpush3.bf16.msra.mxu1 %v26305_v11  ;;  %v32285_v11 = vand.u32 4294901760, %v31450_v22  ;;  %v31547_v45 = vand.u32 4294901760, %v18979_v30  ;;  %v32316_v1 = vand.u32 4294901760, %v31527_v50  ;;  %v32617_v38 = vand.u32 4294901760, %v31576_v2 }
 0xec2   :  { %21762 = vmatmul.mubr.f32.gmra.mrb[74].mxu0 %v32584_v40  ;;  %26340 = vmatprep.subr.bf16.mxu1 %v32585_v51  ;;  %32591 = vst [vmem:[#allocation40_spill] sm:$0xff] %v31509_v57  ;;  %v31604_v16 = vand.u32 4294901760, %v18987_v9 }
 0xec3   :  { %26442 = vmatpush3.bf16.msra.mxu0 %v31424_v25  ;;  %21979 = vmatprep.mubr.f32.mxu0 %v21978_v10  ;;  %v31482_v10 = vld [vmem:[%s32099_s13 + $0x340] sm:$0xff]  ;;  %v31520_v14 = vpack.c.bf16 %v32284_v62, %v32285_v11  ;;  %v32595_v62 = vand.u32 4294901760, %v30646_v13  ;;  %32596 = vst [vmem:[#allocation25_spill] sm:$0xff] %v31547_v45 }
 0xec4   :  { %21314 = vmatmul.mubr.f32.vlgmr.msra.gmra.mrb[74].mxu1 %v32579_v23  ;;  %26444 = vmatprep.subr.bf16.mxu0 %v31433_v15  ;;  %v32298_v43 = vand.u32 4294901760, %v31482_v10  ;;  %v31540_v11 = vld [vmem:[%s32099_s13 + $0x3e0] sm:$0xff]  ;;  %v31592_v15 = vsub.f32 %v18979_v30, %v31547_v45  ;;  %32608 = vst [vmem:[#allocation16_spill] sm:$0xff] %v31604_v16  ;;  %v32610_v45 = vand.u32 4294901760, %v31545_v32 }
 0xec5   :  { %21319 = vmatprep.mubr.f32.mxu1 %v32580_v7  ;;  %26342 = vmatpush3.bf16.msra.mxu1 %v32589_v34  ;;  %32593 = vst [vmem:[#allocation23_spill] sm:$0xff] %v31520_v14  ;;  %v32609_v30 = vand.u32 4294901760, %v31540_v11  ;;  %v32614_v7 = vld [vmem:[#allocation20_spill] sm:$0xff] }
 0xec6   :  { %26344 = vmatprep.subr.bf16.mxu1 %v32590_v46  ;;  %v31555_v13 = vpack.c.bf16 %v32297_v21, %v32298_v43  ;;  %v31571_v21 = vld [vmem:[%s32099_s13 + $0x360] sm:$0xff]  ;;  %v31578_v43 = vand.u32 4294901760, %v18988_v42  ;;  %32604 = vst [vmem:[#allocation46_spill] sm:$0xff] %v31592_v15 }
 0xec7   :  { %26446 = vmatpush3.bf16.msra.mxu0 %v31465_v12  ;;  %v32616_v23 = vand.u32 4294901760, %v31571_v21 }
 0xec8   :  { %21321 = vmatmul.mubr.f32.gmra.mrb[76].mxu1 %v32584_v40  ;;  %26448 = vmatprep.subr.bf16.mxu0 %v31475_v49  ;;  %32598 = vst [vmem:[#allocation12_spill] sm:$0xff] %v31555_v13  ;;  %v32599_v49 = vand.u32 4294901760, %v31501_v58  ;;  %32601 = vst [vmem:[#allocation38_spill] sm:$0xff] %v31578_v43  ;;  %v31611_v40 = vpack.c.bf16 %v32610_v45, %v32609_v30  ;;  %v31626_v8 = vsub.f32 %v18988_v42, %v31578_v43  ;;  %v32613_v45 = vld [vmem:[#allocation18_spill] sm:$0xff]  ;;  %v32626_v42 = vld [vmem:[#allocation19_spill] sm:$0xff] }
 0xec9   :  { %26346 = vmatpush3.bf16.msra.mxu1 %v32594_v39  ;;  %21572 = vmatprep.mubr.f32.mxu1 %v32595_v62  ;;  %v32602_v62 = vld [vmem:[#allocation44_spill] sm:$0xff]  ;;  %v32620_v30 = vand.u32 4294901760, %v31296_v19 }
 0xeca   :  { %26348 = vmatprep.subr.bf16.mxu1 %v32597_v6  ;;  %v31564_v12 = vpack.c.bf16 %v32599_v49, %v32299_v63  ;;  %v31584_v49 = vld [vmem:[%s32099_s13 + $0x3f0] sm:$0xff]  ;;  %v31589_v63 = vld [vmem:[%s32099_s13 + $0x3f8] sm:$0xff]  ;;  %32611 = vst [vmem:[#allocation14_spill] sm:$0xff] %v31611_v40  ;;  %32612 = vst [vmem:[#allocation17_spill] sm:$0xff] %v31626_v8 }
 0xecb   :  { %26450 = vmatpush3.bf16.msra.mxu0 %v31509_v57  ;;  %32603 = vst [vmem:[#allocation42_spill] sm:$0xff] %v31589_v63  ;;  %v32605_v57 = vld [vmem:[#allocation21_spill] sm:$0xff] }
 0xecc   :  { %26452 = vmatprep.subr.bf16.mxu0 %v31520_v14  ;;  %32600 = vst [vmem:[#allocation36_spill] sm:$0xff] %v31564_v12  ;;  %v32606_v14 = vand.u32 4294901760, %v31532_v26 }
 0xecd   :  { %26350 = vmatpush3.bf16.msra.mxu1 %v32602_v62 }
 0xece   :  { %26352 = vmatprep.subr.bf16.mxu1 %v32605_v57  ;;  %v31600_v25 = vpack.c.bf16 %v32606_v14, %v32316_v1  ;;  %v31618_v14 = vld [vmem:[%s32099_s13 + $0x370] sm:$0xff]  ;;  %v31623_v1 = vld [vmem:[%s32099_s13 + $0x378] sm:$0xff]  ;;  %v31638_v57 = vpack.c.bf16 %v32617_v38, %v32616_v23  ;;  %v32623_v38 = vand.u32 4294901760, %v31584_v49  ;;  %v32624_v23 = vand.u32 4294901760, %v31589_v63 }
 0xecf   :  { %26454 = vmatpush3.bf16.msra.mxu0 %v31555_v13  ;;  %v32635_v63 = vand.u32 4294901760, %v31331_v5 }
 0xed0   :  { %32607 = vst [vmem:[#allocation13_spill] sm:$0xff] %v31600_v25  ;;  %26456 = vmatprep.subr.bf16.mxu0 %v31564_v12  ;;  %32618 = vst [vmem:[#allocation41_spill] sm:$0xff] %v31638_v57  ;;  %v31660_v43 = vpack.c.bf16 %v32624_v23, %v32623_v38  ;;  %v32630_v23 = vand.u32 4294901760, %v31319_v36 }
 0xed1   :  { %v23541_v17 = vpop.f32.mrb[48].mxu0  ;;  %26354 = vmatpush3.bf16.msra.mxu1 %v32613_v45  ;;  %v31643_v45 = vsub.f32 %v18987_v9, %v31604_v16 }
 0xed2   :  { %v23542_v13 = vpop.f32.mrb[49].mxu0  ;;  %26356 = vmatprep.subr.bf16.mxu1 %v32614_v7  ;;  %32625 = vst [vmem:[#allocation48_spill] sm:$0xff] %v31660_v43  ;;  %v31679_v16 = vsub.f32 %v31319_v36, %v32630_v23  ;;  %v32633_v7 = vand.u32 4294901760, %v31623_v1 }
 0xed3   :  { %v31631_v12 = vadd.f32 %v23542_v13, %v23541_v17  ;;  %26458 = vmatpush3.bf16.msra.mxu0 %v31600_v25  ;;  %32619 = vst [vmem:[#allocation43_spill] sm:$0xff] %v31643_v45  ;;  %v31648_v17 = vsub.f32 %v31296_v19, %v32620_v30  ;;  %v32621_v13 = vand.u32 4294901760, %v31301_v27  ;;  %v32627_v19 = vand.u32 4294901760, %v31592_v15 }
 0xed4   :  { %26460 = vmatprep.subr.bf16.mxu0 %v31611_v40  ;;  %v32628_v40 = vld [vmem:[#allocation29_spill] sm:$0xff] }
 0xed5   :  { %32615 = vst [vmem:[#allocation15_spill] sm:$0xff] %v31631_v12  ;;  %v31653_v25 = vsub.f32 %v31301_v27, %v32621_v13  ;;  %v23544_v9 = vpop.f32.mrb[50].mxu0  ;;  %26358 = vmatpush3.bf16.msra.mxu1 %v32626_v42  ;;  %v21983_v30 = vsub.f32 %v31592_v15, %v32627_v19  ;;  %v22840_v27 = vld [vmem:[%s32100_s14] ss:$0 sm:$0xff]  ;;  %v32629_v12 = vand.u32 4294901760, %v31314_v29  ;;  %v32632_v15 = vand.u32 4294901760, %v31618_v14 }
 0xed6   :  { %v23545_v13 = vpop.f32.mrb[51].mxu0  ;;  %26360 = vmatprep.subr.bf16.mxu1 %v32628_v40  ;;  %s27213_s14 = smov [#allocation4]  }
 0xed7   :  { %32622 = vst [vmem:[#allocation44_spill] sm:$0xff] %v31653_v25  ;;  %v31674_v38 = vsub.f32 %v31314_v29, %v32629_v12  ;;  %v31681_v42 = vadd.f32 %v23545_v13, %v23544_v9  ;;  %v23427_v19 = vpop.f32.mrb[50].mxu1  ;;  %26462 = vmatpush3.bf16.msra.mxu0 %v31638_v57  ;;  %v31688_v40 = vpack.c.bf16 %v32633_v7, %v32632_v15  ;;  %v32636_v12 = vand.u32 4294901760, %v31336_v52  ;;  %v32637_v57 = vld [vmem:[#allocation33_spill] sm:$0xff]  ;;  %s22817_s18 = sshll.u32 %s27213_s14, 4  ;;  %s22818_s18 = int_to_ptr.vmem [resolvable:$true] %s22817_s18 }
 0xed8   :  { %v31693_v29 = vsub.f32 %v31331_v5, %v32635_v63  ;;  %v23428_v9 = vpop.f32.mrb[51].mxu1  ;;  %26464 = vmatprep.subr.bf16.mxu0 %v31660_v43  ;;  %v26499_v13 = vpack.c.bf16 %v31653_v25, %v31648_v17  ;;  %v19233_v7 = vadd.f32 %v31360_v31, %v22840_v27  ;;  %v32638_v5 = vand.u32 4294901760, %v31626_v8  ;;  %s27132_s5 = scalar_lea.vmem %s22818_s18, 256  ;;  %p27137_p1 = scmp.lt.s32.totalorder %s22818_s18, %s22818_s18 }
 0xed9   :  { %32631 = vst [vmem:[#allocation49_spill] sm:$0xff] %v31681_v42  ;;  %32634 = vst [vmem:[#allocation50_spill] sm:$0xff] %v31688_v40  ;;  %v31698_v36 = vsub.f32 %v31336_v52, %v32636_v12  ;;  %v23429_v15 = vadd.f32 %v23428_v9, %v23427_v19  ;;  %26362 = vmatpush3.bf16.msra.mxu1 %v32637_v57  ;;  %v21984_v42 = vand.u32 4294901760, %v21983_v30  ;;  %v32639_v52 = vld [vmem:[#allocation31_spill] sm:$0xff]  ;;  %v32640_v12 = vand.u32 4294901760, %v31353_v61  ;;  %p27133_p0 = scmp.ne.s32.totalorder %s22818_s18, %s27132_s5  ;;  %p27138_p2 = scmp.lt.s32.totalorder %s27132_s5, %s27132_s5 }
 0xeda   :  { %v21992_v63 = vsub.f32 %v31626_v8, %v32638_v5  ;;  %26364 = vmatprep.subr.bf16.mxu1 %v32639_v52  ;;  %v32641_v25 = vand.u32 4294901760, %v31358_v0  ;;  %v26501_v9 = vpack.c.bf16 %v31679_v16, %v31674_v38  ;;  %v32642_v30 = vand.u32 4294901760, %v31366_v18  ;;  %v32645_v52 = vld [vmem:[#allocation26_spill] sm:$0xff] }
 0xedb   :  { %v31713_v43 = vsub.f32 %v31353_v61, %v32640_v12  ;;  %v19480_v31 = vadd.f32 %v23429_v15, %v19233_v7  ;;  %v23430_v19 = vpop.f32.mrb[52].mxu1  ;;  %26466 = vmatpush3.bf16.msra.mxu0 %v31688_v40  ;;  %v32643_v61 = vand.u32 4294901760, %v31371_v44  ;;  %v26503_v7 = vpack.c.bf16 %v31698_v36, %v31693_v29  ;;  %p27139_p3 = por %p27138_p2, %p27137_p1 }
 0xedc   :  { %v31718_v23 = vsub.f32 %v31358_v0, %v32641_v25  ;;  %v31726_v5 = vsub.f32 %v31366_v18, %v32642_v30  ;;  %v23431_v8 = vpop.f32.mrb[53].mxu1  ;;  %26500 = vmatprep.subr.bf16.mxu0 %v26499_v13  ;;  %v32644_v0 = vand.u32 4294901760, %v31643_v45  ;;  %v19248_v15 = vadd.f32 %v31401_v24, %v22840_v27 }
 0xedd   :  { %v31731_v12 = vsub.f32 %v31371_v44, %v32643_v61  ;;  %v23432_v40 = vadd.f32 %v23431_v8, %v23430_v19  ;;  %26366 = vmatpush3.bf16.msra.mxu1 %v32645_v52  ;;  %v21993_v18 = vand.u32 4294901760, %v21992_v63  ;;  %v31741_v30 = vadd.f32 %v31305_v48, %v19480_v31  ;;  %v32647_v61 = vld [vmem:[#allocation28_spill] sm:$0xff]  ;;  %p27140_p4 = pnand %p27139_p3, %p27133_p0 }
 0xede   :  { %v21998_v25 = vsub.f32 %v31643_v45, %v32644_v0  ;;  %v32646_v44 = vand.u32 4294901760, %v31394_v41  ;;  %21985 = vmatmul.mubr.f32.vlgmr.msra.gmra.mrb[76].mxu0 %v21984_v42  ;;  %26368 = vmatprep.subr.bf16.mxu1 %v32647_v61  ;;  %v32648_v0 = vand.u32 4294901760, %v31399_v56  ;;  %v26505_v48 = vpack.c.bf16 %v31718_v23, %v31713_v43 }
 0xedf   :  { %v19487_v8 = vadd.f32 %v23432_v40, %v19248_v15  ;;  %21994 = vmatprep.mubr.f32.mxu0 %v21993_v18  ;;  %26502 = vmatpush3.bf16.msra.mxu0 %v26501_v9  ;;  %v32649_v24 = vand.u32 4294901760, %v31409_v47  ;;  %v32651_v40 = vld [vmem:[#allocation30_spill] sm:$0xff]  ;;  %v32656_v15 = vand.u32 4294901760, %v32568_v55  ;;  %v32657_v18 = vand.u32 4294901760, %v32569_v33 }
 0xee0   :  { %v31746_v13 = vsub.f32 %v31394_v41, %v32646_v44  ;;  %v31752_v45 = vsub.f32 %v31399_v56, %v32648_v0  ;;  %v32650_v41 = vand.u32 4294901760, %v31414_v4  ;;  %v21999_v63 = vand.u32 4294901760, %v21998_v25  ;;  %26504 = vmatprep.subr.bf16.mxu0 %v26503_v7 }
 0xee1   :  { %v31759_v27 = vsub.f32 %v31409_v47, %v32649_v24  ;;  %v26507_v56 = vpack.c.bf16 %v31731_v12, %v31726_v5  ;;  %26370 = vmatpush3.bf16.msra.mxu1 %v32651_v40  ;;  %v31770_v31 = vadd.f32 %v31338_v20, %v19487_v8  ;;  %v32652_v47 = vand.u32 4294901760, %v31440_v53 }
 0xee2   :  { %v31764_v42 = vsub.f32 %v31414_v4, %v32650_v41  ;;  %22000 = vmatmul.mubr.f32.gmra.mrb[78].mxu0 %v21999_v63  ;;  %26404 = vmatprep.subr.bf16.mxu1 %v32585_v51  ;;  %v32653_v4 = vand.u32 4294901760, %v31445_v35  ;;  %v26509_v20 = vpack.c.bf16 %v31752_v45, %v31746_v13  ;;  %v32654_v25 = vand.u32 4294901760, %v31450_v22 }
 0xee3   :  { %v31776_v19 = vsub.f32 %v31440_v53, %v32652_v47  ;;  %26506 = vmatpush3.bf16.msra.mxu0 %v26505_v48  ;;  %22374 = vmatprep.mubr.f32.mxu0 %v31324_v54  ;;  %v32655_v7 = vand.u32 4294901760, %v31455_v37  ;;  %v32660_v33 = vand.u32 4294901760, %v31496_v3  ;;  %v32668_v63 = vand.u32 4294901760, %v31571_v21 }
 0xee4   :  { %v31781_v9 = vsub.f32 %v31445_v35, %v32653_v4  ;;  %v31789_v51 = vsub.f32 %v31450_v22, %v32654_v25  ;;  %21576 = vmatmul.mubr.f32.vlgmr.msra.gmra.mrb[78].mxu1 %v32656_v15  ;;  %26508 = vmatprep.subr.bf16.mxu0 %v26507_v56  ;;  %v26511_v35 = vpack.c.bf16 %v31764_v42, %v31759_v27  ;;  %v32658_v22 = vand.u32 4294901760, %v31482_v10 }
 0xee5   :  { %v31794_v53 = vsub.f32 %v31455_v37, %v32655_v7  ;;  %21583 = vmatprep.mubr.f32.mxu1 %v32657_v18  ;;  %26406 = vmatpush3.bf16.msra.mxu1 %v32589_v34  ;;  %v32659_v37 = vand.u32 4294901760, %v31487_v60  ;;  %v31819_v34 = vsub.f32 %v31496_v3, %v32660_v33  ;;  %v32663_v3 = vand.u32 4294901760, %v31527_v50 }
 0xee6   :  { %26408 = vmatprep.subr.bf16.mxu1 %v32590_v46  ;;  %v31807_v44 = vsub.f32 %v31482_v10, %v32658_v22  ;;  %v26513_v0 = vpack.c.bf16 %v31781_v9, %v31776_v19  ;;  %v32661_v46 = vand.u32 4294901760, %v31501_v58  ;;  %v32662_v10 = vand.u32 4294901760, %v30967_v59  ;;  %v32676_v22 = vld [vmem:[#allocation18_spill] sm:$0xff] }
 0xee7   :  { %v31812_v55 = vsub.f32 %v31487_v60, %v32659_v37  ;;  %26510 = vmatpush3.bf16.msra.mxu0 %v26509_v20  ;;  %v26515_v60 = vpack.c.bf16 %v31794_v53, %v31789_v51  ;;  %v31836_v48 = vsub.f32 %v31527_v50, %v32663_v3  ;;  %v31862_v56 = vsub.f32 %v31571_v21, %v32668_v63  ;;  %v32671_v20 = vld [vmem:[#allocation42_spill] sm:$0xff] }
 0xee8   :  { %v31824_v8 = vsub.f32 %v31501_v58, %v32661_v46  ;;  %21587 = vmatmul.mubr.f32.gmra.mrb[80].mxu1 %v32662_v10  ;;  %26512 = vmatprep.subr.bf16.mxu0 %v26511_v35  ;;  %v32664_v58 = vand.u32 4294901760, %v31532_v26  ;;  %v32670_v4 = vand.u32 4294901760, %v31584_v49  ;;  %v32672_v25 = vand.u32 4294901760, %v32671_v20  ;;  %v32678_v10 = vld [vmem:[#allocation20_spill] sm:$0xff] }
 0xee9   :  { %26410 = vmatpush3.bf16.msra.mxu1 %v32594_v39  ;;  %21864 = vmatprep.mubr.f32.mxu1 %v32570_v28  ;;  %v26517_v24 = vpack.c.bf16 %v31812_v55, %v31807_v44  ;;  %v32665_v39 = vand.u32 4294901760, %v31540_v11  ;;  %v32674_v35 = vand.u32 4294901760, %v31623_v1  ;;  %v22120_v37 = vand.u32 4294901760, %v31648_v17 }
 0xeea   :  { %26412 = vmatprep.subr.bf16.mxu1 %v32597_v6  ;;  %v31841_v59 = vsub.f32 %v31532_v26, %v32664_v58  ;;  %v32666_v6 = vand.u32 4294901760, %v31545_v32  ;;  %v26519_v50 = vpack.c.bf16 %v31824_v8, %v31819_v34  ;;  %v32667_v26 = vld [vmem:[#allocation21_spill] sm:$0xff]  ;;  %v31879_v7 = vsub.f32 %v32671_v20, %v32672_v25 }
 0xeeb   :  { %26514 = vmatpush3.bf16.msra.mxu0 %v26513_v0  ;;  %v31848_v28 = vsub.f32 %v31540_v11, %v32665_v39  ;;  %v32669_v11 = vand.u32 4294901760, %v31576_v2  ;;  %v31891_v18 = vsub.f32 %v31623_v1, %v32674_v35  ;;  %v32677_v0 = vld [vmem:[#allocation44_spill] sm:$0xff]  ;;  %v22121_v3 = vsub.f32 %v31648_v17, %v22120_v37 }
 0xeec   :  { %v31853_v41 = vsub.f32 %v31545_v32, %v32666_v6  ;;  %26516 = vmatprep.subr.bf16.mxu0 %v26515_v60  ;;  %v26521_v32 = vpack.c.bf16 %v31841_v59, %v31836_v48  ;;  %v22127_v33 = vand.u32 4294901760, %v32677_v0  ;;  %v22008_v58 = vand.u32 4294901760, %v31674_v38 }
 0xeed   :  { %26414 = vmatpush3.bf16.msra.mxu1 %v32602_v62  ;;  %v31867_v47 = vsub.f32 %v31576_v2, %v32669_v11  ;;  %v31874_v62 = vsub.f32 %v31584_v49, %v32670_v4  ;;  %v32673_v2 = vand.u32 4294901760, %v31618_v14  ;;  %32675 = vst [vmem:[#allocation33_spill] sm:$0xff] %v31891_v18  ;;  %v22134_v11 = vand.u32 4294901760, %v31693_v29  ;;  %v32681_v4 = vld [vmem:[#allocation29_spill] sm:$0xff] }
 0xeee   :  { %26416 = vmatprep.subr.bf16.mxu1 %v32667_v26  ;;  %v26523_v21 = vpack.c.bf16 %v31853_v41, %v31848_v28  ;;  %v22128_v39 = vsub.f32 %v32677_v0, %v22127_v33  ;;  %v26563_v63 = vpack.c.bf16 %v22127_v33, %v22120_v37  ;;  %v22141_v17 = vand.u32 4294901760, %v31698_v36 }
 0xeef   :  { %26518 = vmatpush3.bf16.msra.mxu0 %v26517_v24  ;;  %v31886_v15 = vsub.f32 %v31618_v14, %v32673_v2  ;;  %v26525_v14 = vpack.c.bf16 %v31867_v47, %v31862_v56  ;;  %v26527_v1 = vpack.c.bf16 %v31879_v7, %v31874_v62  ;;  %v22015_v24 = vand.u32 4294901760, %v31679_v16 }
 0xef0   :  { %26520 = vmatprep.subr.bf16.mxu0 %v26519_v50  ;;  %v32680_v50 = vld [vmem:[#allocation19_spill] sm:$0xff]  ;;  %v22022_v20 = vand.u32 4294901760, %v31713_v43  ;;  %v22029_v25 = vand.u32 4294901760, %v31718_v23  ;;  %v22148_v37 = vand.u32 4294901760, %v31726_v5  ;;  %v22155_v0 = vand.u32 4294901760, %v31731_v12 }
 0xef1   :  { %v23617_v49 = vpop.f32.mrb[52].mxu0  ;;  %26418 = vmatpush3.bf16.msra.mxu1 %v32676_v22  ;;  %v26529_v26 = vpack.c.bf16 %v31891_v18, %v31886_v15  ;;  %v22016_v2 = vsub.f32 %v31679_v16, %v22015_v24  ;;  %v22122_v22 = vand.u32 4294901760, %v22121_v3  ;;  %v32683_v16 = vld [vmem:[#allocation31_spill] sm:$0xff]  ;;  %v26567_v3 = vpack.c.bf16 %v22141_v17, %v22134_v11 }
 0xef2   :  { %v23618_v46 = vpop.f32.mrb[53].mxu0  ;;  %26420 = vmatprep.subr.bf16.mxu1 %v32678_v10  ;;  %v22036_v10 = vand.u32 4294901760, %v31746_v13 }
 0xef3   :  { %v31897_v60 = vadd.f32 %v23618_v46, %v23617_v49  ;;  %26522 = vmatpush3.bf16.msra.mxu0 %v26521_v32  ;;  %v22129_v46 = vand.u32 4294901760, %v22128_v39 }
 0xef4   :  { %26524 = vmatprep.subr.bf16.mxu0 %v26523_v21  ;;  %v22009_v21 = vsub.f32 %v31674_v38, %v22008_v58  ;;  %v22135_v38 = vsub.f32 %v31693_v29, %v22134_v11  ;;  %v22169_v11 = vand.u32 4294901760, %v31764_v42 }
 0xef5   :  { %32679 = vst [vmem:[#allocation26_spill] sm:$0xff] %v31897_v60  ;;  %v23620_v6 = vpop.f32.mrb[54].mxu0  ;;  %26422 = vmatpush3.bf16.msra.mxu1 %v32680_v50  ;;  %v22043_v50 = vand.u32 4294901760, %v31752_v45  ;;  %v26571_v60 = vpack.c.bf16 %v22155_v0, %v22148_v37  ;;  %v26467_v29 = vpack.c.bf16 %v22129_v46, %v22122_v22 }
 0xef6   :  { %v23621_v32 = vpop.f32.mrb[55].mxu0  ;;  %26424 = vmatprep.subr.bf16.mxu1 %v32681_v4  ;;  %v22010_v39 = vand.u32 4294901760, %v22009_v21  ;;  %v32686_v21 = vld [vmem:[#allocation17_spill] sm:$0xff] }
 0xef7   :  { %v31917_v35 = vadd.f32 %v23621_v32, %v23620_v6  ;;  %v23503_v49 = vpop.f32.mrb[54].mxu1  ;;  %26526 = vmatpush3.bf16.msra.mxu0 %v26525_v14  ;;  %v26565_v14 = vpack.c.bf16 %v22015_v24, %v22008_v58  ;;  %v26569_v6 = vpack.c.bf16 %v22029_v25, %v22022_v20  ;;  %v22142_v32 = vsub.f32 %v31698_v36, %v22141_v17 }
 0xef8   :  { %v23504_v33 = vpop.f32.mrb[55].mxu1  ;;  %26528 = vmatprep.subr.bf16.mxu0 %v26527_v1  ;;  %v22023_v58 = vsub.f32 %v31713_v43, %v22022_v20  ;;  %v22030_v36 = vsub.f32 %v31718_v23, %v22029_v25  ;;  %v22149_v17 = vsub.f32 %v31726_v5, %v22148_v37  ;;  %v22037_v43 = vsub.f32 %v31746_v13, %v22036_v10  ;;  %v32688_v13 = vld [vmem:[#allocation43_spill] sm:$0xff] }
 0xef9   :  { %32682 = vst [vmem:[#allocation28_spill] sm:$0xff] %v31917_v35  ;;  %v23505_v4 = vadd.f32 %v23504_v33, %v23503_v49  ;;  %26426 = vmatpush3.bf16.msra.mxu1 %v32637_v57  ;;  %v22017_v35 = vand.u32 4294901760, %v22016_v2  ;;  %v26573_v49 = vpack.c.bf16 %v22043_v50, %v22036_v10  ;;  %v22136_v33 = vand.u32 4294901760, %v22135_v38  ;;  %v32687_v2 = vld [vmem:[#allocation49_spill] sm:$0xff] }
 0xefa   :  { %26428 = vmatprep.subr.bf16.mxu1 %v32683_v16  ;;  %v22162_v57 = vand.u32 4294901760, %v31759_v27  ;;  %v22170_v25 = vsub.f32 %v31764_v42, %v22169_v11  ;;  %v22024_v5 = vand.u32 4294901760, %v22023_v58  ;;  %v22150_v37 = vand.u32 4294901760, %v22149_v17 }
 0xefb   :  { %v19742_v54 = vadd.f32 %v23505_v4, %v31741_v30  ;;  %v23506_v1 = vpop.f32.mrb[56].mxu1  ;;  %26530 = vmatpush3.bf16.msra.mxu0 %v26529_v26  ;;  %v32684_v30 = vld [vmem:[#allocation15_spill] sm:$0xff]  ;;  %v32685_v26 = vld [vmem:[#allocation46_spill] sm:$0xff]  ;;  %v26469_v23 = vpack.c.bf16 %v22017_v35, %v22010_v39  ;;  %v22038_v42 = vand.u32 4294901760, %v22037_v43  ;;  %v22183_v10 = vand.u32 4294901760, %v31794_v53 }
 0xefc   :  { %v23507_v18 = vpop.f32.mrb[57].mxu1  ;;  %26564 = vmatprep.subr.bf16.mxu0 %v26563_v63  ;;  %v22143_v63 = vand.u32 4294901760, %v22142_v32  ;;  %v22163_v20 = vsub.f32 %v31759_v27, %v22162_v57  ;;  %v26575_v35 = vpack.c.bf16 %v22169_v11, %v22162_v57  ;;  %v32689_v27 = vld [vmem:[#allocation32_spill] sm:$0xff]  ;;  %v22171_v4 = vand.u32 4294901760, %v22170_v25  ;;  %v32691_v32 = vld [vmem:[#allocation27_spill] sm:$0xff] }
 0xefd   :  { %v23508_v16 = vadd.f32 %v23507_v18, %v23506_v1  ;;  %26430 = vmatpush3.bf16.msra.mxu1 %v32645_v52  ;;  %v31933_v24 = vadd.f32 %v32684_v30, %v19742_v54  ;;  %v22156_v18 = vsub.f32 %v31731_v12, %v22155_v0  ;;  %v22044_v54 = vsub.f32 %v31752_v45, %v22043_v50  ;;  %v32690_v50 = vld [vmem:[#allocation22_spill] sm:$0xff] }
 0xefe   :  { %22377 = vmatmul.mubr.f32.vlgmr.msra.gmra.mrb[80].mxu0 %v32685_v26  ;;  %26432 = vmatprep.subr.bf16.mxu1 %v32647_v61  ;;  %v22050_v61 = vand.u32 4294901760, %v31776_v19  ;;  %v22031_v12 = vand.u32 4294901760, %v22030_v36  ;;  %v26471_v45 = vpack.c.bf16 %v22143_v63, %v22136_v33  ;;  %v22164_v38 = vand.u32 4294901760, %v22163_v20  ;;  %v32692_v36 = vld [vmem:[#allocation24_spill] sm:$0xff] }
 0xeff   :  { %v19753_v52 = vadd.f32 %v23508_v16, %v31770_v31  ;;  %22383 = vmatprep.mubr.f32.mxu0 %v32686_v21  ;;  %26566 = vmatpush3.bf16.msra.mxu0 %v26565_v14  ;;  %v22057_v31 = vand.u32 4294901760, %v31781_v9  ;;  %v22157_v0 = vand.u32 4294901760, %v22156_v18  ;;  %v22045_v46 = vand.u32 4294901760, %v22044_v54 }
 0xf00   :  { %26568 = vmatprep.subr.bf16.mxu0 %v26567_v3  ;;  %v22051_v14 = vsub.f32 %v31776_v19, %v22050_v61  ;;  %v22064_v39 = vand.u32 4294901760, %v31807_v44  ;;  %v22071_v33 = vand.u32 4294901760, %v31812_v55  ;;  %v22197_v58 = vand.u32 4294901760, %v31824_v8 }
 0xf01   :  { %26434 = vmatpush3.bf16.msra.mxu1 %v32651_v40  ;;  %v31950_v22 = vadd.f32 %v32687_v2, %v19753_v52  ;;  %v22176_v40 = vand.u32 4294901760, %v31789_v51  ;;  %v22058_v3 = vsub.f32 %v31781_v9, %v22057_v31  ;;  %v26577_v1 = vpack.c.bf16 %v22057_v31, %v22050_v61 }
 0xf02   :  { %22386 = vmatmul.mubr.f32.gmra.mrb[82].mxu0 %v32688_v13  ;;  %26468 = vmatprep.subr.bf16.mxu1 %v26467_v29  ;;  %v26475_v29 = vpack.c.bf16 %v22157_v0, %v22150_v37  ;;  %v26477_v16 = vpack.c.bf16 %v22045_v46, %v22038_v42  ;;  %v22190_v9 = vand.u32 4294901760, %v31819_v34  ;;  %v26479_v30 = vpack.c.bf16 %v22171_v4, %v22164_v38 }
 0xf03   :  { %26570 = vmatpush3.bf16.msra.mxu0 %v26569_v6  ;;  %22671 = vmatprep.mubr.f32.mxu0 %v32689_v27  ;;  %v26473_v6 = vpack.c.bf16 %v22031_v12, %v22024_v5  ;;  %v22177_v57 = vsub.f32 %v31789_v51, %v22176_v40  ;;  %v26579_v19 = vpack.c.bf16 %v22183_v10, %v22176_v40  ;;  %v22052_v63 = vand.u32 4294901760, %v22051_v14 }
 0xf04   :  { %21866 = vmatmul.mubr.f32.vlgmr.msra.gmra.mrb[82].mxu1 %v32690_v50  ;;  %26572 = vmatprep.subr.bf16.mxu0 %v26571_v60  ;;  %v22184_v60 = vsub.f32 %v31794_v53, %v22183_v10  ;;  %v22059_v11 = vand.u32 4294901760, %v22058_v3  ;;  %v22065_v17 = vsub.f32 %v31807_v44, %v22064_v39  ;;  %v22072_v51 = vsub.f32 %v31812_v55, %v22071_v33 }
 0xf05   :  { %21871 = vmatprep.mubr.f32.mxu1 %v32691_v32  ;;  %26470 = vmatpush3.bf16.msra.mxu1 %v26469_v23  ;;  %v22191_v53 = vsub.f32 %v31819_v34, %v22190_v9  ;;  %v22078_v18 = vand.u32 4294901760, %v31836_v48  ;;  %v22085_v52 = vand.u32 4294901760, %v31841_v59  ;;  %v22178_v43 = vand.u32 4294901760, %v22177_v57  ;;  %v32693_v57 = vld [vmem:[#allocation33_spill] sm:$0xff] }
 0xf06   :  { %26472 = vmatprep.subr.bf16.mxu1 %v26471_v45  ;;  %v22185_v54 = vand.u32 4294901760, %v22184_v60  ;;  %v26581_v23 = vpack.c.bf16 %v22071_v33, %v22064_v39  ;;  %v22204_v44 = vand.u32 4294901760, %v31848_v28  ;;  %v22211_v61 = vand.u32 4294901760, %v31853_v41 }
 0xf07   :  { %26574 = vmatpush3.bf16.msra.mxu0 %v26573_v49  ;;  %v22198_v49 = vsub.f32 %v31824_v8, %v22197_v58  ;;  %v26481_v20 = vpack.c.bf16 %v22059_v11, %v22052_v63  ;;  %v26583_v55 = vpack.c.bf16 %v22197_v58, %v22190_v9  ;;  %v22079_v34 = vsub.f32 %v31836_v48, %v22078_v18 }
 0xf08   :  { %21873 = vmatmul.mubr.f32.gmra.mrb[84].mxu1 %v32692_v36  ;;  %26576 = vmatprep.subr.bf16.mxu0 %v26575_v35  ;;  %v22086_v8 = vsub.f32 %v31841_v59, %v22085_v52  ;;  %v22066_v25 = vand.u32 4294901760, %v22065_v17  ;;  %v22073_v5 = vand.u32 4294901760, %v22072_v51  ;;  %v22192_v12 = vand.u32 4294901760, %v22191_v53 }
 0xf09   :  { %26474 = vmatpush3.bf16.msra.mxu1 %v26473_v6  ;;  %22230 = vmatprep.mubr.f32.mxu1 %v32689_v27  ;;  %v22199_v31 = vand.u32 4294901760, %v22198_v49  ;;  %v26483_v2 = vpack.c.bf16 %v22185_v54, %v22178_v43  ;;  %v22205_v45 = vsub.f32 %v31848_v28, %v22204_v44  ;;  %v22212_v35 = vsub.f32 %v31853_v41, %v22211_v61 }
 0xf0a   :  { %26476 = vmatprep.subr.bf16.mxu1 %v26475_v29  ;;  %v26585_v37 = vpack.c.bf16 %v22085_v52, %v22078_v18  ;;  %v26587_v0 = vpack.c.bf16 %v22211_v61, %v22204_v44  ;;  %v22092_v42 = vand.u32 4294901760, %v31862_v56  ;;  %v22099_v48 = vand.u32 4294901760, %v31867_v47 }
 0xf0b   :  { %26578 = vmatpush3.bf16.msra.mxu0 %v26577_v1  ;;  %v22080_v59 = vand.u32 4294901760, %v22079_v34  ;;  %v22087_v46 = vand.u32 4294901760, %v22086_v8  ;;  %v22218_v40 = vand.u32 4294901760, %v31874_v62  ;;  %v22225_v10 = vand.u32 4294901760, %v31879_v7  ;;  %v32695_v8 = vld [vmem:[#allocation25_spill] sm:$0xff] }
 0xf0c   :  { %26580 = vmatprep.subr.bf16.mxu0 %v26579_v19  ;;  %v26485_v38 = vpack.c.bf16 %v22073_v5, %v22066_v25  ;;  %v26487_v28 = vpack.c.bf16 %v22199_v31, %v22192_v12  ;;  %v22093_v41 = vsub.f32 %v31862_v56, %v22092_v42  ;;  %v22100_v4 = vsub.f32 %v31867_v47, %v22099_v48  ;;  %v32696_v5 = vld [vmem:[#allocation38_spill] sm:$0xff]  ;;  %v32697_v12 = vld [vmem:[#allocation28_spill] sm:$0xff] }
 0xf0d   :  { %26478 = vmatpush3.bf16.msra.mxu1 %v26477_v16  ;;  %v22206_v3 = vand.u32 4294901760, %v22205_v45  ;;  %v22213_v32 = vand.u32 4294901760, %v22212_v35  ;;  %v22219_v6 = vsub.f32 %v31874_v62, %v22218_v40  ;;  %v22226_v1 = vsub.f32 %v31879_v7, %v22225_v10  ;;  %v32700_v45 = vld [vmem:[#allocation10_spill] sm:$0xff]  ;;  %v32701_v35 = vld [vmem:[#allocation45_spill] sm:$0xff] }
 0xf0e   :  { %26480 = vmatprep.subr.bf16.mxu1 %v26479_v30  ;;  %v26589_v29 = vpack.c.bf16 %v22099_v48, %v22092_v42  ;;  %v22106_v33 = vand.u32 4294901760, %v31886_v15  ;;  %v22113_v60 = vand.u32 4294901760, %v32693_v57  ;;  %v26489_v56 = vpack.c.bf16 %v22087_v46, %v22080_v59  ;;  %v32705_v42 = vld [vmem:[#allocation37_spill] sm:$0xff]  ;;  %v32706_v48 = vld [vmem:[#allocation47_spill] sm:$0xff] }
 0xf0f   :  { %26582 = vmatpush3.bf16.msra.mxu0 %v26581_v23  ;;  %v26591_v16 = vpack.c.bf16 %v22225_v10, %v22218_v40  ;;  %v22094_v19 = vand.u32 4294901760, %v22093_v41  ;;  %v22101_v9 = vand.u32 4294901760, %v22100_v4  ;;  %v26491_v36 = vpack.c.bf16 %v22213_v32, %v22206_v3  ;;  %v32707_v59 = vld [vmem:[#allocation39_spill] sm:$0xff]  ;;  %v32708_v40 = vld [vmem:[#allocation40_spill] sm:$0xff] }
 0xf10   :  { %26584 = vmatprep.subr.bf16.mxu0 %v26583_v55  ;;  %v22107_v58 = vsub.f32 %v31886_v15, %v22106_v33  ;;  %v22114_v62 = vsub.f32 %v32693_v57, %v22113_v60  ;;  %v22220_v30 = vand.u32 4294901760, %v22219_v6  ;;  %v22227_v63 = vand.u32 4294901760, %v22226_v1  ;;  %v32694_v55 = vld [vmem:[#allocation26_spill] sm:$0xff]  ;;  %v32710_v41 = vld [vmem:[#allocation12_spill] sm:$0xff] }
 0xf11   :  { %v23693_v50 = vpop.f32.mrb[56].mxu0  ;;  %26482 = vmatpush3.bf16.msra.mxu1 %v26481_v20  ;;  %v26593_v51 = vpack.c.bf16 %v22113_v60, %v22106_v33  ;;  %v26493_v18 = vpack.c.bf16 %v22101_v9, %v22094_v19  ;;  %v32713_v33 = vld [vmem:[#allocation14_spill] sm:$0xff]  ;;  %v32715_v9 = vld [vmem:[#allocation48_spill] sm:$0xff] }
 0xf12   :  { %v23694_v14 = vpop.f32.mrb[57].mxu0  ;;  %26484 = vmatprep.subr.bf16.mxu1 %v26483_v2  ;;  %v22108_v52 = vand.u32 4294901760, %v22107_v58  ;;  %v22115_v43 = vand.u32 4294901760, %v22114_v62  ;;  %v26495_v15 = vpack.c.bf16 %v22227_v63, %v22220_v30  ;;  %v32698_v2 = vld [vmem:[#allocation16_spill] sm:$0xff]  ;;  %v32716_v62 = vld [vmem:[#allocation50_spill] sm:$0xff]  ;;  %v32718_v30 = vand.u32 4294901760, %v32686_v21 }
 0xf13   :  { %v31988_v39 = vadd.f32 %v23694_v14, %v23693_v50  ;;  %26586 = vmatpush3.bf16.msra.mxu0 %v26585_v37  ;;  %v32703_v37 = vld [vmem:[#allocation34_spill] sm:$0xff]  ;;  %v32709_v50 = vld [vmem:[#allocation23_spill] sm:$0xff]  ;;  %v32711_v14 = vld [vmem:[#allocation36_spill] sm:$0xff] }
 0xf14   :  { %26588 = vmatprep.subr.bf16.mxu0 %v26587_v0  ;;  %v26497_v20 = vpack.c.bf16 %v22115_v43, %v22108_v52  ;;  %v32704_v0 = vand.u32 4294901760, %v32703_v37 }
 0xf15   :  { %v23696_v47 = vpop.f32.mrb[58].mxu0  ;;  %26486 = vmatpush3.bf16.msra.mxu1 %v26485_v38 }
 0xf16   :  { %v23697_v7 = vpop.f32.mrb[59].mxu0  ;;  %26488 = vmatprep.subr.bf16.mxu1 %v26487_v28 }
 0xf17   :  { %v31994_v11 = vadd.f32 %v23697_v7, %v23696_v47  ;;  %v23579_v17 = vpop.f32.mrb[58].mxu1  ;;  %26590 = vmatpush3.bf16.msra.mxu0 %v26589_v29  ;;  %v32712_v29 = vld [vmem:[#allocation13_spill] sm:$0xff] }
 0xf18   :  { %v23580_v53 = vpop.f32.mrb[59].mxu1  ;;  %26592 = vmatprep.subr.bf16.mxu0 %v26591_v16  ;;  %v32714_v47 = vld [vmem:[#allocation41_spill] sm:$0xff] }
 0xf19   :  { %v23581_v49 = vadd.f32 %v23580_v53, %v23579_v17  ;;  %26490 = vmatpush3.bf16.msra.mxu1 %v26489_v56 }
 0xf1a   :  { %26492 = vmatprep.subr.bf16.mxu1 %v26491_v36  ;;  %v32717_v36 = vand.u32 4294901760, %v32685_v26 }
 0xf1b   :  { %v20032_v54 = vadd.f32 %v23581_v49, %v31933_v24  ;;  %v23582_v23 = vpop.f32.mrb[60].mxu1  ;;  %26594 = vmatpush3.bf16.msra.mxu0 %v26593_v51  ;;  %v32699_v24 = vld [vmem:[#allocation35_spill] sm:$0xff] }
 0xf1c   :  { %v23583_v44 = vpop.f32.mrb[61].mxu1 }
 0xf1d   :  { %v23584_v61 = vadd.f32 %v23583_v44, %v23582_v23  ;;  %26494 = vmatpush3.bf16.msra.mxu1 %v26493_v18  ;;  %v20151_v34 = vadd.f32 %v32694_v55, %v20032_v54 }
 0xf1e   :  { %22673 = vmatmul.mubr.f32.vlgmr.msra.gmra.mrb[84].mxu0 %v32695_v8  ;;  %26496 = vmatprep.subr.bf16.mxu1 %v26495_v15 }
 0xf1f   :  { %v20039_v25 = vadd.f32 %v23584_v61, %v31950_v22  ;;  %22678 = vmatprep.mubr.f32.mxu0 %v32696_v5  ;;  %v32702_v22 = vld [vmem:[#allocation11_spill] sm:$0xff] }
 0xf21   :  { %26498 = vmatpush3.bf16.msra.mxu1 %v26497_v20  ;;  %v20166_v31 = vadd.f32 %v32697_v12, %v20039_v25 }
 0xf22   :  { %22680 = vmatmul.mubr.f32.gmra.mrb[86].mxu0 %v32698_v2  ;;  %26532 = vmatprep.subr.bf16.mxu1 %v32699_v24 }
 0xf24   :  { %22232 = vmatmul.mubr.f32.vlgmr.msra.gmra.mrb[86].mxu1 %v32695_v8 }
 0xf25   :  { %22237 = vmatprep.mubr.f32.mxu1 %v32696_v5  ;;  %26534 = vmatpush3.bf16.msra.mxu1 %v32700_v45 }
 0xf26   :  { %26536 = vmatprep.subr.bf16.mxu1 %v32701_v35 }
 0xf28   :  { %22239 = vmatmul.mubr.f32.gmra.mrb[88].mxu1 %v32698_v2 }
 0xf29   :  { %26538 = vmatpush3.bf16.msra.mxu1 %v32702_v22  ;;  %22490 = vmatprep.mubr.f32.mxu1 %v32704_v0 }
 0xf2a   :  { %26540 = vmatprep.subr.bf16.mxu1 %v32705_v42 }
 0xf2d   :  { %26542 = vmatpush3.bf16.msra.mxu1 %v32706_v48 }
 0xf2e   :  { %26544 = vmatprep.subr.bf16.mxu1 %v32707_v59 }
 0xf31   :  { %v23769_v46 = vpop.f32.mrb[60].mxu0  ;;  %26546 = vmatpush3.bf16.msra.mxu1 %v32708_v40 }
 0xf32   :  { %v23770_v10 = vpop.f32.mrb[61].mxu0  ;;  %26548 = vmatprep.subr.bf16.mxu1 %v32709_v50 }
 0xf33   :  { %v23771_v38 = vadd.f32 %v23770_v10, %v23769_v46 }
 0xf35   :  { %v23772_v28 = vpop.f32.mrb[62].mxu0  ;;  %26550 = vmatpush3.bf16.msra.mxu1 %v32710_v41 }
 0xf36   :  { %v23773_v4 = vpop.f32.mrb[63].mxu0  ;;  %26552 = vmatprep.subr.bf16.mxu1 %v32711_v14 }
 0xf37   :  { %v23774_v3 = vadd.f32 %v23773_v4, %v23772_v28  ;;  %v23655_v32 = vpop.f32.mrb[62].mxu1 }
 0xf38   :  { %v23656_v6 = vpop.f32.mrb[63].mxu1 }
 0xf39   :  { %v23657_v1 = vadd.f32 %v23656_v6, %v23655_v32  ;;  %26554 = vmatpush3.bf16.msra.mxu1 %v32712_v29 }
 0xf3a   :  { %26556 = vmatprep.subr.bf16.mxu1 %v32713_v33 }
 0xf3b   :  { %v20398_v57 = vadd.f32 %v23657_v1, %v20151_v34  ;;  %v23658_v60 = vpop.f32.mrb[64].mxu1 }
 0xf3c   :  { %v23659_v56 = vpop.f32.mrb[65].mxu1 }
 0xf3d   :  { %v23660_v16 = vadd.f32 %v23659_v56, %v23658_v60  ;;  %26558 = vmatpush3.bf16.msra.mxu1 %v32714_v47  ;;  %v20543_v19 = vadd.f32 %v31988_v39, %v20398_v57  ;;  %v32719_v39 = vand.u32 4294901760, %v32688_v13 }
 0xf3e   :  { %26560 = vmatprep.subr.bf16.mxu1 %v32715_v9 }
 0xf3f   :  { %v20405_v58 = vadd.f32 %v23660_v16, %v20166_v31 }
 0xf41   :  { %26562 = vmatpush3.bf16.msra.mxu1 %v32716_v62  ;;  %v20552_v7 = vadd.f32 %v31994_v11, %v20405_v58 }
 0xf42   :  { %26596 = vmatprep.subr.bf16.mxu1 %v32699_v24 }
 0xf44   :  { %22494 = vmatmul.mubr.f32.vlgmr.msra.gmra.mrb[90].mxu1 %v32717_v36 }
 0xf45   :  { %22501 = vmatprep.mubr.f32.mxu1 %v32718_v30  ;;  %26598 = vmatpush3.bf16.msra.mxu1 %v32700_v45 }
 0xf46   :  { %26600 = vmatprep.subr.bf16.mxu1 %v32701_v35 }
 0xf48   :  { %22505 = vmatmul.mubr.f32.gmra.mrb[92].mxu1 %v32719_v39 }
 0xf49   :  { %26602 = vmatpush3.bf16.msra.mxu1 %v32702_v22  ;;  %22782 = vmatprep.mubr.f32.mxu1 %v32689_v27 }
 0xf4a   :  { %26604 = vmatprep.subr.bf16.mxu1 %v32705_v42 }
 0xf4d   :  { %26606 = vmatpush3.bf16.msra.mxu1 %v32706_v48 }
 0xf4e   :  { %26608 = vmatprep.subr.bf16.mxu1 %v32707_v59 }
 0xf51   :  { %v23845_v26 = vpop.f32.mrb[64].mxu0  ;;  %26610 = vmatpush3.bf16.msra.mxu1 %v32708_v40 }
 0xf52   :  { %v23846_v21 = vpop.f32.mrb[65].mxu0  ;;  %26612 = vmatprep.subr.bf16.mxu1 %v32709_v50 }
 0xf53   :  { %v23847_v63 = vadd.f32 %v23846_v21, %v23845_v26 }
 0xf55   :  { %v23848_v11 = vpop.f32.mrb[66].mxu0  ;;  %26614 = vmatpush3.bf16.msra.mxu1 %v32710_v41 }
 0xf56   :  { %v23849_v13 = vpop.f32.mrb[67].mxu0  ;;  %26616 = vmatprep.subr.bf16.mxu1 %v32711_v14 }
 0xf57   :  { %v23850_v27 = vadd.f32 %v23849_v13, %v23848_v11  ;;  %v23731_v17 = vpop.f32.mrb[66].mxu1 }
 0xf58   :  { %v23732_v51 = vpop.f32.mrb[67].mxu1 }
 0xf59   :  { %v23733_v53 = vadd.f32 %v23732_v51, %v23731_v17  ;;  %26618 = vmatpush3.bf16.msra.mxu1 %v32712_v29 }
 0xf5a   :  { %26620 = vmatprep.subr.bf16.mxu1 %v32713_v33 }
 0xf5b   :  { %v20660_v49 = vadd.f32 %v23733_v53, %v20543_v19  ;;  %v23734_v18 = vpop.f32.mrb[68].mxu1 }
 0xf5c   :  { %v23735_v52 = vpop.f32.mrb[69].mxu1 }
 0xf5d   :  { %v23736_v43 = vadd.f32 %v23735_v52, %v23734_v18  ;;  %26622 = vmatpush3.bf16.msra.mxu1 %v32714_v47  ;;  %v20839_v15 = vadd.f32 %v23771_v38, %v20660_v49 }
 0xf5e   :  { %26624 = vmatprep.subr.bf16.mxu1 %v32715_v9 }
 0xf5f   :  { %v20671_v54 = vadd.f32 %v23736_v43, %v20552_v7 }
 0xf61   :  { %26626 = vmatpush3.bf16.msra.mxu1 %v32716_v62  ;;  %v20846_v23 = vadd.f32 %v23774_v3, %v20671_v54 }
 0xf64   :  { %22784 = vmatmul.mubr.f32.vlgmr.msra.gmra.mrb[94].mxu1 %v32695_v8 }
 0xf65   :  { %22789 = vmatprep.mubr.f32.mxu1 %v32696_v5 }
 0xf68   :  { %22791 = vmatmul.mubr.f32.gmra.mrb[96].mxu1 %v32698_v2 }
 0xf71   :  { %v23921_v44 = vpop.f32.mrb[68].mxu0 }
 0xf72   :  { %v23922_v61 = vpop.f32.mrb[69].mxu0 }
 0xf73   :  { %v23923_v20 = vadd.f32 %v23922_v61, %v23921_v44 }
 0xf75   :  { %v23924_v55 = vpop.f32.mrb[70].mxu0 }
 0xf76   :  { %v23925_v34 = vpop.f32.mrb[71].mxu0 }
 0xf77   :  { %v23926_v25 = vadd.f32 %v23925_v34, %v23924_v55  ;;  %v23807_v12 = vpop.f32.mrb[70].mxu1 }
 0xf78   :  { %v23808_v31 = vpop.f32.mrb[71].mxu1 }
 0xf79   :  { %v23809_v24 = vadd.f32 %v23808_v31, %v23807_v12 }
 0xf7b   :  { %v20950_v45 = vadd.f32 %v23809_v24, %v20839_v15  ;;  %v23810_v35 = vpop.f32.mrb[72].mxu1 }
 0xf7c   :  { %v23811_v22 = vpop.f32.mrb[73].mxu1 }
 0xf7d   :  { %v23812_v37 = vadd.f32 %v23811_v22, %v23810_v35  ;;  %v21069_v0 = vadd.f32 %v23847_v63, %v20950_v45 }
 0xf7f   :  { %v20957_v42 = vadd.f32 %v23812_v37, %v20846_v23 }
 0xf81   :  { %v21084_v8 = vadd.f32 %v23850_v27, %v20957_v42 }
 0xf91   :  { %v23997_v48 = vpop.f32.mrb[72].mxu0 }
 0xf92   :  { %v23998_v5 = vpop.f32.mrb[73].mxu0 }
 0xf93   :  { %v23999_v59 = vadd.f32 %v23998_v5, %v23997_v48 }
 0xf95   :  { %v24000_v2 = vpop.f32.mrb[74].mxu0 }
 0xf96   :  { %v24001_v46 = vpop.f32.mrb[75].mxu0 }
 0xf97   :  { %v24002_v40 = vadd.f32 %v24001_v46, %v24000_v2  ;;  %v23883_v10 = vpop.f32.mrb[74].mxu1 }
 0xf98   :  { %v23884_v50 = vpop.f32.mrb[75].mxu1 }
 0xf99   :  { %v23885_v38 = vadd.f32 %v23884_v50, %v23883_v10 }
 0xf9b   :  { %v21316_v28 = vadd.f32 %v23885_v38, %v21069_v0  ;;  %v23886_v41 = vpop.f32.mrb[76].mxu1 }
 0xf9c   :  { %v23887_v4 = vpop.f32.mrb[77].mxu1 }
 0xf9d   :  { %v23888_v14 = vadd.f32 %v23887_v4, %v23886_v41  ;;  %v21461_v3 = vadd.f32 %v23923_v20, %v21316_v28 }
 0xf9f   :  { %v21323_v32 = vadd.f32 %v23888_v14, %v21084_v8 }
 0xfa1   :  { %v21470_v6 = vadd.f32 %v23926_v25, %v21323_v32 }
 0xfb1   :  { %v24073_v1 = vpop.f32.mrb[76].mxu0 }
 0xfb2   :  { %v24074_v29 = vpop.f32.mrb[77].mxu0 }
 0xfb3   :  { %v24075_v33 = vadd.f32 %v24074_v29, %v24073_v1 }
 0xfb5   :  { %v24076_v57 = vpop.f32.mrb[78].mxu0 }
 0xfb6   :  { %v24077_v60 = vpop.f32.mrb[79].mxu0 }
 0xfb7   :  { %v24078_v56 = vadd.f32 %v24077_v60, %v24076_v57  ;;  %v23959_v16 = vpop.f32.mrb[78].mxu1 }
 0xfb8   :  { %v23960_v47 = vpop.f32.mrb[79].mxu1 }
 0xfb9   :  { %v23961_v19 = vadd.f32 %v23960_v47, %v23959_v16 }
 0xfbb   :  { %v21578_v9 = vadd.f32 %v23961_v19, %v21461_v3  ;;  %v23962_v58 = vpop.f32.mrb[80].mxu1 }
 0xfbc   :  { %v23963_v62 = vpop.f32.mrb[81].mxu1 }
 0xfbd   :  { %v23964_v7 = vadd.f32 %v23963_v62, %v23962_v58  ;;  %v21757_v36 = vadd.f32 %v23999_v59, %v21578_v9 }
 0xfbf   :  { %v21589_v30 = vadd.f32 %v23964_v7, %v21470_v6 }
 0xfc1   :  { %v21764_v39 = vadd.f32 %v24002_v40, %v21589_v30 }
 0xfc2   :  { %27143 = shalt.err (!%p27140_p4)
}
 0xfc3   :  { %s27144_s28 = scalar_lea.hbm %s32102_s16, 256 }
 0xfc4   :  { %p27145_p5 = scmp.ne.s32.totalorder %s32102_s16, %s27144_s28  ;;  %p27148_p6 = scmp.lt.u32.totalorder %s27144_s28, %s32102_s16 }
 0xfc6   :  { %p27150_p7 = pnand %p27148_p6, %p27145_p5 }
 0xfc8   :  { %27153 = shalt.err (!%p27150_p7)
}
 0xfc9   :  { %s27214_s12 = smov 128   ;;  %v32720_v1 = vld [vmem:[#allocation9_spill] sm:$0xff]  ;;  %v32721_v60 = vld [vmem:[#allocation8_spill] sm:$0xff] }
 0xfca   :  { %22823 = dma.vmem_to_hbm [thread:$0]  %s22818_s18, 256, %s32102_s16, [#allocation5], %s27214_s12, %s27214_s12, %s32351_s29  }
 0xfcb   :  { %s27215_s16 = smov [#allocation2]  }
 0xfcc   :  { %s22805_s17 = sshll.u32 %s27215_s16, 4  ;;  %s22806_s17 = int_to_ptr.vmem [resolvable:$true] %s22805_s17 }
 0xfcd   :  { %s27154_s21 = scalar_lea.vmem %s22806_s17, 256  ;;  %p27159_p9 = scmp.lt.s32.totalorder %s22806_s17, %s22806_s17 }
 0xfce   :  { %p27155_p8 = scmp.ne.s32.totalorder %s22806_s17, %s27154_s21  ;;  %p27160_p10 = scmp.lt.s32.totalorder %s27154_s21, %s27154_s21 }
 0xfd0   :  { %p27161_p11 = por %p27160_p10, %p27159_p9 }
 0xfd1   :  { %v24149_v26 = vpop.f32.mrb[80].mxu0 }
 0xfd2   :  { %v24150_v21 = vpop.f32.mrb[81].mxu0  ;;  %p27162_p12 = pnand %p27161_p11, %p27155_p8 }
 0xfd3   :  { %v24151_v63 = vadd.f32 %v24150_v21, %v24149_v26 }
 0xfd5   :  { %v24152_v11 = vpop.f32.mrb[82].mxu0 }
 0xfd6   :  { %v24153_v13 = vpop.f32.mrb[83].mxu0 }
 0xfd7   :  { %v24154_v27 = vadd.f32 %v24153_v13, %v24152_v11  ;;  %v24035_v17 = vpop.f32.mrb[82].mxu1 }
 0xfd8   :  { %v24036_v51 = vpop.f32.mrb[83].mxu1 }
 0xfd9   :  { %v24037_v53 = vadd.f32 %v24036_v51, %v24035_v17 }
 0xfdb   :  { %v21868_v49 = vadd.f32 %v24037_v53, %v21757_v36  ;;  %v24038_v18 = vpop.f32.mrb[84].mxu1 }
 0xfdc   :  { %v24039_v52 = vpop.f32.mrb[85].mxu1 }
 0xfdd   :  { %v24040_v43 = vadd.f32 %v24039_v52, %v24038_v18  ;;  %v21987_v15 = vadd.f32 %v24075_v33, %v21868_v49 }
 0xfdf   :  { %v21875_v54 = vadd.f32 %v24040_v43, %v21764_v39 }
 0xfe1   :  { %v22002_v23 = vadd.f32 %v24078_v56, %v21875_v54 }
 0xff1   :  { %v24225_v44 = vpop.f32.mrb[84].mxu0 }
 0xff2   :  { %v24226_v61 = vpop.f32.mrb[85].mxu0 }
 0xff3   :  { %v24227_v20 = vadd.f32 %v24226_v61, %v24225_v44 }
 0xff5   :  { %v24228_v55 = vpop.f32.mrb[86].mxu0 }
 0xff6   :  { %v24229_v34 = vpop.f32.mrb[87].mxu0 }
 0xff7   :  { %v24230_v25 = vadd.f32 %v24229_v34, %v24228_v55  ;;  %v24111_v12 = vpop.f32.mrb[86].mxu1 }
 0xff8   :  { %v24112_v31 = vpop.f32.mrb[87].mxu1 }
 0xff9   :  { %v24113_v24 = vadd.f32 %v24112_v31, %v24111_v12 }
 0xffb   :  { %v22234_v45 = vadd.f32 %v24113_v24, %v21987_v15  ;;  %v24114_v35 = vpop.f32.mrb[88].mxu1 }
 0xffc   :  { %v24115_v22 = vpop.f32.mrb[89].mxu1 }
 0xffd   :  { %v24116_v37 = vadd.f32 %v24115_v22, %v24114_v35  ;;  %v22379_v0 = vadd.f32 %v24151_v63, %v22234_v45 }
 0xfff   :  { %v22241_v42 = vadd.f32 %v24116_v37, %v22002_v23 }
0x1001   :  { %v22388_v8 = vadd.f32 %v24154_v27, %v22241_v42 }
0x1017   :  { %v24187_v48 = vpop.f32.mrb[90].mxu1 }
0x1018   :  { %v24188_v5 = vpop.f32.mrb[91].mxu1 }
0x1019   :  { %v24189_v59 = vadd.f32 %v24188_v5, %v24187_v48 }
0x101b   :  { %v22496_v2 = vadd.f32 %v24189_v59, %v22379_v0  ;;  %v24190_v46 = vpop.f32.mrb[92].mxu1 }
0x101c   :  { %v24191_v40 = vpop.f32.mrb[93].mxu1 }
0x101d   :  { %v24192_v10 = vadd.f32 %v24191_v40, %v24190_v46  ;;  %v22675_v50 = vadd.f32 %v24227_v20, %v22496_v2 }
0x101f   :  { %v22507_v38 = vadd.f32 %v24192_v10, %v22388_v8 }
0x1021   :  { %v22682_v28 = vadd.f32 %v24230_v25, %v22507_v38 }
0x1037   :  { %v24263_v41 = vpop.f32.mrb[94].mxu1 }
0x1038   :  { %v24264_v4 = vpop.f32.mrb[95].mxu1 }
0x1039   :  { %v24265_v14 = vadd.f32 %v24264_v4, %v24263_v41 }
0x103b   :  { %v22786_v3 = vadd.f32 %v24265_v14, %v22675_v50  ;;  %v24266_v32 = vpop.f32.mrb[96].mxu1 }
0x103c   :  { %v24267_v6 = vpop.f32.mrb[97].mxu1 }
0x103d   :  { %v22796_v29 = vadd.f32 %v22786_v3, %v32720_v1  ;;  %v24268_v33 = vadd.f32 %v24267_v6, %v24266_v32 }
0x103f   :  { %22798 = vst.msk [vmem:[#allocation2] sm:$0xff] %vm58_vm0, %v22796_v29  ;;  %v22793_v57 = vadd.f32 %v24268_v33, %v22682_v28 }
0x1041   :  { %v22797_v56 = vadd.f32 %v22793_v57, %v32721_v60 }
0x1043   :  { %22799 = vst.msk [vmem:[#allocation2 + $0x8] sm:$0xff] %vm58_vm0, %v22797_v56 }
0x1044   :  { %27165 = shalt.err (!%p27162_p12)
}
0x1045   :  { %s27166_s1 = scalar_lea.hbm %s32101_s15, 256 }
0x1046   :  { %p27167_p13 = scmp.ne.s32.totalorder %s32101_s15, %s27166_s1  ;;  %p27170_p0 = scmp.lt.u32.totalorder %s27166_s1, %s32101_s15 }
0x1048   :  { %p27172_p1 = pnand %p27170_p0, %p27167_p13 }
0x104a   :  { %27175 = shalt.err (!%p27172_p1)
}
0x104b   :  { %22811 = dma.vmem_to_hbm [thread:$0]  %s22806_s17, 256, %s32101_s15, [#allocation3], %s27214_s12, %s27214_s12, %s32351_s29  }
0x104c   :  { %27176 = dma.done.wait [#allocation3], 256  }
0x104d   :  { %27177 = vsyncadd [#allocation3], 4294967040 }
0x104e   :  { %27178 = dma.done.wait [#allocation5], 256  }
0x104f   :  { %27179 = vsyncadd [#allocation5], 4294967040 }
0x1050   :  { %22830 = vsyncpa [#allocation3], 1 }
0x1051   :  { %22831 = vsyncpa [#allocation5], 1 }

</bundles_post_ra>
